<compile_context>
chip_gen: v5e
topology: v5e:2x2
jax: 0.10.0
libtpu: 0.0.40
codegen_flags: <defaults>
</compile_context>

<pallas_src>
import functools
import math

import jax
import jax.numpy as jnp
from jax.experimental import pallas as pl
from jax.experimental.pallas import tpu as pltpu

LN_EPS = 1e-5
VMEM_LIMIT = 48 * 1024 * 1024        # below v7x's 64 MiB physical, above all scoped defaults
SQRT_HALF = 0.7071067811865476


def _round_up(x, m):
    return ((x + m - 1) // m) * m


def _gelu(x):
    # exact (erf) GELU in float32, matching HF "gelu" activation
    return 0.5 * x * (1.0 + jax.lax.erf(x * jnp.float32(SQRT_HALF)))


def _ln(x, g, b):
    mu = jnp.mean(x, axis=-1, keepdims=True)
    var = jnp.mean(jnp.square(x - mu), axis=-1, keepdims=True)
    return (x - mu) * jax.lax.rsqrt(var + LN_EPS) * g + b


# ----------------------------- Pallas kernels ------------------------------ #

def _make_linear_kernel(ln_in, ln_out, gelu, residual):
    """Fused: [LN over K] -> X @ W + b (bf16 MXU, f32 acc) -> [LN over N] -> [GELU] -> [+res]."""
    def kernel(*refs):
        it = iter(refs)
        x_ref = next(it)
        w_ref = next(it)
        b_ref = next(it)
        g_ref = be_ref = r_ref = None
        if ln_in or ln_out:
            g_ref = next(it)
            be_ref = next(it)
        if residual:
            r_ref = next(it)
        o_ref = next(it)

        x = x_ref[...].astype(jnp.float32)
        if ln_in:
            x = _ln(x, g_ref[...], be_ref[...])
        y = jnp.dot(x.astype(jnp.bfloat16), w_ref[...].astype(jnp.bfloat16),
                    preferred_element_type=jnp.float32)
        y = y + b_ref[...]
        if ln_out:
            y = _ln(y, g_ref[...], be_ref[...])
        if gelu:
            y = _gelu(y)
        if residual:
            y = y + r_ref[...].astype(jnp.float32)
        o_ref[...] = y.astype(o_ref.dtype)
    return kernel


def pallas_linear(x, w, b, *, ln_gamma=None, ln_beta=None, ln_pos=None,
                  gelu=False, residual=None, tile_m=256):
    """(M, K) @ (K, N) + b with optional fused LN (pre over K or post over N),
    GELU and residual add.  Row-tiled over M for pipelining."""
    M, K = x.shape
    K2, Nn = w.shape
    assert K == K2
    ln_in = ln_pos == 'in'
    ln_out = ln_pos == 'out'
    has_ln = ln_in or ln_out
    has_res = residual is not None

    tm = min(tile_m, _round_up(M, 8))
    grid = (pl.cdiv(M, tm),)

    in_specs = [pl.BlockSpec((tm, K), lambda i: (i, 0)),
                pl.BlockSpec((K, Nn), lambda i: (0, 0)),
                pl.BlockSpec((1, Nn), lambda i: (0, 0))]
    args = [x, w, b.reshape(1, Nn)]
    if has_ln:
        C = K if ln_in else Nn
        in_specs += [pl.BlockSpec((1, C), lambda i: (0, 0)),
                     pl.BlockSpec((1, C), lambda i: (0, 0))]
        args += [ln_gamma.reshape(1, C), ln_beta.reshape(1, C)]
    if has_res:
        in_specs.append(pl.BlockSpec((tm, Nn), lambda i: (i, 0)))
        args.append(residual)

    kernel = _make_linear_kernel(ln_in, ln_out, gelu, has_res)
    return pl.pallas_call(
        kernel,
        out_shape=jax.ShapeDtypeStruct((M, Nn), jnp.float32),
        grid=grid,
        in_specs=in_specs,
        out_specs=pl.BlockSpec((tm, Nn), lambda i: (i, 0)),
        compiler_params=pltpu.CompilerParams(
            dimension_semantics=("parallel",),
            vmem_limit_bytes=VMEM_LIMIT),
    )(*args)


def _layernorm_kernel(x_ref, g_ref, b_ref, o_ref):
    o_ref[...] = _ln(x_ref[...].astype(jnp.float32),
                     g_ref[...], b_ref[...]).astype(o_ref.dtype)


def pallas_layernorm(x, gamma, beta, tile_m=512):
    """Standalone LayerNorm over last dim of a 2-D (M, C) array, row-tiled."""
    M, C = x.shape
    tm = min(tile_m, _round_up(M, 8))
    return pl.pallas_call(
        _layernorm_kernel,
        out_shape=jax.ShapeDtypeStruct((M, C), jnp.float32),
        grid=(pl.cdiv(M, tm),),
        in_specs=[pl.BlockSpec((tm, C), lambda i: (i, 0)),
                  pl.BlockSpec((1, C), lambda i: (0, 0)),
                  pl.BlockSpec((1, C), lambda i: (0, 0))],
        out_specs=pl.BlockSpec((tm, C), lambda i: (i, 0)),
        compiler_params=pltpu.CompilerParams(
            dimension_semantics=("parallel",),
            vmem_limit_bytes=VMEM_LIMIT),
    )(x, gamma.reshape(1, C), beta.reshape(1, C))


def _attn_kernel(q_ref, k_ref, v_ref, o_ref, *, heads, dh, scale):
    """All heads of one batch item per grid step; lane-dense (F, H) output."""
    q = q_ref[0].astype(jnp.float32) * scale             # (F, H)
    k = k_ref[0].astype(jnp.float32)
    v = v_ref[0].astype(jnp.float32)
    outs = []
    for hh in range(heads):                              # static per-head loop
        lo, hi = hh * dh, (hh + 1) * dh
        qh = q[:, lo:hi].astype(jnp.bfloat16)
        kh = k[:, lo:hi].astype(jnp.bfloat16)
        vh = v[:, lo:hi].astype(jnp.bfloat16)
        s = jax.lax.dot_general(qh, kh, (((1,), (1,)), ((), ())),
                                preferred_element_type=jnp.float32)   # (F, F)
        m = jnp.max(s, axis=-1, keepdims=True)
        pexp = jnp.exp(s - m)
        denom = jnp.sum(pexp, axis=-1, keepdims=True)
        pnorm = pexp * pl.reciprocal(denom, approx=True)
        outs.append(jnp.dot(pnorm.astype(jnp.bfloat16), vh,
                            preferred_element_type=jnp.float32))
    o_ref[0] = jnp.concatenate(outs, axis=-1).astype(o_ref.dtype)


def pallas_attention(q, k, v, heads):
    """Softmax(QK^T/sqrt(d))V, multi-head, gridded over batch.  q,k,v: (N, F, H)."""
    N, F, H = q.shape
    dh = H // heads
    kernel = functools.partial(_attn_kernel, heads=heads, dh=dh,
                               scale=1.0 / math.sqrt(dh))
    spec = pl.BlockSpec((1, F, H), lambda b: (b, 0, 0))
    return pl.pallas_call(
        kernel,
        out_shape=jax.ShapeDtypeStruct((N, F, H), jnp.float32),
        grid=(N,),
        in_specs=[spec, spec, spec],
        out_specs=spec,
        compiler_params=pltpu.CompilerParams(
            dimension_semantics=("parallel",),
            vmem_limit_bytes=VMEM_LIMIT),
    )(q, k, v)


def _posconv_kernel(x_ref, w_ref, b_ref, o_ref, *, groups):
    """Grouped conv as per-group matmuls (no block-diagonal densification)."""
    outs = []
    for g in range(groups):
        xg = x_ref[g].astype(jnp.bfloat16)               # (M, gsz*K)
        wg = w_ref[g].astype(jnp.bfloat16)               # (gsz*K, gsz)
        outs.append(jnp.dot(xg, wg, preferred_element_type=jnp.float32))
    y = jnp.concatenate(outs, axis=-1) + b_ref[...]      # (M, H), lane-dense
    o_ref[...] = _gelu(y).astype(o_ref.dtype)


def pallas_posconv(patches, wg, b):
    """patches: (groups, M, gsz*K); wg: (groups, gsz*K, gsz) -> (M, H) with GELU."""
    G, M, CK = patches.shape
    gsz = wg.shape[-1]
    H = G * gsz
    kernel = functools.partial(_posconv_kernel, groups=G)
    return pl.pallas_call(
        kernel,
        out_shape=jax.ShapeDtypeStruct((M, H), jnp.float32),
        grid=(1,),
        in_specs=[pl.BlockSpec((G, M, CK), lambda i: (0, 0, 0)),
                  pl.BlockSpec((G, CK, gsz), lambda i: (0, 0, 0)),
                  pl.BlockSpec((1, H), lambda i: (0, 0))],
        out_specs=pl.BlockSpec((M, H), lambda i: (0, 0)),
        compiler_params=pltpu.CompilerParams(vmem_limit_bytes=VMEM_LIMIT),
    )(patches, wg, b.reshape(1, H))


# ------------------------------- JAX glue ---------------------------------- #

def im2col_1d(x, kernel, stride):
    """x: (N, C, L) -> (N, C, out_len, kernel) built from K strided slices (no gather)."""
    N, C, L = x.shape
    out_len = (L - kernel) // stride + 1
    cols = [jax.lax.slice(x, (0, 0, k),
                          (N, C, k + (out_len - 1) * stride + 1),
                          (1, 1, stride))
            for k in range(kernel)]
    return jnp.stack(cols, axis=-1), out_len


def conv_layernorm_gelu(x, w, b, gamma, beta, stride):
    """Wav2Vec2LayerNormConvLayer: Conv1d -> LayerNorm(channels) -> GELU, all fused
    into one Pallas matmul kernel.  x: (N, C_in, L), w: (C_out, C_in, K) PyTorch layout."""
    N = x.shape[0]
    C_out, C_in, K = w.shape
    patches4, out_len = im2col_1d(x, K, stride)                   # (N, C_in, out_len, K)
    patches = patches4.transpose(0, 2, 1, 3).reshape(N * out_len, C_in * K)
    w2 = w.reshape(C_out, C_in * K).T                             # (C_in*K, C_out)
    y = pallas_linear(patches, w2, b, ln_gamma=gamma, ln_beta=beta,
                      ln_pos='out', gelu=True)                    # conv + LN(ch) + GELU
    return y.reshape(N, out_len, C_out).transpose(0, 2, 1)


def pos_conv_embed(h, w_group, b, kernel, groups):
    """Wav2Vec2PositionalConvEmbedding: grouped Conv1d (same-pad) -> drop last -> GELU.
    h: (N, F, H); w_group: (H, H//groups, K) (weight_norm folded into plain weight)."""
    N, F, H = h.shape
    gsz = H // groups
    pad = kernel // 2
    x = h.transpose(0, 2, 1)                                      # (N, H, F)
    x = jnp.pad(x, ((0, 0), (0, 0), (pad, pad)))
    patches4, out_len = im2col_1d(x, kernel, 1)                   # (N, H, out_len, K)
    p = patches4.reshape(N, groups, gsz, out_len, kernel)
    p = p.transpose(1, 0, 3, 2, 4).reshape(groups, N * out_len, gsz * kernel)
    wg = w_group.reshape(groups, gsz, gsz, kernel)                # (g, out_l, in_l, K)
    wg = wg.transpose(0, 2, 3, 1).reshape(groups, gsz * kernel, gsz)
    y = pallas_posconv(p, wg, b)                                  # (N*out_len, H)
    y = y.reshape(N, out_len, H)
    if kernel % 2 == 0:                                           # Wav2Vec2SamePadLayer
        y = y[:, :out_len - 1, :]
    return y


def encoder_layer(h, p, heads):
    """Wav2Vec2EncoderLayerStableLayerNorm: pre-LN attention + pre-LN FFN, fused kernels."""
    N, F, H = h.shape
    x2 = h.reshape(N * F, H)

    # fused LN1 + QKV projection (one (H, 3H) matmul)
    qkv = pallas_linear(x2, p['w_qkv'], p['b_qkv'],
                        ln_gamma=p['ln1_g'], ln_beta=p['ln1_b'], ln_pos='in')
    q = qkv[:, :H].reshape(N, F, H)
    k = qkv[:, H:2 * H].reshape(N, F, H)
    v = qkv[:, 2 * H:].reshape(N, F, H)

    attn = pallas_attention(q, k, v, heads).reshape(N * F, H)
    h2 = pallas_linear(attn, p['wo'], p['bo'], residual=x2)       # out-proj + residual

    # fused LN2 + FFN-in + GELU, then FFN-out + residual
    ff = pallas_linear(h2, p['w_inter'], p['b_inter'],
                       ln_gamma=p['ln2_g'], ln_beta=p['ln2_b'], ln_pos='in', gelu=True)
    h2 = pallas_linear(ff, p['w_out'], p['b_out'], residual=h2)
    return h2.reshape(N, F, H)


def xlsr_branch2_forward(params, waveform, cfg, attention_mask=None):
    """Equivalent of XLSRBranch2.forward: returns last_hidden_state (N, F, hidden)."""
    N, L = waveform.shape
    if attention_mask is None:
        attention_mask = jnp.ones_like(waveform)                  # matches torch.ones_like
    # TODO(synk): a non-trivial attention_mask (variable-length inputs) is not applied to
    # the attention scores / feature masking; the default all-ones mask is a no-op as in
    # the reference full-length path.

    # --- feature extractor (Conv1d -> LayerNorm(ch) -> GELU stack, fused kernels) ---
    x = waveform.astype(jnp.float32)[:, None, :]                  # (N, 1, L)
    for layer, stride in zip(params['conv_layers'], cfg['conv_strides']):
        x = conv_layernorm_gelu(x, layer['w'], layer['b'],
                                layer['g'], layer['beta'], stride)
    x = x.transpose(0, 2, 1)                                      # (N, F, conv_dim)
    _, F, C = x.shape
    x2 = x.reshape(N * F, C)

    # --- feature projection: fused LayerNorm -> Linear (dropout = identity, eval) ---
    x2 = pallas_linear(x2, params['fp_w'], params['fp_b'],
                       ln_gamma=params['fp_ln_g'], ln_beta=params['fp_ln_b'], ln_pos='in')
    H = x2.shape[-1]
    h = x2.reshape(N, F, H)

    # --- encoder (stable layer norm variant) ---
    h = h + pos_conv_embed(h, params['pos_w'], params['pos_b'],
                           cfg['pos_kernel'], cfg['pos_groups'])
    for lp in params['layers']:
        h = encoder_layer(h, lp, cfg['heads'])
    h2 = pallas_layernorm(h.reshape(N * F, H), params['enc_ln_g'], params['enc_ln_b'])
    return h2.reshape(N, F, H)


# --------------------------- deterministic init ----------------------------- #

def init_params(key, hidden=128, heads=4, inter=256, n_layers=2,
                conv_dim=(32, 32, 32), conv_k=(10, 3, 3), conv_s=(5, 2, 2),
                pos_kernel=8, pos_groups=4):
    keys = iter(jax.random.split(key, 256))

    def nrm(shape, scale=0.02):
        return scale * jax.random.normal(next(keys), shape, jnp.float32)

    params = {}
    conv_layers = []
    in_c = 1
    for c, k in zip(conv_dim, conv_k):
        conv_layers.append(dict(w=nrm((c, in_c, k), 0.1), b=jnp.zeros((c,), jnp.float32),
                                g=jnp.ones((c,), jnp.float32),
                                beta=jnp.zeros((c,), jnp.float32)))
        in_c = c
    params['conv_layers'] = conv_layers

    params['fp_ln_g'] = jnp.ones((conv_dim[-1],), jnp.float32)
    params['fp_ln_b'] = jnp.zeros((conv_dim[-1],), jnp.float32)
    params['fp_w'] = nrm((conv_dim[-1], hidden))
    params['fp_b'] = jnp.zeros((hidden,), jnp.float32)

    params['pos_w'] = nrm((hidden, hidden // pos_groups, pos_kernel), 0.05)
    params['pos_b'] = jnp.zeros((hidden,), jnp.float32)

    layers = []
    for _ in range(n_layers):
        wq = nrm((hidden, hidden))
        wk = nrm((hidden, hidden))
        wv = nrm((hidden, hidden))
        layers.append(dict(
            ln1_g=jnp.ones((hidden,), jnp.float32), ln1_b=jnp.zeros((hidden,), jnp.float32),
            w_qkv=jnp.concatenate([wq, wk, wv], axis=1),
            b_qkv=jnp.zeros((3 * hidden,), jnp.float32),
            wo=nrm((hidden, hidden)), bo=jnp.zeros((hidden,), jnp.float32),
            ln2_g=jnp.ones((hidden,), jnp.float32), ln2_b=jnp.zeros((hidden,), jnp.float32),
            w_inter=nrm((hidden, inter)), b_inter=jnp.zeros((inter,), jnp.float32),
            w_out=nrm((inter, hidden)), b_out=jnp.zeros((hidden,), jnp.float32),
        ))
    params['layers'] = layers

    params['enc_ln_g'] = jnp.ones((hidden,), jnp.float32)
    params['enc_ln_b'] = jnp.zeros((hidden,), jnp.float32)

    cfg = dict(conv_strides=tuple(conv_s), pos_kernel=pos_kernel,
               pos_groups=pos_groups, heads=heads)
    return params, cfg


if __name__ == "__main__":
    key = jax.random.PRNGKey(0)
    k_param, k_wave = jax.random.split(key)

    params, cfg = init_params(k_param)
    # small raw waveform (N, L) "16 kHz" -> F = ((400-10)//5+1 -> 79, ->39, ->19)
    waveform = jax.random.normal(k_wave, (2, 400), jnp.float32)

    forward = jax.jit(lambda p, w: xlsr_branch2_forward(p, w, cfg))
    feats = forward(params, waveform)                    # (N, F, hidden) = (2, 19, 128)
    feats = jax.block_until_ready(feats)

    assert feats.shape == (2, 19, 128), feats.shape
    assert bool(jnp.all(jnp.isfinite(feats)))
    print("KERNEL_OK")
</pallas_src>

<mosaic_0001>
module attributes {stable_mosaic.version = 11 : i64} {
  func.func @kernel(%arg0: i32, %arg1: memref<160x10xf32, #tpu.memory_space<vmem>>, %arg2: memref<10x32xf32, #tpu.memory_space<vmem>>, %arg3: memref<1x32xf32, #tpu.memory_space<vmem>>, %arg4: memref<1x32xf32, #tpu.memory_space<vmem>>, %arg5: memref<1x32xf32, #tpu.memory_space<vmem>>, %arg6: memref<160x32xf32, #tpu.memory_space<vmem>>) attributes {dimension_semantics = [#tpu.dimension_semantics<parallel>], iteration_bounds = array<i64: 1>, scalar_prefetch = 0 : i64, scratch_operands = 0 : i64, tpu.core_type = #tpu.core_type<tc>, window_params = [{transform_indices = @transform_0, window_bounds = array<i64: 160, 10>}, {pipeline_mode = #tpu.pipeline_mode<synchronous>, transform_indices = @transform_1, window_bounds = array<i64: 10, 32>}, {pipeline_mode = #tpu.pipeline_mode<synchronous>, transform_indices = @transform_2, window_bounds = array<i64: 1, 32>}, {pipeline_mode = #tpu.pipeline_mode<synchronous>, transform_indices = @transform_3, window_bounds = array<i64: 1, 32>}, {pipeline_mode = #tpu.pipeline_mode<synchronous>, transform_indices = @transform_4, window_bounds = array<i64: 1, 32>}, {transform_indices = @transform_5, window_bounds = array<i64: 160, 32>}]} {
    %c0 = arith.constant 0 : index
    %c0_0 = arith.constant 0 : index
    %0 = vector.load %arg1[%c0, %c0_0] : memref<160x10xf32, #tpu.memory_space<vmem>>, vector<160x10xf32>
    %1 = arith.truncf %0 : vector<160x10xf32> to vector<160x10xbf16>
    %c0_1 = arith.constant 0 : index
    %c0_2 = arith.constant 0 : index
    %2 = vector.load %arg2[%c0_1, %c0_2] : memref<10x32xf32, #tpu.memory_space<vmem>>, vector<10x32xf32>
    %3 = arith.truncf %2 : vector<10x32xf32> to vector<10x32xbf16>
    %cst = arith.constant dense<0.000000e+00> : vector<160x32xf32>
    %4 = tpu.matmul %1, %3, %cst {dimension_numbers = #tpu.dot_dimension_numbers<[1], [0], [0], [1], [0, 0, 1, 1], [], []>} : vector<160x10xbf16>, vector<10x32xbf16>, vector<160x32xf32> -> vector<160x32xf32>
    %c0_3 = arith.constant 0 : index
    %c0_4 = arith.constant 0 : index
    %5 = vector.load %arg3[%c0_3, %c0_4] : memref<1x32xf32, #tpu.memory_space<vmem>>, vector<1x32xf32>
    %6 = vector.broadcast %5 : vector<1x32xf32> to vector<160x32xf32>
    %7 = arith.addf %4, %6 : vector<160x32xf32>
    %c0_5 = arith.constant 0 : index
    %c0_6 = arith.constant 0 : index
    %8 = vector.load %arg4[%c0_5, %c0_6] : memref<1x32xf32, #tpu.memory_space<vmem>>, vector<1x32xf32>
    %c0_7 = arith.constant 0 : index
    %c0_8 = arith.constant 0 : index
    %9 = vector.load %arg5[%c0_7, %c0_8] : memref<1x32xf32, #tpu.memory_space<vmem>>, vector<1x32xf32>
    %cst_9 = arith.constant dense<0.000000e+00> : vector<160xf32>
    %10 = vector.multi_reduction <add>, %7, %cst_9 [1] : vector<160x32xf32> to vector<160xf32>
    %11 = vector.shape_cast %10 : vector<160xf32> to vector<160x1xf32>
    %cst_10 = arith.constant 3.200000e+01 : f32
    %12 = vector.broadcast %cst_10 : f32 to vector<160x1xf32>
    %13 = arith.divf %11, %12 : vector<160x1xf32>
    %14 = vector.broadcast %13 : vector<160x1xf32> to vector<160x32xf32>
    %15 = arith.subf %7, %14 : vector<160x32xf32>
    %16 = arith.mulf %15, %15 : vector<160x32xf32>
    %cst_11 = arith.constant dense<0.000000e+00> : vector<160xf32>
    %17 = vector.multi_reduction <add>, %16, %cst_11 [1] : vector<160x32xf32> to vector<160xf32>
    %18 = vector.shape_cast %17 : vector<160xf32> to vector<160x1xf32>
    %cst_12 = arith.constant 3.200000e+01 : f32
    %19 = vector.broadcast %cst_12 : f32 to vector<160x1xf32>
    %20 = arith.divf %18, %19 : vector<160x1xf32>
    %21 = vector.broadcast %13 : vector<160x1xf32> to vector<160x32xf32>
    %22 = arith.subf %7, %21 : vector<160x32xf32>
    %cst_13 = arith.constant 9.99999974E-6 : f32
    %23 = vector.broadcast %cst_13 : f32 to vector<160x1xf32>
    %24 = arith.addf %20, %23 : vector<160x1xf32>
    %25 = math.rsqrt %24 : vector<160x1xf32>
    %26 = vector.broadcast %25 : vector<160x1xf32> to vector<160x32xf32>
    %27 = arith.mulf %22, %26 : vector<160x32xf32>
    %28 = vector.broadcast %8 : vector<1x32xf32> to vector<160x32xf32>
    %29 = arith.mulf %27, %28 : vector<160x32xf32>
    %30 = vector.broadcast %9 : vector<1x32xf32> to vector<160x32xf32>
    %31 = arith.addf %29, %30 : vector<160x32xf32>
    %cst_14 = arith.constant 5.000000e-01 : f32
    %32 = vector.broadcast %cst_14 : f32 to vector<160x32xf32>
    %33 = arith.mulf %32, %31 : vector<160x32xf32>
    %cst_15 = arith.constant 0.707106769 : f32
    %34 = vector.broadcast %cst_15 : f32 to vector<160x32xf32>
    %35 = arith.mulf %31, %34 : vector<160x32xf32>
    %36 = math.erf %35 : vector<160x32xf32>
    %cst_16 = arith.constant 1.000000e+00 : f32
    %37 = vector.broadcast %cst_16 : f32 to vector<160x32xf32>
    %38 = arith.addf %37, %36 : vector<160x32xf32>
    %39 = arith.mulf %33, %38 : vector<160x32xf32>
    %c0_17 = arith.constant 0 : index
    %c0_18 = arith.constant 0 : index
    %40 = vector.load %arg6[%c0_17, %c0_18] : memref<160x32xf32, #tpu.memory_space<vmem>>, vector<160x32xf32>
    tpu.vector_store %arg6[%c0_17, %c0_18], %39 {strides = array<i32>} : memref<160x32xf32, #tpu.memory_space<vmem>>, vector<160x32xf32>,
    return
  }
  func.func @transform_0(%arg0: i32) -> (i32, i32) {
    %c0_i32 = arith.constant 0 : i32
    %c0_i32_0 = arith.constant 0 : i32
    return %arg0, %c0_i32 : i32, i32
  }
  func.func @transform_1(%arg0: i32) -> (i32, i32) {
    %c0_i32 = arith.constant 0 : i32
    %c0_i32_0 = arith.constant 0 : i32
    %c0_i32_1 = arith.constant 0 : i32
    return %c0_i32, %c0_i32_0 : i32, i32
  }
  func.func @transform_2(%arg0: i32) -> (i32, i32) {
    %c0_i32 = arith.constant 0 : i32
    %c0_i32_0 = arith.constant 0 : i32
    %c0_i32_1 = arith.constant 0 : i32
    return %c0_i32, %c0_i32_0 : i32, i32
  }
  func.func @transform_3(%arg0: i32) -> (i32, i32) {
    %c0_i32 = arith.constant 0 : i32
    %c0_i32_0 = arith.constant 0 : i32
    %c0_i32_1 = arith.constant 0 : i32
    return %c0_i32, %c0_i32_0 : i32, i32
  }
  func.func @transform_4(%arg0: i32) -> (i32, i32) {
    %c0_i32 = arith.constant 0 : i32
    %c0_i32_0 = arith.constant 0 : i32
    %c0_i32_1 = arith.constant 0 : i32
    return %c0_i32, %c0_i32_0 : i32, i32
  }
  func.func @transform_5(%arg0: i32) -> (i32, i32) {
    %c0_i32 = arith.constant 0 : i32
    %c0_i32_0 = arith.constant 0 : i32
    return %arg0, %c0_i32 : i32, i32
  }
}

module attributes {stable_mosaic.version = 11 : i64} {
  func.func @kernel(%arg0: i32, %arg1: memref<80x96xf32, #tpu.memory_space<vmem>>, %arg2: memref<96x32xf32, #tpu.memory_space<vmem>>, %arg3: memref<1x32xf32, #tpu.memory_space<vmem>>, %arg4: memref<1x32xf32, #tpu.memory_space<vmem>>, %arg5: memref<1x32xf32, #tpu.memory_space<vmem>>, %arg6: memref<80x32xf32, #tpu.memory_space<vmem>>) attributes {dimension_semantics = [#tpu.dimension_semantics<parallel>], iteration_bounds = array<i64: 1>, scalar_prefetch = 0 : i64, scratch_operands = 0 : i64, tpu.core_type = #tpu.core_type<tc>, window_params = [{transform_indices = @transform_0, window_bounds = array<i64: 80, 96>}, {pipeline_mode = #tpu.pipeline_mode<synchronous>, transform_indices = @transform_1, window_bounds = array<i64: 96, 32>}, {pipeline_mode = #tpu.pipeline_mode<synchronous>, transform_indices = @transform_2, window_bounds = array<i64: 1, 32>}, {pipeline_mode = #tpu.pipeline_mode<synchronous>, transform_indices = @transform_3, window_bounds = array<i64: 1, 32>}, {pipeline_mode = #tpu.pipeline_mode<synchronous>, transform_indices = @transform_4, window_bounds = array<i64: 1, 32>}, {transform_indices = @transform_5, window_bounds = array<i64: 80, 32>}]} {
    %c0 = arith.constant 0 : index
    %c0_0 = arith.constant 0 : index
    %0 = vector.load %arg1[%c0, %c0_0] : memref<80x96xf32, #tpu.memory_space<vmem>>, vector<80x96xf32>
    %1 = arith.truncf %0 : vector<80x96xf32> to vector<80x96xbf16>
    %c0_1 = arith.constant 0 : index
    %c0_2 = arith.constant 0 : index
    %2 = vector.load %arg2[%c0_1, %c0_2] : memref<96x32xf32, #tpu.memory_space<vmem>>, vector<96x32xf32>
    %3 = arith.truncf %2 : vector<96x32xf32> to vector<96x32xbf16>
    %cst = arith.constant dense<0.000000e+00> : vector<80x32xf32>
    %4 = tpu.matmul %1, %3, %cst {dimension_numbers = #tpu.dot_dimension_numbers<[1], [0], [0], [1], [0, 0, 1, 1], [], []>} : vector<80x96xbf16>, vector<96x32xbf16>, vector<80x32xf32> -> vector<80x32xf32>
    %c0_3 = arith.constant 0 : index
    %c0_4 = arith.constant 0 : index
    %5 = vector.load %arg3[%c0_3, %c0_4] : memref<1x32xf32, #tpu.memory_space<vmem>>, vector<1x32xf32>
    %6 = vector.broadcast %5 : vector<1x32xf32> to vector<80x32xf32>
    %7 = arith.addf %4, %6 : vector<80x32xf32>
    %c0_5 = arith.constant 0 : index
    %c0_6 = arith.constant 0 : index
    %8 = vector.load %arg4[%c0_5, %c0_6] : memref<1x32xf32, #tpu.memory_space<vmem>>, vector<1x32xf32>
    %c0_7 = arith.constant 0 : index
    %c0_8 = arith.constant 0 : index
    %9 = vector.load %arg5[%c0_7, %c0_8] : memref<1x32xf32, #tpu.memory_space<vmem>>, vector<1x32xf32>
    %cst_9 = arith.constant dense<0.000000e+00> : vector<80xf32>
    %10 = vector.multi_reduction <add>, %7, %cst_9 [1] : vector<80x32xf32> to vector<80xf32>
    %11 = vector.shape_cast %10 : vector<80xf32> to vector<80x1xf32>
    %cst_10 = arith.constant 3.200000e+01 : f32
    %12 = vector.broadcast %cst_10 : f32 to vector<80x1xf32>
    %13 = arith.divf %11, %12 : vector<80x1xf32>
    %14 = vector.broadcast %13 : vector<80x1xf32> to vector<80x32xf32>
    %15 = arith.subf %7, %14 : vector<80x32xf32>
    %16 = arith.mulf %15, %15 : vector<80x32xf32>
    %cst_11 = arith.constant dense<0.000000e+00> : vector<80xf32>
    %17 = vector.multi_reduction <add>, %16, %cst_11 [1] : vector<80x32xf32> to vector<80xf32>
    %18 = vector.shape_cast %17 : vector<80xf32> to vector<80x1xf32>
    %cst_12 = arith.constant 3.200000e+01 : f32
    %19 = vector.broadcast %cst_12 : f32 to vector<80x1xf32>
    %20 = arith.divf %18, %19 : vector<80x1xf32>
    %21 = vector.broadcast %13 : vector<80x1xf32> to vector<80x32xf32>
    %22 = arith.subf %7, %21 : vector<80x32xf32>
    %cst_13 = arith.constant 9.99999974E-6 : f32
    %23 = vector.broadcast %cst_13 : f32 to vector<80x1xf32>
    %24 = arith.addf %20, %23 : vector<80x1xf32>
    %25 = math.rsqrt %24 : vector<80x1xf32>
    %26 = vector.broadcast %25 : vector<80x1xf32> to vector<80x32xf32>
    %27 = arith.mulf %22, %26 : vector<80x32xf32>
    %28 = vector.broadcast %8 : vector<1x32xf32> to vector<80x32xf32>
    %29 = arith.mulf %27, %28 : vector<80x32xf32>
    %30 = vector.broadcast %9 : vector<1x32xf32> to vector<80x32xf32>
    %31 = arith.addf %29, %30 : vector<80x32xf32>
    %cst_14 = arith.constant 5.000000e-01 : f32
    %32 = vector.broadcast %cst_14 : f32 to vector<80x32xf32>
    %33 = arith.mulf %32, %31 : vector<80x32xf32>
    %cst_15 = arith.constant 0.707106769 : f32
    %34 = vector.broadcast %cst_15 : f32 to vector<80x32xf32>
    %35 = arith.mulf %31, %34 : vector<80x32xf32>
    %36 = math.erf %35 : vector<80x32xf32>
    %cst_16 = arith.constant 1.000000e+00 : f32
    %37 = vector.broadcast %cst_16 : f32 to vector<80x32xf32>
    %38 = arith.addf %37, %36 : vector<80x32xf32>
    %39 = arith.mulf %33, %38 : vector<80x32xf32>
    %c0_17 = arith.constant 0 : index
    %c0_18 = arith.constant 0 : index
    %40 = vector.load %arg6[%c0_17, %c0_18] : memref<80x32xf32, #tpu.memory_space<vmem>>, vector<80x32xf32>
    tpu.vector_store %arg6[%c0_17, %c0_18], %39 {strides = array<i32>} : memref<80x32xf32, #tpu.memory_space<vmem>>, vector<80x32xf32>,
    return
  }
  func.func @transform_0(%arg0: i32) -> (i32, i32) {
    %c0_i32 = arith.constant 0 : i32
    %c0_i32_0 = arith.constant 0 : i32
    return %arg0, %c0_i32 : i32, i32
  }
  func.func @transform_1(%arg0: i32) -> (i32, i32) {
    %c0_i32 = arith.constant 0 : i32
    %c0_i32_0 = arith.constant 0 : i32
    %c0_i32_1 = arith.constant 0 : i32
    return %c0_i32, %c0_i32_0 : i32, i32
  }
  func.func @transform_2(%arg0: i32) -> (i32, i32) {
    %c0_i32 = arith.constant 0 : i32
    %c0_i32_0 = arith.constant 0 : i32
    %c0_i32_1 = arith.constant 0 : i32
    return %c0_i32, %c0_i32_0 : i32, i32
  }
  func.func @transform_3(%arg0: i32) -> (i32, i32) {
    %c0_i32 = arith.constant 0 : i32
    %c0_i32_0 = arith.constant 0 : i32
    %c0_i32_1 = arith.constant 0 : i32
    return %c0_i32, %c0_i32_0 : i32, i32
  }
  func.func @transform_4(%arg0: i32) -> (i32, i32) {
    %c0_i32 = arith.constant 0 : i32
    %c0_i32_0 = arith.constant 0 : i32
    %c0_i32_1 = arith.constant 0 : i32
    return %c0_i32, %c0_i32_0 : i32, i32
  }
  func.func @transform_5(%arg0: i32) -> (i32, i32) {
    %c0_i32 = arith.constant 0 : i32
    %c0_i32_0 = arith.constant 0 : i32
    return %arg0, %c0_i32 : i32, i32
  }
}

module attributes {stable_mosaic.version = 11 : i64} {
  func.func @kernel(%arg0: i32, %arg1: memref<40x96xf32, #tpu.memory_space<vmem>>, %arg2: memref<96x32xf32, #tpu.memory_space<vmem>>, %arg3: memref<1x32xf32, #tpu.memory_space<vmem>>, %arg4: memref<1x32xf32, #tpu.memory_space<vmem>>, %arg5: memref<1x32xf32, #tpu.memory_space<vmem>>, %arg6: memref<40x32xf32, #tpu.memory_space<vmem>>) attributes {dimension_semantics = [#tpu.dimension_semantics<parallel>], iteration_bounds = array<i64: 1>, scalar_prefetch = 0 : i64, scratch_operands = 0 : i64, tpu.core_type = #tpu.core_type<tc>, window_params = [{transform_indices = @transform_0, window_bounds = array<i64: 40, 96>}, {pipeline_mode = #tpu.pipeline_mode<synchronous>, transform_indices = @transform_1, window_bounds = array<i64: 96, 32>}, {pipeline_mode = #tpu.pipeline_mode<synchronous>, transform_indices = @transform_2, window_bounds = array<i64: 1, 32>}, {pipeline_mode = #tpu.pipeline_mode<synchronous>, transform_indices = @transform_3, window_bounds = array<i64: 1, 32>}, {pipeline_mode = #tpu.pipeline_mode<synchronous>, transform_indices = @transform_4, window_bounds = array<i64: 1, 32>}, {transform_indices = @transform_5, window_bounds = array<i64: 40, 32>}]} {
    %c0 = arith.constant 0 : index
    %c0_0 = arith.constant 0 : index
    %0 = vector.load %arg1[%c0, %c0_0] : memref<40x96xf32, #tpu.memory_space<vmem>>, vector<40x96xf32>
    %1 = arith.truncf %0 : vector<40x96xf32> to vector<40x96xbf16>
    %c0_1 = arith.constant 0 : index
    %c0_2 = arith.constant 0 : index
    %2 = vector.load %arg2[%c0_1, %c0_2] : memref<96x32xf32, #tpu.memory_space<vmem>>, vector<96x32xf32>
    %3 = arith.truncf %2 : vector<96x32xf32> to vector<96x32xbf16>
    %cst = arith.constant dense<0.000000e+00> : vector<40x32xf32>
    %4 = tpu.matmul %1, %3, %cst {dimension_numbers = #tpu.dot_dimension_numbers<[1], [0], [0], [1], [0, 0, 1, 1], [], []>} : vector<40x96xbf16>, vector<96x32xbf16>, vector<40x32xf32> -> vector<40x32xf32>
    %c0_3 = arith.constant 0 : index
    %c0_4 = arith.constant 0 : index
    %5 = vector.load %arg3[%c0_3, %c0_4] : memref<1x32xf32, #tpu.memory_space<vmem>>, vector<1x32xf32>
    %6 = vector.broadcast %5 : vector<1x32xf32> to vector<40x32xf32>
    %7 = arith.addf %4, %6 : vector<40x32xf32>
    %c0_5 = arith.constant 0 : index
    %c0_6 = arith.constant 0 : index
    %8 = vector.load %arg4[%c0_5, %c0_6] : memref<1x32xf32, #tpu.memory_space<vmem>>, vector<1x32xf32>
    %c0_7 = arith.constant 0 : index
    %c0_8 = arith.constant 0 : index
    %9 = vector.load %arg5[%c0_7, %c0_8] : memref<1x32xf32, #tpu.memory_space<vmem>>, vector<1x32xf32>
    %cst_9 = arith.constant dense<0.000000e+00> : vector<40xf32>
    %10 = vector.multi_reduction <add>, %7, %cst_9 [1] : vector<40x32xf32> to vector<40xf32>
    %11 = vector.shape_cast %10 : vector<40xf32> to vector<40x1xf32>
    %cst_10 = arith.constant 3.200000e+01 : f32
    %12 = vector.broadcast %cst_10 : f32 to vector<40x1xf32>
    %13 = arith.divf %11, %12 : vector<40x1xf32>
    %14 = vector.broadcast %13 : vector<40x1xf32> to vector<40x32xf32>
    %15 = arith.subf %7, %14 : vector<40x32xf32>
    %16 = arith.mulf %15, %15 : vector<40x32xf32>
    %cst_11 = arith.constant dense<0.000000e+00> : vector<40xf32>
    %17 = vector.multi_reduction <add>, %16, %cst_11 [1] : vector<40x32xf32> to vector<40xf32>
    %18 = vector.shape_cast %17 : vector<40xf32> to vector<40x1xf32>
    %cst_12 = arith.constant 3.200000e+01 : f32
    %19 = vector.broadcast %cst_12 : f32 to vector<40x1xf32>
    %20 = arith.divf %18, %19 : vector<40x1xf32>
    %21 = vector.broadcast %13 : vector<40x1xf32> to vector<40x32xf32>
    %22 = arith.subf %7, %21 : vector<40x32xf32>
    %cst_13 = arith.constant 9.99999974E-6 : f32
    %23 = vector.broadcast %cst_13 : f32 to vector<40x1xf32>
    %24 = arith.addf %20, %23 : vector<40x1xf32>
    %25 = math.rsqrt %24 : vector<40x1xf32>
    %26 = vector.broadcast %25 : vector<40x1xf32> to vector<40x32xf32>
    %27 = arith.mulf %22, %26 : vector<40x32xf32>
    %28 = vector.broadcast %8 : vector<1x32xf32> to vector<40x32xf32>
    %29 = arith.mulf %27, %28 : vector<40x32xf32>
    %30 = vector.broadcast %9 : vector<1x32xf32> to vector<40x32xf32>
    %31 = arith.addf %29, %30 : vector<40x32xf32>
    %cst_14 = arith.constant 5.000000e-01 : f32
    %32 = vector.broadcast %cst_14 : f32 to vector<40x32xf32>
    %33 = arith.mulf %32, %31 : vector<40x32xf32>
    %cst_15 = arith.constant 0.707106769 : f32
    %34 = vector.broadcast %cst_15 : f32 to vector<40x32xf32>
    %35 = arith.mulf %31, %34 : vector<40x32xf32>
    %36 = math.erf %35 : vector<40x32xf32>
    %cst_16 = arith.constant 1.000000e+00 : f32
    %37 = vector.broadcast %cst_16 : f32 to vector<40x32xf32>
    %38 = arith.addf %37, %36 : vector<40x32xf32>
    %39 = arith.mulf %33, %38 : vector<40x32xf32>
    %c0_17 = arith.constant 0 : index
    %c0_18 = arith.constant 0 : index
    %40 = vector.load %arg6[%c0_17, %c0_18] : memref<40x32xf32, #tpu.memory_space<vmem>>, vector<40x32xf32>
    tpu.vector_store %arg6[%c0_17, %c0_18], %39 {strides = array<i32>} : memref<40x32xf32, #tpu.memory_space<vmem>>, vector<40x32xf32>,
    return
  }
  func.func @transform_0(%arg0: i32) -> (i32, i32) {
    %c0_i32 = arith.constant 0 : i32
    %c0_i32_0 = arith.constant 0 : i32
    return %arg0, %c0_i32 : i32, i32
  }
  func.func @transform_1(%arg0: i32) -> (i32, i32) {
    %c0_i32 = arith.constant 0 : i32
    %c0_i32_0 = arith.constant 0 : i32
    %c0_i32_1 = arith.constant 0 : i32
    return %c0_i32, %c0_i32_0 : i32, i32
  }
  func.func @transform_2(%arg0: i32) -> (i32, i32) {
    %c0_i32 = arith.constant 0 : i32
    %c0_i32_0 = arith.constant 0 : i32
    %c0_i32_1 = arith.constant 0 : i32
    return %c0_i32, %c0_i32_0 : i32, i32
  }
  func.func @transform_3(%arg0: i32) -> (i32, i32) {
    %c0_i32 = arith.constant 0 : i32
    %c0_i32_0 = arith.constant 0 : i32
    %c0_i32_1 = arith.constant 0 : i32
    return %c0_i32, %c0_i32_0 : i32, i32
  }
  func.func @transform_4(%arg0: i32) -> (i32, i32) {
    %c0_i32 = arith.constant 0 : i32
    %c0_i32_0 = arith.constant 0 : i32
    %c0_i32_1 = arith.constant 0 : i32
    return %c0_i32, %c0_i32_0 : i32, i32
  }
  func.func @transform_5(%arg0: i32) -> (i32, i32) {
    %c0_i32 = arith.constant 0 : i32
    %c0_i32_0 = arith.constant 0 : i32
    return %arg0, %c0_i32 : i32, i32
  }
}

module attributes {stable_mosaic.version = 11 : i64} {
  func.func @kernel(%arg0: i32, %arg1: memref<40x32xf32, #tpu.memory_space<vmem>>, %arg2: memref<32x128xf32, #tpu.memory_space<vmem>>, %arg3: memref<1x128xf32, #tpu.memory_space<vmem>>, %arg4: memref<1x32xf32, #tpu.memory_space<vmem>>, %arg5: memref<1x32xf32, #tpu.memory_space<vmem>>, %arg6: memref<40x128xf32, #tpu.memory_space<vmem>>) attributes {dimension_semantics = [#tpu.dimension_semantics<parallel>], iteration_bounds = array<i64: 1>, scalar_prefetch = 0 : i64, scratch_operands = 0 : i64, tpu.core_type = #tpu.core_type<tc>, window_params = [{transform_indices = @transform_0, window_bounds = array<i64: 40, 32>}, {pipeline_mode = #tpu.pipeline_mode<synchronous>, transform_indices = @transform_1, window_bounds = array<i64: 32, 128>}, {pipeline_mode = #tpu.pipeline_mode<synchronous>, transform_indices = @transform_2, window_bounds = array<i64: 1, 128>}, {pipeline_mode = #tpu.pipeline_mode<synchronous>, transform_indices = @transform_3, window_bounds = array<i64: 1, 32>}, {pipeline_mode = #tpu.pipeline_mode<synchronous>, transform_indices = @transform_4, window_bounds = array<i64: 1, 32>}, {transform_indices = @transform_5, window_bounds = array<i64: 40, 128>}]} {
    %c0 = arith.constant 0 : index
    %c0_0 = arith.constant 0 : index
    %0 = vector.load %arg1[%c0, %c0_0] : memref<40x32xf32, #tpu.memory_space<vmem>>, vector<40x32xf32>
    %c0_1 = arith.constant 0 : index
    %c0_2 = arith.constant 0 : index
    %1 = vector.load %arg4[%c0_1, %c0_2] : memref<1x32xf32, #tpu.memory_space<vmem>>, vector<1x32xf32>
    %c0_3 = arith.constant 0 : index
    %c0_4 = arith.constant 0 : index
    %2 = vector.load %arg5[%c0_3, %c0_4] : memref<1x32xf32, #tpu.memory_space<vmem>>, vector<1x32xf32>
    %cst = arith.constant dense<0.000000e+00> : vector<40xf32>
    %3 = vector.multi_reduction <add>, %0, %cst [1] : vector<40x32xf32> to vector<40xf32>
    %4 = vector.shape_cast %3 : vector<40xf32> to vector<40x1xf32>
    %cst_5 = arith.constant 3.200000e+01 : f32
    %5 = vector.broadcast %cst_5 : f32 to vector<40x1xf32>
    %6 = arith.divf %4, %5 : vector<40x1xf32>
    %7 = vector.broadcast %6 : vector<40x1xf32> to vector<40x32xf32>
    %8 = arith.subf %0, %7 : vector<40x32xf32>
    %9 = arith.mulf %8, %8 : vector<40x32xf32>
    %cst_6 = arith.constant dense<0.000000e+00> : vector<40xf32>
    %10 = vector.multi_reduction <add>, %9, %cst_6 [1] : vector<40x32xf32> to vector<40xf32>
    %11 = vector.shape_cast %10 : vector<40xf32> to vector<40x1xf32>
    %cst_7 = arith.constant 3.200000e+01 : f32
    %12 = vector.broadcast %cst_7 : f32 to vector<40x1xf32>
    %13 = arith.divf %11, %12 : vector<40x1xf32>
    %14 = vector.broadcast %6 : vector<40x1xf32> to vector<40x32xf32>
    %15 = arith.subf %0, %14 : vector<40x32xf32>
    %cst_8 = arith.constant 9.99999974E-6 : f32
    %16 = vector.broadcast %cst_8 : f32 to vector<40x1xf32>
    %17 = arith.addf %13, %16 : vector<40x1xf32>
    %18 = math.rsqrt %17 : vector<40x1xf32>
    %19 = vector.broadcast %18 : vector<40x1xf32> to vector<40x32xf32>
    %20 = arith.mulf %15, %19 : vector<40x32xf32>
    %21 = vector.broadcast %1 : vector<1x32xf32> to vector<40x32xf32>
    %22 = arith.mulf %20, %21 : vector<40x32xf32>
    %23 = vector.broadcast %2 : vector<1x32xf32> to vector<40x32xf32>
    %24 = arith.addf %22, %23 : vector<40x32xf32>
    %25 = arith.truncf %24 : vector<40x32xf32> to vector<40x32xbf16>
    %c0_9 = arith.constant 0 : index
    %c0_10 = arith.constant 0 : index
    %26 = vector.load %arg2[%c0_9, %c0_10] : memref<32x128xf32, #tpu.memory_space<vmem>>, vector<32x128xf32>
    %27 = arith.truncf %26 : vector<32x128xf32> to vector<32x128xbf16>
    %cst_11 = arith.constant dense<0.000000e+00> : vector<40x128xf32>
    %28 = tpu.matmul %25, %27, %cst_11 {dimension_numbers = #tpu.dot_dimension_numbers<[1], [0], [0], [1], [0, 0, 1, 1], [], []>} : vector<40x32xbf16>, vector<32x128xbf16>, vector<40x128xf32> -> vector<40x128xf32>
    %c0_12 = arith.constant 0 : index
    %c0_13 = arith.constant 0 : index
    %29 = vector.load %arg3[%c0_12, %c0_13] : memref<1x128xf32, #tpu.memory_space<vmem>>, vector<1x128xf32>
    %30 = vector.broadcast %29 : vector<1x128xf32> to vector<40x128xf32>
    %31 = arith.addf %28, %30 : vector<40x128xf32>
    %c0_14 = arith.constant 0 : index
    %c0_15 = arith.constant 0 : index
    %32 = vector.load %arg6[%c0_14, %c0_15] : memref<40x128xf32, #tpu.memory_space<vmem>>, vector<40x128xf32>
    tpu.vector_store %arg6[%c0_14, %c0_15], %31 {strides = array<i32>} : memref<40x128xf32, #tpu.memory_space<vmem>>, vector<40x128xf32>,
    return
  }
  func.func @transform_0(%arg0: i32) -> (i32, i32) {
    %c0_i32 = arith.constant 0 : i32
    %c0_i32_0 = arith.constant 0 : i32
    return %arg0, %c0_i32 : i32, i32
  }
  func.func @transform_1(%arg0: i32) -> (i32, i32) {
    %c0_i32 = arith.constant 0 : i32
    %c0_i32_0 = arith.constant 0 : i32
    %c0_i32_1 = arith.constant 0 : i32
    return %c0_i32, %c0_i32_0 : i32, i32
  }
  func.func @transform_2(%arg0: i32) -> (i32, i32) {
    %c0_i32 = arith.constant 0 : i32
    %c0_i32_0 = arith.constant 0 : i32
    %c0_i32_1 = arith.constant 0 : i32
    return %c0_i32, %c0_i32_0 : i32, i32
  }
  func.func @transform_3(%arg0: i32) -> (i32, i32) {
    %c0_i32 = arith.constant 0 : i32
    %c0_i32_0 = arith.constant 0 : i32
    %c0_i32_1 = arith.constant 0 : i32
    return %c0_i32, %c0_i32_0 : i32, i32
  }
  func.func @transform_4(%arg0: i32) -> (i32, i32) {
    %c0_i32 = arith.constant 0 : i32
    %c0_i32_0 = arith.constant 0 : i32
    %c0_i32_1 = arith.constant 0 : i32
    return %c0_i32, %c0_i32_0 : i32, i32
  }
  func.func @transform_5(%arg0: i32) -> (i32, i32) {
    %c0_i32 = arith.constant 0 : i32
    %c0_i32_0 = arith.constant 0 : i32
    return %arg0, %c0_i32 : i32, i32
  }
}

module attributes {stable_mosaic.version = 11 : i64} {
  func.func @_posconv_kernel(%arg0: i32, %arg1: memref<4x40x256xf32, #tpu.memory_space<vmem>>, %arg2: memref<4x256x32xf32, #tpu.memory_space<vmem>>, %arg3: memref<1x128xf32, #tpu.memory_space<vmem>>, %arg4: memref<40x128xf32, #tpu.memory_space<vmem>>) attributes {dimension_semantics = [#tpu.dimension_semantics<arbitrary>], iteration_bounds = array<i64: 1>, scalar_prefetch = 0 : i64, scratch_operands = 0 : i64, tpu.core_type = #tpu.core_type<tc>, window_params = [{pipeline_mode = #tpu.pipeline_mode<synchronous>, transform_indices = @transform_0, window_bounds = array<i64: 4, 40, 256>}, {pipeline_mode = #tpu.pipeline_mode<synchronous>, transform_indices = @transform_1, window_bounds = array<i64: 4, 256, 32>}, {pipeline_mode = #tpu.pipeline_mode<synchronous>, transform_indices = @transform_2, window_bounds = array<i64: 1, 128>}, {pipeline_mode = #tpu.pipeline_mode<synchronous>, transform_indices = @transform_3, window_bounds = array<i64: 40, 128>}]} {
    %c0 = arith.constant 0 : index
    %c0_0 = arith.constant 0 : index
    %c0_1 = arith.constant 0 : index
    %0 = vector.load %arg1[%c0, %c0_0, %c0_1] : memref<4x40x256xf32, #tpu.memory_space<vmem>>, vector<1x40x256xf32>
    %1 = vector.shape_cast %0 : vector<1x40x256xf32> to vector<40x256xf32>
    %2 = arith.truncf %1 : vector<40x256xf32> to vector<40x256xbf16>
    %c0_2 = arith.constant 0 : index
    %c0_3 = arith.constant 0 : index
    %c0_4 = arith.constant 0 : index
    %3 = vector.load %arg2[%c0_2, %c0_3, %c0_4] : memref<4x256x32xf32, #tpu.memory_space<vmem>>, vector<1x256x32xf32>
    %4 = vector.shape_cast %3 : vector<1x256x32xf32> to vector<256x32xf32>
    %5 = arith.truncf %4 : vector<256x32xf32> to vector<256x32xbf16>
    %cst = arith.constant dense<0.000000e+00> : vector<40x32xf32>
    %6 = tpu.matmul %2, %5, %cst {dimension_numbers = #tpu.dot_dimension_numbers<[1], [0], [0], [1], [0, 0, 1, 1], [], []>} : vector<40x256xbf16>, vector<256x32xbf16>, vector<40x32xf32> -> vector<40x32xf32>
    %c1 = arith.constant 1 : index
    %c0_5 = arith.constant 0 : index
    %c0_6 = arith.constant 0 : index
    %7 = vector.load %arg1[%c1, %c0_5, %c0_6] : memref<4x40x256xf32, #tpu.memory_space<vmem>>, vector<1x40x256xf32>
    %8 = vector.shape_cast %7 : vector<1x40x256xf32> to vector<40x256xf32>
    %9 = arith.truncf %8 : vector<40x256xf32> to vector<40x256xbf16>
    %c1_7 = arith.constant 1 : index
    %c0_8 = arith.constant 0 : index
    %c0_9 = arith.constant 0 : index
    %10 = vector.load %arg2[%c1_7, %c0_8, %c0_9] : memref<4x256x32xf32, #tpu.memory_space<vmem>>, vector<1x256x32xf32>
    %11 = vector.shape_cast %10 : vector<1x256x32xf32> to vector<256x32xf32>
    %12 = arith.truncf %11 : vector<256x32xf32> to vector<256x32xbf16>
    %cst_10 = arith.constant dense<0.000000e+00> : vector<40x32xf32>
    %13 = tpu.matmul %9, %12, %cst_10 {dimension_numbers = #tpu.dot_dimension_numbers<[1], [0], [0], [1], [0, 0, 1, 1], [], []>} : vector<40x256xbf16>, vector<256x32xbf16>, vector<40x32xf32> -> vector<40x32xf32>
    %c2 = arith.constant 2 : index
    %c0_11 = arith.constant 0 : index
    %c0_12 = arith.constant 0 : index
    %14 = vector.load %arg1[%c2, %c0_11, %c0_12] : memref<4x40x256xf32, #tpu.memory_space<vmem>>, vector<1x40x256xf32>
    %15 = vector.shape_cast %14 : vector<1x40x256xf32> to vector<40x256xf32>
    %16 = arith.truncf %15 : vector<40x256xf32> to vector<40x256xbf16>
    %c2_13 = arith.constant 2 : index
    %c0_14 = arith.constant 0 : index
    %c0_15 = arith.constant 0 : index
    %17 = vector.load %arg2[%c2_13, %c0_14, %c0_15] : memref<4x256x32xf32, #tpu.memory_space<vmem>>, vector<1x256x32xf32>
    %18 = vector.shape_cast %17 : vector<1x256x32xf32> to vector<256x32xf32>
    %19 = arith.truncf %18 : vector<256x32xf32> to vector<256x32xbf16>
    %cst_16 = arith.constant dense<0.000000e+00> : vector<40x32xf32>
    %20 = tpu.matmul %16, %19, %cst_16 {dimension_numbers = #tpu.dot_dimension_numbers<[1], [0], [0], [1], [0, 0, 1, 1], [], []>} : vector<40x256xbf16>, vector<256x32xbf16>, vector<40x32xf32> -> vector<40x32xf32>
    %c3 = arith.constant 3 : index
    %c0_17 = arith.constant 0 : index
    %c0_18 = arith.constant 0 : index
    %21 = vector.load %arg1[%c3, %c0_17, %c0_18] : memref<4x40x256xf32, #tpu.memory_space<vmem>>, vector<1x40x256xf32>
    %22 = vector.shape_cast %21 : vector<1x40x256xf32> to vector<40x256xf32>
    %23 = arith.truncf %22 : vector<40x256xf32> to vector<40x256xbf16>
    %c3_19 = arith.constant 3 : index
    %c0_20 = arith.constant 0 : index
    %c0_21 = arith.constant 0 : index
    %24 = vector.load %arg2[%c3_19, %c0_20, %c0_21] : memref<4x256x32xf32, #tpu.memory_space<vmem>>, vector<1x256x32xf32>
    %25 = vector.shape_cast %24 : vector<1x256x32xf32> to vector<256x32xf32>
    %26 = arith.truncf %25 : vector<256x32xf32> to vector<256x32xbf16>
    %cst_22 = arith.constant dense<0.000000e+00> : vector<40x32xf32>
    %27 = tpu.matmul %23, %26, %cst_22 {dimension_numbers = #tpu.dot_dimension_numbers<[1], [0], [0], [1], [0, 0, 1, 1], [], []>} : vector<40x256xbf16>, vector<256x32xbf16>, vector<40x32xf32> -> vector<40x32xf32>
    %28 = tpu.concatenate %6, %13, %20, %27 in 1 : vector<40x32xf32>, vector<40x32xf32>, vector<40x32xf32>, vector<40x32xf32> -> vector<40x128xf32>
    %c0_23 = arith.constant 0 : index
    %c0_24 = arith.constant 0 : index
    %29 = vector.load %arg3[%c0_23, %c0_24] : memref<1x128xf32, #tpu.memory_space<vmem>>, vector<1x128xf32>
    %30 = vector.broadcast %29 : vector<1x128xf32> to vector<40x128xf32>
    %31 = arith.addf %28, %30 : vector<40x128xf32>
    %cst_25 = arith.constant 5.000000e-01 : f32
    %32 = vector.broadcast %cst_25 : f32 to vector<40x128xf32>
    %33 = arith.mulf %32, %31 : vector<40x128xf32>
    %cst_26 = arith.constant 0.707106769 : f32
    %34 = vector.broadcast %cst_26 : f32 to vector<40x128xf32>
    %35 = arith.mulf %31, %34 : vector<40x128xf32>
    %36 = math.erf %35 : vector<40x128xf32>
    %cst_27 = arith.constant 1.000000e+00 : f32
    %37 = vector.broadcast %cst_27 : f32 to vector<40x128xf32>
    %38 = arith.addf %37, %36 : vector<40x128xf32>
    %39 = arith.mulf %33, %38 : vector<40x128xf32>
    %c0_28 = arith.constant 0 : index
    %c0_29 = arith.constant 0 : index
    %40 = vector.load %arg4[%c0_28, %c0_29] : memref<40x128xf32, #tpu.memory_space<vmem>>, vector<40x128xf32>
    tpu.vector_store %arg4[%c0_28, %c0_29], %39 {strides = array<i32>} : memref<40x128xf32, #tpu.memory_space<vmem>>, vector<40x128xf32>,
    return
  }
  func.func @transform_0(%arg0: i32) -> (i32, i32, i32) {
    %c0_i32 = arith.constant 0 : i32
    %c0_i32_0 = arith.constant 0 : i32
    %c0_i32_1 = arith.constant 0 : i32
    %c0_i32_2 = arith.constant 0 : i32
    return %c0_i32, %c0_i32_0, %c0_i32_1 : i32, i32, i32
  }
  func.func @transform_1(%arg0: i32) -> (i32, i32, i32) {
    %c0_i32 = arith.constant 0 : i32
    %c0_i32_0 = arith.constant 0 : i32
    %c0_i32_1 = arith.constant 0 : i32
    %c0_i32_2 = arith.constant 0 : i32
    return %c0_i32, %c0_i32_0, %c0_i32_1 : i32, i32, i32
  }
  func.func @transform_2(%arg0: i32) -> (i32, i32) {
    %c0_i32 = arith.constant 0 : i32
    %c0_i32_0 = arith.constant 0 : i32
    %c0_i32_1 = arith.constant 0 : i32
    return %c0_i32, %c0_i32_0 : i32, i32
  }
  func.func @transform_3(%arg0: i32) -> (i32, i32) {
    %c0_i32 = arith.constant 0 : i32
    %c0_i32_0 = arith.constant 0 : i32
    %c0_i32_1 = arith.constant 0 : i32
    return %c0_i32, %c0_i32_0 : i32, i32
  }
}

module attributes {stable_mosaic.version = 11 : i64} {
  func.func @kernel(%arg0: i32, %arg1: memref<40x128xf32, #tpu.memory_space<vmem>>, %arg2: memref<128x384xf32, #tpu.memory_space<vmem>>, %arg3: memref<1x384xf32, #tpu.memory_space<vmem>>, %arg4: memref<1x128xf32, #tpu.memory_space<vmem>>, %arg5: memref<1x128xf32, #tpu.memory_space<vmem>>, %arg6: memref<40x384xf32, #tpu.memory_space<vmem>>) attributes {dimension_semantics = [#tpu.dimension_semantics<parallel>], iteration_bounds = array<i64: 1>, scalar_prefetch = 0 : i64, scratch_operands = 0 : i64, tpu.core_type = #tpu.core_type<tc>, window_params = [{transform_indices = @transform_0, window_bounds = array<i64: 40, 128>}, {pipeline_mode = #tpu.pipeline_mode<synchronous>, transform_indices = @transform_1, window_bounds = array<i64: 128, 384>}, {pipeline_mode = #tpu.pipeline_mode<synchronous>, transform_indices = @transform_2, window_bounds = array<i64: 1, 384>}, {pipeline_mode = #tpu.pipeline_mode<synchronous>, transform_indices = @transform_3, window_bounds = array<i64: 1, 128>}, {pipeline_mode = #tpu.pipeline_mode<synchronous>, transform_indices = @transform_4, window_bounds = array<i64: 1, 128>}, {transform_indices = @transform_5, window_bounds = array<i64: 40, 384>}]} {
    %c0 = arith.constant 0 : index
    %c0_0 = arith.constant 0 : index
    %0 = vector.load %arg1[%c0, %c0_0] : memref<40x128xf32, #tpu.memory_space<vmem>>, vector<40x128xf32>
    %c0_1 = arith.constant 0 : index
    %c0_2 = arith.constant 0 : index
    %1 = vector.load %arg4[%c0_1, %c0_2] : memref<1x128xf32, #tpu.memory_space<vmem>>, vector<1x128xf32>
    %c0_3 = arith.constant 0 : index
    %c0_4 = arith.constant 0 : index
    %2 = vector.load %arg5[%c0_3, %c0_4] : memref<1x128xf32, #tpu.memory_space<vmem>>, vector<1x128xf32>
    %cst = arith.constant dense<0.000000e+00> : vector<40xf32>
    %3 = vector.multi_reduction <add>, %0, %cst [1] : vector<40x128xf32> to vector<40xf32>
    %4 = vector.shape_cast %3 : vector<40xf32> to vector<40x1xf32>
    %cst_5 = arith.constant 1.280000e+02 : f32
    %5 = vector.broadcast %cst_5 : f32 to vector<40x1xf32>
    %6 = arith.divf %4, %5 : vector<40x1xf32>
    %7 = vector.broadcast %6 : vector<40x1xf32> to vector<40x128xf32>
    %8 = arith.subf %0, %7 : vector<40x128xf32>
    %9 = arith.mulf %8, %8 : vector<40x128xf32>
    %cst_6 = arith.constant dense<0.000000e+00> : vector<40xf32>
    %10 = vector.multi_reduction <add>, %9, %cst_6 [1] : vector<40x128xf32> to vector<40xf32>
    %11 = vector.shape_cast %10 : vector<40xf32> to vector<40x1xf32>
    %cst_7 = arith.constant 1.280000e+02 : f32
    %12 = vector.broadcast %cst_7 : f32 to vector<40x1xf32>
    %13 = arith.divf %11, %12 : vector<40x1xf32>
    %14 = vector.broadcast %6 : vector<40x1xf32> to vector<40x128xf32>
    %15 = arith.subf %0, %14 : vector<40x128xf32>
    %cst_8 = arith.constant 9.99999974E-6 : f32
    %16 = vector.broadcast %cst_8 : f32 to vector<40x1xf32>
    %17 = arith.addf %13, %16 : vector<40x1xf32>
    %18 = math.rsqrt %17 : vector<40x1xf32>
    %19 = vector.broadcast %18 : vector<40x1xf32> to vector<40x128xf32>
    %20 = arith.mulf %15, %19 : vector<40x128xf32>
    %21 = vector.broadcast %1 : vector<1x128xf32> to vector<40x128xf32>
    %22 = arith.mulf %20, %21 : vector<40x128xf32>
    %23 = vector.broadcast %2 : vector<1x128xf32> to vector<40x128xf32>
    %24 = arith.addf %22, %23 : vector<40x128xf32>
    %25 = arith.truncf %24 : vector<40x128xf32> to vector<40x128xbf16>
    %c0_9 = arith.constant 0 : index
    %c0_10 = arith.constant 0 : index
    %26 = vector.load %arg2[%c0_9, %c0_10] : memref<128x384xf32, #tpu.memory_space<vmem>>, vector<128x384xf32>
    %27 = arith.truncf %26 : vector<128x384xf32> to vector<128x384xbf16>
    %cst_11 = arith.constant dense<0.000000e+00> : vector<40x384xf32>
    %28 = tpu.matmul %25, %27, %cst_11 {dimension_numbers = #tpu.dot_dimension_numbers<[1], [0], [0], [1], [0, 0, 1, 1], [], []>} : vector<40x128xbf16>, vector<128x384xbf16>, vector<40x384xf32> -> vector<40x384xf32>
    %c0_12 = arith.constant 0 : index
    %c0_13 = arith.constant 0 : index
    %29 = vector.load %arg3[%c0_12, %c0_13] : memref<1x384xf32, #tpu.memory_space<vmem>>, vector<1x384xf32>
    %30 = vector.broadcast %29 : vector<1x384xf32> to vector<40x384xf32>
    %31 = arith.addf %28, %30 : vector<40x384xf32>
    %c0_14 = arith.constant 0 : index
    %c0_15 = arith.constant 0 : index
    %32 = vector.load %arg6[%c0_14, %c0_15] : memref<40x384xf32, #tpu.memory_space<vmem>>, vector<40x384xf32>
    tpu.vector_store %arg6[%c0_14, %c0_15], %31 {strides = array<i32>} : memref<40x384xf32, #tpu.memory_space<vmem>>, vector<40x384xf32>,
    return
  }
  func.func @transform_0(%arg0: i32) -> (i32, i32) {
    %c0_i32 = arith.constant 0 : i32
    %c0_i32_0 = arith.constant 0 : i32
    return %arg0, %c0_i32 : i32, i32
  }
  func.func @transform_1(%arg0: i32) -> (i32, i32) {
    %c0_i32 = arith.constant 0 : i32
    %c0_i32_0 = arith.constant 0 : i32
    %c0_i32_1 = arith.constant 0 : i32
    return %c0_i32, %c0_i32_0 : i32, i32
  }
  func.func @transform_2(%arg0: i32) -> (i32, i32) {
    %c0_i32 = arith.constant 0 : i32
    %c0_i32_0 = arith.constant 0 : i32
    %c0_i32_1 = arith.constant 0 : i32
    return %c0_i32, %c0_i32_0 : i32, i32
  }
  func.func @transform_3(%arg0: i32) -> (i32, i32) {
    %c0_i32 = arith.constant 0 : i32
    %c0_i32_0 = arith.constant 0 : i32
    %c0_i32_1 = arith.constant 0 : i32
    return %c0_i32, %c0_i32_0 : i32, i32
  }
  func.func @transform_4(%arg0: i32) -> (i32, i32) {
    %c0_i32 = arith.constant 0 : i32
    %c0_i32_0 = arith.constant 0 : i32
    %c0_i32_1 = arith.constant 0 : i32
    return %c0_i32, %c0_i32_0 : i32, i32
  }
  func.func @transform_5(%arg0: i32) -> (i32, i32) {
    %c0_i32 = arith.constant 0 : i32
    %c0_i32_0 = arith.constant 0 : i32
    return %arg0, %c0_i32 : i32, i32
  }
}

module attributes {stable_mosaic.version = 11 : i64} {
  func.func @_attn_kernel(%arg0: i32, %arg1: memref<1x19x128xf32, #tpu.memory_space<vmem>>, %arg2: memref<1x19x128xf32, #tpu.memory_space<vmem>>, %arg3: memref<1x19x128xf32, #tpu.memory_space<vmem>>, %arg4: memref<1x19x128xf32, #tpu.memory_space<vmem>>) attributes {dimension_semantics = [#tpu.dimension_semantics<parallel>], iteration_bounds = array<i64: 2>, scalar_prefetch = 0 : i64, scratch_operands = 0 : i64, tpu.core_type = #tpu.core_type<tc>, window_params = [{transform_indices = @transform_0, window_bounds = array<i64: 1, 19, 128>}, {transform_indices = @transform_1, window_bounds = array<i64: 1, 19, 128>}, {transform_indices = @transform_2, window_bounds = array<i64: 1, 19, 128>}, {transform_indices = @transform_3, window_bounds = array<i64: 1, 19, 128>}]} {
    %c0 = arith.constant 0 : index
    %c0_0 = arith.constant 0 : index
    %c0_1 = arith.constant 0 : index
    %0 = vector.load %arg1[%c0, %c0_0, %c0_1] : memref<1x19x128xf32, #tpu.memory_space<vmem>>, vector<1x19x128xf32>
    %1 = vector.shape_cast %0 : vector<1x19x128xf32> to vector<19x128xf32>
    %cst = arith.constant 0.176776692 : f32
    %2 = vector.broadcast %cst : f32 to vector<19x128xf32>
    %3 = arith.mulf %1, %2 : vector<19x128xf32>
    %c0_2 = arith.constant 0 : index
    %c0_3 = arith.constant 0 : index
    %c0_4 = arith.constant 0 : index
    %4 = vector.load %arg2[%c0_2, %c0_3, %c0_4] : memref<1x19x128xf32, #tpu.memory_space<vmem>>, vector<1x19x128xf32>
    %5 = vector.shape_cast %4 : vector<1x19x128xf32> to vector<19x128xf32>
    %c0_5 = arith.constant 0 : index
    %c0_6 = arith.constant 0 : index
    %c0_7 = arith.constant 0 : index
    %6 = vector.load %arg3[%c0_5, %c0_6, %c0_7] : memref<1x19x128xf32, #tpu.memory_space<vmem>>, vector<1x19x128xf32>
    %7 = vector.shape_cast %6 : vector<1x19x128xf32> to vector<19x128xf32>
    %8 = vector.extract_strided_slice %3 {offsets = [0, 0], sizes = [19, 32], strides = [1, 1]} : vector<19x128xf32> to vector<19x32xf32>
    %9 = arith.truncf %8 : vector<19x32xf32> to vector<19x32xbf16>
    %10 = vector.extract_strided_slice %5 {offsets = [0, 0], sizes = [19, 32], strides = [1, 1]} : vector<19x128xf32> to vector<19x32xf32>
    %11 = arith.truncf %10 : vector<19x32xf32> to vector<19x32xbf16>
    %12 = vector.extract_strided_slice %7 {offsets = [0, 0], sizes = [19, 32], strides = [1, 1]} : vector<19x128xf32> to vector<19x32xf32>
    %13 = arith.truncf %12 : vector<19x32xf32> to vector<19x32xbf16>
    %cst_8 = arith.constant dense<0.000000e+00> : vector<19x19xf32>
    %14 = tpu.matmul %9, %11, %cst_8 {dimension_numbers = #tpu.dot_dimension_numbers<[1], [1], [0], [0], [0, 0, 1, 0], [], []>} : vector<19x32xbf16>, vector<19x32xbf16>, vector<19x19xf32> -> vector<19x19xf32>
    %cst_9 = arith.constant dense<0xFF800000> : vector<19xf32>
    %15 = vector.multi_reduction <maximumf>, %14, %cst_9 [1] : vector<19x19xf32> to vector<19xf32>
    %16 = vector.shape_cast %15 : vector<19xf32> to vector<19x1xf32>
    %17 = vector.broadcast %16 : vector<19x1xf32> to vector<19x19xf32>
    %18 = arith.subf %14, %17 : vector<19x19xf32>
    %19 = math.exp %18 : vector<19x19xf32>
    %cst_10 = arith.constant dense<0.000000e+00> : vector<19xf32>
    %20 = vector.multi_reduction <add>, %19, %cst_10 [1] : vector<19x19xf32> to vector<19xf32>
    %21 = vector.shape_cast %20 : vector<19xf32> to vector<19x1xf32>
    %22 = tpu.reciprocal %21 {approx = true} : vector<19x1xf32> -> vector<19x1xf32>
    %23 = vector.broadcast %22 : vector<19x1xf32> to vector<19x19xf32>
    %24 = arith.mulf %19, %23 : vector<19x19xf32>
    %25 = arith.truncf %24 : vector<19x19xf32> to vector<19x19xbf16>
    %cst_11 = arith.constant dense<0.000000e+00> : vector<19x32xf32>
    %26 = tpu.matmul %25, %13, %cst_11 {dimension_numbers = #tpu.dot_dimension_numbers<[1], [0], [0], [1], [0, 0, 1, 1], [], []>} : vector<19x19xbf16>, vector<19x32xbf16>, vector<19x32xf32> -> vector<19x32xf32>
    %27 = vector.extract_strided_slice %3 {offsets = [0, 32], sizes = [19, 32], strides = [1, 1]} : vector<19x128xf32> to vector<19x32xf32>
    %28 = arith.truncf %27 : vector<19x32xf32> to vector<19x32xbf16>
    %29 = vector.extract_strided_slice %5 {offsets = [0, 32], sizes = [19, 32], strides = [1, 1]} : vector<19x128xf32> to vector<19x32xf32>
    %30 = arith.truncf %29 : vector<19x32xf32> to vector<19x32xbf16>
    %31 = vector.extract_strided_slice %7 {offsets = [0, 32], sizes = [19, 32], strides = [1, 1]} : vector<19x128xf32> to vector<19x32xf32>
    %32 = arith.truncf %31 : vector<19x32xf32> to vector<19x32xbf16>
    %cst_12 = arith.constant dense<0.000000e+00> : vector<19x19xf32>
    %33 = tpu.matmul %28, %30, %cst_12 {dimension_numbers = #tpu.dot_dimension_numbers<[1], [1], [0], [0], [0, 0, 1, 0], [], []>} : vector<19x32xbf16>, vector<19x32xbf16>, vector<19x19xf32> -> vector<19x19xf32>
    %cst_13 = arith.constant dense<0xFF800000> : vector<19xf32>
    %34 = vector.multi_reduction <maximumf>, %33, %cst_13 [1] : vector<19x19xf32> to vector<19xf32>
    %35 = vector.shape_cast %34 : vector<19xf32> to vector<19x1xf32>
    %36 = vector.broadcast %35 : vector<19x1xf32> to vector<19x19xf32>
    %37 = arith.subf %33, %36 : vector<19x19xf32>
    %38 = math.exp %37 : vector<19x19xf32>
    %cst_14 = arith.constant dense<0.000000e+00> : vector<19xf32>
    %39 = vector.multi_reduction <add>, %38, %cst_14 [1] : vector<19x19xf32> to vector<19xf32>
    %40 = vector.shape_cast %39 : vector<19xf32> to vector<19x1xf32>
    %41 = tpu.reciprocal %40 {approx = true} : vector<19x1xf32> -> vector<19x1xf32>
    %42 = vector.broadcast %41 : vector<19x1xf32> to vector<19x19xf32>
    %43 = arith.mulf %38, %42 : vector<19x19xf32>
    %44 = arith.truncf %43 : vector<19x19xf32> to vector<19x19xbf16>
    %cst_15 = arith.constant dense<0.000000e+00> : vector<19x32xf32>
    %45 = tpu.matmul %44, %32, %cst_15 {dimension_numbers = #tpu.dot_dimension_numbers<[1], [0], [0], [1], [0, 0, 1, 1], [], []>} : vector<19x19xbf16>, vector<19x32xbf16>, vector<19x32xf32> -> vector<19x32xf32>
    %46 = vector.extract_strided_slice %3 {offsets = [0, 64], sizes = [19, 32], strides = [1, 1]} : vector<19x128xf32> to vector<19x32xf32>
    %47 = arith.truncf %46 : vector<19x32xf32> to vector<19x32xbf16>
    %48 = vector.extract_strided_slice %5 {offsets = [0, 64], sizes = [19, 32], strides = [1, 1]} : vector<19x128xf32> to vector<19x32xf32>
    %49 = arith.truncf %48 : vector<19x32xf32> to vector<19x32xbf16>
    %50 = vector.extract_strided_slice %7 {offsets = [0, 64], sizes = [19, 32], strides = [1, 1]} : vector<19x128xf32> to vector<19x32xf32>
    %51 = arith.truncf %50 : vector<19x32xf32> to vector<19x32xbf16>
    %cst_16 = arith.constant dense<0.000000e+00> : vector<19x19xf32>
    %52 = tpu.matmul %47, %49, %cst_16 {dimension_numbers = #tpu.dot_dimension_numbers<[1], [1], [0], [0], [0, 0, 1, 0], [], []>} : vector<19x32xbf16>, vector<19x32xbf16>, vector<19x19xf32> -> vector<19x19xf32>
    %cst_17 = arith.constant dense<0xFF800000> : vector<19xf32>
    %53 = vector.multi_reduction <maximumf>, %52, %cst_17 [1] : vector<19x19xf32> to vector<19xf32>
    %54 = vector.shape_cast %53 : vector<19xf32> to vector<19x1xf32>
    %55 = vector.broadcast %54 : vector<19x1xf32> to vector<19x19xf32>
    %56 = arith.subf %52, %55 : vector<19x19xf32>
    %57 = math.exp %56 : vector<19x19xf32>
    %cst_18 = arith.constant dense<0.000000e+00> : vector<19xf32>
    %58 = vector.multi_reduction <add>, %57, %cst_18 [1] : vector<19x19xf32> to vector<19xf32>
    %59 = vector.shape_cast %58 : vector<19xf32> to vector<19x1xf32>
    %60 = tpu.reciprocal %59 {approx = true} : vector<19x1xf32> -> vector<19x1xf32>
    %61 = vector.broadcast %60 : vector<19x1xf32> to vector<19x19xf32>
    %62 = arith.mulf %57, %61 : vector<19x19xf32>
    %63 = arith.truncf %62 : vector<19x19xf32> to vector<19x19xbf16>
    %cst_19 = arith.constant dense<0.000000e+00> : vector<19x32xf32>
    %64 = tpu.matmul %63, %51, %cst_19 {dimension_numbers = #tpu.dot_dimension_numbers<[1], [0], [0], [1], [0, 0, 1, 1], [], []>} : vector<19x19xbf16>, vector<19x32xbf16>, vector<19x32xf32> -> vector<19x32xf32>
    %65 = vector.extract_strided_slice %3 {offsets = [0, 96], sizes = [19, 32], strides = [1, 1]} : vector<19x128xf32> to vector<19x32xf32>
    %66 = arith.truncf %65 : vector<19x32xf32> to vector<19x32xbf16>
    %67 = vector.extract_strided_slice %5 {offsets = [0, 96], sizes = [19, 32], strides = [1, 1]} : vector<19x128xf32> to vector<19x32xf32>
    %68 = arith.truncf %67 : vector<19x32xf32> to vector<19x32xbf16>
    %69 = vector.extract_strided_slice %7 {offsets = [0, 96], sizes = [19, 32], strides = [1, 1]} : vector<19x128xf32> to vector<19x32xf32>
    %70 = arith.truncf %69 : vector<19x32xf32> to vector<19x32xbf16>
    %cst_20 = arith.constant dense<0.000000e+00> : vector<19x19xf32>
    %71 = tpu.matmul %66, %68, %cst_20 {dimension_numbers = #tpu.dot_dimension_numbers<[1], [1], [0], [0], [0, 0, 1, 0], [], []>} : vector<19x32xbf16>, vector<19x32xbf16>, vector<19x19xf32> -> vector<19x19xf32>
    %cst_21 = arith.constant dense<0xFF800000> : vector<19xf32>
    %72 = vector.multi_reduction <maximumf>, %71, %cst_21 [1] : vector<19x19xf32> to vector<19xf32>
    %73 = vector.shape_cast %72 : vector<19xf32> to vector<19x1xf32>
    %74 = vector.broadcast %73 : vector<19x1xf32> to vector<19x19xf32>
    %75 = arith.subf %71, %74 : vector<19x19xf32>
    %76 = math.exp %75 : vector<19x19xf32>
    %cst_22 = arith.constant dense<0.000000e+00> : vector<19xf32>
    %77 = vector.multi_reduction <add>, %76, %cst_22 [1] : vector<19x19xf32> to vector<19xf32>
    %78 = vector.shape_cast %77 : vector<19xf32> to vector<19x1xf32>
    %79 = tpu.reciprocal %78 {approx = true} : vector<19x1xf32> -> vector<19x1xf32>
    %80 = vector.broadcast %79 : vector<19x1xf32> to vector<19x19xf32>
    %81 = arith.mulf %76, %80 : vector<19x19xf32>
    %82 = arith.truncf %81 : vector<19x19xf32> to vector<19x19xbf16>
    %cst_23 = arith.constant dense<0.000000e+00> : vector<19x32xf32>
    %83 = tpu.matmul %82, %70, %cst_23 {dimension_numbers = #tpu.dot_dimension_numbers<[1], [0], [0], [1], [0, 0, 1, 1], [], []>} : vector<19x19xbf16>, vector<19x32xbf16>, vector<19x32xf32> -> vector<19x32xf32>
    %84 = tpu.concatenate %26, %45, %64, %83 in 1 : vector<19x32xf32>, vector<19x32xf32>, vector<19x32xf32>, vector<19x32xf32> -> vector<19x128xf32>
    %c0_24 = arith.constant 0 : index
    %c0_25 = arith.constant 0 : index
    %c0_26 = arith.constant 0 : index
    %85 = vector.load %arg4[%c0_24, %c0_25, %c0_26] : memref<1x19x128xf32, #tpu.memory_space<vmem>>, vector<1x19x128xf32>
    %86 = vector.shape_cast %85 : vector<1x19x128xf32> to vector<19x128xf32>
    %87 = vector.shape_cast %84 : vector<19x128xf32> to vector<1x19x128xf32>
    tpu.vector_store %arg4[%c0_24, %c0_25, %c0_26], %87 {strides = array<i32>} : memref<1x19x128xf32, #tpu.memory_space<vmem>>, vector<1x19x128xf32>,
    return
  }
  func.func @transform_0(%arg0: i32) -> (i32, i32, i32) {
    %c0_i32 = arith.constant 0 : i32
    %c0_i32_0 = arith.constant 0 : i32
    %c0_i32_1 = arith.constant 0 : i32
    return %arg0, %c0_i32, %c0_i32_0 : i32, i32, i32
  }
  func.func @transform_1(%arg0: i32) -> (i32, i32, i32) {
    %c0_i32 = arith.constant 0 : i32
    %c0_i32_0 = arith.constant 0 : i32
    %c0_i32_1 = arith.constant 0 : i32
    return %arg0, %c0_i32, %c0_i32_0 : i32, i32, i32
  }
  func.func @transform_2(%arg0: i32) -> (i32, i32, i32) {
    %c0_i32 = arith.constant 0 : i32
    %c0_i32_0 = arith.constant 0 : i32
    %c0_i32_1 = arith.constant 0 : i32
    return %arg0, %c0_i32, %c0_i32_0 : i32, i32, i32
  }
  func.func @transform_3(%arg0: i32) -> (i32, i32, i32) {
    %c0_i32 = arith.constant 0 : i32
    %c0_i32_0 = arith.constant 0 : i32
    %c0_i32_1 = arith.constant 0 : i32
    return %arg0, %c0_i32, %c0_i32_0 : i32, i32, i32
  }
}

module attributes {stable_mosaic.version = 11 : i64} {
  func.func @kernel(%arg0: i32, %arg1: memref<40x128xf32, #tpu.memory_space<vmem>>, %arg2: memref<128x128xf32, #tpu.memory_space<vmem>>, %arg3: memref<1x128xf32, #tpu.memory_space<vmem>>, %arg4: memref<40x128xf32, #tpu.memory_space<vmem>>, %arg5: memref<40x128xf32, #tpu.memory_space<vmem>>) attributes {dimension_semantics = [#tpu.dimension_semantics<parallel>], iteration_bounds = array<i64: 1>, scalar_prefetch = 0 : i64, scratch_operands = 0 : i64, tpu.core_type = #tpu.core_type<tc>, window_params = [{transform_indices = @transform_0, window_bounds = array<i64: 40, 128>}, {pipeline_mode = #tpu.pipeline_mode<synchronous>, transform_indices = @transform_1, window_bounds = array<i64: 128, 128>}, {pipeline_mode = #tpu.pipeline_mode<synchronous>, transform_indices = @transform_2, window_bounds = array<i64: 1, 128>}, {transform_indices = @transform_3, window_bounds = array<i64: 40, 128>}, {transform_indices = @transform_4, window_bounds = array<i64: 40, 128>}]} {
    %c0 = arith.constant 0 : index
    %c0_0 = arith.constant 0 : index
    %0 = vector.load %arg1[%c0, %c0_0] : memref<40x128xf32, #tpu.memory_space<vmem>>, vector<40x128xf32>
    %1 = arith.truncf %0 : vector<40x128xf32> to vector<40x128xbf16>
    %c0_1 = arith.constant 0 : index
    %c0_2 = arith.constant 0 : index
    %2 = vector.load %arg2[%c0_1, %c0_2] : memref<128x128xf32, #tpu.memory_space<vmem>>, vector<128x128xf32>
    %3 = arith.truncf %2 : vector<128x128xf32> to vector<128x128xbf16>
    %cst = arith.constant dense<0.000000e+00> : vector<40x128xf32>
    %4 = tpu.matmul %1, %3, %cst {dimension_numbers = #tpu.dot_dimension_numbers<[1], [0], [0], [1], [0, 0, 1, 1], [], []>} : vector<40x128xbf16>, vector<128x128xbf16>, vector<40x128xf32> -> vector<40x128xf32>
    %c0_3 = arith.constant 0 : index
    %c0_4 = arith.constant 0 : index
    %5 = vector.load %arg3[%c0_3, %c0_4] : memref<1x128xf32, #tpu.memory_space<vmem>>, vector<1x128xf32>
    %6 = vector.broadcast %5 : vector<1x128xf32> to vector<40x128xf32>
    %7 = arith.addf %4, %6 : vector<40x128xf32>
    %c0_5 = arith.constant 0 : index
    %c0_6 = arith.constant 0 : index
    %8 = vector.load %arg4[%c0_5, %c0_6] : memref<40x128xf32, #tpu.memory_space<vmem>>, vector<40x128xf32>
    %9 = arith.addf %7, %8 : vector<40x128xf32>
    %c0_7 = arith.constant 0 : index
    %c0_8 = arith.constant 0 : index
    %10 = vector.load %arg5[%c0_7, %c0_8] : memref<40x128xf32, #tpu.memory_space<vmem>>, vector<40x128xf32>
    tpu.vector_store %arg5[%c0_7, %c0_8], %9 {strides = array<i32>} : memref<40x128xf32, #tpu.memory_space<vmem>>, vector<40x128xf32>,
    return
  }
  func.func @transform_0(%arg0: i32) -> (i32, i32) {
    %c0_i32 = arith.constant 0 : i32
    %c0_i32_0 = arith.constant 0 : i32
    return %arg0, %c0_i32 : i32, i32
  }
  func.func @transform_1(%arg0: i32) -> (i32, i32) {
    %c0_i32 = arith.constant 0 : i32
    %c0_i32_0 = arith.constant 0 : i32
    %c0_i32_1 = arith.constant 0 : i32
    return %c0_i32, %c0_i32_0 : i32, i32
  }
  func.func @transform_2(%arg0: i32) -> (i32, i32) {
    %c0_i32 = arith.constant 0 : i32
    %c0_i32_0 = arith.constant 0 : i32
    %c0_i32_1 = arith.constant 0 : i32
    return %c0_i32, %c0_i32_0 : i32, i32
  }
  func.func @transform_3(%arg0: i32) -> (i32, i32) {
    %c0_i32 = arith.constant 0 : i32
    %c0_i32_0 = arith.constant 0 : i32
    return %arg0, %c0_i32 : i32, i32
  }
  func.func @transform_4(%arg0: i32) -> (i32, i32) {
    %c0_i32 = arith.constant 0 : i32
    %c0_i32_0 = arith.constant 0 : i32
    return %arg0, %c0_i32 : i32, i32
  }
}

module attributes {stable_mosaic.version = 11 : i64} {
  func.func @kernel(%arg0: i32, %arg1: memref<40x128xf32, #tpu.memory_space<vmem>>, %arg2: memref<128x256xf32, #tpu.memory_space<vmem>>, %arg3: memref<1x256xf32, #tpu.memory_space<vmem>>, %arg4: memref<1x128xf32, #tpu.memory_space<vmem>>, %arg5: memref<1x128xf32, #tpu.memory_space<vmem>>, %arg6: memref<40x256xf32, #tpu.memory_space<vmem>>) attributes {dimension_semantics = [#tpu.dimension_semantics<parallel>], iteration_bounds = array<i64: 1>, scalar_prefetch = 0 : i64, scratch_operands = 0 : i64, tpu.core_type = #tpu.core_type<tc>, window_params = [{transform_indices = @transform_0, window_bounds = array<i64: 40, 128>}, {pipeline_mode = #tpu.pipeline_mode<synchronous>, transform_indices = @transform_1, window_bounds = array<i64: 128, 256>}, {pipeline_mode = #tpu.pipeline_mode<synchronous>, transform_indices = @transform_2, window_bounds = array<i64: 1, 256>}, {pipeline_mode = #tpu.pipeline_mode<synchronous>, transform_indices = @transform_3, window_bounds = array<i64: 1, 128>}, {pipeline_mode = #tpu.pipeline_mode<synchronous>, transform_indices = @transform_4, window_bounds = array<i64: 1, 128>}, {transform_indices = @transform_5, window_bounds = array<i64: 40, 256>}]} {
    %c0 = arith.constant 0 : index
    %c0_0 = arith.constant 0 : index
    %0 = vector.load %arg1[%c0, %c0_0] : memref<40x128xf32, #tpu.memory_space<vmem>>, vector<40x128xf32>
    %c0_1 = arith.constant 0 : index
    %c0_2 = arith.constant 0 : index
    %1 = vector.load %arg4[%c0_1, %c0_2] : memref<1x128xf32, #tpu.memory_space<vmem>>, vector<1x128xf32>
    %c0_3 = arith.constant 0 : index
    %c0_4 = arith.constant 0 : index
    %2 = vector.load %arg5[%c0_3, %c0_4] : memref<1x128xf32, #tpu.memory_space<vmem>>, vector<1x128xf32>
    %cst = arith.constant dense<0.000000e+00> : vector<40xf32>
    %3 = vector.multi_reduction <add>, %0, %cst [1] : vector<40x128xf32> to vector<40xf32>
    %4 = vector.shape_cast %3 : vector<40xf32> to vector<40x1xf32>
    %cst_5 = arith.constant 1.280000e+02 : f32
    %5 = vector.broadcast %cst_5 : f32 to vector<40x1xf32>
    %6 = arith.divf %4, %5 : vector<40x1xf32>
    %7 = vector.broadcast %6 : vector<40x1xf32> to vector<40x128xf32>
    %8 = arith.subf %0, %7 : vector<40x128xf32>
    %9 = arith.mulf %8, %8 : vector<40x128xf32>
    %cst_6 = arith.constant dense<0.000000e+00> : vector<40xf32>
    %10 = vector.multi_reduction <add>, %9, %cst_6 [1] : vector<40x128xf32> to vector<40xf32>
    %11 = vector.shape_cast %10 : vector<40xf32> to vector<40x1xf32>
    %cst_7 = arith.constant 1.280000e+02 : f32
    %12 = vector.broadcast %cst_7 : f32 to vector<40x1xf32>
    %13 = arith.divf %11, %12 : vector<40x1xf32>
    %14 = vector.broadcast %6 : vector<40x1xf32> to vector<40x128xf32>
    %15 = arith.subf %0, %14 : vector<40x128xf32>
    %cst_8 = arith.constant 9.99999974E-6 : f32
    %16 = vector.broadcast %cst_8 : f32 to vector<40x1xf32>
    %17 = arith.addf %13, %16 : vector<40x1xf32>
    %18 = math.rsqrt %17 : vector<40x1xf32>
    %19 = vector.broadcast %18 : vector<40x1xf32> to vector<40x128xf32>
    %20 = arith.mulf %15, %19 : vector<40x128xf32>
    %21 = vector.broadcast %1 : vector<1x128xf32> to vector<40x128xf32>
    %22 = arith.mulf %20, %21 : vector<40x128xf32>
    %23 = vector.broadcast %2 : vector<1x128xf32> to vector<40x128xf32>
    %24 = arith.addf %22, %23 : vector<40x128xf32>
    %25 = arith.truncf %24 : vector<40x128xf32> to vector<40x128xbf16>
    %c0_9 = arith.constant 0 : index
    %c0_10 = arith.constant 0 : index
    %26 = vector.load %arg2[%c0_9, %c0_10] : memref<128x256xf32, #tpu.memory_space<vmem>>, vector<128x256xf32>
    %27 = arith.truncf %26 : vector<128x256xf32> to vector<128x256xbf16>
    %cst_11 = arith.constant dense<0.000000e+00> : vector<40x256xf32>
    %28 = tpu.matmul %25, %27, %cst_11 {dimension_numbers = #tpu.dot_dimension_numbers<[1], [0], [0], [1], [0, 0, 1, 1], [], []>} : vector<40x128xbf16>, vector<128x256xbf16>, vector<40x256xf32> -> vector<40x256xf32>
    %c0_12 = arith.constant 0 : index
    %c0_13 = arith.constant 0 : index
    %29 = vector.load %arg3[%c0_12, %c0_13] : memref<1x256xf32, #tpu.memory_space<vmem>>, vector<1x256xf32>
    %30 = vector.broadcast %29 : vector<1x256xf32> to vector<40x256xf32>
    %31 = arith.addf %28, %30 : vector<40x256xf32>
    %cst_14 = arith.constant 5.000000e-01 : f32
    %32 = vector.broadcast %cst_14 : f32 to vector<40x256xf32>
    %33 = arith.mulf %32, %31 : vector<40x256xf32>
    %cst_15 = arith.constant 0.707106769 : f32
    %34 = vector.broadcast %cst_15 : f32 to vector<40x256xf32>
    %35 = arith.mulf %31, %34 : vector<40x256xf32>
    %36 = math.erf %35 : vector<40x256xf32>
    %cst_16 = arith.constant 1.000000e+00 : f32
    %37 = vector.broadcast %cst_16 : f32 to vector<40x256xf32>
    %38 = arith.addf %37, %36 : vector<40x256xf32>
    %39 = arith.mulf %33, %38 : vector<40x256xf32>
    %c0_17 = arith.constant 0 : index
    %c0_18 = arith.constant 0 : index
    %40 = vector.load %arg6[%c0_17, %c0_18] : memref<40x256xf32, #tpu.memory_space<vmem>>, vector<40x256xf32>
    tpu.vector_store %arg6[%c0_17, %c0_18], %39 {strides = array<i32>} : memref<40x256xf32, #tpu.memory_space<vmem>>, vector<40x256xf32>,
    return
  }
  func.func @transform_0(%arg0: i32) -> (i32, i32) {
    %c0_i32 = arith.constant 0 : i32
    %c0_i32_0 = arith.constant 0 : i32
    return %arg0, %c0_i32 : i32, i32
  }
  func.func @transform_1(%arg0: i32) -> (i32, i32) {
    %c0_i32 = arith.constant 0 : i32
    %c0_i32_0 = arith.constant 0 : i32
    %c0_i32_1 = arith.constant 0 : i32
    return %c0_i32, %c0_i32_0 : i32, i32
  }
  func.func @transform_2(%arg0: i32) -> (i32, i32) {
    %c0_i32 = arith.constant 0 : i32
    %c0_i32_0 = arith.constant 0 : i32
    %c0_i32_1 = arith.constant 0 : i32
    return %c0_i32, %c0_i32_0 : i32, i32
  }
  func.func @transform_3(%arg0: i32) -> (i32, i32) {
    %c0_i32 = arith.constant 0 : i32
    %c0_i32_0 = arith.constant 0 : i32
    %c0_i32_1 = arith.constant 0 : i32
    return %c0_i32, %c0_i32_0 : i32, i32
  }
  func.func @transform_4(%arg0: i32) -> (i32, i32) {
    %c0_i32 = arith.constant 0 : i32
    %c0_i32_0 = arith.constant 0 : i32
    %c0_i32_1 = arith.constant 0 : i32
    return %c0_i32, %c0_i32_0 : i32, i32
  }
  func.func @transform_5(%arg0: i32) -> (i32, i32) {
    %c0_i32 = arith.constant 0 : i32
    %c0_i32_0 = arith.constant 0 : i32
    return %arg0, %c0_i32 : i32, i32
  }
}

module attributes {stable_mosaic.version = 11 : i64} {
  func.func @kernel(%arg0: i32, %arg1: memref<40x256xf32, #tpu.memory_space<vmem>>, %arg2: memref<256x128xf32, #tpu.memory_space<vmem>>, %arg3: memref<1x128xf32, #tpu.memory_space<vmem>>, %arg4: memref<40x128xf32, #tpu.memory_space<vmem>>, %arg5: memref<40x128xf32, #tpu.memory_space<vmem>>) attributes {dimension_semantics = [#tpu.dimension_semantics<parallel>], iteration_bounds = array<i64: 1>, scalar_prefetch = 0 : i64, scratch_operands = 0 : i64, tpu.core_type = #tpu.core_type<tc>, window_params = [{transform_indices = @transform_0, window_bounds = array<i64: 40, 256>}, {pipeline_mode = #tpu.pipeline_mode<synchronous>, transform_indices = @transform_1, window_bounds = array<i64: 256, 128>}, {pipeline_mode = #tpu.pipeline_mode<synchronous>, transform_indices = @transform_2, window_bounds = array<i64: 1, 128>}, {transform_indices = @transform_3, window_bounds = array<i64: 40, 128>}, {transform_indices = @transform_4, window_bounds = array<i64: 40, 128>}]} {
    %c0 = arith.constant 0 : index
    %c0_0 = arith.constant 0 : index
    %0 = vector.load %arg1[%c0, %c0_0] : memref<40x256xf32, #tpu.memory_space<vmem>>, vector<40x256xf32>
    %1 = arith.truncf %0 : vector<40x256xf32> to vector<40x256xbf16>
    %c0_1 = arith.constant 0 : index
    %c0_2 = arith.constant 0 : index
    %2 = vector.load %arg2[%c0_1, %c0_2] : memref<256x128xf32, #tpu.memory_space<vmem>>, vector<256x128xf32>
    %3 = arith.truncf %2 : vector<256x128xf32> to vector<256x128xbf16>
    %cst = arith.constant dense<0.000000e+00> : vector<40x128xf32>
    %4 = tpu.matmul %1, %3, %cst {dimension_numbers = #tpu.dot_dimension_numbers<[1], [0], [0], [1], [0, 0, 1, 1], [], []>} : vector<40x256xbf16>, vector<256x128xbf16>, vector<40x128xf32> -> vector<40x128xf32>
    %c0_3 = arith.constant 0 : index
    %c0_4 = arith.constant 0 : index
    %5 = vector.load %arg3[%c0_3, %c0_4] : memref<1x128xf32, #tpu.memory_space<vmem>>, vector<1x128xf32>
    %6 = vector.broadcast %5 : vector<1x128xf32> to vector<40x128xf32>
    %7 = arith.addf %4, %6 : vector<40x128xf32>
    %c0_5 = arith.constant 0 : index
    %c0_6 = arith.constant 0 : index
    %8 = vector.load %arg4[%c0_5, %c0_6] : memref<40x128xf32, #tpu.memory_space<vmem>>, vector<40x128xf32>
    %9 = arith.addf %7, %8 : vector<40x128xf32>
    %c0_7 = arith.constant 0 : index
    %c0_8 = arith.constant 0 : index
    %10 = vector.load %arg5[%c0_7, %c0_8] : memref<40x128xf32, #tpu.memory_space<vmem>>, vector<40x128xf32>
    tpu.vector_store %arg5[%c0_7, %c0_8], %9 {strides = array<i32>} : memref<40x128xf32, #tpu.memory_space<vmem>>, vector<40x128xf32>,
    return
  }
  func.func @transform_0(%arg0: i32) -> (i32, i32) {
    %c0_i32 = arith.constant 0 : i32
    %c0_i32_0 = arith.constant 0 : i32
    return %arg0, %c0_i32 : i32, i32
  }
  func.func @transform_1(%arg0: i32) -> (i32, i32) {
    %c0_i32 = arith.constant 0 : i32
    %c0_i32_0 = arith.constant 0 : i32
    %c0_i32_1 = arith.constant 0 : i32
    return %c0_i32, %c0_i32_0 : i32, i32
  }
  func.func @transform_2(%arg0: i32) -> (i32, i32) {
    %c0_i32 = arith.constant 0 : i32
    %c0_i32_0 = arith.constant 0 : i32
    %c0_i32_1 = arith.constant 0 : i32
    return %c0_i32, %c0_i32_0 : i32, i32
  }
  func.func @transform_3(%arg0: i32) -> (i32, i32) {
    %c0_i32 = arith.constant 0 : i32
    %c0_i32_0 = arith.constant 0 : i32
    return %arg0, %c0_i32 : i32, i32
  }
  func.func @transform_4(%arg0: i32) -> (i32, i32) {
    %c0_i32 = arith.constant 0 : i32
    %c0_i32_0 = arith.constant 0 : i32
    return %arg0, %c0_i32 : i32, i32
  }
}

module attributes {stable_mosaic.version = 11 : i64} {
  func.func @_layernorm_kernel(%arg0: i32, %arg1: memref<40x128xf32, #tpu.memory_space<vmem>>, %arg2: memref<1x128xf32, #tpu.memory_space<vmem>>, %arg3: memref<1x128xf32, #tpu.memory_space<vmem>>, %arg4: memref<40x128xf32, #tpu.memory_space<vmem>>) attributes {dimension_semantics = [#tpu.dimension_semantics<parallel>], iteration_bounds = array<i64: 1>, scalar_prefetch = 0 : i64, scratch_operands = 0 : i64, tpu.core_type = #tpu.core_type<tc>, window_params = [{transform_indices = @transform_0, window_bounds = array<i64: 40, 128>}, {pipeline_mode = #tpu.pipeline_mode<synchronous>, transform_indices = @transform_1, window_bounds = array<i64: 1, 128>}, {pipeline_mode = #tpu.pipeline_mode<synchronous>, transform_indices = @transform_2, window_bounds = array<i64: 1, 128>}, {transform_indices = @transform_3, window_bounds = array<i64: 40, 128>}]} {
    %c0 = arith.constant 0 : index
    %c0_0 = arith.constant 0 : index
    %0 = vector.load %arg1[%c0, %c0_0] : memref<40x128xf32, #tpu.memory_space<vmem>>, vector<40x128xf32>
    %c0_1 = arith.constant 0 : index
    %c0_2 = arith.constant 0 : index
    %1 = vector.load %arg2[%c0_1, %c0_2] : memref<1x128xf32, #tpu.memory_space<vmem>>, vector<1x128xf32>
    %c0_3 = arith.constant 0 : index
    %c0_4 = arith.constant 0 : index
    %2 = vector.load %arg3[%c0_3, %c0_4] : memref<1x128xf32, #tpu.memory_space<vmem>>, vector<1x128xf32>
    %cst = arith.constant dense<0.000000e+00> : vector<40xf32>
    %3 = vector.multi_reduction <add>, %0, %cst [1] : vector<40x128xf32> to vector<40xf32>
    %4 = vector.shape_cast %3 : vector<40xf32> to vector<40x1xf32>
    %cst_5 = arith.constant 1.280000e+02 : f32
    %5 = vector.broadcast %cst_5 : f32 to vector<40x1xf32>
    %6 = arith.divf %4, %5 : vector<40x1xf32>
    %7 = vector.broadcast %6 : vector<40x1xf32> to vector<40x128xf32>
    %8 = arith.subf %0, %7 : vector<40x128xf32>
    %9 = arith.mulf %8, %8 : vector<40x128xf32>
    %cst_6 = arith.constant dense<0.000000e+00> : vector<40xf32>
    %10 = vector.multi_reduction <add>, %9, %cst_6 [1] : vector<40x128xf32> to vector<40xf32>
    %11 = vector.shape_cast %10 : vector<40xf32> to vector<40x1xf32>
    %cst_7 = arith.constant 1.280000e+02 : f32
    %12 = vector.broadcast %cst_7 : f32 to vector<40x1xf32>
    %13 = arith.divf %11, %12 : vector<40x1xf32>
    %14 = vector.broadcast %6 : vector<40x1xf32> to vector<40x128xf32>
    %15 = arith.subf %0, %14 : vector<40x128xf32>
    %cst_8 = arith.constant 9.99999974E-6 : f32
    %16 = vector.broadcast %cst_8 : f32 to vector<40x1xf32>
    %17 = arith.addf %13, %16 : vector<40x1xf32>
    %18 = math.rsqrt %17 : vector<40x1xf32>
    %19 = vector.broadcast %18 : vector<40x1xf32> to vector<40x128xf32>
    %20 = arith.mulf %15, %19 : vector<40x128xf32>
    %21 = vector.broadcast %1 : vector<1x128xf32> to vector<40x128xf32>
    %22 = arith.mulf %20, %21 : vector<40x128xf32>
    %23 = vector.broadcast %2 : vector<1x128xf32> to vector<40x128xf32>
    %24 = arith.addf %22, %23 : vector<40x128xf32>
    %c0_9 = arith.constant 0 : index
    %c0_10 = arith.constant 0 : index
    %25 = vector.load %arg4[%c0_9, %c0_10] : memref<40x128xf32, #tpu.memory_space<vmem>>, vector<40x128xf32>
    tpu.vector_store %arg4[%c0_9, %c0_10], %24 {strides = array<i32>} : memref<40x128xf32, #tpu.memory_space<vmem>>, vector<40x128xf32>,
    return
  }
  func.func @transform_0(%arg0: i32) -> (i32, i32) {
    %c0_i32 = arith.constant 0 : i32
    %c0_i32_0 = arith.constant 0 : i32
    return %arg0, %c0_i32 : i32, i32
  }
  func.func @transform_1(%arg0: i32) -> (i32, i32) {
    %c0_i32 = arith.constant 0 : i32
    %c0_i32_0 = arith.constant 0 : i32
    %c0_i32_1 = arith.constant 0 : i32
    return %c0_i32, %c0_i32_0 : i32, i32
  }
  func.func @transform_2(%arg0: i32) -> (i32, i32) {
    %c0_i32 = arith.constant 0 : i32
    %c0_i32_0 = arith.constant 0 : i32
    %c0_i32_1 = arith.constant 0 : i32
    return %c0_i32, %c0_i32_0 : i32, i32
  }
  func.func @transform_3(%arg0: i32) -> (i32, i32) {
    %c0_i32 = arith.constant 0 : i32
    %c0_i32_0 = arith.constant 0 : i32
    return %arg0, %c0_i32 : i32, i32
  }
}

</mosaic_0001>

<bundles_post_ra>
// kernel: _lambda_.16
= control target key start
LH: loop header
LB: loop body
LE: loop exit
PB: predicated region body
PF: predicated region fallthrough
CT: control target
= control target key end

     0   :  { %vm89_vm0 = vcmask 1044480   ;;  %vm58_vm1 = vcmask 80896   ;;  %vm154_vm2 = vcmask 261120   ;;  %s3080_s1 = inlined_call_operand.vmem [shape: f32[10,32], index: 1, kind: input, shape index: {}]   ;;  %s3081_s0 = inlined_call_operand.vmem [shape: f32[158,10], index: 0, kind: input, shape index: {}]   ;;  %s3082_s2 = inlined_call_operand.vmem [shape: f32[1,32], index: 2, kind: input, shape index: {}]   ;;  %s3083_s3 = inlined_call_operand.vmem [shape: f32[1,32], index: 3, kind: input, shape index: {}]   ;;  %s3084_s4 = inlined_call_operand.vmem [shape: f32[1,32], index: 4, kind: input, shape index: {}]   ;;  %s3085_s5 = inlined_call_operand.vmem [shape: f32[158,32], index: 5, kind: output, shape index: {}]  }
   0x1   :  { %v51_v0 = vld [vmem:[%s3080_s1] sm:$0xff]  ;;  %v52_v1 = vld [vmem:[%s3080_s1 + $0x8] sm:$0x3]  ;;  %v27_v5 = vld [vmem:[%s3081_s0 + $0x30] sm:$0xff] }
   0x2   :  { %v21_v2 = vld [vmem:[%s3081_s0] sm:$0xff]  ;;  %v53_v3 = vpack.c.bf16 %v52_v1, %v51_v0  ;;  %v22_v4 = vld [vmem:[%s3081_s0 + $0x8] sm:$0xff]  ;;  %v28_v6 = vld [vmem:[%s3081_s0 + $0x38] sm:$0xff] }
   0x3   :  { %v35_v7 = vld [vmem:[%s3081_s0 + $0x70] sm:$0xff]  ;;  %v36_v8 = vld [vmem:[%s3081_s0 + $0x78] sm:$0xff]  ;;  %v33_v9 = vld [vmem:[%s3081_s0 + $0x60] sm:$0xff]  ;;  %v41_v11 = vpack.c.bf16 %v22_v4, %v21_v2  ;;  %v44_v12 = vpack.c.bf16 %v28_v6, %v27_v5 }
   0x4   :  { %v91_v10 = vsel %vm89_vm0, %v53_v3, 0  ;;  %v34_v13 = vld [vmem:[%s3081_s0 + $0x68] sm:$0xff]  ;;  %v48_v14 = vpack.c.bf16 %v36_v8, %v35_v7  ;;  %v29_v16 = vld [vmem:[%s3081_s0 + $0x40] sm:$0xff]  ;;  %v23_v18 = vld [vmem:[%s3081_s0 + $0x10] sm:$0xff] }
   0x5   :  { %100 = vmatpush.bf16.msra.mxu0 %v91_v10  ;;  %1582 = vmatpush.bf16.msra.mxu1 %v91_v10  ;;  %v47_v15 = vpack.c.bf16 %v34_v13, %v33_v9  ;;  %v30_v17 = vld [vmem:[%s3081_s0 + $0x48] sm:$0xff]  ;;  %v24_v19 = vld [vmem:[%s3081_s0 + $0x18] sm:$0xff]  ;;  %v37_v20 = vld [vmem:[%s3081_s0 + $0x80] sm:$0xff] }
   0x6   :  { %1584 = vmatpush.bf16.msra.mxu3 %v91_v10  ;;  %1583 = vmatpush.bf16.msra.mxu2 %v91_v10  ;;  %v38_v21 = vld [vmem:[%s3081_s0 + $0x88] sm:$0xff]  ;;  %v45_v22 = vpack.c.bf16 %v30_v17, %v29_v16  ;;  %v42_v23 = vpack.c.bf16 %v24_v19, %v23_v18  ;;  %v25_v25 = vld [vmem:[%s3081_s0 + $0x20] sm:$0xff]  ;;  %v31_v27 = vld [vmem:[%s3081_s0 + $0x50] sm:$0xff] }
   0x7   :  { %v49_v24 = vpack.c.bf16 %v38_v21, %v37_v20  ;;  %v26_v26 = vld [vmem:[%s3081_s0 + $0x28] sm:$0xff]  ;;  %v32_v28 = vld [vmem:[%s3081_s0 + $0x58] sm:$0xff]  ;;  %v39_v29 = vld [vmem:[%s3081_s0 + $0x90] sm:$0xff] }
   0x8   :  { %1552 = vmatmul.msk.bf16.vlgmr.msra.gmra.mxu0 %vm58_vm1, %v41_v11  ;;  %1555 = vmatmul.msk.bf16.vlgmr.msra.gmra.mxu1 %vm58_vm1, %v44_v12  ;;  %v40_v30 = vld [vmem:[%s3081_s0 + $0x98] sm:$0xff]  ;;  %v43_v31 = vpack.c.bf16 %v26_v26, %v25_v25  ;;  %v46_v32 = vpack.c.bf16 %v32_v28, %v31_v27  ;;  %v1785_v34 = vld [vmem:[%s3082_s2] ss:$0 sm:$0xff] }
   0x9   :  { %1559 = vmatmul.msk.bf16.vlgmr.msra.gmra.mxu3 %vm58_vm1, %v48_v14  ;;  %1558 = vmatmul.msk.bf16.vlgmr.msra.gmra.mxu2 %vm58_vm1, %v47_v15  ;;  %v50_v33 = vpack.c.bf16 %v40_v30, %v39_v29 }
  0x18   :  { %1556 = vmatmul.msk.bf16.gmra.mxu1 %vm58_vm1, %v45_v22  ;;  %1553 = vmatmul.msk.bf16.gmra.mxu0 %vm58_vm1, %v42_v23 }
  0x19   :  { %1560 = vmatmul.msk.bf16.gmra.mxu3 %vm58_vm1, %v49_v24 }
  0x28   :  { %1554 = vmatmul.msk.bf16.gmra.mxu0 %vm58_vm1, %v43_v31  ;;  %1557 = vmatmul.msk.bf16.gmra.mxu1 %vm58_vm1, %v46_v32  ;;  %v1675_v31 = vmov 32.0  }
  0x29   :  { %1561 = vmatmul.msk.bf16.gmra.mxu3 %vm58_vm1, %v50_v33  ;;  %1589 = vrcp.f32 %v1675_v31 }
  0x2f   :  { %v1590_v32 = vpop.eup %1589 }
  0x30   :  { %v216_v33 = vmul.f32 32.0, %v1590_v32  ;;  %vm220_vm3 = vweird.f32 %v1590_v32 }
  0x85   :  { %v102_v35 = vpop.f32.mrf.mxu0  ;;  %v117_v36 = vpop.f32.mrf.mxu1 }
  0x86   :  { %v1788_v37 = vadd.f32 %v1785_v34, %v102_v35  ;;  %v1793_v39 = vadd.f32 %v1785_v34, %v117_v36  ;;  %v217_v35 = vsub.f32 1.0, %v216_v33 }
  0x88   :  { %v155_v38 = vsel %vm154_vm2, %v1788_v37, 0.0  ;;  %v173_v46 = vsel %vm154_vm2, %v1793_v39, 0.0  ;;  %v218_v36 = vmul.f32 %v1590_v32, %v217_v35 }
  0x89   :  { %156 = vadd.xlane.f32.xlu0 %v155_v38 }
  0x8a   :  { %v219_v38 = vadd.f32 %v1590_v32, %v218_v36 }
  0x8c   :  { %v137_v40 = vpop.f32.mrf.mxu3  ;;  %v132_v41 = vpop.f32.mrf.mxu2 }
  0x8d   :  { %v1796_v42 = vadd.f32 %v1785_v34, %v137_v40  ;;  %v104_v43 = vpop.f32.mrf.mxu0  ;;  %v119_v44 = vpop.f32.mrf.mxu1  ;;  %v1808_v49 = vadd.f32 %v1785_v34, %v132_v41  ;;  %v1887_v40 = vsel %vm220_vm3, %v1590_v32, %v219_v38 }
  0x8e   :  { %v1799_v45 = vadd.f32 %v1785_v34, %v119_v44  ;;  %v1826_v61 = vadd.f32 %v1785_v34, %v104_v43 }
  0x8f   :  { %v197_v47 = vsel %vm154_vm2, %v1796_v42, 0.0  ;;  %v191_v57 = vsel %vm154_vm2, %v1808_v49, 0.0 }
  0x90   :  { %198 = vadd.xlane.f32.xlu2 %v197_v47  ;;  %v176_v48 = vsel %vm154_vm2, %v1799_v45, 0.0  ;;  %v158_v0 = vsel %vm154_vm2, %v1826_v61, 0.0 }
  0x91   :  { %177 = vadd.xlane.f32.xlu1 %v176_v48  ;;  %174 = vadd.xlane.f32.xlu0 %v173_v46 }
  0x94   :  { %v139_v50 = vpop.f32.mrf.mxu3  ;;  %v134_v51 = vpop.f32.mrf.mxu2 }
  0x95   :  { %v122_v52 = vpop.f32.mrf.mxu1  ;;  %v1811_v53 = vadd.f32 %v1785_v34, %v134_v51  ;;  %v107_v54 = vpop.f32.mrf.mxu0  ;;  %v1836_v4 = vadd.f32 %v1785_v34, %v139_v50 }
  0x96   :  { %v1814_v55 = vadd.f32 %v1785_v34, %v122_v52  ;;  %v1823_v59 = vadd.f32 %v1785_v34, %v107_v54 }
  0x97   :  { %v194_v56 = vsel %vm154_vm2, %v1811_v53, 0.0  ;;  %v200_v9 = vsel %vm154_vm2, %v1836_v4, 0.0 }
  0x98   :  { %v179_v58 = vsel %vm154_vm2, %v1814_v55, 0.0  ;;  %v161_v63 = vsel %vm154_vm2, %v1823_v59, 0.0 }
  0x99   :  { %180 = vadd.xlane.f32.xlu2 %v179_v58  ;;  %195 = vadd.xlane.f32.xlu1 %v194_v56 }
  0x9a   :  { %192 = vadd.xlane.f32.xlu0 %v191_v57 }
  0x9c   :  { %v142_v60 = vpop.f32.mrf.mxu3 }
  0x9d   :  { %v109_v62 = vpop.f32.mrf.mxu0  ;;  %v1833_v1 = vadd.f32 %v1785_v34, %v142_v60  ;;  %v124_v3 = vpop.f32.mrf.mxu1 }
  0x9e   :  { %v1851_v11 = vadd.f32 %v1785_v34, %v109_v62  ;;  %v1854_v13 = vadd.f32 %v1785_v34, %v124_v3 }
  0x9f   :  { %v203_v7 = vsel %vm154_vm2, %v1833_v1, 0.0 }
  0xa0   :  { %v164_v17 = vsel %vm154_vm2, %v1851_v11, 0.0  ;;  %v182_v18 = vsel %vm154_vm2, %v1854_v13, 0.0 }
  0xa1   :  { %162 = vadd.xlane.f32.xlu1 %v161_v63 }
  0xa2   :  { %159 = vadd.xlane.f32.xlu0 %v158_v0 }
  0xa4   :  { %v144_v2 = vpop.f32.mrf.mxu3 }
  0xa5   :  { %v1839_v5 = vadd.f32 %v1785_v34, %v144_v2  ;;  %v112_v6 = vpop.f32.mrf.mxu0  ;;  %v127_v12 = vpop.f32.mrf.mxu1 }
  0xa6   :  { %v1848_v10 = vadd.f32 %v1785_v34, %v112_v6  ;;  %v1866_v20 = vadd.f32 %v1785_v34, %v127_v12 }
  0xa7   :  { %v206_v8 = vsel %vm154_vm2, %v1839_v5, 0.0 }
  0xa8   :  { %207 = vadd.xlane.f32.xlu2 %v206_v8  ;;  %v167_v14 = vsel %vm154_vm2, %v1848_v10, 0.0  ;;  %v185_v23 = vsel %vm154_vm2, %v1866_v20, 0.0 }
  0xa9   :  { %204 = vadd.xlane.f32.xlu1 %v203_v7 }
  0xaa   :  { %201 = vadd.xlane.f32.xlu0 %v200_v9 }
  0xac   :  { %v147_v15 = vpop.f32.mrf.mxu3 }
  0xad   :  { %v114_v16 = vpop.f32.mrf.mxu0  ;;  %v1869_v21 = vadd.f32 %v1785_v34, %v147_v15  ;;  %v129_v24 = vpop.f32.mrf.mxu1 }
  0xae   :  { %v1863_v19 = vadd.f32 %v1785_v34, %v114_v16  ;;  %v1878_v27 = vadd.f32 %v1785_v34, %v129_v24 }
  0xaf   :  { %v209_v25 = vsel %vm154_vm2, %v1869_v21, 0.0 }
  0xb0   :  { %168 = vadd.xlane.f32.xlu2 %v167_v14  ;;  %v170_v22 = vsel %vm154_vm2, %v1863_v19, 0.0  ;;  %v188_v29 = vsel %vm154_vm2, %v1878_v27, 0.0 }
  0xb1   :  { %165 = vadd.xlane.f32.xlu1 %v164_v17 }
  0xb2   :  { %183 = vadd.xlane.f32.xlu0 %v182_v18 }
  0xb4   :  { %v149_v26 = vpop.f32.mrf.mxu3 }
  0xb5   :  { %v1881_v28 = vadd.f32 %v1785_v34, %v149_v26 }
  0xb7   :  { %v212_v30 = vsel %vm154_vm2, %v1881_v28, 0.0 }
  0xb8   :  { %171 = vadd.xlane.f32.xlu2 %v170_v22 }
  0xb9   :  { %186 = vadd.xlane.f32.xlu1 %v185_v23 }
  0xba   :  { %210 = vadd.xlane.f32.xlu0 %v209_v25 }
  0xc0   :  { %189 = vadd.xlane.f32.xlu2 %v188_v29 }
  0xc1   :  { %213 = vadd.xlane.f32.xlu1 %v212_v30 }
  0xfc   :  { %v157_v34 = vpop.xlane.xlu0 %156 }
  0xfd   :  { %v222_v41 = vmul.f32 %v1887_v40, %v157_v34 }
  0xff   :  { %v1891_v43 = vsub.f32 %v1788_v37, %v222_v41 }
 0x101   :  { %v262_v44 = vmul.f32 %v1891_v43, %v1891_v43 }
 0x103   :  { %v199_v46 = vpop.xlane.xlu2 %198  ;;  %v282_v47 = vsel %vm154_vm2, %v262_v44, 0.0 }
 0x104   :  { %v236_v48 = vmul.f32 %v1887_v40, %v199_v46  ;;  %v178_v50 = vpop.xlane.xlu1 %177  ;;  %283 = vadd.xlane.f32.xlu2 %v282_v47  ;;  %v175_v51 = vpop.xlane.xlu0 %174 }
 0x105   :  { %v228_v52 = vmul.f32 %v1887_v40, %v175_v51 }
 0x106   :  { %v1899_v54 = vsub.f32 %v1796_v42, %v236_v48 }
 0x107   :  { %v1902_v56 = vsub.f32 %v1793_v39, %v228_v52 }
 0x108   :  { %v276_v37 = vmul.f32 %v1899_v54, %v1899_v54 }
 0x109   :  { %v268_v57 = vmul.f32 %v1902_v56, %v1902_v56 }
 0x10a   :  { %v324_v58 = vsel %vm154_vm2, %v276_v37, 0.0 }
 0x10b   :  { %325 = vadd.xlane.f32.xlu1 %v324_v58  ;;  %v300_v60 = vsel %vm154_vm2, %v268_v57, 0.0 }
 0x10c   :  { %v196_v62 = vpop.xlane.xlu1 %195  ;;  %301 = vadd.xlane.f32.xlu2 %v300_v60  ;;  %v181_v2 = vpop.xlane.xlu2 %180 }
 0x10d   :  { %v193_v63 = vpop.xlane.xlu0 %192  ;;  %v230_v12 = vmul.f32 %v1887_v40, %v181_v2 }
 0x10e   :  { %v234_v42 = vmul.f32 %v1887_v40, %v193_v63 }
 0x10f   :  { %v1932_v18 = vsub.f32 %v1814_v55, %v230_v12  ;;  %v235_v55 = vmul.f32 %v1887_v40, %v196_v62 }
 0x110   :  { %v1912_v0 = vsub.f32 %v1808_v49, %v234_v42  ;;  %v229_v49 = vmul.f32 %v1887_v40, %v178_v50 }
 0x111   :  { %v270_v29 = vmul.f32 %v1932_v18, %v1932_v18  ;;  %v1952_v35 = vsub.f32 %v1811_v53, %v235_v55 }
 0x112   :  { %v274_v39 = vmul.f32 %v1912_v0, %v1912_v0 }
 0x113   :  { %v306_v33 = vsel %vm154_vm2, %v270_v29, 0.0  ;;  %v275_v53 = vmul.f32 %v1952_v35, %v1952_v35 }
 0x114   :  { %v163_v3 = vpop.xlane.xlu1 %162  ;;  %v318_v6 = vsel %vm154_vm2, %v274_v39, 0.0 }
 0x115   :  { %v224_v7 = vmul.f32 %v1887_v40, %v163_v3  ;;  %319 = vadd.xlane.f32.xlu2 %v318_v6  ;;  %v160_v8 = vpop.xlane.xlu0 %159  ;;  %v321_v57 = vsel %vm154_vm2, %v275_v53, 0.0 }
 0x116   :  { %v223_v9 = vmul.f32 %v1887_v40, %v160_v8 }
 0x117   :  { %v1921_v14 = vsub.f32 %v1823_v59, %v224_v7  ;;  %v1936_v59 = vsub.f32 %v1799_v45, %v229_v49 }
 0x118   :  { %v1925_v15 = vsub.f32 %v1826_v61, %v223_v9 }
 0x119   :  { %v264_v16 = vmul.f32 %v1921_v14, %v1921_v14  ;;  %v269_v45 = vmul.f32 %v1936_v59, %v1936_v59 }
 0x11a   :  { %v263_v17 = vmul.f32 %v1925_v15, %v1925_v15 }
 0x11b   :  { %v208_v22 = vpop.xlane.xlu2 %207  ;;  %v288_v23 = vsel %vm154_vm2, %v264_v16, 0.0  ;;  %v303_v38 = vsel %vm154_vm2, %v269_v45, 0.0 }
 0x11c   :  { %289 = vadd.xlane.f32.xlu1 %v288_v23  ;;  %v205_v24 = vpop.xlane.xlu1 %204  ;;  %v285_v61 = vsel %vm154_vm2, %v263_v17, 0.0  ;;  %v239_v12 = vmul.f32 %v1887_v40, %v208_v22 }
 0x11d   :  { %286 = vadd.xlane.f32.xlu0 %v285_v61  ;;  %v202_v25 = vpop.xlane.xlu0 %201  ;;  %v238_v44 = vmul.f32 %v1887_v40, %v205_v24 }
 0x11e   :  { %v237_v26 = vmul.f32 %v1887_v40, %v202_v25  ;;  %v2008_v23 = vsub.f32 %v1839_v5, %v239_v12 }
 0x11f   :  { %v1967_v50 = vsub.f32 %v1833_v1, %v238_v44 }
 0x120   :  { %v1944_v30 = vsub.f32 %v1836_v4, %v237_v26  ;;  %v279_v26 = vmul.f32 %v2008_v23, %v2008_v23 }
 0x121   :  { %v278_v1 = vmul.f32 %v1967_v50, %v1967_v50 }
 0x122   :  { %v277_v31 = vmul.f32 %v1944_v30, %v1944_v30  ;;  %v333_v55 = vsel %vm154_vm2, %v279_v26, 0.0 }
 0x123   :  { %v169_v32 = vpop.xlane.xlu2 %168 }
 0x124   :  { %307 = vadd.xlane.f32.xlu1 %v306_v33  ;;  %v166_v36 = vpop.xlane.xlu1 %165  ;;  %v327_v34 = vsel %vm154_vm2, %v277_v31, 0.0  ;;  %v226_v62 = vmul.f32 %v1887_v40, %v169_v32 }
 0x125   :  { %v225_v4 = vmul.f32 %v1887_v40, %v166_v36  ;;  %304 = vadd.xlane.f32.xlu0 %v303_v38  ;;  %328 = vadd.xlane.f32.xlu2 %v327_v34  ;;  %v184_v41 = vpop.xlane.xlu0 %183 }
 0x126   :  { %v231_v47 = vmul.f32 %v1887_v40, %v184_v41  ;;  %v1989_v6 = vsub.f32 %v1848_v10, %v226_v62 }
 0x127   :  { %v1959_v46 = vsub.f32 %v1851_v11, %v225_v4 }
 0x128   :  { %v1971_v37 = vsub.f32 %v1854_v13, %v231_v47 }
 0x129   :  { %v265_v48 = vmul.f32 %v1959_v46, %v1959_v46 }
 0x12a   :  { %v271_v42 = vmul.f32 %v1971_v37, %v1971_v37 }
 0x12b   :  { %v172_v51 = vpop.xlane.xlu2 %171  ;;  %v291_v52 = vsel %vm154_vm2, %v265_v48, 0.0 }
 0x12c   :  { %v227_v11 = vmul.f32 %v1887_v40, %v172_v51  ;;  %v187_v2 = vpop.xlane.xlu1 %186  ;;  %v309_v9 = vsel %vm154_vm2, %v271_v42, 0.0 }
 0x12d   :  { %322 = vadd.xlane.f32.xlu0 %v321_v57  ;;  %292 = vadd.xlane.f32.xlu2 %v291_v52  ;;  %v211_v58 = vpop.xlane.xlu0 %210  ;;  %v232_v16 = vmul.f32 %v1887_v40, %v187_v2  ;;  %v2036_v2 = vld [vmem:[%s3083_s3] ss:$0 sm:$0xff] }
 0x12e   :  { %v1976_v60 = vsub.f32 %v1863_v19, %v227_v11  ;;  %v240_v63 = vmul.f32 %v1887_v40, %v211_v58  ;;  %v330_v19 = vsel %vm154_vm2, %v278_v1, 0.0 }
 0x130   :  { %v267_v13 = vmul.f32 %v1976_v60, %v1976_v60  ;;  %v1992_v7 = vsub.f32 %v1869_v21, %v240_v63  ;;  %v266_v21 = vmul.f32 %v1989_v6, %v1989_v6 }
 0x132   :  { %v297_v39 = vsel %vm154_vm2, %v267_v13, 0.0  ;;  %v280_v17 = vmul.f32 %v1992_v7, %v1992_v7  ;;  %v294_v22 = vsel %vm154_vm2, %v266_v21, 0.0 }
 0x133   :  { %v190_v3 = vpop.xlane.xlu2 %189  ;;  %298 = vadd.xlane.f32.xlu1 %v297_v39 }
 0x134   :  { %v233_v8 = vmul.f32 %v1887_v40, %v190_v3  ;;  %v336_v61 = vsel %vm154_vm2, %v280_v17, 0.0  ;;  %v214_v25 = vpop.xlane.xlu1 %213 }
 0x135   :  { %331 = vadd.xlane.f32.xlu0 %v330_v19  ;;  %310 = vadd.xlane.f32.xlu2 %v309_v9  ;;  %v241_v29 = vmul.f32 %v1887_v40, %v214_v25  ;;  %v2041_v9 = vld [vmem:[%s3084_s4] ss:$0 sm:$0xff] }
 0x136   :  { %v1998_v49 = vsub.f32 %v1878_v27, %v233_v8  ;;  %v2012_v27 = vsub.f32 %v1866_v20, %v232_v16 }
 0x137   :  { %v2023_v20 = vsub.f32 %v1881_v28, %v241_v29 }
 0x138   :  { %v273_v10 = vmul.f32 %v1998_v49, %v1998_v49  ;;  %v272_v5 = vmul.f32 %v2012_v27, %v2012_v27 }
 0x139   :  { %v281_v31 = vmul.f32 %v2023_v20, %v2023_v20 }
 0x13a   :  { %v315_v24 = vsel %vm154_vm2, %v273_v10, 0.0  ;;  %v312_v45 = vsel %vm154_vm2, %v272_v5, 0.0 }
 0x13b   :  { %316 = vadd.xlane.f32.xlu1 %v315_v24  ;;  %v339_v32 = vsel %vm154_vm2, %v281_v31, 0.0 }
 0x13d   :  { %295 = vadd.xlane.f32.xlu0 %v294_v22  ;;  %337 = vadd.xlane.f32.xlu2 %v336_v61 }
 0x143   :  { %334 = vadd.xlane.f32.xlu1 %v333_v55 }
 0x145   :  { %313 = vadd.xlane.f32.xlu0 %v312_v45 }
 0x14d   :  { %340 = vadd.xlane.f32.xlu0 %v339_v32 }
 0x177   :  { %v284_v33 = vpop.xlane.xlu2 %283 }
 0x178   :  { %v342_v36 = vmul.f32 %v284_v33, %v1887_v40 }
 0x17a   :  { %v362_v38 = vadd.f32 1e-05, %v342_v36 }
 0x17c   :  { %1591 = vrsqrt.f32 %v362_v38  ;;  %vm388_vm5 = vweird.f32 %v362_v38 }
 0x17e   :  { %v326_v34 = vpop.xlane.xlu1 %325 }
 0x17f   :  { %v356_v4 = vmul.f32 %v326_v34, %v1887_v40  ;;  %v302_v41 = vpop.xlane.xlu2 %301 }
 0x180   :  { %v348_v28 = vmul.f32 %v302_v41, %v1887_v40 }
 0x181   :  { %v376_v44 = vadd.f32 1e-05, %v356_v4 }
 0x182   :  { %v1592_v47 = vpop.eup %1591  ;;  %v368_v53 = vadd.f32 1e-05, %v348_v28 }
 0x183   :  { %v383_v48 = vmul.f32 %v1592_v47, %v362_v38  ;;  %1593 = vrsqrt.f32 %v376_v44  ;;  %vm389_vm4 = vweird.f32 %v1592_v47  ;;  %vm528_vm9 = vweird.f32 %v376_v44 }
 0x184   :  { %1595 = vrsqrt.f32 %v368_v53  ;;  %vm390_vm6 = vmor %vm388_vm5, %vm389_vm4  ;;  %vm448_vm11 = vweird.f32 %v368_v53 }
 0x185   :  { %v384_v51 = vmul.f32 %v1592_v47, %v383_v48 }
 0x187   :  { %v385_v52 = vmul.f32 0.5, %v384_v51 }
 0x188   :  { %v320_v11 = vpop.xlane.xlu2 %319 }
 0x189   :  { %v1594_v57 = vpop.eup %1593  ;;  %v386_v58 = vsub.f32 1.5, %v385_v52  ;;  %v354_v1 = vmul.f32 %v320_v11, %v1887_v40 }
 0x18a   :  { %v1596_v62 = vpop.eup %1595  ;;  %v523_v63 = vmul.f32 %v1594_v57, %v376_v44  ;;  %vm529_vm7 = vweird.f32 %v1594_v57 }
 0x18b   :  { %v387_v13 = vmul.f32 %v1592_v47, %v386_v58  ;;  %v443_v42 = vmul.f32 %v1596_v62, %v368_v53  ;;  %v374_v39 = vadd.f32 1e-05, %v354_v1  ;;  %vm449_vm8 = vweird.f32 %v1596_v62  ;;  %vm530_vm10 = vmor %vm528_vm9, %vm529_vm7 }
 0x18c   :  { %v524_v3 = vmul.f32 %v1594_v57, %v523_v63  ;;  %vm450_vm12 = vmor %vm448_vm11, %vm449_vm8 }
 0x18d   :  { %v391_v19 = vsel %vm390_vm6, %v1592_v47, %v387_v13  ;;  %v444_v8 = vmul.f32 %v1596_v62, %v443_v42  ;;  %1597 = vrsqrt.f32 %v374_v39  ;;  %vm508_vm14 = vweird.f32 %v374_v39 }
 0x18e   :  { %v582_v12 = vmul.f32 %v391_v19, %v1891_v43  ;;  %v525_v16 = vmul.f32 0.5, %v524_v3 }
 0x18f   :  { %v445_v10 = vmul.f32 0.5, %v444_v8  ;;  %v290_v21 = vpop.xlane.xlu1 %289 }
 0x190   :  { %v605_v17 = vmul.f32 %v2036_v2, %v582_v12  ;;  %v526_v24 = vsub.f32 1.5, %v525_v16  ;;  %v344_v22 = vmul.f32 %v290_v21, %v1887_v40  ;;  %v287_v25 = vpop.xlane.xlu0 %286 }
 0x191   :  { %v446_v61 = vsub.f32 1.5, %v445_v10  ;;  %v343_v33 = vmul.f32 %v287_v25, %v1887_v40 }
 0x192   :  { %v628_v26 = vadd.f32 %v2041_v9, %v605_v17  ;;  %v527_v29 = vmul.f32 %v1594_v57, %v526_v24  ;;  %v2047_v5 = vadd.f32 1e-05, %v344_v22 }
 0x193   :  { %v1598_v55 = vpop.eup %1597  ;;  %v447_v43 = vmul.f32 %v1596_v62, %v446_v61  ;;  %v2061_v48 = vadd.f32 1e-05, %v343_v33 }
 0x194   :  { %v2049_v45 = vmul.f32 0.70710677, %v628_v26  ;;  %v531_v31 = vsel %vm530_vm10, %v1594_v57, %v527_v29  ;;  %v503_v32 = vmul.f32 %v1598_v55, %v374_v39  ;;  %1599 = vrsqrt.f32 %v2047_v5 }
 0x195   :  { %v596_v36 = vmul.f32 %v531_v31, %v1899_v54  ;;  %v451_v38 = vsel %vm450_vm12, %v1596_v62, %v447_v43  ;;  %vm509_vm13 = vweird.f32 %v1598_v55  ;;  %1601 = vrsqrt.f32 %v2061_v48 }
 0x196   :  { %v688_v34 = vmul.f32 %v2049_v45, %v2049_v45  ;;  %v588_v4 = vmul.f32 %v451_v38, %v1902_v56  ;;  %v504_v41 = vmul.f32 %v1598_v55, %v503_v32  ;;  %vm510_vm15 = vmor %vm508_vm14, %vm509_vm13  ;;  %v2099_v43 = vmul.f32 0.5, %v628_v26 }
 0x197   :  { %v619_v28 = vmul.f32 %v2036_v2, %v596_v36  ;;  %vm408_vm0 = vweird.f32 %v2047_v5  ;;  %vm398_vm6 = vweird.f32 %v2061_v48 }
 0x198   :  { %v2058_v44 = vmin.f32 %v688_v34, 16.0  ;;  %v611_v47 = vmul.f32 %v2036_v2, %v588_v4  ;;  %v505_v53 = vmul.f32 0.5, %v504_v41 }
 0x199   :  { %v2064_v54 = vadd.f32 %v2041_v9, %v619_v28 }
 0x19a   :  { %v690_v51 = vmul.f32 2.1237322e-06, %v2058_v44  ;;  %v701_v52 = vmul.f32 3.8918573e-05, %v2058_v44  ;;  %v2069_v56 = vadd.f32 %v2041_v9, %v611_v47  ;;  %v506_v11 = vsub.f32 1.5, %v505_v53  ;;  %v2071_v57 = vpop.eup %1599 }
 0x19b   :  { %v2074_v58 = vmul.f32 0.70710677, %v2064_v54  ;;  %v403_v3 = vmul.f32 %v2071_v57, %v2047_v5  ;;  %vm409_vm1 = vweird.f32 %v2071_v57 }
 0x19c   :  { %v691_v1 = vadd.f32 0.00028619796, %v690_v51  ;;  %v702_v62 = vadd.f32 0.001143296, %v701_v52  ;;  %v507_v63 = vmul.f32 %v1598_v55, %v506_v11  ;;  %v2080_v42 = vmul.f32 0.70710677, %v2069_v56  ;;  %vm2140_vm3 = vmor %vm408_vm0, %vm409_vm1 }
 0x19d   :  { %v1248_v13 = vmul.f32 %v2074_v58, %v2074_v58  ;;  %v404_v21 = vmul.f32 %v2071_v57, %v403_v3 }
 0x19e   :  { %v692_v19 = vmul.f32 %v691_v1, %v2058_v44  ;;  %v703_v8 = vmul.f32 %v702_v62, %v2058_v44  ;;  %v511_v39 = vsel %vm510_vm15, %v1598_v55, %v507_v63  ;;  %v928_v16 = vmul.f32 %v2080_v42, %v2080_v42  ;;  %v2097_v55 = vpop.eup %1601 }
 0x19f   :  { %v2086_v12 = vmin.f32 %v1248_v13, 16.0  ;;  %v594_v10 = vmul.f32 %v511_v39, %v1912_v0  ;;  %v405_v32 = vmul.f32 0.5, %v404_v21  ;;  %v393_v51 = vmul.f32 %v2097_v55, %v2061_v48 }
 0x1a0   :  { %v693_v17 = vadd.f32 0.0036580483, %v692_v19  ;;  %v704_v24 = vadd.f32 0.014752088, %v703_v8  ;;  %v2094_v25 = vmin.f32 %v928_v16, 16.0  ;;  %v308_v8 = vpop.xlane.xlu1 %307  ;;  %vm399_vm4 = vweird.f32 %v2097_v55 }
 0x1a1   :  { %v1250_v22 = vmul.f32 2.1237322e-06, %v2086_v12  ;;  %v1261_v61 = vmul.f32 3.8918573e-05, %v2086_v12  ;;  %v617_v29 = vmul.f32 %v2036_v2, %v594_v10  ;;  %v406_v19 = vsub.f32 1.5, %v405_v32  ;;  %vm400_vm12 = vmor %vm398_vm6, %vm399_vm4 }
 0x1a2   :  { %v694_v31 = vmul.f32 %v693_v17, %v2058_v44  ;;  %v705_v0 = vmul.f32 %v704_v24, %v2058_v44  ;;  %v930_v38 = vmul.f32 2.1237322e-06, %v2094_v25  ;;  %v941_v28 = vmul.f32 3.8918573e-05, %v2094_v25 }
 0x1a3   :  { %v1251_v33 = vadd.f32 0.00028619796, %v1250_v22  ;;  %v1262_v36 = vadd.f32 0.001143296, %v1261_v61  ;;  %v2105_v34 = vadd.f32 %v2041_v9, %v617_v29  ;;  %v407_v61 = vmul.f32 %v2071_v57, %v406_v19 }
 0x1a4   :  { %v695_v4 = vadd.f32 0.05243302, %v694_v31  ;;  %v706_v41 = vadd.f32 0.112945676, %v705_v0  ;;  %v931_v53 = vadd.f32 0.00028619796, %v930_v38  ;;  %v350_v32 = vmul.f32 %v308_v8, %v1887_v40 }
 0x1a5   :  { %v1252_v26 = vmul.f32 %v1251_v33, %v2086_v12  ;;  %v1263_v47 = vmul.f32 %v1262_v36, %v2086_v12  ;;  %v942_v1 = vadd.f32 0.001143296, %v941_v28  ;;  %v2117_v62 = vmul.f32 0.70710677, %v2105_v34 }
 0x1a6   :  { %v696_v52 = vmul.f32 %v695_v4, %v2058_v44  ;;  %v707_v11 = vmul.f32 %v706_v41, %v2058_v44  ;;  %v932_v3 = vmul.f32 %v931_v53, %v2094_v25 }
 0x1a7   :  { %v1253_v63 = vadd.f32 0.0036580483, %v1252_v26  ;;  %v1264_v13 = vadd.f32 0.014752088, %v1263_v47  ;;  %v943_v10 = vmul.f32 %v942_v1, %v2094_v25  ;;  %v1168_v21 = vmul.f32 %v2117_v62, %v2117_v62 }
 0x1a8   :  { %v697_v39 = vadd.f32 0.18741608, %v696_v52  ;;  %v708_v16 = vadd.f32 0.4994258, %v707_v11  ;;  %v933_v22 = vadd.f32 0.0036580483, %v932_v3  ;;  %v411_v1 = vsel %vm2140_vm3, %v2071_v57, %v407_v61 }
 0x1a9   :  { %v1254_v17 = vmul.f32 %v1253_v63, %v2086_v12  ;;  %v1265_v24 = vmul.f32 %v1264_v13, %v2086_v12  ;;  %v944_v31 = vadd.f32 0.014752088, %v943_v10  ;;  %v2127_v0 = vmin.f32 %v1168_v21, 16.0 }
 0x1aa   :  { %v709_v29 = vmul.f32 %v708_v16, %v2058_v44  ;;  %v698_v33 = vmul.f32 %v697_v39, %v2058_v44  ;;  %v934_v4 = vmul.f32 %v933_v22, %v2094_v25  ;;  %v394_v44 = vmul.f32 %v2097_v55, %v393_v51 }
 0x1ab   :  { %v1255_v36 = vadd.f32 0.05243302, %v1254_v17  ;;  %v1266_v38 = vadd.f32 0.112945676, %v1265_v24  ;;  %v945_v28 = vmul.f32 %v944_v31, %v2094_v25  ;;  %v1170_v26 = vmul.f32 2.1237322e-06, %v2127_v0 }
 0x1ac   :  { %v2132_v41 = vadd.f32 1.0, %v709_v29  ;;  %v935_v11 = vadd.f32 0.05243302, %v934_v4  ;;  %v2152_v63 = vmul.f32 0.5, %v2064_v54  ;;  %v1181_v5 = vmul.f32 3.8918573e-05, %v2127_v0 }
 0x1ad   :  { %v1256_v53 = vmul.f32 %v1255_v36, %v2086_v12  ;;  %v1267_v52 = vmul.f32 %v1266_v38, %v2086_v12  ;;  %v2155_v13 = vadd.f32 1e-05, %v350_v32  ;;  %v699_v3 = vadd.f32 1.1283791, %v698_v33 }
 0x1ae   :  { %1603 = vrcp.f32 %v2132_v41  ;;  %v936_v8 = vmul.f32 %v935_v11, %v2094_v25  ;;  %v2159_v39 = vmul.f32 0.5, %v2069_v56  ;;  %v946_v16 = vadd.f32 0.112945676, %v945_v28 }
 0x1af   :  { %v1257_v51 = vadd.f32 0.18741608, %v1256_v53  ;;  %v1268_v19 = vadd.f32 0.4994258, %v1267_v52  ;;  %v1171_v10 = vadd.f32 0.00028619796, %v1170_v26  ;;  %v584_v57 = vmul.f32 %v411_v1, %v1921_v14 }
 0x1b0   :  { %v937_v17 = vadd.f32 0.18741608, %v936_v8  ;;  %v395_v24 = vmul.f32 0.5, %v394_v44  ;;  %v947_v22 = vmul.f32 %v946_v16, %v2094_v25  ;;  %v1182_v29 = vadd.f32 0.001143296, %v1181_v5 }
 0x1b1   :  { %v1258_v21 = vmul.f32 %v1257_v51, %v2086_v12  ;;  %v1269_v54 = vmul.f32 %v1268_v19, %v2086_v12  ;;  %v1172_v61 = vmul.f32 %v1171_v10, %v2127_v0  ;;  %v607_v31 = vmul.f32 %v2036_v2, %v584_v57 }
 0x1b2   :  { %v700_v56 = vmul.f32 %v699_v3, %v2049_v45  ;;  %1605 = vrsqrt.f32 %v2155_v13  ;;  %v938_v12 = vmul.f32 %v937_v17, %v2094_v25  ;;  %v948_v33 = vadd.f32 0.4994258, %v947_v22 }
 0x1b3   :  { %v2168_v32 = vadd.f32 1.0, %v1269_v54  ;;  %v1173_v36 = vadd.f32 0.0036580483, %v1172_v61  ;;  %v1183_v38 = vmul.f32 %v1182_v29, %v2127_v0  ;;  %vm716_vm5 = vweird.f32 %v2132_v41 }
 0x1b4   :  { %v1604_v14 = vpop.eup %1603  ;;  %v720_v28 = vand.u32 2147483647, %v2132_v41  ;;  %v722_v45 = vand.u32 2147483648, %v2132_v41  ;;  %v1259_v26 = vadd.f32 1.1283791, %v1258_v21  ;;  %v2181_v47 = vadd.f32 %v2041_v9, %v607_v31 }
 0x1b5   :  { %v712_v4 = vmul.f32 %v1604_v14, %v2132_v41  ;;  %1607 = vrcp.f32 %v2168_v32  ;;  %v396_v44 = vsub.f32 1.5, %v395_v24  ;;  %v949_v52 = vmul.f32 %v948_v33, %v2094_v25 }
 0x1b6   :  { %v1174_v11 = vmul.f32 %v1173_v36, %v2127_v0  ;;  %v1184_v1 = vadd.f32 0.014752088, %v1183_v38  ;;  %vm717_vm7 = vweird.f32 %v1604_v14  ;;  %v1280_v5 = vand.u32 2147483647, %v2168_v32 }
 0x1b7   :  { %v713_v53 = vsub.f32 1.0, %v712_v4  ;;  %v1282_v3 = vand.u32 2147483648, %v2168_v32  ;;  %v939_v51 = vadd.f32 1.1283791, %v938_v12  ;;  %v2189_v16 = vadd.f32 1.0, %v949_v52  ;;  %vm718_vm10 = vmor %vm716_vm5, %vm717_vm7 }
 0x1b8   :  { %v2187_v19 = vpop.eup %1605  ;;  %v1175_v10 = vadd.f32 0.05243302, %v1174_v11  ;;  %v1185_v57 = vmul.f32 %v1184_v1, %v2127_v0  ;;  %vm2192_vm8 = vcmp.eq.f32.partialorder %v720_v28, 8.507059e+37  ;;  %v723_v25 = vor.u32 1.1754944e-38, %v722_v45 }
 0x1b9   :  { %v714_v8 = vmul.f32 %v1604_v14, %v713_v53  ;;  %v1260_v54 = vmul.f32 %v1259_v26, %v2074_v58  ;;  %v2198_v17 = vmul.f32 0.70710677, %v2181_v47  ;;  %vm1276_vm9 = vweird.f32 %v2168_v32 }
 0x1ba   :  { %1609 = vrcp.f32 %v2189_v16  ;;  %v397_v61 = vmul.f32 %v2097_v55, %v396_v44  ;;  %vm2207_vm11 = vcmp.eq.f32.partialorder %v1280_v5, 8.507059e+37  ;;  %v1283_v58 = vor.u32 1.1754944e-38, %v1282_v3 }
 0x1bb   :  { %v1608_v24 = vpop.eup %1607  ;;  %v715_v22 = vadd.f32 %v1604_v14, %v714_v8  ;;  %v2212_v12 = vmul.f32 %v939_v51, %v2080_v42  ;;  %v1176_v33 = vmul.f32 %v1175_v10, %v2127_v0  ;;  %v1186_v38 = vadd.f32 0.112945676, %v1185_v57 }
 0x1bc   :  { %v1272_v29 = vmul.f32 %v1608_v24, %v2168_v32  ;;  %v768_v4 = vmul.f32 %v2198_v17, %v2198_v17  ;;  %v463_v41 = vmul.f32 %v2187_v19, %v2155_v13  ;;  %v960_v26 = vand.u32 2147483647, %v2189_v16 }
 0x1bd   :  { %v719_v36 = vsel %vm718_vm10, %v1604_v14, %v715_v22  ;;  %v1177_v44 = vadd.f32 0.18741608, %v1176_v33  ;;  %v1187_v14 = vmul.f32 %v1186_v38, %v2127_v0  ;;  %v401_v52 = vsel %vm400_vm12, %v2097_v55, %v397_v61 }
 0x1be   :  { %v724_v28 = vsel %vm2192_vm8, %v723_v25, %v719_v36  ;;  %v1273_v45 = vsub.f32 1.0, %v1272_v29  ;;  %v2227_v53 = vmin.f32 %v768_v4, 16.0  ;;  %vm1277_vm13 = vweird.f32 %v1608_v24 }
 0x1bf   :  { %v725_v42 = vmul.f32 %v724_v28, %v700_v56  ;;  %v1178_v1 = vmul.f32 %v1177_v44, %v2127_v0  ;;  %v583_v5 = vmul.f32 %v401_v52, %v1925_v15  ;;  %vm956_vm14 = vweird.f32 %v2189_v16  ;;  %vm1278_vm0 = vmor %vm1276_vm9, %vm1277_vm13  ;;  %v329_v52 = vpop.xlane.xlu2 %328 }
 0x1c0   :  { %v1274_v11 = vmul.f32 %v1608_v24, %v1273_v45  ;;  %v1610_v3 = vpop.eup %1609  ;;  %v1188_v8 = vadd.f32 0.4994258, %v1187_v14  ;;  %v770_v48 = vmul.f32 2.1237322e-06, %v2227_v53  ;;  %v962_v57 = vand.u32 2147483648, %v2189_v16 }
 0x1c1   :  { %v1562_v51 = vclamps-f32 %v725_v42, 1.0  ;;  %v952_v10 = vmul.f32 %v1610_v3, %v2189_v16  ;;  %vm957_vm15 = vweird.f32 %v1610_v3  ;;  %v781_v25 = vmul.f32 3.8918573e-05, %v2227_v53 }
 0x1c2   :  { %v1275_v56 = vadd.f32 %v1608_v24, %v1274_v11  ;;  %v1189_v21 = vmul.f32 %v1188_v8, %v2127_v0  ;;  %v771_v15 = vadd.f32 0.00028619796, %v770_v48  ;;  %v1179_v29 = vadd.f32 1.1283791, %v1178_v1  ;;  %vm958_vm4 = vmor %vm956_vm14, %vm957_vm15 }
 0x1c3   :  { %v1488_v55 = vadd.f32 1.0, %v1562_v51  ;;  %v953_v61 = vsub.f32 1.0, %v952_v10  ;;  %v606_v33 = vmul.f32 %v2036_v2, %v583_v5  ;;  %v782_v0 = vadd.f32 0.001143296, %v781_v25  ;;  %v305_v10 = vpop.xlane.xlu0 %304 }
 0x1c4   :  { %v1279_v22 = vsel %vm1278_vm0, %v1608_v24, %v1275_v56  ;;  %v2244_v4 = vadd.f32 1.0, %v1189_v21  ;;  %v772_v32 = vmul.f32 %v771_v15, %v2227_v53  ;;  %vm2254_vm1 = vcmp.eq.f32.partialorder %v960_v26, 8.507059e+37 }
 0x1c5   :  { %v1508_v36 = vmul.f32 %v1488_v55, %v2099_v43  ;;  %v1284_v38 = vsel %vm2207_vm11, %v1283_v58, %v1279_v22  ;;  %v954_v45 = vmul.f32 %v1610_v3, %v953_v61  ;;  %v2248_v44 = vadd.f32 %v2041_v9, %v606_v33 }
 0x1c6   :  { %v1285_v28 = vmul.f32 %v1284_v38, %v1260_v54  ;;  %v963_v24 = vor.u32 1.1754944e-38, %v962_v57  ;;  %1611 = vrcp.f32 %v2244_v4  ;;  %v464_v31 = vmul.f32 %v2187_v19, %v463_v41 }
 0x1c7   :  { %1528 = vst.msk [vmem:[%s3085_s5] sm:$0xff] %vm154_vm2, %v1508_v36  ;;  %vm468_vm3 = vweird.f32 %v2155_v13  ;;  %v955_v58 = vadd.f32 %v1610_v3, %v954_v45  ;;  %v773_v42 = vadd.f32 0.0036580483, %v772_v32  ;;  %v783_v14 = vmul.f32 %v782_v0, %v2227_v53 }
 0x1c8   :  { %v1576_v54 = vclamps-f32 %v1285_v28, 1.0  ;;  %v2266_v26 = vmul.f32 %v1179_v29, %v2117_v62  ;;  %v1200_v11 = vand.u32 2147483647, %v2244_v4  ;;  %v2270_v1 = vmul.f32 0.70710677, %v2248_v44 }
 0x1c9   :  { %vm469_vm5 = vweird.f32 %v2187_v19  ;;  %v959_v5 = vsel %vm958_vm4, %v1610_v3, %v955_v58  ;;  %v774_v51 = vmul.f32 %v773_v42, %v2227_v53  ;;  %v784_v8 = vadd.f32 0.014752088, %v783_v14 }
 0x1ca   :  { %v1502_v41 = vadd.f32 1.0, %v1576_v54  ;;  %v964_v48 = vsel %vm2254_vm1, %v963_v24, %v959_v5  ;;  %v728_v16 = vmul.f32 %v2270_v1, %v2270_v1  ;;  %v465_v62 = vmul.f32 0.5, %v464_v31  ;;  %vm470_vm7 = vmor %vm468_vm3, %vm469_vm5 }
 0x1cb   :  { %v357_v56 = vmul.f32 %v329_v52, %v1887_v40  ;;  %v965_v55 = vmul.f32 %v964_v48, %v2212_v12  ;;  %v775_v21 = vadd.f32 0.05243302, %v774_v51  ;;  %v785_v3 = vmul.f32 %v784_v8, %v2227_v53 }
 0x1cc   :  { %v1522_v57 = vmul.f32 %v1502_v41, %v2152_v63  ;;  %v1612_v15 = vpop.eup %1611  ;;  %v1202_v25 = vand.u32 2147483648, %v2244_v4  ;;  %v2283_v22 = vmin.f32 %v728_v16, 16.0  ;;  %v466_v61 = vsub.f32 1.5, %v465_v62 }
 0x1cd   :  { %v2285_v29 = vadd.f32 1e-05, %v357_v56  ;;  %v1568_v33 = vclamps-f32 %v965_v55, 1.0  ;;  %v1192_v63 = vmul.f32 %v1612_v15, %v2244_v4  ;;  %v776_v12 = vmul.f32 %v775_v21, %v2227_v53 }
 0x1ce   :  { %1542 = vst.msk [vmem:[%s3085_s5 + $0x70] sm:$0xff] %vm154_vm2, %v1522_v57  ;;  %v349_v36 = vmul.f32 %v305_v10, %v1887_v40  ;;  %v786_v38 = vadd.f32 0.112945676, %v785_v3  ;;  %v730_v32 = vmul.f32 2.1237322e-06, %v2283_v22  ;;  %v467_v45 = vmul.f32 %v2187_v19, %v466_v61 }
 0x1cf   :  { %v741_v28 = vmul.f32 3.8918573e-05, %v2283_v22  ;;  %v1494_v0 = vadd.f32 1.0, %v1568_v33  ;;  %v1193_v43 = vsub.f32 1.0, %v1192_v63  ;;  %vm1197_vm6 = vweird.f32 %v1612_v15 }
 0x1d0   :  { %1613 = vrsqrt.f32 %v2285_v29  ;;  %v787_v24 = vmul.f32 %v786_v38, %v2227_v53  ;;  %v731_v31 = vadd.f32 0.00028619796, %v730_v32  ;;  %v471_v58 = vsel %vm470_vm7, %v2187_v19, %v467_v45 }
 0x1d1   :  { %v742_v54 = vadd.f32 0.001143296, %v741_v28  ;;  %v1514_v42 = vmul.f32 %v1494_v0, %v2159_v39  ;;  %v1194_v14 = vmul.f32 %v1612_v15, %v1193_v43  ;;  %v777_v52 = vadd.f32 0.18741608, %v776_v12 }
 0x1d2   :  { %v590_v41 = vmul.f32 %v471_v58, %v1932_v18  ;;  %vm1196_vm8 = vweird.f32 %v2244_v4  ;;  %v788_v5 = vadd.f32 0.4994258, %v787_v24  ;;  %v732_v13 = vmul.f32 %v731_v31, %v2283_v22 }
 0x1d3   :  { %v743_v51 = vmul.f32 %v742_v54, %v2283_v22  ;;  %1534 = vst.msk [vmem:[%s3085_s5 + $0x30] sm:$0xff] %vm154_vm2, %v1514_v42  ;;  %v1195_v8 = vadd.f32 %v1612_v15, %v1194_v14  ;;  %vm1201_vm9 = vcmp.eq.f32.partialorder %v1200_v11, 8.507059e+37  ;;  %v2314_v19 = vadd.f32 1e-05, %v349_v36  ;;  %vm1198_vm10 = vmor %vm1196_vm8, %vm1197_vm6 }
 0x1d4   :  { %v613_v39 = vmul.f32 %v2036_v2, %v590_v41  ;;  %v1203_v18 = vor.u32 1.1754944e-38, %v1202_v25  ;;  %v789_v4 = vmul.f32 %v788_v5, %v2227_v53  ;;  %v733_v48 = vadd.f32 0.0036580483, %v732_v13 }
 0x1d5   :  { %v744_v16 = vadd.f32 0.014752088, %v743_v51  ;;  %v1199_v56 = vsel %vm1198_vm10, %v1612_v15, %v1195_v8  ;;  %v778_v10 = vmul.f32 %v777_v52, %v2227_v53  ;;  %1615 = vrsqrt.f32 %v2314_v19  ;;  %v293_v15 = vpop.xlane.xlu2 %292 }
 0x1d6   :  { %v2318_v62 = vpop.eup %1613  ;;  %v2322_v57 = vadd.f32 %v2041_v9, %v613_v39  ;;  %v1204_v11 = vsel %vm1201_vm9, %v1203_v18, %v1199_v56  ;;  %v2325_v55 = vadd.f32 1.0, %v789_v4  ;;  %v734_v21 = vmul.f32 %v733_v48, %v2283_v22 }
 0x1d7   :  { %v745_v3 = vmul.f32 %v744_v16, %v2283_v22  ;;  %v1205_v25 = vmul.f32 %v1204_v11, %v2266_v26  ;;  %v533_v53 = vmul.f32 %v2318_v62, %v2285_v29  ;;  %v660_v33 = vmul.f32 0.5, %v2105_v34 }
 0x1d8   :  { %v2331_v61 = vmul.f32 0.70710677, %v2322_v57  ;;  %v2337_v63 = vmul.f32 0.5, %v2181_v47  ;;  %1617 = vrcp.f32 %v2325_v55  ;;  %vm538_vm11 = vweird.f32 %v2285_v29 }
 0x1d9   :  { %v1574_v12 = vclamps-f32 %v1205_v25, 1.0  ;;  %v735_v36 = vadd.f32 0.05243302, %v734_v21  ;;  %v746_v38 = vadd.f32 0.112945676, %v745_v3  ;;  %v534_v45 = vmul.f32 %v2318_v62, %v533_v53 }
 0x1da   :  { %v1008_v26 = vmul.f32 %v2331_v61, %v2331_v61  ;;  %v779_v32 = vadd.f32 1.1283791, %v778_v10  ;;  %v800_v28 = vand.u32 2147483647, %v2325_v55  ;;  %v345_v34 = vmul.f32 %v293_v15, %v1887_v40 }
 0x1db   :  { %v2346_v0 = vpop.eup %1615  ;;  %v1500_v47 = vadd.f32 1.0, %v1574_v12  ;;  %v736_v43 = vmul.f32 %v735_v36, %v2283_v22  ;;  %v747_v24 = vmul.f32 %v746_v38, %v2283_v22  ;;  %v802_v54 = vand.u32 2147483648, %v2325_v55 }
 0x1dc   :  { %v2350_v31 = vmin.f32 %v1008_v26, 16.0  ;;  %v535_v58 = vmul.f32 0.5, %v534_v45  ;;  %vm539_vm12 = vweird.f32 %v2318_v62  ;;  %v453_v42 = vmul.f32 %v2346_v0, %v2314_v19  ;;  %v323_v45 = vpop.xlane.xlu0 %322 }
 0x1dd   :  { %v1520_v14 = vmul.f32 %v1500_v47, %v660_v33  ;;  %v737_v52 = vadd.f32 0.18741608, %v736_v43  ;;  %v748_v41 = vadd.f32 0.4994258, %v747_v24  ;;  %v2359_v18 = vadd.f32 1e-05, %v345_v34  ;;  %vm540_vm14 = vmor %vm538_vm11, %vm539_vm12 }
 0x1de   :  { %v1010_v5 = vmul.f32 2.1237322e-06, %v2350_v31  ;;  %v1618_v13 = vpop.eup %1617  ;;  %v1021_v51 = vmul.f32 3.8918573e-05, %v2350_v31  ;;  %v536_v8 = vsub.f32 1.5, %v535_v58  ;;  %v454_v39 = vmul.f32 %v2346_v0, %v453_v42 }
 0x1df   :  { %1540 = vst.msk [vmem:[%s3085_s5 + $0x60] sm:$0xff] %vm154_vm2, %v1520_v14  ;;  %v792_v4 = vmul.f32 %v1618_v13, %v2325_v55  ;;  %v738_v48 = vmul.f32 %v737_v52, %v2283_v22  ;;  %v749_v16 = vmul.f32 %v748_v41, %v2283_v22  ;;  %vm459_vm13 = vweird.f32 %v2346_v0 }
 0x1e0   :  { %v1011_v56 = vadd.f32 0.00028619796, %v1010_v5  ;;  %v1022_v10 = vadd.f32 0.001143296, %v1021_v51  ;;  %v537_v11 = vmul.f32 %v2318_v62, %v536_v8  ;;  %v455_v21 = vmul.f32 0.5, %v454_v39 }
 0x1e1   :  { %v793_v3 = vsub.f32 1.0, %v792_v4  ;;  %v739_v25 = vadd.f32 1.1283791, %v738_v48  ;;  %v2370_v53 = vadd.f32 1.0, %v749_v16  ;;  %1619 = vrsqrt.f32 %v2359_v18 }
 0x1e2   :  { %v1012_v22 = vmul.f32 %v1011_v56, %v2350_v31  ;;  %v1023_v15 = vmul.f32 %v1022_v10, %v2350_v31  ;;  %v541_v33 = vsel %vm540_vm14, %v2318_v62, %v537_v11  ;;  %v456_v12 = vsub.f32 1.5, %v455_v21 }
 0x1e3   :  { %v780_v36 = vmul.f32 %v779_v32, %v2198_v17  ;;  %v794_v38 = vmul.f32 %v1618_v13, %v793_v3  ;;  %vm797_vm15 = vweird.f32 %v1618_v13  ;;  %1621 = vrcp.f32 %v2370_v53 }
 0x1e4   :  { %vm796_vm0 = vweird.f32 %v2325_v55  ;;  %v1013_v26 = vadd.f32 0.0036580483, %v1012_v22  ;;  %v597_v29 = vmul.f32 %v541_v33, %v1944_v30  ;;  %vm458_vm1 = vweird.f32 %v2314_v19 }
 0x1e5   :  { %v795_v34 = vadd.f32 %v1618_v13, %v794_v38  ;;  %vm801_vm3 = vcmp.eq.f32.partialorder %v800_v28, 8.507059e+37  ;;  %v1024_v47 = vadd.f32 0.014752088, %v1023_v15  ;;  %v457_v62 = vmul.f32 %v2346_v0, %v456_v12  ;;  %vm460_vm4 = vmor %vm458_vm1, %vm459_vm13 }
 0x1e6   :  { %vm798_vm5 = vmor %vm796_vm0, %vm797_vm15  ;;  %v803_v17 = vor.u32 1.1754944e-38, %v802_v54  ;;  %v740_v32 = vmul.f32 %v739_v25, %v2270_v1  ;;  %v1014_v55 = vmul.f32 %v1013_v26, %v2350_v31  ;;  %v620_v43 = vmul.f32 %v2036_v2, %v597_v29 }
 0x1e7   :  { %v2391_v30 = vpop.eup %1619  ;;  %v799_v19 = vsel %vm798_vm5, %v1618_v13, %v795_v34  ;;  %v1025_v24 = vmul.f32 %v1024_v47, %v2350_v31  ;;  %v461_v28 = vsel %vm460_vm4, %v2346_v0, %v457_v62  ;;  %v355_v58 = vmul.f32 %v323_v45, %v1887_v40 }
 0x1e8   :  { %v804_v42 = vsel %vm801_vm3, %v803_v17, %v799_v19  ;;  %vm756_vm6 = vweird.f32 %v2370_v53  ;;  %v1015_v14 = vadd.f32 0.05243302, %v1014_v55  ;;  %v2398_v54 = vadd.f32 %v2041_v9, %v620_v43 }
 0x1e9   :  { %v589_v1 = vmul.f32 %v461_v28, %v1936_v59  ;;  %v1622_v52 = vpop.eup %1621  ;;  %v805_v41 = vmul.f32 %v804_v42, %v780_v36  ;;  %v760_v5 = vand.u32 2147483647, %v2370_v53  ;;  %v1026_v13 = vadd.f32 0.112945676, %v1025_v24 }
 0x1ea   :  { %v413_v51 = vmul.f32 %v2391_v30, %v2359_v18  ;;  %v752_v0 = vmul.f32 %v1622_v52, %v2370_v53  ;;  %vm757_vm7 = vweird.f32 %v1622_v52  ;;  %v762_v8 = vand.u32 2147483648, %v2370_v53 }
 0x1eb   :  { %v1016_v39 = vmul.f32 %v1015_v14, %v2350_v31  ;;  %v1564_v4 = vclamps-f32 %v805_v41, 1.0  ;;  %v1027_v48 = vmul.f32 %v1026_v13, %v2350_v31  ;;  %v2409_v59 = vmul.f32 0.70710677, %v2398_v54  ;;  %vm758_vm8 = vmor %vm756_vm6, %vm757_vm7 }
 0x1ec   :  { %v612_v16 = vmul.f32 %v2036_v2, %v589_v1  ;;  %v753_v56 = vsub.f32 1.0, %v752_v0  ;;  %v414_v11 = vmul.f32 %v2391_v30, %v413_v51  ;;  %v2413_v21 = vadd.f32 1e-05, %v355_v58 }
 0x1ed   :  { %v1017_v10 = vadd.f32 0.18741608, %v1016_v39  ;;  %v1490_v3 = vadd.f32 1.0, %v1564_v4  ;;  %v1028_v25 = vadd.f32 0.4994258, %v1027_v48  ;;  %v1288_v22 = vmul.f32 %v2409_v59, %v2409_v59 }
 0x1ee   :  { %v2418_v15 = vadd.f32 %v2041_v9, %v612_v16  ;;  %v754_v33 = vmul.f32 %v1622_v52, %v753_v56  ;;  %v415_v36 = vmul.f32 0.5, %v414_v11  ;;  %1623 = vrsqrt.f32 %v2413_v21 }
 0x1ef   :  { %v1018_v12 = vmul.f32 %v1017_v10, %v2350_v31  ;;  %v1510_v38 = vmul.f32 %v1490_v3, %v2337_v63  ;;  %v763_v26 = vor.u32 1.1754944e-38, %v762_v8  ;;  %v1029_v29 = vmul.f32 %v1028_v25, %v2350_v31 }
 0x1f0   :  { %v2424_v45 = vmin.f32 %v1288_v22, 16.0  ;;  %v755_v34 = vadd.f32 %v1622_v52, %v754_v33  ;;  %v2427_v62 = vmul.f32 0.70710677, %v2418_v15  ;;  %v416_v17 = vsub.f32 1.5, %v415_v36 }
 0x1f1   :  { %v1019_v47 = vadd.f32 1.1283791, %v1018_v12  ;;  %1530 = vst.msk [vmem:[%s3085_s5 + $0x10] sm:$0xff] %vm154_vm2, %v1510_v38  ;;  %v2436_v63 = vadd.f32 1.0, %v1029_v29  ;;  %vm419_vm9 = vweird.f32 %v2391_v30  ;;  %vm761_vm10 = vcmp.eq.f32.partialorder %v760_v5, 8.507059e+37 }
 0x1f2   :  { %v1290_v31 = vmul.f32 2.1237322e-06, %v2424_v45  ;;  %v1301_v55 = vmul.f32 3.8918573e-05, %v2424_v45  ;;  %v759_v43 = vsel %vm758_vm8, %v1622_v52, %v755_v34  ;;  %v968_v19 = vmul.f32 %v2427_v62, %v2427_v62 }
 0x1f3   :  { %v417_v24 = vmul.f32 %v2391_v30, %v416_v17  ;;  %v764_v28 = vsel %vm761_vm10, %v763_v26, %v759_v43  ;;  %1625 = vrcp.f32 %v2436_v63  ;;  %vm418_vm11 = vweird.f32 %v2359_v18  ;;  %v299_v43 = vpop.xlane.xlu1 %298 }
 0x1f4   :  { %v2446_v53 = vpop.eup %1623  ;;  %v649_v58 = vmul.f32 0.5, %v2248_v44  ;;  %v765_v42 = vmul.f32 %v764_v28, %v740_v32  ;;  %v1291_v14 = vadd.f32 0.00028619796, %v1290_v31  ;;  %v1302_v1 = vadd.f32 0.001143296, %v1301_v55  ;;  %vm420_vm12 = vmor %vm418_vm11, %vm419_vm9 }
 0x1f5   :  { %v2450_v52 = vmul.f32 %v1019_v47, %v2331_v61  ;;  %v2452_v41 = vmin.f32 %v968_v19, 16.0  ;;  %v421_v5 = vsel %vm420_vm12, %v2391_v30, %v417_v24  ;;  %v513_v13 = vmul.f32 %v2446_v53, %v2413_v21 }
 0x1f6   :  { %v1563_v51 = vclamps-f32 %v765_v42, 1.0  ;;  %v1040_v18 = vand.u32 2147483647, %v2436_v63  ;;  %v1292_v0 = vmul.f32 %v1291_v14, %v2424_v45  ;;  %v1303_v44 = vmul.f32 %v1302_v1, %v2424_v45 }
 0x1f7   :  { %v970_v32 = vmul.f32 2.1237322e-06, %v2452_v41  ;;  %v981_v8 = vmul.f32 3.8918573e-05, %v2452_v41  ;;  %v585_v61 = vmul.f32 %v421_v5, %v1959_v46  ;;  %v514_v39 = vmul.f32 %v2446_v53, %v513_v13 }
 0x1f8   :  { %vm518_vm13 = vweird.f32 %v2413_v21  ;;  %v1489_v30 = vadd.f32 1.0, %v1563_v51  ;;  %vm1036_vm14 = vweird.f32 %v2436_v63  ;;  %v1293_v4 = vadd.f32 0.0036580483, %v1292_v0 }
 0x1f9   :  { %v1304_v48 = vadd.f32 0.014752088, %v1303_v44  ;;  %v1626_v16 = vpop.eup %1625  ;;  %v971_v56 = vadd.f32 0.00028619796, %v970_v32  ;;  %v982_v10 = vadd.f32 0.001143296, %v981_v8  ;;  %v608_v11 = vmul.f32 %v2036_v2, %v585_v61 }
 0x1fa   :  { %v515_v3 = vmul.f32 0.5, %v514_v39  ;;  %v1509_v25 = vmul.f32 %v1489_v30, %v649_v58  ;;  %v1032_v22 = vmul.f32 %v1626_v16, %v2436_v63  ;;  %v1042_v46 = vand.u32 2147483648, %v2436_v63 }
 0x1fb   :  { %v1294_v33 = vmul.f32 %v1293_v4, %v2424_v45  ;;  %v1305_v12 = vmul.f32 %v1304_v48, %v2424_v45  ;;  %v972_v36 = vmul.f32 %v971_v56, %v2452_v41  ;;  %v983_v38 = vmul.f32 %v982_v10, %v2452_v41 }
 0x1fc   :  { %v2474_v26 = vadd.f32 %v2041_v9, %v608_v11  ;;  %1529 = vst.msk [vmem:[%s3085_s5 + $0x8] sm:$0xff] %vm154_vm2, %v1509_v25  ;;  %v1033_v2 = vsub.f32 1.0, %v1032_v22  ;;  %vm2480_vm15 = vcmp.eq.f32.partialorder %v1040_v18, 8.507059e+37  ;;  %v516_v47 = vsub.f32 1.5, %v515_v3 }
 0x1fd   :  { %v1295_v34 = vadd.f32 0.05243302, %v1294_v33  ;;  %v1306_v17 = vadd.f32 0.112945676, %v1305_v12  ;;  %v973_v31 = vadd.f32 0.0036580483, %v972_v36  ;;  %vm519_vm0 = vweird.f32 %v2446_v53 }
 0x1fe   :  { %v984_v55 = vadd.f32 0.014752088, %v983_v38  ;;  %v1034_v9 = vmul.f32 %v1626_v16, %v1033_v2  ;;  %vm1037_vm1 = vweird.f32 %v1626_v16  ;;  %v2487_v24 = vmul.f32 0.70710677, %v2474_v26  ;;  %vm520_vm3 = vmor %vm518_vm13, %vm519_vm0 }
 0x1ff   :  { %v1296_v19 = vmul.f32 %v1295_v34, %v2424_v45  ;;  %v1307_v28 = vmul.f32 %v1306_v17, %v2424_v45  ;;  %v974_v58 = vmul.f32 %v973_v31, %v2452_v41  ;;  %v517_v14 = vmul.f32 %v2446_v53, %v516_v47  ;;  %vm1038_vm4 = vmor %vm1036_vm14, %vm1037_vm1  ;;  %v311_v31 = vpop.xlane.xlu2 %310 }
 0x200   :  { %v985_v42 = vmul.f32 %v984_v55, %v2452_v41  ;;  %v1035_v1 = vadd.f32 %v1626_v16, %v1034_v9  ;;  %v1043_v5 = vor.u32 1.1754944e-38, %v1042_v46  ;;  %v808_v13 = vmul.f32 %v2487_v24, %v2487_v24 }
 0x201   :  { %v347_v51 = vmul.f32 %v299_v43, %v1887_v40  ;;  %v1308_v18 = vadd.f32 0.4994258, %v1307_v28  ;;  %v975_v0 = vadd.f32 0.05243302, %v974_v58  ;;  %v521_v32 = vsel %vm520_vm3, %v2446_v53, %v517_v14 }
 0x202   :  { %v986_v44 = vadd.f32 0.112945676, %v985_v42  ;;  %v1039_v8 = vsel %vm1038_vm4, %v1626_v16, %v1035_v1  ;;  %v1297_v61 = vadd.f32 0.18741608, %v1296_v19  ;;  %v2501_v39 = vmin.f32 %v808_v13, 16.0 }
 0x203   :  { %v595_v30 = vmul.f32 %v521_v32, %v1952_v35  ;;  %v1044_v21 = vsel %vm2480_vm15, %v1043_v5, %v1039_v8  ;;  %v1309_v4 = vmul.f32 %v1308_v18, %v2424_v45  ;;  %v976_v48 = vmul.f32 %v975_v0, %v2452_v41  ;;  %v2517_v35 = vld [vmem:[%s3083_s3] ss:$0 sm:$0xff] }
 0x204   :  { %v987_v63 = vmul.f32 %v986_v44, %v2452_v41  ;;  %v1045_v56 = vmul.f32 %v1044_v21, %v2450_v52  ;;  %v810_v10 = vmul.f32 2.1237322e-06, %v2501_v39  ;;  %v821_v53 = vmul.f32 3.8918573e-05, %v2501_v39 }
 0x205   :  { %v2512_v16 = vadd.f32 1.0, %v1309_v4  ;;  %v977_v11 = vadd.f32 0.18741608, %v976_v48  ;;  %v618_v25 = vmul.f32 %v2517_v35, %v595_v30  ;;  %v1298_v46 = vmul.f32 %v1297_v61, %v2424_v45 }
 0x206   :  { %v988_v3 = vadd.f32 0.4994258, %v987_v63  ;;  %v1570_v22 = vclamps-f32 %v1045_v56, 1.0  ;;  %v811_v33 = vadd.f32 0.00028619796, %v810_v10  ;;  %v656_v12 = vmul.f32 0.5, %v2322_v57 }
 0x207   :  { %v822_v52 = vadd.f32 0.001143296, %v821_v53  ;;  %1627 = vrcp.f32 %v2512_v16  ;;  %v2523_v36 = vadd.f32 1e-05, %v347_v51  ;;  %v978_v2 = vmul.f32 %v977_v11, %v2452_v41  ;;  %v2535_v57 = vld [vmem:[%s3084_s4] ss:$0 sm:$0xff] }
 0x208   :  { %v1496_v38 = vadd.f32 1.0, %v1570_v22  ;;  %v989_v29 = vmul.f32 %v988_v3, %v2452_v41  ;;  %v812_v34 = vmul.f32 %v811_v33, %v2501_v39  ;;  %v2529_v47 = vmul.f32 0.5, %v2398_v54 }
 0x209   :  { %v823_v45 = vmul.f32 %v822_v52, %v2501_v39  ;;  %v2538_v17 = vadd.f32 %v2535_v57, %v618_v25  ;;  %v1299_v43 = vadd.f32 1.1283791, %v1298_v46  ;;  %v1320_v19 = vand.u32 2147483647, %v2512_v16 }
 0x20a   :  { %v1516_v55 = vmul.f32 %v1496_v38, %v656_v12  ;;  %v2540_v9 = vadd.f32 1.0, %v989_v29  ;;  %v813_v41 = vadd.f32 0.0036580483, %v812_v34  ;;  %1629 = vrsqrt.f32 %v2523_v36 }
 0x20b   :  { %v824_v54 = vadd.f32 0.014752088, %v823_v45  ;;  %v2544_v28 = vmul.f32 0.70710677, %v2538_v17  ;;  %v1322_v58 = vand.u32 2147483648, %v2512_v16  ;;  %v351_v14 = vmul.f32 %v311_v31, %v1887_v40 }
 0x20c   :  { %1536 = vst.msk [vmem:[%s3085_s5 + $0x40] sm:$0xff] %vm154_vm2, %v1516_v55  ;;  %v979_v42 = vadd.f32 1.1283791, %v978_v2  ;;  %1631 = vrcp.f32 %v2540_v9  ;;  %v2555_v5 = vmul.f32 0.5, %v2418_v15  ;;  %v814_v13 = vmul.f32 %v813_v41, %v2501_v39 }
 0x20d   :  { %v1628_v1 = vpop.eup %1627  ;;  %v825_v51 = vmul.f32 %v824_v54, %v2501_v39  ;;  %v1208_v18 = vmul.f32 %v2544_v28, %v2544_v28  ;;  %v1300_v0 = vmul.f32 %v1299_v43, %v2409_v59  ;;  %vm1316_vm5 = vweird.f32 %v2512_v16 }
 0x20e   :  { %v1312_v44 = vmul.f32 %v1628_v1, %v2512_v16  ;;  %v1000_v32 = vand.u32 2147483647, %v2540_v9  ;;  %vm2565_vm6 = vcmp.eq.f32.partialorder %v1320_v19, 8.507059e+37  ;;  %v815_v15 = vadd.f32 0.05243302, %v814_v13  ;;  %v332_v16 = vpop.xlane.xlu0 %331 }
 0x20f   :  { %v826_v61 = vadd.f32 0.112945676, %v825_v51  ;;  %v2569_v30 = vmin.f32 %v1208_v18, 16.0  ;;  %v1323_v4 = vor.u32 1.1754944e-38, %v1322_v58  ;;  %v980_v48 = vmul.f32 %v979_v42, %v2427_v62 }
 0x210   :  { %v1313_v21 = vsub.f32 1.0, %v1312_v44  ;;  %v2572_v63 = vadd.f32 1e-05, %v351_v14  ;;  %v2574_v59 = vpop.eup %1629  ;;  %vm996_vm7 = vweird.f32 %v2540_v9  ;;  %v816_v56 = vmul.f32 %v815_v15, %v2501_v39  ;;  %v317_v15 = vpop.xlane.xlu1 %316 }
 0x211   :  { %v827_v10 = vmul.f32 %v826_v61, %v2501_v39  ;;  %v1210_v53 = vmul.f32 2.1237322e-06, %v2569_v30  ;;  %v1221_v11 = vmul.f32 3.8918573e-05, %v2569_v30  ;;  %vm1317_vm8 = vweird.f32 %v1628_v1 }
 0x212   :  { %v1632_v3 = vpop.eup %1631  ;;  %v1314_v25 = vmul.f32 %v1628_v1, %v1313_v21  ;;  %v433_v62 = vmul.f32 %v2574_v59, %v2523_v36  ;;  %1633 = vrsqrt.f32 %v2572_v63  ;;  %vm2585_vm9 = vcmp.eq.f32.partialorder %v1000_v32, 8.507059e+37  ;;  %vm1318_vm10 = vmor %vm1316_vm5, %vm1317_vm8 }
 0x213   :  { %v992_v22 = vmul.f32 %v1632_v3, %v2540_v9  ;;  %v1002_v33 = vand.u32 2147483648, %v2540_v9  ;;  %v828_v52 = vadd.f32 0.4994258, %v827_v10  ;;  %v1211_v38 = vadd.f32 0.00028619796, %v1210_v53 }
 0x214   :  { %v1315_v12 = vadd.f32 %v1628_v1, %v1314_v25  ;;  %v1222_v2 = vadd.f32 0.001143296, %v1221_v11  ;;  %v434_v29 = vmul.f32 %v2574_v59, %v433_v62  ;;  %v817_v45 = vadd.f32 0.18741608, %v816_v56 }
 0x215   :  { %v993_v34 = vsub.f32 1.0, %v992_v22  ;;  %v829_v31 = vmul.f32 %v828_v52, %v2501_v39  ;;  %vm438_vm11 = vweird.f32 %v2523_v36  ;;  %v1212_v43 = vmul.f32 %v1211_v38, %v2569_v30 }
 0x216   :  { %v1319_v55 = vsel %vm1318_vm10, %v1628_v1, %v1315_v12  ;;  %v1223_v41 = vmul.f32 %v1222_v2, %v2569_v30  ;;  %v435_v19 = vmul.f32 0.5, %v434_v29  ;;  %vm997_vm12 = vweird.f32 %v1632_v3 }
 0x217   :  { %v1324_v54 = vsel %vm2565_vm6, %v1323_v4, %v1319_v55  ;;  %v994_v58 = vmul.f32 %v1632_v3, %v993_v34  ;;  %v2599_v42 = vadd.f32 1.0, %v829_v31  ;;  %v1213_v51 = vadd.f32 0.0036580483, %v1212_v43  ;;  %vm998_vm14 = vmor %vm996_vm7, %vm997_vm12 }
 0x218   :  { %v2601_v14 = vpop.eup %1633  ;;  %v1325_v13 = vmul.f32 %v1324_v54, %v1300_v0  ;;  %v1224_v18 = vadd.f32 0.014752088, %v1223_v41  ;;  %v436_v44 = vsub.f32 1.5, %v435_v19  ;;  %v1003_v32 = vor.u32 1.1754944e-38, %v1002_v33 }
 0x219   :  { %v995_v1 = vadd.f32 %v1632_v3, %v994_v58  ;;  %1635 = vrcp.f32 %v2599_v42  ;;  %vm439_vm13 = vweird.f32 %v2574_v59  ;;  %v818_v61 = vmul.f32 %v817_v45, %v2501_v39 }
 0x21a   :  { %v1577_v8 = vclamps-f32 %v1325_v13, 1.0  ;;  %v1214_v21 = vmul.f32 %v1213_v51, %v2569_v30  ;;  %v358_v0 = vmul.f32 %v332_v16, %v1887_v40  ;;  %v1225_v56 = vmul.f32 %v1224_v18, %v2569_v30  ;;  %vm440_vm15 = vmor %vm438_vm11, %vm439_vm13 }
 0x21b   :  { %v999_v4 = vsel %vm998_vm14, %v1632_v3, %v995_v1  ;;  %v437_v10 = vmul.f32 %v2574_v59, %v436_v44  ;;  %v473_v53 = vmul.f32 %v2601_v14, %v2572_v63  ;;  %vm478_vm0 = vweird.f32 %v2572_v63  ;;  %v338_v1 = vpop.xlane.xlu2 %337 }
 0x21c   :  { %v1503_v11 = vadd.f32 1.0, %v1577_v8  ;;  %v1004_v25 = vsel %vm2585_vm9, %v1003_v32, %v999_v4  ;;  %v353_v39 = vmul.f32 %v317_v15, %v1887_v40  ;;  %v1215_v3 = vadd.f32 0.05243302, %v1214_v21 }
 0x21d   :  { %v1005_v9 = vmul.f32 %v1004_v25, %v980_v48  ;;  %v1226_v62 = vadd.f32 0.112945676, %v1225_v56  ;;  %v441_v22 = vsel %vm440_vm15, %v2574_v59, %v437_v10  ;;  %v819_v52 = vadd.f32 1.1283791, %v818_v61 }
 0x21e   :  { %v1523_v33 = vmul.f32 %v1503_v11, %v2529_v47  ;;  %v587_v12 = vmul.f32 %v441_v22, %v1976_v60  ;;  %v474_v46 = vmul.f32 %v2601_v14, %v473_v53  ;;  %v1216_v36 = vmul.f32 %v1215_v3, %v2569_v30 }
 0x21f   :  { %v1636_v38 = vpop.eup %1635  ;;  %v1569_v2 = vclamps-f32 %v1005_v9, 1.0  ;;  %v1227_v29 = vmul.f32 %v1226_v62, %v2569_v30  ;;  %v2626_v34 = vadd.f32 1e-05, %v358_v0  ;;  %v840_v48 = vand.u32 2147483647, %v2599_v42 }
 0x220   :  { %1543 = vst.msk [vmem:[%s3085_s5 + $0x78] sm:$0xff] %vm154_vm2, %v1523_v33  ;;  %v832_v47 = vmul.f32 %v1636_v38, %v2599_v42  ;;  %v610_v60 = vmul.f32 %v2517_v35, %v587_v12  ;;  %v475_v59 = vmul.f32 0.5, %v474_v46  ;;  %v842_v31 = vand.u32 2147483648, %v2599_v42 }
 0x221   :  { %v1495_v45 = vadd.f32 1.0, %v1569_v2  ;;  %v1228_v55 = vadd.f32 0.4994258, %v1227_v29  ;;  %1637 = vrsqrt.f32 %v2626_v34  ;;  %vm479_vm1 = vweird.f32 %v2601_v14 }
 0x222   :  { %v833_v43 = vsub.f32 1.0, %v832_v47  ;;  %v2638_v41 = vadd.f32 %v2535_v57, %v610_v60  ;;  %v476_v19 = vsub.f32 1.5, %v475_v59  ;;  %v1217_v58 = vadd.f32 0.18741608, %v1216_v36  ;;  %vm480_vm4 = vmor %vm478_vm0, %vm479_vm1 }
 0x223   :  { %v1515_v54 = vmul.f32 %v1495_v45, %v2555_v5  ;;  %v1229_v16 = vmul.f32 %v1228_v55, %v2569_v30  ;;  %v2643_v13 = vadd.f32 1e-05, %v353_v39  ;;  %vm837_vm3 = vweird.f32 %v1636_v38 }
 0x224   :  { %v834_v51 = vmul.f32 %v1636_v38, %v833_v43  ;;  %v2646_v18 = vmul.f32 0.70710677, %v2638_v41  ;;  %v477_v44 = vmul.f32 %v2601_v14, %v476_v19  ;;  %v820_v5 = vmul.f32 %v819_v52, %v2487_v24 }
 0x225   :  { %1535 = vst.msk [vmem:[%s3085_s5 + $0x38] sm:$0xff] %vm154_vm2, %v1515_v54  ;;  %v2654_v32 = vadd.f32 1.0, %v1229_v16  ;;  %1639 = vrsqrt.f32 %v2643_v13  ;;  %vm836_vm5 = vweird.f32 %v2599_v42  ;;  %v843_v0 = vor.u32 1.1754944e-38, %v842_v31 }
 0x226   :  { %v835_v15 = vadd.f32 %v1636_v38, %v834_v51  ;;  %v888_v8 = vmul.f32 %v2646_v18, %v2646_v18  ;;  %v481_v61 = vsel %vm480_vm4, %v2601_v14, %v477_v44  ;;  %vm838_vm6 = vmor %vm836_vm5, %vm837_vm3  ;;  %v1218_v24 = vmul.f32 %v1217_v58, %v2569_v30 }
 0x227   :  { %v2663_v21 = vpop.eup %1637  ;;  %1641 = vrcp.f32 %v2654_v32  ;;  %v360_v63 = vmul.f32 %v338_v1, %v1887_v40  ;;  %vm841_vm7 = vcmp.eq.f32.partialorder %v840_v48, 8.507059e+37  ;;  %v591_v42 = vmul.f32 %v481_v61, %v1971_v37 }
 0x228   :  { %v839_v4 = vsel %vm838_vm6, %v1636_v38, %v835_v15  ;;  %v2668_v56 = vmin.f32 %v888_v8, 16.0  ;;  %v651_v10 = vmul.f32 0.5, %v2474_v26  ;;  %v543_v14 = vmul.f32 %v2663_v21, %v2626_v34 }
 0x229   :  { %v844_v53 = vsel %vm841_vm7, %v843_v0, %v839_v4  ;;  %vm548_vm8 = vweird.f32 %v2626_v34  ;;  %v1240_v30 = vand.u32 2147483647, %v2654_v32  ;;  %v1219_v3 = vadd.f32 1.1283791, %v1218_v24 }
 0x22a   :  { %v845_v11 = vmul.f32 %v844_v53, %v820_v5  ;;  %v890_v25 = vmul.f32 2.1237322e-06, %v2668_v56  ;;  %v901_v39 = vmul.f32 3.8918573e-05, %v2668_v56  ;;  %v614_v37 = vmul.f32 %v2517_v35, %v591_v42 }
 0x22b   :  { %v2678_v9 = vpop.eup %1639  ;;  %v544_v26 = vmul.f32 %v2663_v21, %v543_v14  ;;  %v2682_v62 = vadd.f32 1e-05, %v360_v63  ;;  %vm1236_vm9 = vweird.f32 %v2654_v32  ;;  %v1242_v38 = vand.u32 2147483648, %v2654_v32 }
 0x22c   :  { %v1565_v22 = vclamps-f32 %v845_v11, 1.0  ;;  %v891_v33 = vadd.f32 0.00028619796, %v890_v25  ;;  %v902_v52 = vadd.f32 0.001143296, %v901_v39  ;;  %v493_v12 = vmul.f32 %v2678_v9, %v2643_v13 }
 0x22d   :  { %v1642_v46 = vpop.eup %1641  ;;  %v2689_v2 = vadd.f32 %v2535_v57, %v614_v37  ;;  %v545_v36 = vmul.f32 0.5, %v544_v26  ;;  %1643 = vrsqrt.f32 %v2682_v62  ;;  %vm2693_vm10 = vcmp.eq.f32.partialorder %v1240_v30, 8.507059e+37 }
 0x22e   :  { %v1491_v29 = vadd.f32 1.0, %v1565_v22  ;;  %v1232_v47 = vmul.f32 %v1642_v46, %v2654_v32  ;;  %v892_v60 = vmul.f32 %v891_v33, %v2668_v56  ;;  %vm498_vm11 = vweird.f32 %v2643_v13 }
 0x22f   :  { %v903_v59 = vmul.f32 %v902_v52, %v2668_v56  ;;  %v2701_v45 = vmul.f32 0.70710677, %v2689_v2  ;;  %v546_v31 = vsub.f32 1.5, %v545_v36  ;;  %vm549_vm12 = vweird.f32 %v2663_v21 }
 0x230   :  { %v1511_v55 = vmul.f32 %v1491_v29, %v651_v10  ;;  %v1233_v43 = vsub.f32 1.0, %v1232_v47  ;;  %v893_v19 = vadd.f32 0.0036580483, %v892_v60  ;;  %v494_v54 = vmul.f32 %v2678_v9, %v493_v12  ;;  %vm550_vm14 = vmor %vm548_vm8, %vm549_vm12 }
 0x231   :  { %v1243_v58 = vor.u32 1.1754944e-38, %v1242_v38  ;;  %v904_v16 = vadd.f32 0.014752088, %v903_v59  ;;  %v1048_v51 = vmul.f32 %v2701_v45, %v2701_v45  ;;  %v547_v44 = vmul.f32 %v2663_v21, %v546_v31 }
 0x232   :  { %1531 = vst.msk [vmem:[%s3085_s5 + $0x18] sm:$0xff] %vm154_vm2, %v1511_v55  ;;  %v1234_v1 = vmul.f32 %v1642_v46, %v1233_v43  ;;  %vm1237_vm13 = vweird.f32 %v1642_v46  ;;  %v894_v5 = vmul.f32 %v893_v19, %v2668_v56  ;;  %v495_v15 = vmul.f32 0.5, %v494_v54 }
 0x233   :  { %v2715_v8 = vpop.eup %1643  ;;  %v905_v61 = vmul.f32 %v904_v16, %v2668_v56  ;;  %v2718_v0 = vmin.f32 %v1048_v51, 16.0  ;;  %v551_v24 = vsel %vm550_vm14, %v2663_v21, %v547_v44  ;;  %vm499_vm15 = vweird.f32 %v2678_v9  ;;  %vm1238_vm0 = vmor %vm1236_vm9, %vm1237_vm13  ;;  %v296_v44 = vpop.xlane.xlu0 %295 }
 0x234   :  { %v1235_v63 = vadd.f32 %v1642_v46, %v1234_v1  ;;  %v895_v4 = vadd.f32 0.05243302, %v894_v5  ;;  %v598_v42 = vmul.f32 %v551_v24, %v1967_v50  ;;  %v496_v10 = vsub.f32 1.5, %v495_v15  ;;  %vm500_vm1 = vmor %vm498_vm11, %vm499_vm15 }
 0x235   :  { %v1220_v53 = vmul.f32 %v1219_v3, %v2544_v28  ;;  %v906_v34 = vadd.f32 0.112945676, %v905_v61  ;;  %v1050_v14 = vmul.f32 2.1237322e-06, %v2718_v0  ;;  %v1061_v11 = vmul.f32 3.8918573e-05, %v2718_v0 }
 0x236   :  { %v1239_v30 = vsel %vm1238_vm0, %v1642_v46, %v1235_v63  ;;  %v621_v21 = vmul.f32 %v2517_v35, %v598_v42  ;;  %v497_v25 = vmul.f32 %v2678_v9, %v496_v10  ;;  %v563_v39 = vmul.f32 %v2715_v8, %v2682_v62 }
 0x237   :  { %v1244_v50 = vsel %vm2693_vm10, %v1243_v58, %v1239_v30  ;;  %v907_v28 = vmul.f32 %v906_v34, %v2668_v56  ;;  %v1051_v32 = vadd.f32 0.00028619796, %v1050_v14  ;;  %v1062_v3 = vadd.f32 0.001143296, %v1061_v11 }
 0x238   :  { %v1245_v37 = vmul.f32 %v1244_v50, %v1220_v53  ;;  %v896_v26 = vmul.f32 %v895_v4, %v2668_v56  ;;  %v2741_v22 = vadd.f32 %v2535_v57, %v621_v21  ;;  %v501_v33 = vsel %vm500_vm1, %v2678_v9, %v497_v25 }
 0x239   :  { %v908_v52 = vadd.f32 0.4994258, %v907_v28  ;;  %v1052_v12 = vmul.f32 %v1051_v32, %v2718_v0  ;;  %v1063_v46 = vmul.f32 %v1062_v3, %v2718_v0  ;;  %v593_v38 = vmul.f32 %v501_v33, %v1998_v49 }
 0x23a   :  { %v1575_v36 = vclamps-f32 %v1245_v37, 1.0  ;;  %v2748_v29 = vmul.f32 0.70710677, %v2741_v22  ;;  %v661_v59 = vmul.f32 0.5, %v2538_v17  ;;  %v564_v55 = vmul.f32 %v2715_v8, %v563_v39 }
 0x23b   :  { %v909_v13 = vmul.f32 %v908_v52, %v2668_v56  ;;  %v1053_v47 = vadd.f32 0.0036580483, %v1052_v12  ;;  %v1064_v48 = vadd.f32 0.014752088, %v1063_v46  ;;  %v616_v60 = vmul.f32 %v2517_v35, %v593_v38 }
 0x23c   :  { %v1501_v9 = vadd.f32 1.0, %v1575_v36  ;;  %v1328_v31 = vmul.f32 %v2748_v29, %v2748_v29  ;;  %v897_v43 = vadd.f32 0.18741608, %v896_v26  ;;  %v565_v17 = vmul.f32 0.5, %v564_v55 }
 0x23d   :  { %v2756_v49 = vadd.f32 1.0, %v909_v13  ;;  %v1054_v19 = vmul.f32 %v1053_v47, %v2718_v0  ;;  %v1065_v54 = vmul.f32 %v1064_v48, %v2718_v0  ;;  %v2763_v51 = vadd.f32 %v2535_v57, %v616_v60 }
 0x23e   :  { %v1521_v58 = vmul.f32 %v1501_v9, %v661_v59  ;;  %v2760_v16 = vmin.f32 %v1328_v31, 16.0  ;;  %v898_v15 = vmul.f32 %v897_v43, %v2668_v56  ;;  %v346_v63 = vmul.f32 %v296_v44, %v1887_v40 }
 0x23f   :  { %1645 = vrcp.f32 %v2756_v49  ;;  %v1055_v1 = vadd.f32 0.05243302, %v1054_v19  ;;  %v1066_v5 = vadd.f32 0.112945676, %v1065_v54  ;;  %v2777_v10 = vmul.f32 0.70710677, %v2763_v51 }
 0x240   :  { %1541 = vst.msk [vmem:[%s3085_s5 + $0x68] sm:$0xff] %vm154_vm2, %v1521_v58  ;;  %v1330_v61 = vmul.f32 2.1237322e-06, %v2760_v16  ;;  %v1341_v24 = vmul.f32 3.8918573e-05, %v2760_v16  ;;  %v566_v53 = vsub.f32 1.5, %v565_v17  ;;  %vm569_vm3 = vweird.f32 %v2715_v8 }
 0x241   :  { %v1056_v4 = vmul.f32 %v1055_v1, %v2718_v0  ;;  %v1067_v42 = vmul.f32 %v1066_v5, %v2718_v0  ;;  %v2780_v34 = vmul.f32 0.5, %v2638_v41  ;;  %v1128_v30 = vmul.f32 %v2777_v10, %v2777_v10 }
 0x242   :  { %v1331_v14 = vadd.f32 0.00028619796, %v1330_v61  ;;  %v1342_v11 = vadd.f32 0.001143296, %v1341_v24  ;;  %v567_v21 = vmul.f32 %v2715_v8, %v566_v53  ;;  %vm568_vm4 = vweird.f32 %v2682_v62 }
 0x243   :  { %v1068_v56 = vadd.f32 0.4994258, %v1067_v42  ;;  %v899_v39 = vadd.f32 1.1283791, %v898_v15  ;;  %v2789_v41 = vadd.f32 1e-05, %v346_v63  ;;  %vm570_vm5 = vmor %vm568_vm4, %vm569_vm3  ;;  %vm916_vm6 = vweird.f32 %v2756_v49 }
 0x244   :  { %v1332_v50 = vmul.f32 %v1331_v14, %v2760_v16  ;;  %v1343_v28 = vmul.f32 %v1342_v11, %v2760_v16  ;;  %v920_v3 = vand.u32 2147483647, %v2756_v49  ;;  %v1057_v37 = vadd.f32 0.18741608, %v1056_v4 }
 0x245   :  { %v1646_v25 = vpop.eup %1645  ;;  %v1069_v26 = vmul.f32 %v1068_v56, %v2718_v0  ;;  %v2794_v12 = vmin.f32 %v1128_v30, 16.0  ;;  %v571_v62 = vsel %vm570_vm5, %v2715_v8, %v567_v21  ;;  %v922_v38 = vand.u32 2147483648, %v2756_v49 }
 0x246   :  { %v912_v32 = vmul.f32 %v1646_v25, %v2756_v49  ;;  %v1333_v33 = vadd.f32 0.0036580483, %v1332_v50  ;;  %v1344_v52 = vadd.f32 0.014752088, %v1343_v28  ;;  %v600_v13 = vmul.f32 %v571_v62, %v1992_v7 }
 0x247   :  { %v2798_v36 = vadd.f32 1.0, %v1069_v26  ;;  %v1130_v60 = vmul.f32 2.1237322e-06, %v2794_v12  ;;  %v1141_v59 = vmul.f32 3.8918573e-05, %v2794_v12  ;;  %vm917_vm7 = vweird.f32 %v1646_v25 }
 0x248   :  { %v913_v46 = vsub.f32 1.0, %v912_v32  ;;  %v1334_v47 = vmul.f32 %v1333_v33, %v2760_v16  ;;  %v1345_v48 = vmul.f32 %v1344_v52, %v2760_v16  ;;  %v1058_v8 = vmul.f32 %v1057_v37, %v2718_v0  ;;  %vm918_vm8 = vmor %vm916_vm6, %vm917_vm7  ;;  %v314_v33 = vpop.xlane.xlu0 %313 }
 0x249   :  { %1647 = vrcp.f32 %v2798_v36  ;;  %v623_v55 = vmul.f32 %v2517_v35, %v600_v13  ;;  %v1131_v19 = vadd.f32 0.00028619796, %v1130_v60  ;;  %v1142_v54 = vadd.f32 0.001143296, %v1141_v59 }
 0x24a   :  { %v914_v9 = vmul.f32 %v1646_v25, %v913_v46  ;;  %v1335_v31 = vadd.f32 0.05243302, %v1334_v47  ;;  %1649 = vrsqrt.f32 %v2789_v41  ;;  %v1346_v43 = vadd.f32 0.112945676, %v1345_v48 }
 0x24b   :  { %v900_v58 = vmul.f32 %v899_v39, %v2646_v18  ;;  %vm921_vm9 = vcmp.eq.f32.partialorder %v920_v3, 8.507059e+37  ;;  %v923_v17 = vor.u32 1.1754944e-38, %v922_v38  ;;  %v2812_v49 = vadd.f32 %v2535_v57, %v623_v55 }
 0x24c   :  { %v915_v7 = vadd.f32 %v1646_v25, %v914_v9  ;;  %v1347_v0 = vmul.f32 %v1346_v43, %v2760_v16  ;;  %v1132_v1 = vmul.f32 %v1131_v19, %v2794_v12  ;;  %v1143_v5 = vmul.f32 %v1142_v54, %v2794_v12  ;;  %v335_v19 = vpop.xlane.xlu1 %334 }
 0x24d   :  { %v1059_v61 = vadd.f32 1.1283791, %v1058_v8  ;;  %v1336_v24 = vmul.f32 %v1335_v31, %v2760_v16  ;;  %v2819_v63 = vmul.f32 0.70710677, %v2812_v49  ;;  %v1080_v30 = vand.u32 2147483647, %v2798_v36 }
 0x24e   :  { %v919_v44 = vsel %vm918_vm8, %v1646_v25, %v915_v7  ;;  %v1348_v42 = vadd.f32 0.4994258, %v1347_v0  ;;  %v1133_v53 = vadd.f32 0.0036580483, %v1132_v1  ;;  %v1144_v14 = vadd.f32 0.014752088, %v1143_v5 }
 0x24f   :  { %v924_v15 = vsel %vm921_vm9, %v923_v17, %v919_v44  ;;  %v1648_v18 = vpop.eup %1647  ;;  %v1082_v21 = vand.u32 2147483648, %v2798_v36  ;;  %v1408_v25 = vmul.f32 %v2819_v63, %v2819_v63  ;;  %v1337_v37 = vadd.f32 0.18741608, %v1336_v24 }
 0x250   :  { %v925_v4 = vmul.f32 %v924_v15, %v900_v58  ;;  %v2821_v11 = vpop.eup %1649  ;;  %v1072_v56 = vmul.f32 %v1648_v18, %v2798_v36  ;;  %v1349_v50 = vmul.f32 %v1348_v42, %v2760_v16  ;;  %v1134_v28 = vmul.f32 %v1133_v53, %v2794_v12 }
 0x251   :  { %v1145_v32 = vmul.f32 %v1144_v14, %v2794_v12  ;;  %vm1077_vm10 = vweird.f32 %v1648_v18  ;;  %v2831_v26 = vmin.f32 %v1408_v25, 16.0  ;;  %v423_v38 = vmul.f32 %v2821_v11, %v2789_v41 }
 0x252   :  { %v1567_v39 = vclamps-f32 %v925_v4, 1.0  ;;  %v1073_v3 = vsub.f32 1.0, %v1072_v56  ;;  %v2833_v62 = vadd.f32 1.0, %v1349_v50  ;;  %v1135_v47 = vadd.f32 0.05243302, %v1134_v28 }
 0x253   :  { %v1146_v46 = vadd.f32 0.112945676, %v1145_v32  ;;  %v1410_v48 = vmul.f32 2.1237322e-06, %v2831_v26  ;;  %v1421_v60 = vmul.f32 3.8918573e-05, %v2831_v26  ;;  %v1060_v8 = vmul.f32 %v1059_v61, %v2701_v45 }
 0x254   :  { %v1493_v52 = vadd.f32 1.0, %v1567_v39  ;;  %v1074_v13 = vmul.f32 %v1648_v18, %v1073_v3  ;;  %v657_v9 = vmul.f32 0.5, %v2689_v2  ;;  %1651 = vrcp.f32 %v2833_v62 }
 0x255   :  { %vm1076_vm11 = vweird.f32 %v2798_v36  ;;  %v1338_v55 = vmul.f32 %v1337_v37, %v2760_v16  ;;  %v1147_v7 = vmul.f32 %v1146_v46, %v2794_v12  ;;  %v1411_v2 = vadd.f32 0.00028619796, %v1410_v48 }
 0x256   :  { %v1513_v59 = vmul.f32 %v1493_v52, %v2780_v34  ;;  %v1075_v31 = vadd.f32 %v1648_v18, %v1074_v13  ;;  %vm1078_vm12 = vmor %vm1076_vm11, %vm1077_vm10  ;;  %v1083_v34 = vor.u32 1.1754944e-38, %v1082_v21  ;;  %v1422_v43 = vadd.f32 0.001143296, %v1421_v60  ;;  %v341_v21 = vpop.xlane.xlu0 %340 }
 0x257   :  { %v424_v45 = vmul.f32 %v2821_v11, %v423_v38  ;;  %vm428_vm13 = vweird.f32 %v2789_v41  ;;  %vm1081_vm14 = vcmp.eq.f32.partialorder %v1080_v30, 8.507059e+37  ;;  %v1136_v16 = vmul.f32 %v1135_v47, %v2794_v12 }
 0x258   :  { %1533 = vst.msk [vmem:[%s3085_s5 + $0x28] sm:$0xff] %vm154_vm2, %v1513_v59  ;;  %v1079_v36 = vsel %vm1078_vm12, %v1648_v18, %v1075_v31  ;;  %v1148_v54 = vadd.f32 0.4994258, %v1147_v7  ;;  %v1412_v17 = vmul.f32 %v1411_v2, %v2831_v26  ;;  %v1423_v44 = vmul.f32 %v1422_v43, %v2831_v26 }
 0x259   :  { %v1084_v58 = vsel %vm1081_vm14, %v1083_v34, %v1079_v36  ;;  %v425_v0 = vmul.f32 0.5, %v424_v45  ;;  %v1339_v5 = vadd.f32 1.1283791, %v1338_v55  ;;  %v359_v61 = vmul.f32 %v335_v19, %v1887_v40 }
 0x25a   :  { %v1085_v1 = vmul.f32 %v1084_v58, %v1060_v8  ;;  %v1149_v15 = vmul.f32 %v1148_v54, %v2794_v12  ;;  %v1652_v24 = vpop.eup %1651  ;;  %v1413_v4 = vadd.f32 0.0036580483, %v1412_v17  ;;  %v1424_v42 = vadd.f32 0.014752088, %v1423_v44 }
 0x25b   :  { %v426_v18 = vsub.f32 1.5, %v425_v0  ;;  %v352_v53 = vmul.f32 %v314_v33, %v1887_v40  ;;  %v1352_v56 = vmul.f32 %v1652_v24, %v2833_v62  ;;  %v1137_v30 = vadd.f32 0.18741608, %v1136_v16 }
 0x25c   :  { %v1571_v14 = vclamps-f32 %v1085_v1, 1.0  ;;  %vm429_vm15 = vweird.f32 %v2821_v11  ;;  %v2861_v25 = vadd.f32 1.0, %v1149_v15  ;;  %v1414_v39 = vmul.f32 %v1413_v4, %v2831_v26 }
 0x25d   :  { %v1425_v50 = vmul.f32 %v1424_v42, %v2831_v26  ;;  %v427_v28 = vmul.f32 %v2821_v11, %v426_v18  ;;  %v1353_v3 = vsub.f32 1.0, %v1352_v56  ;;  %v1360_v37 = vand.u32 2147483647, %v2833_v62  ;;  %vm430_vm1 = vmor %vm428_vm13, %vm429_vm15 }
 0x25e   :  { %v1497_v32 = vadd.f32 1.0, %v1571_v14  ;;  %v2867_v33 = vadd.f32 1e-05, %v359_v61  ;;  %vm1357_vm0 = vweird.f32 %v1652_v24  ;;  %v1362_v52 = vand.u32 2147483648, %v2833_v62 }
 0x25f   :  { %1653 = vrcp.f32 %v2861_v25  ;;  %v361_v46 = vmul.f32 %v341_v21, %v1887_v40  ;;  %v1354_v13 = vmul.f32 %v1652_v24, %v1353_v3  ;;  %v1415_v47 = vadd.f32 0.05243302, %v1414_v39 }
 0x260   :  { %v1517_v38 = vmul.f32 %v1497_v32, %v657_v9  ;;  %v1426_v48 = vadd.f32 0.112945676, %v1425_v50  ;;  %vm1356_vm3 = vweird.f32 %v2833_v62  ;;  %v1138_v60 = vmul.f32 %v1137_v30, %v2794_v12 }
 0x261   :  { %v431_v59 = vsel %vm430_vm1, %v2821_v11, %v427_v28  ;;  %1655 = vrsqrt.f32 %v2867_v33  ;;  %v1355_v40 = vadd.f32 %v1652_v24, %v1354_v13  ;;  %v1416_v9 = vmul.f32 %v1415_v47, %v2831_v26  ;;  %vm1358_vm4 = vmor %vm1356_vm3, %vm1357_vm0 }
 0x262   :  { %1537 = vst.msk [vmem:[%s3085_s5 + $0x48] sm:$0xff] %vm154_vm2, %v1517_v38  ;;  %v1427_v8 = vmul.f32 %v1426_v48, %v2831_v26  ;;  %v586_v41 = vmul.f32 %v431_v59, %v1989_v6  ;;  %v1340_v62 = vmul.f32 %v1339_v5, %v2748_v29  ;;  %v1363_v12 = vor.u32 1.1754944e-38, %v1362_v52 }
 0x263   :  { %v2889_v11 = vadd.f32 1e-05, %v352_v53  ;;  %v2891_v31 = vadd.f32 1e-05, %v361_v46  ;;  %v1359_v55 = vsel %vm1358_vm4, %v1652_v24, %v1355_v40  ;;  %vm1361_vm5 = vcmp.eq.f32.partialorder %v1360_v37, 8.507059e+37 }
 0x264   :  { %v1428_v7 = vadd.f32 0.4994258, %v1427_v8  ;;  %v609_v34 = vmul.f32 %v2517_v35, %v586_v41  ;;  %v1364_v43 = vsel %vm1361_vm5, %v1363_v12, %v1359_v55  ;;  %v1139_v45 = vadd.f32 1.1283791, %v1138_v60 }
 0x265   :  { %v1654_v2 = vpop.eup %1653  ;;  %v1417_v19 = vadd.f32 0.18741608, %v1416_v9  ;;  %1657 = vrsqrt.f32 %v2889_v11  ;;  %v664_v6 = vmul.f32 0.5, %v2741_v22  ;;  %v1365_v29 = vmul.f32 %v1364_v43, %v1340_v62 }
 0x266   :  { %v1152_v36 = vmul.f32 %v1654_v2, %v2861_v25  ;;  %v1160_v16 = vand.u32 2147483647, %v2861_v25  ;;  %v1162_v58 = vand.u32 2147483648, %v2861_v25  ;;  %v1429_v17 = vmul.f32 %v1428_v7, %v2831_v26 }
 0x267   :  { %v2898_v54 = vpop.eup %1655  ;;  %v2903_v44 = vadd.f32 %v2535_v57, %v609_v34  ;;  %1659 = vrsqrt.f32 %v2891_v31  ;;  %v1578_v0 = vclamps-f32 %v1365_v29, 1.0  ;;  %v659_v1 = vmul.f32 0.5, %v2763_v51 }
 0x268   :  { %v1153_v22 = vsub.f32 1.0, %v1152_v36  ;;  %v553_v5 = vmul.f32 %v2898_v54, %v2867_v33  ;;  %v1140_v15 = vmul.f32 %v1139_v45, %v2777_v10  ;;  %v1418_v61 = vmul.f32 %v1417_v19, %v2831_v26 }
 0x269   :  { %v2911_v24 = vadd.f32 1.0, %v1429_v17  ;;  %v2914_v4 = vmul.f32 0.70710677, %v2903_v44  ;;  %v1504_v42 = vadd.f32 1.0, %v1578_v0  ;;  %vm1157_vm6 = vweird.f32 %v1654_v2 }
 0x26a   :  { %v1154_v18 = vmul.f32 %v1654_v2, %v1153_v22  ;;  %v554_v53 = vmul.f32 %v2898_v54, %v553_v5  ;;  %vm1156_vm7 = vweird.f32 %v2861_v25  ;;  %vm2920_vm8 = vcmp.eq.f32.partialorder %v1160_v16, 8.507059e+37 }
 0x26b   :  { %v2917_v14 = vpop.eup %1657  ;;  %v1163_v10 = vor.u32 1.1754944e-38, %v1162_v58  ;;  %1661 = vrcp.f32 %v2911_v24  ;;  %v1524_v26 = vmul.f32 %v1504_v42, %v664_v6  ;;  %v848_v30 = vmul.f32 %v2914_v4, %v2914_v4  ;;  %vm1158_vm9 = vmor %vm1156_vm7, %vm1157_vm6 }
 0x26c   :  { %v1155_v56 = vadd.f32 %v1654_v2, %v1154_v18  ;;  %v555_v21 = vmul.f32 0.5, %v554_v53  ;;  %v1419_v50 = vadd.f32 1.1283791, %v1418_v61  ;;  %vm558_vm10 = vweird.f32 %v2867_v33 }
 0x26d   :  { %v2927_v39 = vpop.eup %1659  ;;  %v483_v25 = vmul.f32 %v2917_v14, %v2889_v11  ;;  %vm488_vm11 = vweird.f32 %v2889_v11  ;;  %1544 = vst.msk [vmem:[%s3085_s5 + $0x80] sm:$0xff] %vm154_vm2, %v1524_v26  ;;  %v2937_v32 = vmin.f32 %v848_v30, 16.0  ;;  %v1440_v46 = vand.u32 2147483647, %v2911_v24 }
 0x26e   :  { %v1159_v28 = vsel %vm1158_vm9, %v1654_v2, %v1155_v56  ;;  %v556_v3 = vsub.f32 1.5, %v555_v21  ;;  %v573_v37 = vmul.f32 %v2927_v39, %v2891_v31  ;;  %vm559_vm12 = vweird.f32 %v2898_v54  ;;  %v1674_v56 = vld [vmem:[%s3084_s4] ss:$0 sm:$0xff] }
 0x26f   :  { %v1164_v52 = vsel %vm2920_vm8, %v1163_v10, %v1159_v28  ;;  %v484_v38 = vmul.f32 %v2917_v14, %v483_v25  ;;  %v850_v47 = vmul.f32 2.1237322e-06, %v2937_v32  ;;  %v861_v48 = vmul.f32 3.8918573e-05, %v2937_v32  ;;  %vm560_vm14 = vmor %vm558_vm10, %vm559_vm12 }
 0x270   :  { %v1165_v13 = vmul.f32 %v1164_v52, %v1140_v15  ;;  %v557_v60 = vmul.f32 %v2898_v54, %v556_v3  ;;  %v1442_v40 = vand.u32 2147483648, %v2911_v24  ;;  %vm489_vm13 = vweird.f32 %v2917_v14 }
 0x271   :  { %v1662_v59 = vpop.eup %1661  ;;  %v485_v9 = vmul.f32 0.5, %v484_v38  ;;  %v574_v8 = vmul.f32 %v2927_v39, %v573_v37  ;;  %v851_v12 = vadd.f32 0.00028619796, %v850_v47  ;;  %vm579_vm15 = vweird.f32 %v2927_v39  ;;  %vm490_vm1 = vmor %vm488_vm11, %vm489_vm13 }
 0x272   :  { %v1573_v41 = vclamps-f32 %v1165_v13, 1.0  ;;  %v1432_v62 = vmul.f32 %v1662_v59, %v2911_v24  ;;  %v862_v55 = vadd.f32 0.001143296, %v861_v48  ;;  %v561_v7 = vsel %vm560_vm14, %v2898_v54, %v557_v60 }
 0x273   :  { %v486_v34 = vsub.f32 1.5, %v485_v9  ;;  %v575_v2 = vmul.f32 0.5, %v574_v8  ;;  %v852_v19 = vmul.f32 %v851_v12, %v2937_v32  ;;  %v599_v6 = vmul.f32 %v561_v7, %v2008_v23 }
 0x274   :  { %v1499_v43 = vadd.f32 1.0, %v1573_v41  ;;  %v1433_v45 = vsub.f32 1.0, %v1432_v62  ;;  %vm1437_vm0 = vweird.f32 %v1662_v59  ;;  %v863_v29 = vmul.f32 %v862_v55, %v2937_v32 }
 0x275   :  { %v487_v36 = vmul.f32 %v2917_v14, %v486_v34  ;;  %v576_v33 = vsub.f32 1.5, %v575_v2  ;;  %v853_v17 = vadd.f32 0.0036580483, %v852_v19  ;;  %v622_v0 = vmul.f32 %v2517_v35, %v599_v6 }
 0x276   :  { %v1519_v16 = vmul.f32 %v1499_v43, %v659_v1  ;;  %v1434_v58 = vmul.f32 %v1662_v59, %v1433_v45  ;;  %v864_v54 = vadd.f32 0.014752088, %v863_v29  ;;  %vm578_vm3 = vweird.f32 %v2891_v31 }
 0x277   :  { %v491_v22 = vsel %vm490_vm1, %v2917_v14, %v487_v36  ;;  %v577_v23 = vmul.f32 %v2927_v39, %v576_v33  ;;  %vm1436_vm4 = vweird.f32 %v2911_v24  ;;  %v2975_v35 = vadd.f32 %v2535_v57, %v622_v0  ;;  %vm580_vm5 = vmor %vm578_vm3, %vm579_vm15 }
 0x278   :  { %1539 = vst.msk [vmem:[%s3085_s5 + $0x58] sm:$0xff] %vm154_vm2, %v1519_v16  ;;  %v1435_v1 = vadd.f32 %v1662_v59, %v1434_v58  ;;  %v592_v11 = vmul.f32 %v491_v22, %v2012_v27  ;;  %v1420_v5 = vmul.f32 %v1419_v50, %v2819_v63  ;;  %vm1438_vm6 = vmor %vm1436_vm4, %vm1437_vm0  ;;  %v1443_v31 = vor.u32 1.1754944e-38, %v1442_v40  ;;  %v1673_v63 = vld [vmem:[%s3083_s3] ss:$0 sm:$0xff] }
 0x279   :  { %v865_v15 = vmul.f32 %v864_v54, %v2937_v32  ;;  %v581_v61 = vsel %vm580_vm5, %v2927_v39, %v577_v23  ;;  %vm1441_vm7 = vcmp.eq.f32.partialorder %v1440_v46, 8.507059e+37  ;;  %v854_v24 = vmul.f32 %v853_v17, %v2937_v32 }
 0x27a   :  { %v1439_v42 = vsel %vm1438_vm6, %v1662_v59, %v1435_v1  ;;  %v2986_v57 = vmul.f32 0.70710677, %v2975_v35  ;;  %v615_v53 = vmul.f32 %v1673_v63, %v592_v11  ;;  %v601_v14 = vmul.f32 %v581_v61, %v2023_v20 }
 0x27b   :  { %v1444_v27 = vsel %vm1441_vm7, %v1443_v31, %v1439_v42  ;;  %v866_v18 = vadd.f32 0.112945676, %v865_v15  ;;  %v855_v25 = vadd.f32 0.05243302, %v854_v24  ;;  %v666_v37 = vmul.f32 0.5, %v2812_v49 }
 0x27c   :  { %v1445_v51 = vmul.f32 %v1444_v27, %v1420_v5  ;;  %v1368_v10 = vmul.f32 %v2986_v57, %v2986_v57  ;;  %v2998_v30 = vadd.f32 %v1674_v56, %v615_v53  ;;  %v624_v21 = vmul.f32 %v1673_v63, %v601_v14 }
 0x27d   :  { %v867_v26 = vmul.f32 %v866_v18, %v2937_v32  ;;  %v856_v9 = vmul.f32 %v855_v25, %v2937_v32 }
 0x27e   :  { %v1580_v39 = vclamps-f32 %v1445_v51, 1.0  ;;  %v3000_v50 = vmin.f32 %v1368_v10, 16.0  ;;  %v3003_v20 = vmul.f32 0.70710677, %v2998_v30  ;;  %v3005_v3 = vadd.f32 %v1674_v56, %v624_v21 }
 0x27f   :  { %v868_v28 = vadd.f32 0.4994258, %v867_v26  ;;  %v857_v2 = vadd.f32 0.18741608, %v856_v9 }
 0x280   :  { %v1506_v52 = vadd.f32 1.0, %v1580_v39  ;;  %v1370_v46 = vmul.f32 2.1237322e-06, %v3000_v50  ;;  %v1381_v38 = vmul.f32 3.8918573e-05, %v3000_v50  ;;  %v1088_v47 = vmul.f32 %v3003_v20, %v3003_v20 }
 0x281   :  { %v869_v13 = vmul.f32 %v868_v28, %v2937_v32  ;;  %v3014_v48 = vmul.f32 0.70710677, %v3005_v3  ;;  %v858_v54 = vmul.f32 %v857_v2, %v2937_v32  ;;  %v652_v2 = vmul.f32 0.5, %v2903_v44 }
 0x282   :  { %v1526_v60 = vmul.f32 %v1506_v52, %v666_v37  ;;  %v1371_v59 = vadd.f32 0.00028619796, %v1370_v46  ;;  %v1382_v40 = vadd.f32 0.001143296, %v1381_v38  ;;  %v3017_v49 = vmin.f32 %v1088_v47, 16.0 }
 0x283   :  { %v870_v8 = vadd.f32 1.0, %v869_v13  ;;  %v1448_v41 = vmul.f32 %v3014_v48, %v3014_v48  ;;  %v859_v63 = vadd.f32 1.1283791, %v858_v54 }
 0x284   :  { %1546 = vst.msk [vmem:[%s3085_s5 + $0x90] sm:$0xff] %vm154_vm2, %v1526_v60  ;;  %v1372_v62 = vmul.f32 %v1371_v59, %v3000_v50  ;;  %v1383_v12 = vmul.f32 %v1382_v40, %v3000_v50  ;;  %v1090_v34 = vmul.f32 2.1237322e-06, %v3017_v49  ;;  %v1101_v43 = vmul.f32 3.8918573e-05, %v3017_v49 }
 0x285   :  { %1663 = vrcp.f32 %v870_v8  ;;  %v3029_v45 = vmin.f32 %v1448_v41, 16.0  ;;  %v882_v53 = vand.u32 2147483648, %v870_v8  ;;  %v880_v10 = vand.u32 2147483647, %v870_v8 }
 0x286   :  { %v1373_v55 = vadd.f32 0.0036580483, %v1372_v62  ;;  %v1384_v7 = vadd.f32 0.014752088, %v1383_v12  ;;  %v1091_v6 = vadd.f32 0.00028619796, %v1090_v34  ;;  %vm876_vm9 = vweird.f32 %v870_v8 }
 0x287   :  { %v1102_v36 = vadd.f32 0.001143296, %v1101_v43  ;;  %v1450_v33 = vmul.f32 2.1237322e-06, %v3029_v45  ;;  %v1461_v16 = vmul.f32 3.8918573e-05, %v3029_v45  ;;  %v860_v47 = vmul.f32 %v859_v63, %v2914_v4 }
 0x288   :  { %v1385_v19 = vmul.f32 %v1384_v7, %v3000_v50  ;;  %v1374_v29 = vmul.f32 %v1373_v55, %v3000_v50  ;;  %v1092_v17 = vmul.f32 %v1091_v6, %v3017_v49  ;;  %v883_v46 = vor.u32 1.1754944e-38, %v882_v53 }
 0x289   :  { %v1103_v22 = vmul.f32 %v1102_v36, %v3017_v49  ;;  %v1451_v23 = vadd.f32 0.00028619796, %v1450_v33  ;;  %v1462_v1 = vadd.f32 0.001143296, %v1461_v16  ;;  %vm881_vm11 = vcmp.eq.f32.partialorder %v880_v10, 8.507059e+37 }
 0x28a   :  { %v1386_v58 = vadd.f32 0.112945676, %v1385_v19  ;;  %v1375_v31 = vadd.f32 0.05243302, %v1374_v29  ;;  %v1093_v18 = vadd.f32 0.0036580483, %v1092_v17 }
 0x28b   :  { %v1664_v0 = vpop.eup %1663  ;;  %v1104_v15 = vadd.f32 0.014752088, %v1103_v22  ;;  %v1452_v61 = vmul.f32 %v1451_v23, %v3029_v45  ;;  %v1463_v42 = vmul.f32 %v1462_v1, %v3029_v45 }
 0x28c   :  { %v872_v11 = vmul.f32 %v1664_v0, %v870_v8  ;;  %v1387_v5 = vmul.f32 %v1386_v58, %v3000_v50  ;;  %vm877_vm8 = vweird.f32 %v1664_v0  ;;  %v1376_v56 = vmul.f32 %v1375_v31, %v3000_v50 }
 0x28d   :  { %v1105_v32 = vmul.f32 %v1104_v15, %v3017_v49  ;;  %v1464_v14 = vadd.f32 0.014752088, %v1463_v42  ;;  %v1453_v39 = vadd.f32 0.0036580483, %v1452_v61  ;;  %v1094_v52 = vmul.f32 %v1093_v18, %v3017_v49  ;;  %vm878_vm10 = vmor %vm876_vm9, %vm877_vm8 }
 0x28e   :  { %v873_v24 = vsub.f32 1.0, %v872_v11  ;;  %v1388_v27 = vadd.f32 0.4994258, %v1387_v5  ;;  %v1377_v40 = vadd.f32 0.18741608, %v1376_v56 }
 0x28f   :  { %v1106_v21 = vadd.f32 0.112945676, %v1105_v32  ;;  %v1465_v25 = vmul.f32 %v1464_v14, %v3029_v45  ;;  %v1454_v9 = vmul.f32 %v1453_v39, %v3029_v45  ;;  %v1095_v62 = vadd.f32 0.05243302, %v1094_v52 }
 0x290   :  { %v874_v51 = vmul.f32 %v1664_v0, %v873_v24  ;;  %v1389_v26 = vmul.f32 %v1388_v27, %v3000_v50  ;;  %v1378_v4 = vmul.f32 %v1377_v40, %v3000_v50 }
 0x291   :  { %v1107_v38 = vmul.f32 %v1106_v21, %v3017_v49  ;;  %v1466_v13 = vadd.f32 0.112945676, %v1465_v25  ;;  %v1455_v43 = vadd.f32 0.05243302, %v1454_v9  ;;  %v1096_v29 = vmul.f32 %v1095_v62, %v3017_v49 }
 0x292   :  { %v875_v28 = vadd.f32 %v1664_v0, %v874_v51  ;;  %v1390_v37 = vadd.f32 1.0, %v1389_v26  ;;  %v1379_v44 = vadd.f32 1.1283791, %v1378_v4  ;;  %v667_v4 = vmul.f32 0.5, %v3005_v3 }
 0x293   :  { %v1108_v8 = vadd.f32 0.4994258, %v1107_v38  ;;  %v1467_v12 = vmul.f32 %v1466_v13, %v3029_v45  ;;  %v1097_v22 = vadd.f32 0.18741608, %v1096_v29 }
 0x294   :  { %v879_v60 = vsel %vm878_vm10, %v1664_v0, %v875_v28  ;;  %1665 = vrcp.f32 %v1390_v37  ;;  %v1456_v0 = vmul.f32 %v1455_v43, %v3029_v45  ;;  %v1402_v50 = vand.u32 2147483648, %v1390_v37 }
 0x295   :  { %v884_v59 = vsel %vm881_vm11, %v883_v46, %v879_v60  ;;  %v1109_v7 = vmul.f32 %v1108_v8, %v3017_v49  ;;  %v1468_v34 = vadd.f32 0.4994258, %v1467_v12  ;;  %v1400_v1 = vand.u32 2147483647, %v1390_v37 }
 0x296   :  { %v885_v41 = vmul.f32 %v884_v59, %v860_v47  ;;  %vm1396_vm13 = vweird.f32 %v1390_v37  ;;  %v1457_v5 = vadd.f32 0.18741608, %v1456_v0  ;;  %v1403_v15 = vor.u32 1.1754944e-38, %v1402_v50 }
 0x297   :  { %v1110_v36 = vadd.f32 1.0, %v1109_v7  ;;  %v1469_v33 = vmul.f32 %v1468_v34, %v3029_v45  ;;  %v1098_v61 = vmul.f32 %v1097_v22, %v3017_v49  ;;  %v1380_v42 = vmul.f32 %v1379_v44, %v2986_v57 }
 0x298   :  { %v1566_v55 = vclamps-f32 %v885_v41, 1.0  ;;  %vm1401_vm15 = vcmp.eq.f32.partialorder %v1400_v1, 8.507059e+37  ;;  %v1458_v14 = vmul.f32 %v1457_v5, %v3029_v45  ;;  %v665_v49 = vmul.f32 0.5, %v2975_v35 }
 0x299   :  { %1667 = vrcp.f32 %v1110_v36  ;;  %v1470_v54 = vadd.f32 1.0, %v1469_v33  ;;  %v1099_v51 = vadd.f32 1.1283791, %v1098_v61  ;;  %v1122_v10 = vand.u32 2147483648, %v1110_v36 }
 0x29a   :  { %v1666_v19 = vpop.eup %1665  ;;  %v1492_v6 = vadd.f32 1.0, %v1566_v55  ;;  %v1120_v39 = vand.u32 2147483647, %v1110_v36  ;;  %vm1116_vm1 = vweird.f32 %v1110_v36  ;;  %v658_v55 = vmul.f32 0.5, %v2998_v30 }
 0x29b   :  { %v1392_v16 = vmul.f32 %v1666_v19, %v1390_v37  ;;  %vm1397_vm12 = vweird.f32 %v1666_v19  ;;  %1669 = vrcp.f32 %v1470_v54  ;;  %v1459_v37 = vadd.f32 1.1283791, %v1458_v14 }
 0x29c   :  { %v1512_v58 = vmul.f32 %v1492_v6, %v652_v2  ;;  %vm1398_vm14 = vmor %vm1396_vm13, %vm1397_vm12  ;;  %v1482_v52 = vand.u32 2147483648, %v1470_v54  ;;  %v1123_v46 = vor.u32 1.1754944e-38, %v1122_v10  ;;  %v1480_v45 = vand.u32 2147483647, %v1470_v54 }
 0x29d   :  { %v1393_v17 = vsub.f32 1.0, %v1392_v16  ;;  %v1100_v47 = vmul.f32 %v1099_v51, %v3003_v20  ;;  %vm1121_vm5 = vcmp.eq.f32.partialorder %v1120_v39, 8.507059e+37  ;;  %vm1476_vm6 = vweird.f32 %v1470_v54 }
 0x29e   :  { %1532 = vst.msk [vmem:[%s3085_s5 + $0x20] sm:$0xff] %vm154_vm2, %v1512_v58  ;;  %v1483_v9 = vor.u32 1.1754944e-38, %v1482_v52  ;;  %v1460_v41 = vmul.f32 %v1459_v37, %v3014_v48  ;;  %vm1481_vm8 = vcmp.eq.f32.partialorder %v1480_v45, 8.507059e+37 }
 0x29f   :  { %v1394_v23 = vmul.f32 %v1666_v19, %v1393_v17  ;;  %v1668_v31 = vpop.eup %1667 }
 0x2a0   :  { %v1112_v27 = vmul.f32 %v1668_v31, %v1110_v36  ;;  %vm1117_vm0 = vweird.f32 %v1668_v31 }
 0x2a1   :  { %v1395_v11 = vadd.f32 %v1666_v19, %v1394_v23  ;;  %v1670_v63 = vpop.eup %1669  ;;  %vm1118_vm3 = vmor %vm1116_vm1, %vm1117_vm0 }
 0x2a2   :  { %v1113_v32 = vsub.f32 1.0, %v1112_v27  ;;  %v1472_v26 = vmul.f32 %v1670_v63, %v1470_v54  ;;  %vm1477_vm4 = vweird.f32 %v1670_v63 }
 0x2a3   :  { %v1399_v24 = vsel %vm1398_vm14, %v1666_v19, %v1395_v11  ;;  %vm1478_vm7 = vmor %vm1476_vm6, %vm1477_vm4 }
 0x2a4   :  { %v1404_v18 = vsel %vm1401_vm15, %v1403_v15, %v1399_v24  ;;  %v1114_v21 = vmul.f32 %v1668_v31, %v1113_v32  ;;  %v1473_v57 = vsub.f32 1.0, %v1472_v26 }
 0x2a5   :  { %v1405_v53 = vmul.f32 %v1404_v18, %v1380_v42 }
 0x2a6   :  { %v1115_v28 = vadd.f32 %v1668_v31, %v1114_v21  ;;  %v1474_v38 = vmul.f32 %v1670_v63, %v1473_v57 }
 0x2a7   :  { %v1579_v56 = vclamps-f32 %v1405_v53, 1.0 }
 0x2a8   :  { %v1119_v60 = vsel %vm1118_vm3, %v1668_v31, %v1115_v28  ;;  %v1475_v40 = vadd.f32 %v1670_v63, %v1474_v38 }
 0x2a9   :  { %v1505_v25 = vadd.f32 1.0, %v1579_v56  ;;  %v1124_v59 = vsel %vm1121_vm5, %v1123_v46, %v1119_v60 }
 0x2aa   :  { %v1125_v35 = vmul.f32 %v1124_v59, %v1100_v47  ;;  %v1479_v62 = vsel %vm1478_vm7, %v1670_v63, %v1475_v40 }
 0x2ab   :  { %v1525_v13 = vmul.f32 %v1505_v25, %v665_v49  ;;  %v1484_v12 = vsel %vm1481_vm8, %v1483_v9, %v1479_v62 }
 0x2ac   :  { %v1572_v8 = vclamps-f32 %v1125_v35, 1.0  ;;  %v1485_v20 = vmul.f32 %v1484_v12, %v1460_v41 }
 0x2ad   :  { %1545 = vst.msk [vmem:[%s3085_s5 + $0x88] sm:$0xff] %vm154_vm2, %v1525_v13 }
 0x2ae   :  { %v1498_v7 = vadd.f32 1.0, %v1572_v8  ;;  %v1581_v34 = vclamps-f32 %v1485_v20, 1.0 }
 0x2b0   :  { %v1518_v2 = vmul.f32 %v1498_v7, %v658_v55  ;;  %v1507_v43 = vadd.f32 1.0, %v1581_v34 }
 0x2b2   :  { %1538 = vst.msk [vmem:[%s3085_s5 + $0x50] sm:$0xff] %vm154_vm2, %v1518_v2  ;;  %v1527_v19 = vmul.f32 %v1507_v43, %v667_v4 }
 0x2b4   :  { %1547 = vst.msk [vmem:[%s3085_s5 + $0x98] sm:$0xff] %vm154_vm2, %v1527_v19 }

// kernel: _lambda_.17
= control target key start
LH: loop header
LB: loop body
LE: loop exit
PB: predicated region body
PF: predicated region fallthrough
CT: control target
= control target key end

     0   :  { %vm58_vm0 = vcmask 785408   ;;  %vm110_vm1 = vcmask 261120   ;;  %s1582_s1 = inlined_call_operand.vmem [shape: f32[96,32], index: 1, kind: input, shape index: {}]   ;;  %s1583_s2 = inlined_call_operand.vmem [shape: f32[1,32], index: 2, kind: input, shape index: {}]   ;;  %s1584_s0 = inlined_call_operand.vmem [shape: f32[78,96], index: 0, kind: input, shape index: {}]   ;;  %s1585_s3 = inlined_call_operand.vmem [shape: f32[1,32], index: 3, kind: input, shape index: {}]   ;;  %s1586_s4 = inlined_call_operand.vmem [shape: f32[1,32], index: 4, kind: input, shape index: {}]   ;;  %s1587_s5 = inlined_call_operand.vmem [shape: f32[78,32], index: 5, kind: output, shape index: {}]  }
   0x1   :  { %v46_v0 = vld [vmem:[%s1582_s1 + $0x50] sm:$0xff]  ;;  %v47_v1 = vld [vmem:[%s1582_s1 + $0x58] sm:$0xff]  ;;  %v44_v2 = vld [vmem:[%s1582_s1 + $0x40] sm:$0xff] }
   0x2   :  { %v53_v3 = vpack.c.bf16 %v47_v1, %v46_v0  ;;  %v45_v4 = vld [vmem:[%s1582_s1 + $0x48] sm:$0xff]  ;;  %v42_v6 = vld [vmem:[%s1582_s1 + $0x30] sm:$0xff]  ;;  %v43_v7 = vld [vmem:[%s1582_s1 + $0x38] sm:$0xff]  ;;  %v897_v0 = vmov 32.0  }
   0x3   :  { %v52_v5 = vpack.c.bf16 %v45_v4, %v44_v2  ;;  %v51_v8 = vpack.c.bf16 %v43_v7, %v42_v6  ;;  %v40_v9 = vld [vmem:[%s1582_s1 + $0x20] sm:$0xff]  ;;  %v41_v10 = vld [vmem:[%s1582_s1 + $0x28] sm:$0xff]  ;;  %v38_v12 = vld [vmem:[%s1582_s1 + $0x10] sm:$0xff]  ;;  %855 = vrcp.f32 %v897_v0 }
   0x4   :  { %76 = vmatpush.bf16.msra.mxu0 %v53_v3  ;;  %833 = vmatpush.bf16.msra.mxu1 %v53_v3  ;;  %v50_v11 = vpack.c.bf16 %v41_v10, %v40_v9  ;;  %v39_v13 = vld [vmem:[%s1582_s1 + $0x18] sm:$0xff]  ;;  %v36_v15 = vld [vmem:[%s1582_s1] sm:$0xff]  ;;  %v37_v16 = vld [vmem:[%s1582_s1 + $0x8] sm:$0xff] }
   0x5   :  { %834 = vmatpush.bf16.msra.mxu2 %v53_v3  ;;  %835 = vmatpush.bf16.msra.mxu3 %v53_v3  ;;  %v49_v14 = vpack.c.bf16 %v39_v13, %v38_v12  ;;  %v21_v17 = vld [vmem:[%s1584_s0] sm:$0xff]  ;;  %v22_v18 = vld [vmem:[%s1584_s0 + $0x8] sm:$0xff]  ;;  %v48_v19 = vpack.c.bf16 %v37_v16, %v36_v15  ;;  %v23_v20 = vld [vmem:[%s1584_s0 + $0x10] sm:$0xff] }
   0x6   :  { %v24_v21 = vld [vmem:[%s1584_s0 + $0x18] sm:$0xff]  ;;  %v25_v22 = vld [vmem:[%s1584_s0 + $0x20] sm:$0xff]  ;;  %v26_v23 = vld [vmem:[%s1584_s0 + $0x28] sm:$0xff]  ;;  %v31_v26 = vpack.c.bf16 %v22_v18, %v21_v17 }
   0x7   :  { %v27_v24 = vld [vmem:[%s1584_s0 + $0x30] sm:$0xff]  ;;  %v28_v25 = vld [vmem:[%s1584_s0 + $0x38] sm:$0xff]  ;;  %v32_v27 = vpack.c.bf16 %v24_v21, %v23_v20  ;;  %v33_v28 = vpack.c.bf16 %v26_v23, %v25_v22  ;;  %v29_v30 = vld [vmem:[%s1584_s0 + $0x40] sm:$0xff] }
   0x8   :  { %77 = vmatpush.bf16.msra.mxu0 %v52_v5  ;;  %836 = vmatpush.bf16.msra.mxu1 %v52_v5  ;;  %v34_v29 = vpack.c.bf16 %v28_v25, %v27_v24  ;;  %v30_v31 = vld [vmem:[%s1584_s0 + $0x48] sm:$0xff]  ;;  %v852_v33 = vld [vmem:[%s1583_s2] ss:$0 sm:$0xff] }
   0x9   :  { %837 = vmatpush.bf16.msra.mxu2 %v52_v5  ;;  %838 = vmatpush.bf16.msra.mxu3 %v52_v5  ;;  %v35_v32 = vpack.c.bf16 %v30_v31, %v29_v30  ;;  %v856_v1 = vpop.eup %855 }
   0xa   :  { %v142_v2 = vmul.f32 32.0, %v856_v1  ;;  %vm146_vm2 = vweird.f32 %v856_v1 }
   0xc   :  { %78 = vmatpush.bf16.msra.mxu0 %v51_v8  ;;  %839 = vmatpush.bf16.msra.mxu1 %v51_v8  ;;  %v143_v3 = vsub.f32 1.0, %v142_v2 }
   0xd   :  { %840 = vmatpush.bf16.msra.mxu2 %v51_v8  ;;  %841 = vmatpush.bf16.msra.mxu3 %v51_v8 }
   0xe   :  { %v144_v4 = vmul.f32 %v856_v1, %v143_v3 }
  0x10   :  { %79 = vmatpush.bf16.msra.mxu0 %v50_v11  ;;  %842 = vmatpush.bf16.msra.mxu1 %v50_v11  ;;  %v145_v5 = vadd.f32 %v856_v1, %v144_v4 }
  0x11   :  { %843 = vmatpush.bf16.msra.mxu2 %v50_v11  ;;  %844 = vmatpush.bf16.msra.mxu3 %v50_v11 }
  0x12   :  { %v1019_v6 = vsel %vm146_vm2, %v856_v1, %v145_v5 }
  0x14   :  { %80 = vmatpush.bf16.msra.mxu0 %v49_v14  ;;  %845 = vmatpush.bf16.msra.mxu1 %v49_v14 }
  0x15   :  { %846 = vmatpush.bf16.msra.mxu2 %v49_v14  ;;  %847 = vmatpush.bf16.msra.mxu3 %v49_v14 }
  0x18   :  { %81 = vmatpush.bf16.msra.mxu0 %v48_v19  ;;  %848 = vmatpush.bf16.msra.mxu1 %v48_v19 }
  0x19   :  { %849 = vmatpush.bf16.msra.mxu2 %v48_v19  ;;  %850 = vmatpush.bf16.msra.mxu3 %v48_v19 }
  0x1b   :  { %818 = vmatmul.msk.bf16.vlgmr.msra.gmra.mxu0 %vm58_vm0, %v31_v26  ;;  %819 = vmatmul.msk.bf16.vlgmr.msra.gmra.mxu1 %vm58_vm0, %v32_v27 }
  0x1c   :  { %820 = vmatmul.msk.bf16.vlgmr.msra.gmra.mxu2 %vm58_vm0, %v33_v28  ;;  %821 = vmatmul.msk.bf16.vlgmr.msra.gmra.mxu3 %vm58_vm0, %v34_v29 }
  0x2c   :  { %822 = vmatmul.msk.bf16.gmra.mxu3 %vm58_vm0, %v35_v32 }
  0x98   :  { %v83_v34 = vpop.f32.mrf.mxu0  ;;  %v88_v35 = vpop.f32.mrf.mxu1 }
  0x99   :  { %v84_v36 = vadd.f32 %v852_v33, %v83_v34  ;;  %v89_v37 = vadd.f32 %v852_v33, %v88_v35 }
  0x9b   :  { %v117_v38 = vsel %vm110_vm1, %v89_v37, 0.0  ;;  %v111_v39 = vsel %vm110_vm1, %v84_v36, 0.0 }
  0x9c   :  { %118 = vadd.xlane.f32.xlu1 %v117_v38  ;;  %112 = vadd.xlane.f32.xlu0 %v111_v39 }
  0x9f   :  { %v93_v40 = vpop.f32.mrf.mxu2  ;;  %v98_v41 = vpop.f32.mrf.mxu3 }
  0xa0   :  { %v94_v42 = vadd.f32 %v852_v33, %v93_v40  ;;  %v99_v43 = vadd.f32 %v852_v33, %v98_v41  ;;  %v90_v44 = vpop.f32.mrf.mxu1  ;;  %v85_v49 = vpop.f32.mrf.mxu0 }
  0xa1   :  { %v91_v45 = vadd.f32 %v852_v33, %v90_v44  ;;  %v1002_v50 = vadd.f32 %v852_v33, %v85_v49 }
  0xa2   :  { %v123_v46 = vsel %vm110_vm1, %v94_v42, 0.0  ;;  %v129_v48 = vsel %vm110_vm1, %v99_v43, 0.0 }
  0xa3   :  { %124 = vadd.xlane.f32.xlu2 %v123_v46  ;;  %v120_v47 = vsel %vm110_vm1, %v91_v45, 0.0  ;;  %v114_v57 = vsel %vm110_vm1, %v1002_v50, 0.0 }
  0xa4   :  { %121 = vadd.xlane.f32.xlu1 %v120_v47  ;;  %130 = vadd.xlane.f32.xlu0 %v129_v48 }
  0xa7   :  { %v95_v51 = vpop.f32.mrf.mxu2  ;;  %v100_v52 = vpop.f32.mrf.mxu3 }
  0xa8   :  { %v96_v53 = vadd.f32 %v852_v33, %v95_v51  ;;  %v1004_v54 = vadd.f32 %v852_v33, %v100_v52 }
  0xaa   :  { %v126_v55 = vsel %vm110_vm1, %v96_v53, 0.0  ;;  %v132_v56 = vsel %vm110_vm1, %v1004_v54, 0.0 }
  0xab   :  { %127 = vadd.xlane.f32.xlu2 %v126_v55 }
  0xac   :  { %133 = vadd.xlane.f32.xlu1 %v132_v56  ;;  %115 = vadd.xlane.f32.xlu0 %v114_v57 }
  0xaf   :  { %v103_v58 = vpop.f32.mrf.mxu3 }
  0xb0   :  { %v1011_v59 = vadd.f32 %v852_v33, %v103_v58 }
  0xb2   :  { %v135_v60 = vsel %vm110_vm1, %v1011_v59, 0.0 }
  0xb3   :  { %136 = vadd.xlane.f32.xlu2 %v135_v60 }
  0xb7   :  { %v105_v61 = vpop.f32.mrf.mxu3 }
  0xb8   :  { %v1015_v62 = vadd.f32 %v852_v33, %v105_v61 }
  0xba   :  { %v138_v63 = vsel %vm110_vm1, %v1015_v62, 0.0 }
  0xbb   :  { %139 = vadd.xlane.f32.xlu0 %v138_v63 }
 0x10f   :  { %v119_v7 = vpop.xlane.xlu1 %118  ;;  %v113_v8 = vpop.xlane.xlu0 %112 }
 0x110   :  { %v150_v9 = vmul.f32 %v1019_v6, %v119_v7  ;;  %v148_v10 = vmul.f32 %v1019_v6, %v113_v8 }
 0x112   :  { %v1023_v11 = vsub.f32 %v89_v37, %v150_v9  ;;  %v1025_v12 = vsub.f32 %v84_v36, %v148_v10 }
 0x114   :  { %v170_v13 = vmul.f32 %v1023_v11, %v1023_v11  ;;  %v168_v14 = vmul.f32 %v1025_v12, %v1025_v12 }
 0x116   :  { %v125_v15 = vpop.xlane.xlu2 %124  ;;  %v184_v16 = vsel %vm110_vm1, %v170_v13, 0.0  ;;  %v178_v17 = vsel %vm110_vm1, %v168_v14, 0.0 }
 0x117   :  { %v152_v18 = vmul.f32 %v1019_v6, %v125_v15  ;;  %v122_v19 = vpop.xlane.xlu1 %121  ;;  %185 = vadd.xlane.f32.xlu0 %v184_v16  ;;  %179 = vadd.xlane.f32.xlu1 %v178_v17  ;;  %v131_v20 = vpop.xlane.xlu0 %130 }
 0x118   :  { %v154_v21 = vmul.f32 %v1019_v6, %v131_v20  ;;  %v151_v23 = vmul.f32 %v1019_v6, %v122_v19 }
 0x119   :  { %v1035_v22 = vsub.f32 %v94_v42, %v152_v18 }
 0x11a   :  { %v1038_v24 = vsub.f32 %v99_v43, %v154_v21  ;;  %v1045_v28 = vsub.f32 %v91_v45, %v151_v23 }
 0x11b   :  { %v172_v25 = vmul.f32 %v1035_v22, %v1035_v22 }
 0x11c   :  { %v174_v26 = vmul.f32 %v1038_v24, %v1038_v24  ;;  %v171_v38 = vmul.f32 %v1045_v28, %v1045_v28 }
 0x11d   :  { %v190_v27 = vsel %vm110_vm1, %v172_v25, 0.0 }
 0x11e   :  { %191 = vadd.xlane.f32.xlu2 %v190_v27  ;;  %v128_v29 = vpop.xlane.xlu2 %127  ;;  %v196_v30 = vsel %vm110_vm1, %v174_v26, 0.0  ;;  %v187_v44 = vsel %vm110_vm1, %v171_v38, 0.0 }
 0x11f   :  { %v153_v31 = vmul.f32 %v1019_v6, %v128_v29  ;;  %v134_v32 = vpop.xlane.xlu1 %133  ;;  %197 = vadd.xlane.f32.xlu1 %v196_v30  ;;  %v116_v33 = vpop.xlane.xlu0 %115 }
 0x120   :  { %v149_v34 = vmul.f32 %v1019_v6, %v116_v33  ;;  %v155_v36 = vmul.f32 %v1019_v6, %v134_v32  ;;  %v1099_v32 = vld [vmem:[%s1585_s3] ss:$0 sm:$0xff] }
 0x121   :  { %v1050_v35 = vsub.f32 %v96_v53, %v153_v31 }
 0x122   :  { %v1054_v37 = vsub.f32 %v1002_v50, %v149_v34  ;;  %v1064_v42 = vsub.f32 %v1004_v54, %v155_v36 }
 0x123   :  { %v173_v39 = vmul.f32 %v1050_v35, %v1050_v35 }
 0x124   :  { %v169_v40 = vmul.f32 %v1054_v37, %v1054_v37  ;;  %v175_v48 = vmul.f32 %v1064_v42, %v1064_v42 }
 0x125   :  { %v193_v41 = vsel %vm110_vm1, %v173_v39, 0.0  ;;  %v1105_v39 = vld [vmem:[%s1586_s4] ss:$0 sm:$0xff] }
 0x126   :  { %v137_v43 = vpop.xlane.xlu2 %136  ;;  %194 = vadd.xlane.f32.xlu0 %v193_v41  ;;  %v181_v45 = vsel %vm110_vm1, %v169_v40, 0.0  ;;  %v199_v52 = vsel %vm110_vm1, %v175_v48, 0.0 }
 0x127   :  { %v156_v46 = vmul.f32 %v1019_v6, %v137_v43  ;;  %188 = vadd.xlane.f32.xlu1 %v187_v44  ;;  %182 = vadd.xlane.f32.xlu2 %v181_v45 }
 0x129   :  { %v1070_v47 = vsub.f32 %v1011_v59, %v156_v46 }
 0x12b   :  { %v176_v49 = vmul.f32 %v1070_v47, %v1070_v47 }
 0x12d   :  { %v202_v50 = vsel %vm110_vm1, %v176_v49, 0.0 }
 0x12e   :  { %203 = vadd.xlane.f32.xlu0 %v202_v50  ;;  %v140_v51 = vpop.xlane.xlu0 %139 }
 0x12f   :  { %v157_v53 = vmul.f32 %v1019_v6, %v140_v51  ;;  %200 = vadd.xlane.f32.xlu2 %v199_v52 }
 0x131   :  { %v1080_v54 = vsub.f32 %v1015_v62, %v157_v53 }
 0x133   :  { %v177_v55 = vmul.f32 %v1080_v54, %v1080_v54 }
 0x135   :  { %v205_v56 = vsel %vm110_vm1, %v177_v55, 0.0 }
 0x136   :  { %206 = vadd.xlane.f32.xlu1 %v205_v56 }
 0x18a   :  { %v180_v57 = vpop.xlane.xlu1 %179  ;;  %v186_v58 = vpop.xlane.xlu0 %185 }
 0x18b   :  { %v208_v59 = vmul.f32 %v180_v57, %v1019_v6  ;;  %v210_v60 = vmul.f32 %v186_v58, %v1019_v6 }
 0x18d   :  { %v218_v61 = vadd.f32 1e-05, %v208_v59  ;;  %v220_v63 = vadd.f32 1e-05, %v210_v60 }
 0x18f   :  { %857 = vrsqrt.f32 %v218_v61  ;;  %vm234_vm5 = vweird.f32 %v218_v61  ;;  %vm254_vm7 = vweird.f32 %v220_v63 }
 0x190   :  { %859 = vrsqrt.f32 %v220_v63 }
 0x191   :  { %v192_v0 = vpop.xlane.xlu2 %191 }
 0x192   :  { %v212_v62 = vmul.f32 %v192_v0, %v1019_v6  ;;  %v198_v1 = vpop.xlane.xlu1 %197 }
 0x193   :  { %v214_v2 = vmul.f32 %v198_v1, %v1019_v6 }
 0x194   :  { %v222_v3 = vadd.f32 1e-05, %v212_v62 }
 0x195   :  { %v858_v4 = vpop.eup %857  ;;  %v224_v5 = vadd.f32 1e-05, %v214_v2 }
 0x196   :  { %v860_v7 = vpop.eup %859  ;;  %v229_v8 = vmul.f32 %v858_v4, %v218_v61  ;;  %861 = vrsqrt.f32 %v222_v3  ;;  %vm235_vm3 = vweird.f32 %v858_v4  ;;  %vm274_vm11 = vweird.f32 %v222_v3 }
 0x197   :  { %v249_v9 = vmul.f32 %v860_v7, %v220_v63  ;;  %863 = vrsqrt.f32 %v224_v5  ;;  %vm255_vm4 = vweird.f32 %v860_v7  ;;  %vm236_vm6 = vmor %vm234_vm5, %vm235_vm3  ;;  %vm294_vm13 = vweird.f32 %v224_v5 }
 0x198   :  { %v230_v10 = vmul.f32 %v858_v4, %v229_v8  ;;  %vm256_vm8 = vmor %vm254_vm7, %vm255_vm4 }
 0x199   :  { %v250_v13 = vmul.f32 %v860_v7, %v249_v9  ;;  %v195_v14 = vpop.xlane.xlu0 %194 }
 0x19a   :  { %v231_v15 = vmul.f32 0.5, %v230_v10  ;;  %v213_v16 = vmul.f32 %v195_v14, %v1019_v6  ;;  %v189_v17 = vpop.xlane.xlu1 %188  ;;  %v183_v61 = vpop.xlane.xlu2 %182 }
 0x19b   :  { %v251_v18 = vmul.f32 0.5, %v250_v13  ;;  %v211_v19 = vmul.f32 %v189_v17, %v1019_v6  ;;  %v209_v8 = vmul.f32 %v183_v61, %v1019_v6 }
 0x19c   :  { %v862_v20 = vpop.eup %861  ;;  %v232_v21 = vsub.f32 1.5, %v231_v15  ;;  %v1091_v23 = vadd.f32 1e-05, %v213_v16 }
 0x19d   :  { %v864_v25 = vpop.eup %863  ;;  %v252_v26 = vsub.f32 1.5, %v251_v18  ;;  %v269_v27 = vmul.f32 %v862_v20, %v222_v3  ;;  %v1093_v29 = vadd.f32 1e-05, %v211_v19  ;;  %vm275_vm9 = vweird.f32 %v862_v20 }
 0x19e   :  { %v233_v30 = vmul.f32 %v858_v4, %v232_v21  ;;  %v289_v31 = vmul.f32 %v864_v25, %v224_v5  ;;  %865 = vrsqrt.f32 %v1091_v23  ;;  %vm295_vm10 = vweird.f32 %v864_v25  ;;  %vm276_vm12 = vmor %vm274_vm11, %vm275_vm9 }
 0x19f   :  { %v253_v33 = vmul.f32 %v860_v7, %v252_v26  ;;  %v270_v34 = vmul.f32 %v862_v20, %v269_v27  ;;  %867 = vrsqrt.f32 %v1093_v29  ;;  %vm296_vm14 = vmor %vm294_vm13, %vm295_vm10  ;;  %vm284_vm15 = vweird.f32 %v1091_v23 }
 0x1a0   :  { %v237_v36 = vsel %vm236_vm6, %v858_v4, %v233_v30  ;;  %v290_v38 = vmul.f32 %v864_v25, %v289_v31  ;;  %vm264_vm4 = vweird.f32 %v1093_v29 }
 0x1a1   :  { %v328_v40 = vmul.f32 %v237_v36, %v1025_v12  ;;  %v257_v41 = vsel %vm256_vm8, %v860_v7, %v253_v33  ;;  %v271_v43 = vmul.f32 0.5, %v270_v34 }
 0x1a2   :  { %v330_v44 = vmul.f32 %v257_v41, %v1023_v11  ;;  %v291_v45 = vmul.f32 0.5, %v290_v38 }
 0x1a3   :  { %v341_v46 = vmul.f32 %v1099_v32, %v328_v40  ;;  %v272_v48 = vsub.f32 1.5, %v271_v43 }
 0x1a4   :  { %v1110_v49 = vpop.eup %865  ;;  %v343_v50 = vmul.f32 %v1099_v32, %v330_v44  ;;  %v292_v51 = vsub.f32 1.5, %v291_v45 }
 0x1a5   :  { %v1113_v52 = vpop.eup %867  ;;  %v1116_v53 = vadd.f32 %v1105_v39, %v341_v46  ;;  %v273_v12 = vmul.f32 %v862_v20, %v272_v48  ;;  %v279_v11 = vmul.f32 %v1110_v49, %v1091_v23  ;;  %vm285_vm0 = vweird.f32 %v1110_v49 }
 0x1a6   :  { %v1121_v55 = vadd.f32 %v1105_v39, %v343_v50  ;;  %v293_v56 = vmul.f32 %v864_v25, %v292_v51  ;;  %v259_v57 = vmul.f32 %v1113_v52, %v1093_v29  ;;  %vm265_vm2 = vweird.f32 %v1113_v52  ;;  %vm1183_vm3 = vmor %vm284_vm15, %vm285_vm0 }
 0x1a7   :  { %v1126_v58 = vmul.f32 0.70710677, %v1116_v53  ;;  %v277_v59 = vsel %vm276_vm12, %v862_v20, %v273_v12  ;;  %v280_v60 = vmul.f32 %v1110_v49, %v279_v11  ;;  %v1157_v20 = vadd.f32 1e-05, %v209_v8  ;;  %vm1203_vm5 = vmor %vm264_vm4, %vm265_vm2 }
 0x1a8   :  { %v1130_v63 = vmul.f32 0.70710677, %v1121_v55  ;;  %v332_v0 = vmul.f32 %v277_v59, %v1035_v22  ;;  %v297_v62 = vsel %vm296_vm14, %v864_v25, %v293_v56  ;;  %v260_v4 = vmul.f32 %v1113_v52, %v259_v57 }
 0x1a9   :  { %v384_v1 = vmul.f32 %v1126_v58, %v1126_v58  ;;  %v334_v2 = vmul.f32 %v297_v62, %v1038_v24  ;;  %v281_v3 = vmul.f32 0.5, %v280_v60  ;;  %869 = vrsqrt.f32 %v1157_v20 }
 0x1aa   :  { %v464_v5 = vmul.f32 %v1130_v63, %v1130_v63  ;;  %v345_v7 = vmul.f32 %v1099_v32, %v332_v0  ;;  %v261_v14 = vmul.f32 0.5, %v260_v4  ;;  %vm244_vm15 = vweird.f32 %v1157_v20 }
 0x1ab   :  { %v1141_v9 = vmin.f32 %v384_v1, 16.0  ;;  %v347_v22 = vmul.f32 %v1099_v32, %v334_v2  ;;  %v282_v24 = vsub.f32 1.5, %v281_v3 }
 0x1ac   :  { %v1144_v10 = vmin.f32 %v464_v5, 16.0  ;;  %v1147_v13 = vadd.f32 %v1105_v39, %v345_v7  ;;  %v262_v33 = vsub.f32 1.5, %v261_v14 }
 0x1ad   :  { %v386_v15 = vmul.f32 2.1237322e-06, %v1141_v9  ;;  %v397_v16 = vmul.f32 3.8918573e-05, %v1141_v9  ;;  %v1152_v17 = vadd.f32 %v1105_v39, %v347_v22  ;;  %v283_v31 = vmul.f32 %v1110_v49, %v282_v24 }
 0x1ae   :  { %v466_v18 = vmul.f32 2.1237322e-06, %v1144_v10  ;;  %v477_v19 = vmul.f32 3.8918573e-05, %v1144_v10  ;;  %v1160_v26 = vmul.f32 0.70710677, %v1147_v13  ;;  %v263_v56 = vmul.f32 %v1113_v52, %v262_v33 }
 0x1af   :  { %v387_v21 = vadd.f32 0.00028619796, %v386_v15  ;;  %v398_v25 = vadd.f32 0.001143296, %v397_v16  ;;  %v1169_v40 = vmul.f32 0.70710677, %v1152_v17  ;;  %v287_v11 = vsel %vm1183_vm3, %v1110_v49, %v283_v31  ;;  %v1207_v5 = vpop.eup %869 }
 0x1b0   :  { %v467_v27 = vadd.f32 0.00028619796, %v466_v18  ;;  %v478_v30 = vadd.f32 0.001143296, %v477_v19  ;;  %v544_v38 = vmul.f32 %v1160_v26, %v1160_v26  ;;  %v333_v3 = vmul.f32 %v287_v11, %v1050_v35 }
 0x1b1   :  { %v388_v34 = vmul.f32 %v387_v21, %v1141_v9  ;;  %v399_v36 = vmul.f32 %v398_v25, %v1141_v9  ;;  %v624_v48 = vmul.f32 %v1169_v40, %v1169_v40  ;;  %v267_v29 = vsel %vm1203_vm5, %v1113_v52, %v263_v56 }
 0x1b2   :  { %v468_v41 = vmul.f32 %v467_v27, %v1144_v10  ;;  %v479_v43 = vmul.f32 %v478_v30, %v1144_v10  ;;  %v1175_v46 = vmin.f32 %v544_v38, 16.0  ;;  %v239_v52 = vmul.f32 %v1207_v5, %v1157_v20 }
 0x1b3   :  { %v389_v44 = vadd.f32 0.0036580483, %v388_v34  ;;  %v400_v45 = vadd.f32 0.014752088, %v399_v36  ;;  %v1197_v62 = vmin.f32 %v624_v48, 16.0  ;;  %v346_v36 = vmul.f32 %v1099_v32, %v333_v3 }
 0x1b4   :  { %v469_v51 = vadd.f32 0.0036580483, %v468_v41  ;;  %v480_v12 = vadd.f32 0.014752088, %v479_v43  ;;  %v546_v60 = vmul.f32 2.1237322e-06, %v1175_v46  ;;  %vm245_vm14 = vweird.f32 %v1207_v5 }
 0x1b5   :  { %v390_v57 = vmul.f32 %v389_v44, %v1141_v9  ;;  %v401_v59 = vmul.f32 %v400_v45, %v1141_v9  ;;  %v557_v23 = vmul.f32 3.8918573e-05, %v1175_v46  ;;  %v626_v15 = vmul.f32 2.1237322e-06, %v1197_v62 }
 0x1b6   :  { %v470_v61 = vmul.f32 %v469_v51, %v1144_v10  ;;  %v481_v0 = vmul.f32 %v480_v12, %v1144_v10  ;;  %v547_v2 = vadd.f32 0.00028619796, %v546_v60  ;;  %v637_v21 = vmul.f32 3.8918573e-05, %v1197_v62 }
 0x1b7   :  { %v391_v1 = vadd.f32 0.05243302, %v390_v57  ;;  %v402_v49 = vadd.f32 0.112945676, %v401_v59  ;;  %v558_v22 = vadd.f32 0.001143296, %v557_v23  ;;  %v331_v44 = vmul.f32 %v267_v29, %v1045_v28 }
 0x1b8   :  { %v471_v7 = vadd.f32 0.05243302, %v470_v61  ;;  %v482_v8 = vadd.f32 0.112945676, %v481_v0  ;;  %v548_v35 = vmul.f32 %v547_v2, %v1175_v46  ;;  %v627_v43 = vadd.f32 0.00028619796, %v626_v15 }
 0x1b9   :  { %v392_v24 = vmul.f32 %v391_v1, %v1141_v9  ;;  %v403_v14 = vmul.f32 %v402_v49, %v1141_v9  ;;  %v559_v19 = vmul.f32 %v558_v22, %v1175_v46  ;;  %v638_v51 = vadd.f32 0.001143296, %v637_v21  ;;  %v204_v49 = vpop.xlane.xlu0 %203 }
 0x1ba   :  { %v472_v16 = vmul.f32 %v471_v7, %v1144_v10  ;;  %v483_v18 = vmul.f32 %v482_v8, %v1144_v10  ;;  %v549_v30 = vadd.f32 0.0036580483, %v548_v35  ;;  %v1230_v12 = vmul.f32 0.5, %v1116_v53 }
 0x1bb   :  { %v393_v25 = vadd.f32 0.18741608, %v392_v24  ;;  %v404_v27 = vadd.f32 0.4994258, %v403_v14  ;;  %v560_v34 = vadd.f32 0.014752088, %v559_v19  ;;  %v628_v28 = vmul.f32 %v627_v43, %v1197_v62 }
 0x1bc   :  { %v473_v31 = vadd.f32 0.18741608, %v472_v16  ;;  %v484_v33 = vadd.f32 0.4994258, %v483_v18  ;;  %v550_v41 = vmul.f32 %v549_v30, %v1175_v46  ;;  %v1241_v23 = vmul.f32 0.5, %v1121_v55 }
 0x1bd   :  { %v405_v38 = vmul.f32 %v404_v27, %v1141_v9  ;;  %v394_v45 = vmul.f32 %v393_v25, %v1141_v9  ;;  %v561_v50 = vmul.f32 %v560_v34, %v1175_v46  ;;  %v639_v9 = vmul.f32 %v638_v51, %v1197_v62 }
 0x1be   :  { %v485_v48 = vmul.f32 %v484_v33, %v1144_v10  ;;  %v474_v56 = vmul.f32 %v473_v31, %v1144_v10  ;;  %v551_v57 = vadd.f32 0.05243302, %v550_v41  ;;  %v1244_v53 = vadd.f32 %v1105_v39, %v346_v36 }
 0x1bf   :  { %v1232_v11 = vadd.f32 1.0, %v405_v38  ;;  %v562_v60 = vadd.f32 0.112945676, %v561_v50  ;;  %v240_v61 = vmul.f32 %v1207_v5, %v239_v52  ;;  %v395_v0 = vadd.f32 1.1283791, %v394_v45 }
 0x1c0   :  { %v1235_v59 = vadd.f32 1.0, %v485_v48  ;;  %v1249_v10 = vmul.f32 0.5, %v1147_v13  ;;  %v344_v1 = vmul.f32 %v1099_v32, %v331_v44  ;;  %v475_v55 = vadd.f32 1.1283791, %v474_v56 }
 0x1c1   :  { %871 = vrcp.f32 %v1232_v11  ;;  %v416_v2 = vand.u32 2147483647, %v1232_v11  ;;  %v418_v3 = vand.u32 2147483648, %v1232_v11  ;;  %v552_v4 = vmul.f32 %v551_v57, %v1175_v46 }
 0x1c2   :  { %873 = vrcp.f32 %v1235_v59  ;;  %v496_v7 = vand.u32 2147483647, %v1235_v59  ;;  %v563_v8 = vmul.f32 %v562_v60, %v1175_v46  ;;  %v629_v22 = vadd.f32 0.0036580483, %v628_v28 }
 0x1c3   :  { %v640_v29 = vadd.f32 0.014752088, %v639_v9  ;;  %v498_v24 = vand.u32 2147483648, %v1235_v59  ;;  %v553_v13 = vadd.f32 0.18741608, %v552_v4  ;;  %v216_v35 = vmul.f32 %v204_v49, %v1019_v6 }
 0x1c4   :  { %v1259_v14 = vmul.f32 0.70710677, %v1244_v53  ;;  %v396_v15 = vmul.f32 %v395_v0, %v1126_v58  ;;  %v564_v16 = vadd.f32 0.4994258, %v563_v8  ;;  %v630_v18 = vmul.f32 %v629_v22, %v1197_v62 }
 0x1c5   :  { %v641_v19 = vmul.f32 %v640_v29, %v1197_v62  ;;  %vm412_vm6 = vweird.f32 %v1232_v11  ;;  %v476_v25 = vmul.f32 %v475_v55, %v1130_v63  ;;  %vm492_vm7 = vweird.f32 %v1235_v59 }
 0x1c6   :  { %v584_v27 = vmul.f32 %v1259_v14, %v1259_v14  ;;  %vm1271_vm8 = vcmp.eq.f32.partialorder %v416_v2, 8.507059e+37  ;;  %v419_v31 = vor.u32 1.1754944e-38, %v418_v3  ;;  %v565_v33 = vmul.f32 %v564_v16, %v1175_v46 }
 0x1c7   :  { %v872_v21 = vpop.eup %871  ;;  %v631_v34 = vadd.f32 0.05243302, %v630_v18  ;;  %vm1277_vm9 = vcmp.eq.f32.partialorder %v496_v7, 8.507059e+37  ;;  %v499_v38 = vor.u32 1.1754944e-38, %v498_v24  ;;  %v554_v41 = vmul.f32 %v553_v13, %v1175_v46 }
 0x1c8   :  { %v874_v30 = vpop.eup %873  ;;  %v408_v52 = vmul.f32 %v872_v21, %v1232_v11  ;;  %v642_v43 = vadd.f32 0.112945676, %v641_v19  ;;  %v1282_v45 = vadd.f32 1.0, %v565_v33  ;;  %v1285_v50 = vmin.f32 %v584_v27, 16.0 }
 0x1c9   :  { %v488_v36 = vmul.f32 %v874_v30, %v1235_v59  ;;  %v632_v48 = vmul.f32 %v631_v34, %v1197_v62  ;;  %v1289_v57 = vadd.f32 %v1105_v39, %v344_v1  ;;  %v1291_v60 = vmul.f32 0.5, %v240_v61 }
 0x1ca   :  { %v409_v44 = vsub.f32 1.0, %v408_v52  ;;  %v643_v56 = vmul.f32 %v642_v43, %v1197_v62  ;;  %vm413_vm10 = vweird.f32 %v872_v21  ;;  %875 = vrcp.f32 %v1282_v45 }
 0x1cb   :  { %v489_v51 = vsub.f32 1.0, %v488_v36  ;;  %v1294_v46 = vadd.f32 1e-05, %v216_v35  ;;  %vm493_vm11 = vweird.f32 %v874_v30  ;;  %v633_v0 = vadd.f32 0.18741608, %v632_v48  ;;  %vm414_vm12 = vmor %vm412_vm6, %vm413_vm10 }
 0x1cc   :  { %v410_v28 = vmul.f32 %v872_v21, %v409_v44  ;;  %v644_v49 = vadd.f32 0.4994258, %v643_v56  ;;  %v555_v3 = vadd.f32 1.1283791, %v554_v41  ;;  %v586_v55 = vmul.f32 2.1237322e-06, %v1285_v50  ;;  %vm494_vm13 = vmor %vm492_vm7, %vm493_vm11 }
 0x1cd   :  { %v490_v9 = vmul.f32 %v874_v30, %v489_v51  ;;  %v597_v4 = vmul.f32 3.8918573e-05, %v1285_v50  ;;  %v576_v1 = vand.u32 2147483647, %v1282_v45  ;;  %v634_v7 = vmul.f32 %v633_v0, %v1197_v62  ;;  %vm246_vm6 = vmor %vm244_vm15, %vm245_vm14 }
 0x1ce   :  { %v411_v2 = vadd.f32 %v872_v21, %v410_v28  ;;  %v645_v8 = vmul.f32 %v644_v49, %v1197_v62  ;;  %v578_v29 = vand.u32 2147483648, %v1282_v45  ;;  %v587_v24 = vadd.f32 0.00028619796, %v586_v55 }
 0x1cf   :  { %v491_v61 = vadd.f32 %v874_v30, %v490_v9  ;;  %v598_v13 = vadd.f32 0.001143296, %v597_v4  ;;  %v1311_v18 = vmul.f32 0.70710677, %v1289_v57  ;;  %v556_v58 = vmul.f32 %v555_v3, %v1160_v26 }
 0x1d0   :  { %v415_v22 = vsel %vm414_vm12, %v872_v21, %v411_v2  ;;  %v1308_v16 = vadd.f32 1.0, %v645_v8  ;;  %v876_v62 = vpop.eup %875  ;;  %v588_v21 = vmul.f32 %v587_v24, %v1285_v50  ;;  %vm572_vm0 = vweird.f32 %v1282_v45 }
 0x1d1   :  { %v420_v35 = vsel %vm1271_vm8, %v419_v31, %v415_v22  ;;  %v495_v11 = vsel %vm494_vm13, %v874_v30, %v491_v61  ;;  %v599_v27 = vmul.f32 %v598_v13, %v1285_v50  ;;  %v568_v30 = vmul.f32 %v876_v62, %v1282_v45 }
 0x1d2   :  { %v421_v19 = vmul.f32 %v420_v35, %v396_v15  ;;  %v500_v59 = vsel %vm1277_vm9, %v499_v38, %v495_v11  ;;  %v635_v31 = vadd.f32 1.1283791, %v634_v7  ;;  %vm1322_vm2 = vcmp.eq.f32.partialorder %v576_v1, 8.507059e+37 }
 0x1d3   :  { %v501_v52 = vmul.f32 %v500_v59, %v476_v25  ;;  %877 = vrcp.f32 %v1308_v16  ;;  %v569_v36 = vsub.f32 1.0, %v568_v30  ;;  %v579_v63 = vor.u32 1.1754944e-38, %v578_v29 }
 0x1d4   :  { %v823_v33 = vclamps-f32 %v421_v19, 1.0  ;;  %v589_v25 = vadd.f32 0.0036580483, %v588_v21  ;;  %vm573_vm3 = vweird.f32 %v876_v62  ;;  %v600_v26 = vadd.f32 0.014752088, %v599_v27 }
 0x1d5   :  { %v825_v34 = vclamps-f32 %v501_v52, 1.0  ;;  %v504_v41 = vmul.f32 %v1311_v18, %v1311_v18  ;;  %v570_v44 = vmul.f32 %v876_v62, %v569_v36  ;;  %v636_v48 = vmul.f32 %v635_v31, %v1169_v40  ;;  %vm574_vm4 = vmor %vm572_vm0, %vm573_vm3  ;;  %v201_v36 = vpop.xlane.xlu2 %200 }
 0x1d6   :  { %v784_v38 = vadd.f32 1.0, %v823_v33  ;;  %v590_v51 = vmul.f32 %v589_v25, %v1285_v50  ;;  %v601_v28 = vmul.f32 %v600_v26, %v1285_v50  ;;  %v242_v0 = vsub.f32 1.5, %v1291_v60 }
 0x1d7   :  { %v786_v43 = vadd.f32 1.0, %v825_v34  ;;  %v1333_v9 = vmin.f32 %v504_v41, 16.0  ;;  %v571_v2 = vadd.f32 %v876_v62, %v570_v44  ;;  %v656_v3 = vand.u32 2147483647, %v1308_v16 }
 0x1d8   :  { %v794_v56 = vmul.f32 %v784_v38, %v1230_v12  ;;  %879 = vrsqrt.f32 %v1294_v46  ;;  %vm652_vm5 = vweird.f32 %v1308_v16  ;;  %v602_v40 = vadd.f32 0.112945676, %v601_v28 }
 0x1d9   :  { %v796_v49 = vmul.f32 %v786_v43, %v1241_v23  ;;  %v878_v55 = vpop.eup %877  ;;  %v506_v12 = vmul.f32 2.1237322e-06, %v1333_v9  ;;  %v243_v23 = vmul.f32 %v1207_v5, %v242_v0  ;;  %v575_v60 = vsel %vm574_vm4, %v876_v62, %v571_v2 }
 0x1da   :  { %804 = vst.msk [vmem:[%s1587_s5] sm:$0xff] %vm110_vm1, %v794_v56  ;;  %v648_v4 = vmul.f32 %v878_v55, %v1308_v16  ;;  %v658_v61 = vand.u32 2147483648, %v1308_v16  ;;  %v591_v1 = vadd.f32 0.05243302, %v590_v51  ;;  %v580_v45 = vsel %vm1322_vm2, %v579_v63, %v575_v60 }
 0x1db   :  { %806 = vst.msk [vmem:[%s1587_s5 + $0x10] sm:$0xff] %vm110_vm1, %v796_v49  ;;  %v603_v7 = vmul.f32 %v602_v40, %v1285_v50  ;;  %v507_v8 = vadd.f32 0.00028619796, %v506_v12  ;;  %v517_v22 = vmul.f32 3.8918573e-05, %v1333_v9  ;;  %v581_v29 = vmul.f32 %v580_v45, %v556_v58 }
 0x1dc   :  { %v649_v24 = vsub.f32 1.0, %v648_v4  ;;  %vm1363_vm7 = vcmp.eq.f32.partialorder %v656_v3, 8.507059e+37  ;;  %v247_v35 = vsel %vm246_vm6, %v1207_v5, %v243_v23  ;;  %vm653_vm8 = vweird.f32 %v878_v55 }
 0x1dd   :  { %v604_v11 = vadd.f32 0.4994258, %v603_v7  ;;  %v508_v62 = vmul.f32 %v507_v8, %v1333_v9  ;;  %v518_v19 = vadd.f32 0.001143296, %v517_v22  ;;  %v329_v59 = vmul.f32 %v247_v35, %v1054_v37  ;;  %vm654_vm9 = vmor %vm652_vm5, %vm653_vm8 }
 0x1de   :  { %v1370_v21 = vpop.eup %879  ;;  %v827_v27 = vclamps-f32 %v581_v29, 1.0  ;;  %v650_v52 = vmul.f32 %v878_v55, %v649_v24  ;;  %v592_v20 = vmul.f32 %v591_v1, %v1285_v50  ;;  %v659_v34 = vor.u32 1.1754944e-38, %v658_v61 }
 0x1df   :  { %v605_v58 = vmul.f32 %v604_v11, %v1285_v50  ;;  %v509_v30 = vadd.f32 0.0036580483, %v508_v62  ;;  %v519_v31 = vmul.f32 %v518_v19, %v1333_v9  ;;  %v342_v5 = vmul.f32 %v1099_v32, %v329_v59 }
 0x1e0   :  { %v788_v33 = vadd.f32 1.0, %v827_v27  ;;  %v651_v15 = vadd.f32 %v878_v55, %v650_v52  ;;  %v309_v37 = vmul.f32 %v1370_v21, %v1294_v46  ;;  %v593_v44 = vadd.f32 0.18741608, %v592_v20 }
 0x1e1   :  { %v1380_v63 = vadd.f32 1.0, %v605_v58  ;;  %v510_v25 = vmul.f32 %v509_v30, %v1333_v9  ;;  %v520_v38 = vadd.f32 0.014752088, %v519_v31  ;;  %v1384_v26 = vadd.f32 %v1105_v39, %v342_v5 }
 0x1e2   :  { %v798_v41 = vmul.f32 %v788_v33, %v1249_v10  ;;  %v655_v43 = vsel %vm654_vm9, %v878_v55, %v651_v15  ;;  %v310_v51 = vmul.f32 %v1370_v21, %v309_v37  ;;  %v215_v16 = vmul.f32 %v201_v36, %v1019_v6  ;;  %v207_v55 = vpop.xlane.xlu1 %206 }
 0x1e3   :  { %v660_v56 = vsel %vm1363_vm7, %v659_v34, %v655_v43  ;;  %881 = vrcp.f32 %v1380_v63  ;;  %v511_v0 = vadd.f32 0.05243302, %v510_v25  ;;  %v521_v10 = vmul.f32 %v520_v38, %v1333_v9 }
 0x1e4   :  { %808 = vst.msk [vmem:[%s1587_s5 + $0x20] sm:$0xff] %vm110_vm1, %v798_v41  ;;  %v661_v28 = vmul.f32 %v660_v56, %v636_v48  ;;  %v370_v49 = vmul.f32 0.5, %v1152_v17  ;;  %v1399_v2 = vmul.f32 0.70710677, %v1384_v26  ;;  %v311_v3 = vmul.f32 0.5, %v310_v51 }
 0x1e5   :  { %v594_v12 = vmul.f32 %v593_v44, %v1285_v50  ;;  %v512_v23 = vmul.f32 %v511_v0, %v1333_v9  ;;  %v522_v60 = vadd.f32 0.112945676, %v521_v10  ;;  %vm315_vm10 = vweird.f32 %v1370_v21 }
 0x1e6   :  { %v829_v40 = vclamps-f32 %v661_v28, 1.0  ;;  %v424_v4 = vmul.f32 %v1399_v2, %v1399_v2  ;;  %v312_v48 = vsub.f32 1.5, %v311_v3  ;;  %v1406_v61 = vadd.f32 1e-05, %v215_v16 }
 0x1e7   :  { %v523_v1 = vmul.f32 %v522_v60, %v1333_v9  ;;  %vm314_vm11 = vweird.f32 %v1294_v46  ;;  %v217_v45 = vmul.f32 %v207_v55, %v1019_v6  ;;  %v513_v50 = vadd.f32 0.18741608, %v512_v23 }
 0x1e8   :  { %v790_v17 = vadd.f32 1.0, %v829_v40  ;;  %v1411_v8 = vmin.f32 %v424_v4, 16.0  ;;  %v313_v22 = vmul.f32 %v1370_v21, %v312_v48  ;;  %883 = vrsqrt.f32 %v1406_v61  ;;  %vm316_vm12 = vmor %vm314_vm11, %vm315_vm10 }
 0x1e9   :  { %v882_v7 = vpop.eup %881  ;;  %v595_v24 = vadd.f32 1.1283791, %v594_v12  ;;  %v616_v35 = vand.u32 2147483647, %v1380_v63  ;;  %v524_v46 = vadd.f32 0.4994258, %v523_v1  ;;  %v514_v20 = vmul.f32 %v513_v50, %v1333_v9 }
 0x1ea   :  { %v800_v29 = vmul.f32 %v790_v17, %v370_v49  ;;  %v608_v13 = vmul.f32 %v882_v7, %v1380_v63  ;;  %v426_v6 = vmul.f32 2.1237322e-06, %v1411_v8  ;;  %v437_v11 = vmul.f32 3.8918573e-05, %v1411_v8 }
 0x1eb   :  { %v317_v62 = vsel %vm316_vm12, %v1370_v21, %v313_v22  ;;  %v618_v59 = vand.u32 2147483648, %v1380_v63  ;;  %v1428_v52 = vadd.f32 1e-05, %v217_v45  ;;  %v525_v58 = vmul.f32 %v524_v46, %v1333_v9 }
 0x1ec   :  { %810 = vst.msk [vmem:[%s1587_s5 + $0x30] sm:$0xff] %vm110_vm1, %v800_v29  ;;  %v609_v19 = vsub.f32 1.0, %v608_v13  ;;  %v336_v27 = vmul.f32 %v317_v62, %v1070_v47  ;;  %v427_v30 = vadd.f32 0.00028619796, %v426_v6  ;;  %v438_v31 = vadd.f32 0.001143296, %v437_v11 }
 0x1ed   :  { %vm613_vm13 = vweird.f32 %v882_v7  ;;  %885 = vrsqrt.f32 %v1428_v52  ;;  %v1436_v15 = vadd.f32 1.0, %v525_v58  ;;  %vm612_vm14 = vweird.f32 %v1380_v63 }
 0x1ee   :  { %v610_v5 = vmul.f32 %v882_v7, %v609_v19  ;;  %v349_v21 = vmul.f32 %v1099_v32, %v336_v27  ;;  %v1434_v33 = vpop.eup %883  ;;  %v428_v47 = vmul.f32 %v427_v30, %v1411_v8  ;;  %v439_v34 = vmul.f32 %v438_v31, %v1411_v8  ;;  %vm614_vm15 = vmor %vm612_vm14, %vm613_vm13 }
 0x1ef   :  { %v299_v36 = vmul.f32 %v1434_v33, %v1406_v61  ;;  %v596_v25 = vmul.f32 %v595_v24, %v1259_v14  ;;  %v619_v38 = vor.u32 1.1754944e-38, %v618_v59  ;;  %v515_v41 = vadd.f32 1.1283791, %v514_v20 }
 0x1f0   :  { %v611_v37 = vadd.f32 %v882_v7, %v610_v5  ;;  %v1442_v9 = vadd.f32 %v1105_v39, %v349_v21  ;;  %887 = vrcp.f32 %v1436_v15  ;;  %vm617_vm0 = vcmp.eq.f32.partialorder %v616_v35, 8.507059e+37 }
 0x1f1   :  { %v429_v44 = vadd.f32 0.0036580483, %v428_v47  ;;  %v440_v51 = vadd.f32 0.014752088, %v439_v34  ;;  %v369_v56 = vmul.f32 0.5, %v1244_v53  ;;  %v300_v49 = vmul.f32 %v1434_v33, %v299_v36 }
 0x1f2   :  { %v615_v43 = vsel %vm614_vm15, %v882_v7, %v611_v37  ;;  %v1450_v16 = vmul.f32 0.70710677, %v1442_v9  ;;  %v516_v3 = vmul.f32 %v515_v41, %v1311_v18  ;;  %vm304_vm2 = vweird.f32 %v1406_v61 }
 0x1f3   :  { %v620_v63 = vsel %vm617_vm0, %v619_v38, %v615_v43  ;;  %v1452_v28 = vpop.eup %885  ;;  %v430_v14 = vmul.f32 %v429_v44, %v1411_v8  ;;  %v441_v10 = vmul.f32 %v440_v51, %v1411_v8  ;;  %v301_v23 = vmul.f32 0.5, %v300_v49 }
 0x1f4   :  { %v621_v0 = vmul.f32 %v620_v63, %v596_v25  ;;  %v704_v55 = vmul.f32 %v1450_v16, %v1450_v16  ;;  %v319_v53 = vmul.f32 %v1452_v28, %v1428_v52  ;;  %vm324_vm3 = vweird.f32 %v1428_v52 }
 0x1f5   :  { %v442_v12 = vadd.f32 0.112945676, %v441_v10  ;;  %v536_v4 = vand.u32 2147483647, %v1436_v15  ;;  %vm305_vm4 = vweird.f32 %v1434_v33  ;;  %v538_v45 = vand.u32 2147483648, %v1436_v15 }
 0x1f6   :  { %v828_v40 = vclamps-f32 %v621_v0, 1.0  ;;  %v888_v60 = vpop.eup %887  ;;  %v1465_v48 = vmin.f32 %v704_v55, 16.0  ;;  %v320_v18 = vmul.f32 %v1452_v28, %v319_v53  ;;  %v431_v7 = vadd.f32 0.05243302, %v430_v14  ;;  %vm306_vm7 = vmor %vm304_vm2, %vm305_vm4 }
 0x1f7   :  { %v528_v1 = vmul.f32 %v888_v60, %v1436_v15  ;;  %v443_v50 = vmul.f32 %v442_v12, %v1411_v8  ;;  %v302_v24 = vsub.f32 1.5, %v301_v23  ;;  %vm325_vm5 = vweird.f32 %v1452_v28 }
 0x1f8   :  { %v789_v17 = vadd.f32 1.0, %v828_v40  ;;  %v706_v22 = vmul.f32 2.1237322e-06, %v1465_v48  ;;  %v717_v29 = vmul.f32 3.8918573e-05, %v1465_v48  ;;  %v321_v46 = vmul.f32 0.5, %v320_v18  ;;  %vm1496_vm9 = vmor %vm324_vm3, %vm325_vm5 }
 0x1f9   :  { %v529_v35 = vsub.f32 1.0, %v528_v1  ;;  %v444_v6 = vadd.f32 0.4994258, %v443_v50  ;;  %v303_v19 = vmul.f32 %v1434_v33, %v302_v24  ;;  %vm533_vm6 = vweird.f32 %v888_v60 }
 0x1fa   :  { %v799_v13 = vmul.f32 %v789_v17, %v369_v56  ;;  %v707_v11 = vadd.f32 0.00028619796, %v706_v22  ;;  %v718_v62 = vadd.f32 0.001143296, %v717_v29  ;;  %v432_v27 = vmul.f32 %v431_v7, %v1411_v8 }
 0x1fb   :  { %v530_v59 = vmul.f32 %v888_v60, %v529_v35  ;;  %v322_v20 = vsub.f32 1.5, %v321_v46  ;;  %vm532_vm8 = vweird.f32 %v1436_v15  ;;  %v445_v58 = vmul.f32 %v444_v6, %v1411_v8 }
 0x1fc   :  { %809 = vst.msk [vmem:[%s1587_s5 + $0x28] sm:$0xff] %vm110_vm1, %v799_v13  ;;  %v719_v30 = vmul.f32 %v718_v62, %v1465_v48  ;;  %v307_v31 = vsel %vm306_vm7, %v1434_v33, %v303_v19  ;;  %v708_v21 = vmul.f32 %v707_v11, %v1465_v48  ;;  %vm534_vm10 = vmor %vm532_vm8, %vm533_vm6  ;;  %vm537_vm11 = vcmp.eq.f32.partialorder %v536_v4, 8.507059e+37 }
 0x1fd   :  { %v531_v5 = vadd.f32 %v888_v60, %v530_v59  ;;  %v335_v47 = vmul.f32 %v307_v31, %v1064_v42  ;;  %v323_v34 = vmul.f32 %v1452_v28, %v322_v20  ;;  %v539_v15 = vor.u32 1.1754944e-38, %v538_v45 }
 0x1fe   :  { %v446_v37 = vadd.f32 1.0, %v445_v58  ;;  %v720_v33 = vadd.f32 0.014752088, %v719_v30  ;;  %v433_v25 = vadd.f32 0.18741608, %v432_v27  ;;  %v367_v49 = vmul.f32 0.5, %v1289_v57 }
 0x1ff   :  { %v535_v36 = vsel %vm534_vm10, %v888_v60, %v531_v5  ;;  %v348_v38 = vmul.f32 %v1099_v32, %v335_v47  ;;  %v327_v42 = vsel %vm1496_vm9, %v1452_v28, %v323_v34  ;;  %v709_v43 = vadd.f32 0.0036580483, %v708_v21 }
 0x200   :  { %v540_v41 = vsel %vm537_vm11, %v539_v15, %v535_v36  ;;  %889 = vrcp.f32 %v446_v37  ;;  %v721_v44 = vmul.f32 %v720_v33, %v1465_v48  ;;  %v337_v56 = vmul.f32 %v327_v42, %v1080_v54 }
 0x201   :  { %v541_v52 = vmul.f32 %v540_v41, %v516_v3  ;;  %v1506_v51 = vadd.f32 %v1105_v39, %v348_v38  ;;  %v434_v0 = vmul.f32 %v433_v25, %v1411_v8  ;;  %v710_v55 = vmul.f32 %v709_v43, %v1465_v48 }
 0x202   :  { %v722_v14 = vadd.f32 0.112945676, %v721_v44  ;;  %v350_v28 = vmul.f32 %v1099_v32, %v337_v56  ;;  %v456_v4 = vand.u32 2147483647, %v446_v37  ;;  %v458_v1 = vand.u32 2147483648, %v446_v37 }
 0x203   :  { %v826_v63 = vclamps-f32 %v541_v52, 1.0  ;;  %v1511_v10 = vmul.f32 0.70710677, %v1506_v51  ;;  %v435_v23 = vadd.f32 1.1283791, %v434_v0  ;;  %vm452_vm13 = vweird.f32 %v446_v37 }
 0x204   :  { %v723_v53 = vmul.f32 %v722_v14, %v1465_v48  ;;  %v1520_v12 = vadd.f32 %v1105_v39, %v350_v28  ;;  %v711_v45 = vadd.f32 0.05243302, %v710_v55  ;;  %vm457_vm15 = vcmp.eq.f32.partialorder %v456_v4, 8.507059e+37 }
 0x205   :  { %v787_v3 = vadd.f32 1.0, %v826_v63  ;;  %v664_v54 = vmul.f32 %v1511_v10, %v1511_v10  ;;  %v436_v62 = vmul.f32 %v435_v23, %v1399_v2  ;;  %v459_v19 = vor.u32 1.1754944e-38, %v458_v1 }
 0x206   :  { %v890_v40 = vpop.eup %889  ;;  %v724_v18 = vadd.f32 0.4994258, %v723_v53  ;;  %v1525_v57 = vmul.f32 0.70710677, %v1520_v12  ;;  %v712_v11 = vmul.f32 %v711_v45, %v1465_v48  ;;  %v365_v38 = vmul.f32 0.5, %v1384_v26 }
 0x207   :  { %v797_v8 = vmul.f32 %v787_v3, %v367_v49  ;;  %v448_v60 = vmul.f32 %v890_v40, %v446_v37  ;;  %v1522_v32 = vmin.f32 %v664_v54, 16.0  ;;  %vm453_vm12 = vweird.f32 %v890_v40 }
 0x208   :  { %v725_v39 = vmul.f32 %v724_v18, %v1465_v48  ;;  %v744_v22 = vmul.f32 %v1525_v57, %v1525_v57  ;;  %vm454_vm14 = vmor %vm452_vm13, %vm453_vm12  ;;  %v713_v21 = vadd.f32 0.18741608, %v712_v11 }
 0x209   :  { %807 = vst.msk [vmem:[%s1587_s5 + $0x18] sm:$0xff] %vm110_vm1, %v797_v8  ;;  %v449_v17 = vsub.f32 1.0, %v448_v60  ;;  %v666_v7 = vmul.f32 2.1237322e-06, %v1522_v32  ;;  %v677_v50 = vmul.f32 3.8918573e-05, %v1522_v32 }
 0x20a   :  { %v726_v24 = vadd.f32 1.0, %v725_v39  ;;  %v1536_v46 = vmin.f32 %v744_v22, 16.0  ;;  %v714_v41 = vmul.f32 %v713_v21, %v1465_v48 }
 0x20b   :  { %v450_v29 = vmul.f32 %v890_v40, %v449_v17  ;;  %v667_v13 = vadd.f32 0.00028619796, %v666_v7  ;;  %v678_v35 = vadd.f32 0.001143296, %v677_v50 }
 0x20c   :  { %891 = vrcp.f32 %v726_v24  ;;  %v746_v58 = vmul.f32 2.1237322e-06, %v1536_v46  ;;  %v757_v31 = vmul.f32 3.8918573e-05, %v1536_v46  ;;  %v738_v28 = vand.u32 2147483648, %v726_v24 }
 0x20d   :  { %v451_v6 = vadd.f32 %v890_v40, %v450_v29  ;;  %v668_v27 = vmul.f32 %v667_v13, %v1522_v32  ;;  %v679_v20 = vmul.f32 %v678_v35, %v1522_v32  ;;  %v715_v26 = vadd.f32 1.1283791, %v714_v41 }
 0x20e   :  { %v747_v34 = vadd.f32 0.00028619796, %v746_v58  ;;  %v758_v2 = vadd.f32 0.001143296, %v757_v31  ;;  %v736_v55 = vand.u32 2147483647, %v726_v24  ;;  %vm732_vm2 = vweird.f32 %v726_v24 }
 0x20f   :  { %v455_v59 = vsel %vm454_vm14, %v890_v40, %v451_v6  ;;  %v680_v47 = vadd.f32 0.014752088, %v679_v20  ;;  %v669_v61 = vadd.f32 0.0036580483, %v668_v27  ;;  %v739_v60 = vor.u32 1.1754944e-38, %v738_v28 }
 0x210   :  { %v460_v30 = vsel %vm457_vm15, %v459_v19, %v455_v59  ;;  %v748_v33 = vmul.f32 %v747_v34, %v1536_v46  ;;  %v759_v25 = vmul.f32 %v758_v2, %v1536_v46  ;;  %v716_v17 = vmul.f32 %v715_v26, %v1450_v16 }
 0x211   :  { %v461_v5 = vmul.f32 %v460_v30, %v436_v62  ;;  %v681_v37 = vmul.f32 %v680_v47, %v1522_v32  ;;  %v670_v43 = vmul.f32 %v669_v61, %v1522_v32  ;;  %vm737_vm4 = vcmp.eq.f32.partialorder %v736_v55, 8.507059e+37 }
 0x212   :  { %v892_v36 = vpop.eup %891  ;;  %v760_v56 = vadd.f32 0.014752088, %v759_v25  ;;  %v749_v14 = vadd.f32 0.0036580483, %v748_v33  ;;  %v372_v6 = vmul.f32 0.5, %v1442_v9  ;;  %v373_v26 = vmul.f32 0.5, %v1520_v12 }
 0x213   :  { %v824_v15 = vclamps-f32 %v461_v5, 1.0  ;;  %v728_v52 = vmul.f32 %v892_v36, %v726_v24  ;;  %v682_v44 = vadd.f32 0.112945676, %v681_v37  ;;  %vm733_vm0 = vweird.f32 %v892_v36 }
 0x214   :  { %v761_v3 = vmul.f32 %v760_v56, %v1536_v46  ;;  %v671_v53 = vadd.f32 0.05243302, %v670_v43  ;;  %v750_v23 = vmul.f32 %v749_v14, %v1536_v46  ;;  %vm734_vm3 = vmor %vm732_vm2, %vm733_vm0 }
 0x215   :  { %v785_v42 = vadd.f32 1.0, %v824_v15  ;;  %v729_v0 = vsub.f32 1.0, %v728_v52  ;;  %v683_v49 = vmul.f32 %v682_v44, %v1522_v32 }
 0x216   :  { %v762_v54 = vadd.f32 0.112945676, %v761_v3  ;;  %v672_v39 = vmul.f32 %v671_v53, %v1522_v32  ;;  %v751_v29 = vadd.f32 0.05243302, %v750_v23 }
 0x217   :  { %v795_v63 = vmul.f32 %v785_v42, %v365_v38  ;;  %v730_v48 = vmul.f32 %v892_v36, %v729_v0  ;;  %v684_v40 = vadd.f32 0.4994258, %v683_v49 }
 0x218   :  { %v763_v18 = vmul.f32 %v762_v54, %v1536_v46  ;;  %v673_v35 = vadd.f32 0.18741608, %v672_v39  ;;  %v752_v62 = vmul.f32 %v751_v29, %v1536_v46 }
 0x219   :  { %805 = vst.msk [vmem:[%s1587_s5 + $0x8] sm:$0xff] %vm110_vm1, %v795_v63  ;;  %v731_v8 = vadd.f32 %v892_v36, %v730_v48  ;;  %v685_v4 = vmul.f32 %v684_v40, %v1522_v32  ;;  %v371_v63 = vmul.f32 0.5, %v1506_v51 }
 0x21a   :  { %v764_v50 = vadd.f32 0.4994258, %v763_v18  ;;  %v674_v27 = vmul.f32 %v673_v35, %v1522_v32  ;;  %v753_v58 = vadd.f32 0.18741608, %v752_v62 }
 0x21b   :  { %v735_v1 = vsel %vm734_vm3, %v892_v36, %v731_v8  ;;  %v686_v7 = vadd.f32 1.0, %v685_v4 }
 0x21c   :  { %v740_v45 = vsel %vm737_vm4, %v739_v60, %v735_v1  ;;  %v765_v13 = vmul.f32 %v764_v50, %v1536_v46  ;;  %v675_v31 = vadd.f32 1.1283791, %v674_v27  ;;  %v754_v34 = vmul.f32 %v753_v58, %v1536_v46 }
 0x21d   :  { %v741_v22 = vmul.f32 %v740_v45, %v716_v17  ;;  %893 = vrcp.f32 %v686_v7  ;;  %v698_v5 = vand.u32 2147483648, %v686_v7  ;;  %v696_v47 = vand.u32 2147483647, %v686_v7 }
 0x21e   :  { %v766_v16 = vadd.f32 1.0, %v765_v13  ;;  %vm692_vm6 = vweird.f32 %v686_v7  ;;  %v676_v32 = vmul.f32 %v675_v31, %v1511_v10  ;;  %v755_v36 = vadd.f32 1.1283791, %v754_v34 }
 0x21f   :  { %v831_v24 = vclamps-f32 %v741_v22, 1.0  ;;  %v699_v15 = vor.u32 1.1754944e-38, %v698_v5  ;;  %vm697_vm8 = vcmp.eq.f32.partialorder %v696_v47, 8.507059e+37 }
 0x220   :  { %895 = vrcp.f32 %v766_v16  ;;  %v778_v25 = vand.u32 2147483648, %v766_v16  ;;  %v776_v41 = vand.u32 2147483647, %v766_v16  ;;  %vm772_vm10 = vweird.f32 %v766_v16 }
 0x221   :  { %v792_v11 = vadd.f32 1.0, %v831_v24  ;;  %v756_v56 = vmul.f32 %v755_v36, %v1525_v57 }
 0x222   :  { %v779_v44 = vor.u32 1.1754944e-38, %v778_v25  ;;  %vm777_vm12 = vcmp.eq.f32.partialorder %v776_v41, 8.507059e+37 }
 0x223   :  { %v802_v19 = vmul.f32 %v792_v11, %v372_v6  ;;  %v894_v59 = vpop.eup %893 }
 0x224   :  { %v688_v20 = vmul.f32 %v894_v59, %v686_v7  ;;  %vm693_vm5 = vweird.f32 %v894_v59 }
 0x225   :  { %812 = vst.msk [vmem:[%s1587_s5 + $0x40] sm:$0xff] %vm110_vm1, %v802_v19  ;;  %vm694_vm7 = vmor %vm692_vm6, %vm693_vm5 }
 0x226   :  { %v689_v30 = vsub.f32 1.0, %v688_v20  ;;  %v896_v9 = vpop.eup %895 }
 0x227   :  { %v768_v61 = vmul.f32 %v896_v9, %v766_v16  ;;  %vm773_vm9 = vweird.f32 %v896_v9 }
 0x228   :  { %v690_v21 = vmul.f32 %v894_v59, %v689_v30  ;;  %vm774_vm11 = vmor %vm772_vm10, %vm773_vm9 }
 0x229   :  { %v769_v37 = vsub.f32 1.0, %v768_v61 }
 0x22a   :  { %v691_v2 = vadd.f32 %v894_v59, %v690_v21 }
 0x22b   :  { %v770_v42 = vmul.f32 %v896_v9, %v769_v37 }
 0x22c   :  { %v695_v33 = vsel %vm694_vm7, %v894_v59, %v691_v2 }
 0x22d   :  { %v700_v38 = vsel %vm697_vm8, %v699_v15, %v695_v33  ;;  %v771_v43 = vadd.f32 %v896_v9, %v770_v42 }
 0x22e   :  { %v701_v52 = vmul.f32 %v700_v38, %v676_v32 }
 0x22f   :  { %v775_v10 = vsel %vm774_vm11, %v896_v9, %v771_v43 }
 0x230   :  { %v830_v46 = vclamps-f32 %v701_v52, 1.0  ;;  %v780_v14 = vsel %vm777_vm12, %v779_v44, %v775_v10 }
 0x231   :  { %v781_v28 = vmul.f32 %v780_v14, %v756_v56 }
 0x232   :  { %v791_v0 = vadd.f32 1.0, %v830_v46 }
 0x233   :  { %v832_v3 = vclamps-f32 %v781_v28, 1.0 }
 0x234   :  { %v801_v49 = vmul.f32 %v791_v0, %v371_v63 }
 0x235   :  { %v793_v48 = vadd.f32 1.0, %v832_v3 }
 0x236   :  { %811 = vst.msk [vmem:[%s1587_s5 + $0x38] sm:$0xff] %vm110_vm1, %v801_v49 }
 0x237   :  { %v803_v55 = vmul.f32 %v793_v48, %v373_v26 }
 0x239   :  { %813 = vst.msk [vmem:[%s1587_s5 + $0x48] sm:$0xff] %vm110_vm1, %v803_v55 }

// kernel: _lambda_.18
= control target key start
LH: loop header
LB: loop body
LE: loop exit
PB: predicated region body
PF: predicated region fallthrough
CT: control target
= control target key end

     0   :  { %vm51_vm0 = vcmask 785408   ;;  %vm86_vm1 = vcmask 261120   ;;  %v495_v43 = vmov 32.0   ;;  %s804_s1 = inlined_call_operand.vmem [shape: f32[96,32], index: 1, kind: input, shape index: {}]   ;;  %s805_s2 = inlined_call_operand.vmem [shape: f32[1,32], index: 2, kind: input, shape index: {}]   ;;  %s806_s0 = inlined_call_operand.vmem [shape: f32[38,96], index: 0, kind: input, shape index: {}]   ;;  %s807_s3 = inlined_call_operand.vmem [shape: f32[1,32], index: 3, kind: input, shape index: {}]   ;;  %s808_s4 = inlined_call_operand.vmem [shape: f32[1,32], index: 4, kind: input, shape index: {}]   ;;  %s809_s5 = inlined_call_operand.vmem [shape: f32[38,32], index: 5, kind: output, shape index: {}]  }
   0x1   :  { %v39_v0 = vld [vmem:[%s804_s1 + $0x50] sm:$0xff]  ;;  %v40_v1 = vld [vmem:[%s804_s1 + $0x58] sm:$0xff]  ;;  %v37_v2 = vld [vmem:[%s804_s1 + $0x40] sm:$0xff]  ;;  %473 = vrcp.f32 %v495_v43 }
   0x2   :  { %v46_v3 = vpack.c.bf16 %v40_v1, %v39_v0  ;;  %v38_v4 = vld [vmem:[%s804_s1 + $0x48] sm:$0xff]  ;;  %v35_v6 = vld [vmem:[%s804_s1 + $0x30] sm:$0xff]  ;;  %v36_v7 = vld [vmem:[%s804_s1 + $0x38] sm:$0xff] }
   0x3   :  { %v45_v5 = vpack.c.bf16 %v38_v4, %v37_v2  ;;  %v44_v8 = vpack.c.bf16 %v36_v7, %v35_v6  ;;  %v33_v9 = vld [vmem:[%s804_s1 + $0x20] sm:$0xff]  ;;  %v34_v10 = vld [vmem:[%s804_s1 + $0x28] sm:$0xff]  ;;  %v31_v12 = vld [vmem:[%s804_s1 + $0x10] sm:$0xff] }
   0x4   :  { %63 = vmatpush.bf16.msra.mxu0 %v46_v3  ;;  %457 = vmatpush.bf16.msra.mxu1 %v46_v3  ;;  %v43_v11 = vpack.c.bf16 %v34_v10, %v33_v9  ;;  %v32_v13 = vld [vmem:[%s804_s1 + $0x18] sm:$0xff]  ;;  %v29_v15 = vld [vmem:[%s804_s1] sm:$0xff]  ;;  %v30_v16 = vld [vmem:[%s804_s1 + $0x8] sm:$0xff] }
   0x5   :  { %458 = vmatpush.bf16.msra.mxu2 %v46_v3  ;;  %v42_v14 = vpack.c.bf16 %v32_v13, %v31_v12  ;;  %v21_v17 = vld [vmem:[%s806_s0] sm:$0xff]  ;;  %v41_v18 = vpack.c.bf16 %v30_v16, %v29_v15  ;;  %v22_v19 = vld [vmem:[%s806_s0 + $0x8] sm:$0xff]  ;;  %v23_v20 = vld [vmem:[%s806_s0 + $0x10] sm:$0xff] }
   0x6   :  { %v24_v21 = vld [vmem:[%s806_s0 + $0x18] sm:$0xff]  ;;  %v25_v22 = vld [vmem:[%s806_s0 + $0x20] sm:$0xff]  ;;  %v26_v23 = vpack.c.bf16 %v22_v19, %v21_v17 }
   0x7   :  { %v27_v24 = vpack.c.bf16 %v24_v21, %v23_v20  ;;  %v28_v25 = vpack.c.bf16 %v25_v22, %v25_v22  ;;  %v470_v26 = vld [vmem:[%s805_s2] ss:$0 sm:$0xff]  ;;  %v474_v44 = vpop.eup %473 }
   0x8   :  { %64 = vmatpush.bf16.msra.mxu0 %v45_v5  ;;  %459 = vmatpush.bf16.msra.mxu1 %v45_v5  ;;  %v103_v45 = vmul.f32 32.0, %v474_v44  ;;  %vm107_vm2 = vweird.f32 %v474_v44 }
   0x9   :  { %460 = vmatpush.bf16.msra.mxu2 %v45_v5 }
   0xa   :  { %v104_v46 = vsub.f32 1.0, %v103_v45  ;;  %v621_v45 = vld [vmem:[%s808_s4] ss:$0 sm:$0xff] }
   0xc   :  { %65 = vmatpush.bf16.msra.mxu0 %v44_v8  ;;  %461 = vmatpush.bf16.msra.mxu1 %v44_v8  ;;  %v105_v47 = vmul.f32 %v474_v44, %v104_v46 }
   0xd   :  { %462 = vmatpush.bf16.msra.mxu2 %v44_v8 }
   0xe   :  { %v106_v48 = vadd.f32 %v474_v44, %v105_v47 }
  0x10   :  { %66 = vmatpush.bf16.msra.mxu0 %v43_v11  ;;  %463 = vmatpush.bf16.msra.mxu1 %v43_v11  ;;  %v108_v49 = vsel %vm107_vm2, %v474_v44, %v106_v48 }
  0x11   :  { %464 = vmatpush.bf16.msra.mxu2 %v43_v11 }
  0x14   :  { %67 = vmatpush.bf16.msra.mxu0 %v42_v14  ;;  %465 = vmatpush.bf16.msra.mxu1 %v42_v14 }
  0x15   :  { %466 = vmatpush.bf16.msra.mxu2 %v42_v14 }
  0x18   :  { %68 = vmatpush.bf16.msra.mxu0 %v41_v18  ;;  %467 = vmatpush.bf16.msra.mxu1 %v41_v18 }
  0x19   :  { %468 = vmatpush.bf16.msra.mxu2 %v41_v18 }
  0x1b   :  { %449 = vmatmul.msk.bf16.vlgmr.msra.gmra.mxu0 %vm51_vm0, %v26_v23  ;;  %450 = vmatmul.msk.bf16.vlgmr.msra.gmra.mxu1 %vm51_vm0, %v27_v24 }
  0x1c   :  { %451 = vmatmul.msk.bf16.vlgmr.msra.gmra.mxu2 %vm51_vm0, %v28_v25 }
  0x98   :  { %v70_v27 = vpop.f32.mrf.mxu0  ;;  %v75_v28 = vpop.f32.mrf.mxu1 }
  0x99   :  { %v71_v29 = vadd.f32 %v470_v26, %v70_v27  ;;  %v76_v30 = vadd.f32 %v470_v26, %v75_v28 }
  0x9b   :  { %v93_v31 = vsel %vm86_vm1, %v76_v30, 0.0  ;;  %v87_v32 = vsel %vm86_vm1, %v71_v29, 0.0 }
  0x9c   :  { %94 = vadd.xlane.f32.xlu1 %v93_v31  ;;  %88 = vadd.xlane.f32.xlu0 %v87_v32 }
  0x9f   :  { %v80_v33 = vpop.f32.mrf.mxu2 }
  0xa0   :  { %v81_v34 = vadd.f32 %v470_v26, %v80_v33  ;;  %v72_v35 = vpop.f32.mrf.mxu0  ;;  %v77_v36 = vpop.f32.mrf.mxu1 }
  0xa1   :  { %v73_v37 = vadd.f32 %v470_v26, %v72_v35  ;;  %v78_v38 = vadd.f32 %v470_v26, %v77_v36 }
  0xa2   :  { %v99_v39 = vsel %vm86_vm1, %v81_v34, 0.0 }
  0xa3   :  { %100 = vadd.xlane.f32.xlu2 %v99_v39  ;;  %v96_v40 = vsel %vm86_vm1, %v78_v38, 0.0  ;;  %v90_v41 = vsel %vm86_vm1, %v73_v37, 0.0 }
  0xa4   :  { %97 = vadd.xlane.f32.xlu1 %v96_v40  ;;  %91 = vadd.xlane.f32.xlu0 %v90_v41  ;;  %v615_v40 = vld [vmem:[%s807_s3] ss:$0 sm:$0xff] }
  0xa7   :  { %v82_v42 = vpop.f32.mrf.mxu2 }
 0x10f   :  { %v95_v50 = vpop.xlane.xlu1 %94  ;;  %v89_v51 = vpop.xlane.xlu0 %88 }
 0x110   :  { %v111_v52 = vmul.f32 %v108_v49, %v95_v50  ;;  %v109_v53 = vmul.f32 %v108_v49, %v89_v51 }
 0x112   :  { %v585_v54 = vsub.f32 %v76_v30, %v111_v52  ;;  %v587_v55 = vsub.f32 %v71_v29, %v109_v53 }
 0x114   :  { %v121_v56 = vmul.f32 %v585_v54, %v585_v54  ;;  %v119_v57 = vmul.f32 %v587_v55, %v587_v55 }
 0x116   :  { %v101_v58 = vpop.xlane.xlu2 %100  ;;  %v130_v59 = vsel %vm86_vm1, %v121_v56, 0.0  ;;  %v124_v60 = vsel %vm86_vm1, %v119_v57, 0.0 }
 0x117   :  { %131 = vadd.xlane.f32.xlu1 %v130_v59  ;;  %v98_v61 = vpop.xlane.xlu1 %97  ;;  %125 = vadd.xlane.f32.xlu2 %v124_v60  ;;  %v92_v62 = vpop.xlane.xlu0 %91  ;;  %v113_v1 = vmul.f32 %v108_v49, %v101_v58 }
 0x118   :  { %v112_v63 = vmul.f32 %v108_v49, %v98_v61  ;;  %v110_v0 = vmul.f32 %v108_v49, %v92_v62 }
 0x119   :  { %v603_v6 = vsub.f32 %v81_v34, %v113_v1 }
 0x11a   :  { %v595_v2 = vsub.f32 %v78_v38, %v112_v63  ;;  %v597_v3 = vsub.f32 %v73_v37, %v110_v0 }
 0x11b   :  { %v123_v9 = vmul.f32 %v603_v6, %v603_v6 }
 0x11c   :  { %v122_v4 = vmul.f32 %v595_v2, %v595_v2  ;;  %v120_v5 = vmul.f32 %v597_v3, %v597_v3 }
 0x11d   :  { %v136_v10 = vsel %vm86_vm1, %v123_v9, 0.0 }
 0x11e   :  { %v133_v7 = vsel %vm86_vm1, %v122_v4, 0.0  ;;  %v127_v8 = vsel %vm86_vm1, %v120_v5, 0.0 }
 0x11f   :  { %134 = vadd.xlane.f32.xlu2 %v133_v7  ;;  %128 = vadd.xlane.f32.xlu0 %v127_v8 }
 0x127   :  { %137 = vadd.xlane.f32.xlu0 %v136_v10 }
 0x18a   :  { %v132_v11 = vpop.xlane.xlu1 %131  ;;  %v126_v12 = vpop.xlane.xlu2 %125 }
 0x18b   :  { %v141_v13 = vmul.f32 %v132_v11, %v108_v49  ;;  %v139_v14 = vmul.f32 %v126_v12, %v108_v49 }
 0x18d   :  { %v146_v15 = vadd.f32 1e-05, %v141_v13  ;;  %v144_v16 = vadd.f32 1e-05, %v139_v14 }
 0x18f   :  { %475 = vrsqrt.f32 %v146_v15  ;;  %vm175_vm5 = vweird.f32 %v146_v15  ;;  %vm155_vm7 = vweird.f32 %v144_v16 }
 0x190   :  { %477 = vrsqrt.f32 %v144_v16 }
 0x192   :  { %v135_v17 = vpop.xlane.xlu2 %134  ;;  %v129_v18 = vpop.xlane.xlu0 %128 }
 0x193   :  { %v142_v19 = vmul.f32 %v135_v17, %v108_v49  ;;  %v140_v20 = vmul.f32 %v129_v18, %v108_v49 }
 0x195   :  { %v476_v21 = vpop.eup %475  ;;  %v147_v22 = vadd.f32 1e-05, %v142_v19  ;;  %v145_v23 = vadd.f32 1e-05, %v140_v20 }
 0x196   :  { %v478_v24 = vpop.eup %477  ;;  %v170_v25 = vmul.f32 %v476_v21, %v146_v15  ;;  %vm176_vm3 = vweird.f32 %v476_v21 }
 0x197   :  { %v150_v26 = vmul.f32 %v478_v24, %v144_v16  ;;  %479 = vrsqrt.f32 %v147_v22  ;;  %vm156_vm4 = vweird.f32 %v478_v24  ;;  %vm177_vm6 = vmor %vm175_vm5, %vm176_vm3  ;;  %vm185_vm11 = vweird.f32 %v147_v22 }
 0x198   :  { %v171_v27 = vmul.f32 %v476_v21, %v170_v25  ;;  %481 = vrsqrt.f32 %v145_v23  ;;  %vm157_vm8 = vmor %vm155_vm7, %vm156_vm4  ;;  %vm165_vm13 = vweird.f32 %v145_v23 }
 0x199   :  { %v151_v28 = vmul.f32 %v478_v24, %v150_v26 }
 0x19a   :  { %v172_v29 = vmul.f32 0.5, %v171_v27  ;;  %v138_v30 = vpop.xlane.xlu0 %137 }
 0x19b   :  { %v152_v31 = vmul.f32 0.5, %v151_v28  ;;  %v143_v32 = vmul.f32 %v138_v30, %v108_v49 }
 0x19c   :  { %v173_v33 = vsub.f32 1.5, %v172_v29 }
 0x19d   :  { %v480_v34 = vpop.eup %479  ;;  %v153_v35 = vsub.f32 1.5, %v152_v31  ;;  %v610_v36 = vadd.f32 1e-05, %v143_v32 }
 0x19e   :  { %v482_v37 = vpop.eup %481  ;;  %v174_v38 = vmul.f32 %v476_v21, %v173_v33  ;;  %v180_v39 = vmul.f32 %v480_v34, %v147_v22  ;;  %vm186_vm9 = vweird.f32 %v480_v34 }
 0x19f   :  { %v154_v41 = vmul.f32 %v478_v24, %v153_v35  ;;  %v160_v42 = vmul.f32 %v482_v37, %v145_v23  ;;  %483 = vrsqrt.f32 %v610_v36  ;;  %vm166_vm10 = vweird.f32 %v482_v37  ;;  %vm187_vm12 = vmor %vm185_vm11, %vm186_vm9 }
 0x1a0   :  { %v178_v43 = vsel %vm177_vm6, %v476_v21, %v174_v38  ;;  %v181_v44 = vmul.f32 %v480_v34, %v180_v39  ;;  %vm167_vm14 = vmor %vm165_vm13, %vm166_vm10  ;;  %vm195_vm0 = vweird.f32 %v610_v36 }
 0x1a1   :  { %v201_v46 = vmul.f32 %v178_v43, %v585_v54  ;;  %v158_v47 = vsel %vm157_vm8, %v478_v24, %v154_v41  ;;  %v161_v48 = vmul.f32 %v482_v37, %v160_v42 }
 0x1a2   :  { %v199_v49 = vmul.f32 %v158_v47, %v587_v55  ;;  %v182_v50 = vmul.f32 0.5, %v181_v44 }
 0x1a3   :  { %v209_v51 = vmul.f32 %v615_v40, %v201_v46  ;;  %v162_v52 = vmul.f32 0.5, %v161_v48 }
 0x1a4   :  { %v207_v53 = vmul.f32 %v615_v40, %v199_v49  ;;  %v183_v56 = vsub.f32 1.5, %v182_v50 }
 0x1a5   :  { %v627_v57 = vpop.eup %483  ;;  %v630_v58 = vadd.f32 %v621_v45, %v209_v51  ;;  %v163_v59 = vsub.f32 1.5, %v162_v52 }
 0x1a6   :  { %v633_v54 = vadd.f32 %v621_v45, %v207_v53  ;;  %v184_v60 = vmul.f32 %v480_v34, %v183_v56  ;;  %v190_v55 = vmul.f32 %v627_v57, %v610_v36  ;;  %vm196_vm15 = vweird.f32 %v627_v57 }
 0x1a7   :  { %v638_v61 = vmul.f32 0.70710677, %v630_v58  ;;  %v164_v62 = vmul.f32 %v482_v37, %v163_v59  ;;  %vm687_vm2 = vmor %vm195_vm0, %vm196_vm15 }
 0x1a8   :  { %v641_v63 = vmul.f32 0.70710677, %v633_v54  ;;  %v188_v0 = vsel %vm187_vm12, %v480_v34, %v184_v60  ;;  %v191_v1 = vmul.f32 %v627_v57, %v190_v55 }
 0x1a9   :  { %v310_v4 = vmul.f32 %v638_v61, %v638_v61  ;;  %v202_v5 = vmul.f32 %v188_v0, %v595_v2  ;;  %v168_v7 = vsel %vm167_vm14, %v482_v37, %v164_v62 }
 0x1aa   :  { %v230_v8 = vmul.f32 %v641_v63, %v641_v63  ;;  %v200_v9 = vmul.f32 %v168_v7, %v597_v3  ;;  %v192_v10 = vmul.f32 0.5, %v191_v1 }
 0x1ab   :  { %v650_v11 = vmin.f32 %v310_v4, 16.0  ;;  %v210_v12 = vmul.f32 %v615_v40, %v202_v5 }
 0x1ac   :  { %v653_v13 = vmin.f32 %v230_v8, 16.0  ;;  %v208_v14 = vmul.f32 %v615_v40, %v200_v9  ;;  %v193_v17 = vsub.f32 1.5, %v192_v10 }
 0x1ad   :  { %v312_v15 = vmul.f32 2.1237322e-06, %v650_v11  ;;  %v323_v16 = vmul.f32 3.8918573e-05, %v650_v11  ;;  %v659_v2 = vadd.f32 %v621_v45, %v210_v12 }
 0x1ae   :  { %v232_v18 = vmul.f32 2.1237322e-06, %v653_v13  ;;  %v243_v3 = vmul.f32 3.8918573e-05, %v653_v13  ;;  %v664_v19 = vadd.f32 %v621_v45, %v208_v14  ;;  %v194_v28 = vmul.f32 %v627_v57, %v193_v17 }
 0x1af   :  { %v313_v20 = vadd.f32 0.00028619796, %v312_v15  ;;  %v324_v21 = vadd.f32 0.001143296, %v323_v16  ;;  %v667_v24 = vmul.f32 0.70710677, %v659_v2 }
 0x1b0   :  { %v233_v22 = vadd.f32 0.00028619796, %v232_v18  ;;  %v244_v23 = vadd.f32 0.001143296, %v243_v3  ;;  %v673_v27 = vmul.f32 0.70710677, %v664_v19  ;;  %v198_v36 = vsel %vm687_vm2, %v627_v57, %v194_v28 }
 0x1b1   :  { %v314_v25 = vmul.f32 %v313_v20, %v650_v11  ;;  %v325_v26 = vmul.f32 %v324_v21, %v650_v11  ;;  %v350_v31 = vmul.f32 %v667_v24, %v667_v24  ;;  %v203_v55 = vmul.f32 %v198_v36, %v603_v6 }
 0x1b2   :  { %v234_v29 = vmul.f32 %v233_v22, %v653_v13  ;;  %v245_v30 = vmul.f32 %v244_v23, %v653_v13  ;;  %v270_v34 = vmul.f32 %v673_v27, %v673_v27 }
 0x1b3   :  { %v315_v32 = vadd.f32 0.0036580483, %v314_v25  ;;  %v326_v33 = vadd.f32 0.014752088, %v325_v26  ;;  %v683_v38 = vmin.f32 %v350_v31, 16.0  ;;  %v211_v18 = vmul.f32 %v615_v40, %v203_v55 }
 0x1b4   :  { %v235_v35 = vadd.f32 0.0036580483, %v234_v29  ;;  %v246_v37 = vadd.f32 0.014752088, %v245_v30  ;;  %v693_v43 = vmin.f32 %v270_v34, 16.0 }
 0x1b5   :  { %v316_v41 = vmul.f32 %v315_v32, %v650_v11  ;;  %v327_v42 = vmul.f32 %v326_v33, %v650_v11  ;;  %v352_v47 = vmul.f32 2.1237322e-06, %v683_v38  ;;  %v363_v48 = vmul.f32 3.8918573e-05, %v683_v38 }
 0x1b6   :  { %v236_v44 = vmul.f32 %v235_v35, %v653_v13  ;;  %v247_v46 = vmul.f32 %v246_v37, %v653_v13  ;;  %v272_v51 = vmul.f32 2.1237322e-06, %v693_v43  ;;  %v283_v4 = vmul.f32 3.8918573e-05, %v693_v43 }
 0x1b7   :  { %v317_v49 = vadd.f32 0.05243302, %v316_v41  ;;  %v328_v50 = vadd.f32 0.112945676, %v327_v42  ;;  %v353_v56 = vadd.f32 0.00028619796, %v352_v47  ;;  %v723_v29 = vadd.f32 %v621_v45, %v211_v18 }
 0x1b8   :  { %v237_v52 = vadd.f32 0.05243302, %v236_v44  ;;  %v248_v53 = vadd.f32 0.112945676, %v247_v46  ;;  %v364_v57 = vadd.f32 0.001143296, %v363_v48 }
 0x1b9   :  { %v318_v59 = vmul.f32 %v317_v49, %v650_v11  ;;  %v329_v60 = vmul.f32 %v328_v50, %v650_v11  ;;  %v273_v1 = vadd.f32 0.00028619796, %v272_v51  ;;  %v354_v8 = vmul.f32 %v353_v56, %v683_v38 }
 0x1ba   :  { %v238_v62 = vmul.f32 %v237_v52, %v653_v13  ;;  %v249_v0 = vmul.f32 %v248_v53, %v653_v13  ;;  %v365_v9 = vmul.f32 %v364_v57, %v683_v38  ;;  %v284_v17 = vadd.f32 0.001143296, %v283_v4 }
 0x1bb   :  { %v319_v5 = vadd.f32 0.18741608, %v318_v59  ;;  %v330_v7 = vadd.f32 0.4994258, %v329_v60  ;;  %v274_v16 = vmul.f32 %v273_v1, %v693_v43  ;;  %v355_v21 = vadd.f32 0.0036580483, %v354_v8 }
 0x1bc   :  { %v250_v10 = vadd.f32 0.4994258, %v249_v0  ;;  %v239_v14 = vadd.f32 0.18741608, %v238_v62  ;;  %v366_v15 = vadd.f32 0.014752088, %v365_v9  ;;  %v285_v26 = vmul.f32 %v284_v17, %v693_v43 }
 0x1bd   :  { %v331_v12 = vmul.f32 %v330_v7, %v650_v11  ;;  %v320_v3 = vmul.f32 %v319_v5, %v650_v11  ;;  %v275_v28 = vadd.f32 0.0036580483, %v274_v16  ;;  %v356_v11 = vmul.f32 %v355_v21, %v683_v38 }
 0x1be   :  { %v251_v6 = vmul.f32 %v250_v10, %v653_v13  ;;  %v367_v23 = vmul.f32 %v366_v15, %v683_v38  ;;  %v240_v25 = vmul.f32 %v239_v14, %v653_v13  ;;  %v286_v32 = vadd.f32 0.014752088, %v285_v26 }
 0x1bf   :  { %v332_v20 = vadd.f32 1.0, %v331_v12  ;;  %v321_v40 = vadd.f32 1.1283791, %v320_v3  ;;  %v276_v34 = vmul.f32 %v275_v28, %v693_v43  ;;  %v729_v13 = vmul.f32 0.70710677, %v723_v29 }
 0x1c0   :  { %v716_v22 = vadd.f32 1.0, %v251_v6  ;;  %v368_v30 = vadd.f32 0.112945676, %v367_v23  ;;  %v241_v31 = vadd.f32 1.1283791, %v240_v25  ;;  %v287_v45 = vmul.f32 %v286_v32, %v693_v43 }
 0x1c1   :  { %485 = vrcp.f32 %v332_v20  ;;  %v322_v37 = vmul.f32 %v321_v40, %v638_v61  ;;  %vm338_vm3 = vweird.f32 %v332_v20  ;;  %v357_v39 = vadd.f32 0.05243302, %v356_v11 }
 0x1c2   :  { %487 = vrcp.f32 %v716_v22  ;;  %v369_v33 = vmul.f32 %v368_v30, %v683_v38  ;;  %v342_v36 = vand.u32 2147483647, %v332_v20  ;;  %v344_v44 = vand.u32 2147483648, %v332_v20 }
 0x1c3   :  { %v242_v47 = vmul.f32 %v241_v31, %v641_v63  ;;  %vm258_vm4 = vweird.f32 %v716_v22  ;;  %v288_v49 = vadd.f32 0.112945676, %v287_v45  ;;  %v264_v51 = vand.u32 2147483648, %v716_v22 }
 0x1c4   :  { %v370_v46 = vadd.f32 0.4994258, %v369_v33  ;;  %v390_v52 = vmul.f32 %v729_v13, %v729_v13  ;;  %v358_v56 = vmul.f32 %v357_v39, %v683_v38  ;;  %v277_v59 = vadd.f32 0.05243302, %v276_v34 }
 0x1c5   :  { %v289_v60 = vmul.f32 %v288_v49, %v693_v43  ;;  %v262_v0 = vand.u32 2147483647, %v716_v22  ;;  %vm343_vm7 = vcmp.eq.f32.partialorder %v342_v36, 8.507059e+37  ;;  %v345_v5 = vor.u32 1.1754944e-38, %v344_v44 }
 0x1c6   :  { %v371_v61 = vmul.f32 %v370_v46, %v683_v38  ;;  %v744_v55 = vmin.f32 %v390_v52, 16.0  ;;  %v265_v8 = vor.u32 1.1754944e-38, %v264_v51  ;;  %v359_v9 = vadd.f32 0.18741608, %v358_v56 }
 0x1c7   :  { %v486_v35 = vpop.eup %485  ;;  %v290_v1 = vadd.f32 0.4994258, %v289_v60  ;;  %v278_v14 = vmul.f32 %v277_v59, %v693_v43  ;;  %vm263_vm10 = vcmp.eq.f32.partialorder %v262_v0, 8.507059e+37  ;;  %v222_v33 = vmul.f32 0.5, %v630_v58 }
 0x1c8   :  { %v488_v41 = vpop.eup %487  ;;  %v334_v42 = vmul.f32 %v486_v35, %v332_v20  ;;  %vm339_vm5 = vweird.f32 %v486_v35  ;;  %v742_v57 = vadd.f32 1.0, %v371_v61  ;;  %v392_v15 = vmul.f32 2.1237322e-06, %v744_v55 }
 0x1c9   :  { %v254_v48 = vmul.f32 %v488_v41, %v716_v22  ;;  %vm259_vm6 = vweird.f32 %v488_v41  ;;  %vm340_vm8 = vmor %vm338_vm3, %vm339_vm5  ;;  %v291_v10 = vmul.f32 %v290_v1, %v693_v43  ;;  %v403_v6 = vmul.f32 3.8918573e-05, %v744_v55 }
 0x1ca   :  { %v335_v50 = vsub.f32 1.0, %v334_v42  ;;  %489 = vrcp.f32 %v742_v57  ;;  %vm260_vm9 = vmor %vm258_vm4, %vm259_vm6  ;;  %v393_v21 = vadd.f32 0.00028619796, %v392_v15  ;;  %v360_v26 = vmul.f32 %v359_v9, %v683_v38 }
 0x1cb   :  { %v255_v53 = vsub.f32 1.0, %v254_v48  ;;  %v755_v18 = vadd.f32 1.0, %v291_v10  ;;  %v404_v23 = vadd.f32 0.001143296, %v403_v6  ;;  %v279_v40 = vadd.f32 0.18741608, %v278_v14 }
 0x1cc   :  { %v336_v63 = vmul.f32 %v486_v35, %v335_v50  ;;  %v394_v11 = vmul.f32 %v393_v21, %v744_v55  ;;  %v361_v38 = vadd.f32 1.1283791, %v360_v26  ;;  %v384_v36 = vand.u32 2147483648, %v742_v57 }
 0x1cd   :  { %v256_v62 = vmul.f32 %v488_v41, %v255_v53  ;;  %491 = vrcp.f32 %v755_v18  ;;  %v405_v30 = vmul.f32 %v404_v23, %v744_v55  ;;  %v280_v44 = vmul.f32 %v279_v40, %v693_v43 }
 0x1ce   :  { %v337_v4 = vadd.f32 %v486_v35, %v336_v63  ;;  %v382_v58 = vand.u32 2147483647, %v742_v57  ;;  %v362_v43 = vmul.f32 %v361_v38, %v667_v24  ;;  %vm378_vm12 = vweird.f32 %v742_v57 }
 0x1cf   :  { %v257_v7 = vadd.f32 %v488_v41, %v256_v62  ;;  %v385_v52 = vor.u32 1.1754944e-38, %v384_v36  ;;  %v281_v53 = vadd.f32 1.1283791, %v280_v44  ;;  %v302_v63 = vand.u32 2147483647, %v755_v18 }
 0x1d0   :  { %v341_v12 = vsel %vm340_vm8, %v486_v35, %v337_v4  ;;  %v490_v22 = vpop.eup %489  ;;  %v220_v35 = vmul.f32 0.5, %v633_v54  ;;  %vm383_vm14 = vcmp.eq.f32.partialorder %v382_v58, 8.507059e+37  ;;  %v304_v62 = vand.u32 2147483648, %v755_v18 }
 0x1d1   :  { %v346_v16 = vsel %vm343_vm7, %v345_v5, %v341_v12  ;;  %v261_v17 = vsel %vm260_vm9, %v488_v41, %v257_v7  ;;  %v374_v32 = vmul.f32 %v490_v22, %v742_v57  ;;  %v395_v41 = vadd.f32 0.0036580483, %v394_v11 }
 0x1d2   :  { %v347_v3 = vmul.f32 %v346_v16, %v322_v37  ;;  %v266_v20 = vsel %vm263_vm10, %v265_v8, %v261_v17  ;;  %v406_v37 = vadd.f32 0.014752088, %v405_v30  ;;  %vm379_vm11 = vweird.f32 %v490_v22 }
 0x1d3   :  { %v267_v25 = vmul.f32 %v266_v20, %v242_v47  ;;  %v375_v45 = vsub.f32 1.0, %v374_v32  ;;  %v492_v47 = vpop.eup %491  ;;  %v396_v61 = vmul.f32 %v395_v41, %v744_v55  ;;  %vm380_vm13 = vmor %vm378_vm12, %vm379_vm11  ;;  %vm298_vm0 = vweird.f32 %v755_v18 }
 0x1d4   :  { %v454_v28 = vclamps-f32 %v347_v3, 1.0  ;;  %v407_v46 = vmul.f32 %v406_v37, %v744_v55  ;;  %v294_v54 = vmul.f32 %v492_v47, %v755_v18  ;;  %vm299_vm15 = vweird.f32 %v492_v47 }
 0x1d5   :  { %v452_v31 = vclamps-f32 %v267_v25, 1.0  ;;  %v376_v49 = vmul.f32 %v490_v22, %v375_v45  ;;  %v397_v57 = vadd.f32 0.05243302, %v396_v61  ;;  %vm300_vm2 = vmor %vm298_vm0, %vm299_vm15  ;;  %v305_v9 = vor.u32 1.1754944e-38, %v304_v62 }
 0x1d6   :  { %v432_v34 = vadd.f32 1.0, %v454_v28  ;;  %v408_v50 = vadd.f32 0.112945676, %v407_v46  ;;  %v295_v56 = vsub.f32 1.0, %v294_v54  ;;  %v282_v10 = vmul.f32 %v281_v53, %v673_v27 }
 0x1d7   :  { %v430_v39 = vadd.f32 1.0, %v452_v31  ;;  %v377_v51 = vadd.f32 %v490_v22, %v376_v49  ;;  %vm303_vm3 = vcmp.eq.f32.partialorder %v302_v63, 8.507059e+37  ;;  %v223_v15 = vmul.f32 0.5, %v659_v2 }
 0x1d8   :  { %v437_v42 = vmul.f32 %v432_v34, %v222_v33  ;;  %v409_v59 = vmul.f32 %v408_v50, %v744_v55  ;;  %v296_v1 = vmul.f32 %v492_v47, %v295_v56  ;;  %v398_v17 = vmul.f32 %v397_v57, %v744_v55 }
 0x1d9   :  { %v435_v48 = vmul.f32 %v430_v39, %v220_v35  ;;  %v381_v60 = vsel %vm380_vm13, %v490_v22, %v377_v51  ;;  %v221_v27 = vmul.f32 0.5, %v664_v19  ;;  %v224_v39 = vmul.f32 0.5, %v723_v29 }
 0x1da   :  { %442 = vst.msk [vmem:[%s809_s5 + $0x10] sm:$0xff] %vm86_vm1, %v437_v42  ;;  %v386_v0 = vsel %vm383_vm14, %v385_v52, %v381_v60  ;;  %v410_v24 = vadd.f32 0.4994258, %v409_v59  ;;  %v297_v5 = vadd.f32 %v492_v47, %v296_v1  ;;  %v399_v21 = vadd.f32 0.18741608, %v398_v17 }
 0x1db   :  { %440 = vst.msk [vmem:[%s809_s5] sm:$0xff] %vm86_vm1, %v435_v48  ;;  %v387_v4 = vmul.f32 %v386_v0, %v362_v43 }
 0x1dc   :  { %v411_v7 = vmul.f32 %v410_v24, %v744_v55  ;;  %v301_v12 = vsel %vm300_vm2, %v492_v47, %v297_v5  ;;  %v400_v2 = vmul.f32 %v399_v21, %v744_v55 }
 0x1dd   :  { %v455_v8 = vclamps-f32 %v387_v4, 1.0  ;;  %v306_v16 = vsel %vm303_vm3, %v305_v9, %v301_v12 }
 0x1de   :  { %v412_v14 = vadd.f32 1.0, %v411_v7  ;;  %v307_v3 = vmul.f32 %v306_v16, %v282_v10  ;;  %v401_v11 = vadd.f32 1.1283791, %v400_v2 }
 0x1df   :  { %v433_v6 = vadd.f32 1.0, %v455_v8 }
 0x1e0   :  { %493 = vrcp.f32 %v412_v14  ;;  %v453_v18 = vclamps-f32 %v307_v3, 1.0  ;;  %v424_v40 = vand.u32 2147483648, %v412_v14  ;;  %v422_v31 = vand.u32 2147483647, %v412_v14 }
 0x1e1   :  { %v438_v20 = vmul.f32 %v433_v6, %v223_v15  ;;  %vm418_vm5 = vweird.f32 %v412_v14  ;;  %v402_v33 = vmul.f32 %v401_v11, %v729_v13 }
 0x1e2   :  { %v431_v23 = vadd.f32 1.0, %v453_v18  ;;  %v425_v19 = vor.u32 1.1754944e-38, %v424_v40  ;;  %vm423_vm7 = vcmp.eq.f32.partialorder %v422_v31, 8.507059e+37 }
 0x1e3   :  { %443 = vst.msk [vmem:[%s809_s5 + $0x18] sm:$0xff] %vm86_vm1, %v438_v20 }
 0x1e4   :  { %v436_v26 = vmul.f32 %v431_v23, %v221_v27 }
 0x1e6   :  { %v494_v25 = vpop.eup %493  ;;  %441 = vst.msk [vmem:[%s809_s5 + $0x8] sm:$0xff] %vm86_vm1, %v436_v26 }
 0x1e7   :  { %v414_v22 = vmul.f32 %v494_v25, %v412_v14  ;;  %vm419_vm4 = vweird.f32 %v494_v25 }
 0x1e8   :  { %vm420_vm6 = vmor %vm418_vm5, %vm419_vm4 }
 0x1e9   :  { %v415_v28 = vsub.f32 1.0, %v414_v22 }
 0x1eb   :  { %v416_v30 = vmul.f32 %v494_v25, %v415_v28 }
 0x1ed   :  { %v417_v32 = vadd.f32 %v494_v25, %v416_v30 }
 0x1ef   :  { %v421_v34 = vsel %vm420_vm6, %v494_v25, %v417_v32 }
 0x1f0   :  { %v426_v55 = vsel %vm423_vm7, %v425_v19, %v421_v34 }
 0x1f1   :  { %v427_v35 = vmul.f32 %v426_v55, %v402_v33 }
 0x1f3   :  { %v456_v37 = vclamps-f32 %v427_v35, 1.0 }
 0x1f5   :  { %v434_v38 = vadd.f32 1.0, %v456_v37 }
 0x1f7   :  { %v439_v45 = vmul.f32 %v434_v38, %v224_v39 }
 0x1f9   :  { %444 = vst.msk [vmem:[%s809_s5 + $0x20] sm:$0xff] %vm86_vm1, %v439_v45 }

// kernel: _lambda_.19
= control target key start
LH: loop header
LB: loop body
LE: loop exit
PB: predicated region body
PF: predicated region fallthrough
CT: control target
= control target key end

     0   :  { %vm28_vm0 = vcmask 261120   ;;  %v239_v10 = vmov 32.0   ;;  %s371_s0 = inlined_call_operand.vmem [shape: f32[38,32], index: 0, kind: input, shape index: {}]   ;;  %s372_s3 = inlined_call_operand.vmem [shape: f32[1,32], index: 3, kind: input, shape index: {}]   ;;  %s373_s4 = inlined_call_operand.vmem [shape: f32[1,32], index: 4, kind: input, shape index: {}]   ;;  %s374_s2 = inlined_call_operand.vmem [shape: f32[1,128], index: 2, kind: input, shape index: {}]   ;;  %s375_s1 = inlined_call_operand.vmem [shape: f32[32,128], index: 1, kind: input, shape index: {}]   ;;  %s376_s5 = inlined_call_operand.vmem [shape: f32[38,128], index: 5, kind: output, shape index: {}]  }
   0x1   :  { %v25_v0 = vld [vmem:[%s371_s0 + $0x20] sm:$0xff]  ;;  %v22_v1 = vld [vmem:[%s371_s0 + $0x8] sm:$0xff]  ;;  %v24_v4 = vld [vmem:[%s371_s0 + $0x18] sm:$0xff]  ;;  %227 = vrcp.f32 %v239_v10 }
   0x2   :  { %v41_v2 = vsel %vm28_vm0, %v25_v0, 0.0  ;;  %v32_v3 = vsel %vm28_vm0, %v22_v1, 0.0  ;;  %v38_v5 = vsel %vm28_vm0, %v24_v4, 0.0  ;;  %v23_v6 = vld [vmem:[%s371_s0 + $0x10] sm:$0xff]  ;;  %v21_v7 = vld [vmem:[%s371_s0] sm:$0xff]  ;;  %v168_v43 = vld [vmem:[%s375_s1 + $0x18] sm:$0xff] }
   0x3   :  { %42 = vadd.xlane.f32.xlu0 %v41_v2  ;;  %33 = vadd.xlane.f32.xlu1 %v32_v3  ;;  %v35_v8 = vsel %vm28_vm0, %v23_v6, 0.0  ;;  %v29_v9 = vsel %vm28_vm0, %v21_v7, 0.0  ;;  %v167_v42 = vld [vmem:[%s375_s1 + $0x10] sm:$0xff]  ;;  %v165_v45 = vld [vmem:[%s375_s1] sm:$0xff]  ;;  %v166_v46 = vld [vmem:[%s375_s1 + $0x8] sm:$0xff] }
   0x4   :  { %39 = vadd.xlane.f32.xlu2 %v38_v5  ;;  %v170_v44 = vpack.c.bf16 %v168_v43, %v167_v42  ;;  %v169_v47 = vpack.c.bf16 %v166_v46, %v165_v45 }
   0x6   :  { %220 = vmatpush.bf16.msra.mxu2 %v170_v44  ;;  %190 = vmatpush.bf16.msra.mxu0 %v170_v44 }
   0x7   :  { %v228_v11 = vpop.eup %227  ;;  %219 = vmatpush.bf16.msra.mxu1 %v170_v44 }
   0x8   :  { %v45_v12 = vmul.f32 32.0, %v228_v11  ;;  %vm49_vm1 = vweird.f32 %v228_v11 }
   0xa   :  { %v46_v13 = vsub.f32 1.0, %v45_v12  ;;  %222 = vmatpush.bf16.msra.mxu2 %v169_v47  ;;  %191 = vmatpush.bf16.msra.mxu0 %v169_v47 }
   0xb   :  { %36 = vadd.xlane.f32.xlu1 %v35_v8  ;;  %30 = vadd.xlane.f32.xlu0 %v29_v9 }
   0xc   :  { %v47_v14 = vmul.f32 %v228_v11, %v46_v13  ;;  %221 = vmatpush.bf16.msra.mxu1 %v169_v47 }
   0xe   :  { %v48_v15 = vadd.f32 %v228_v11, %v47_v14 }
  0x10   :  { %v290_v16 = vsel %vm49_vm1, %v228_v11, %v48_v15  ;;  %v224_v15 = vld [vmem:[%s372_s3] ss:$0 sm:$0xff] }
  0x76   :  { %v43_v17 = vpop.xlane.xlu0 %42  ;;  %v34_v18 = vpop.xlane.xlu1 %33 }
  0x77   :  { %v55_v19 = vmul.f32 %v290_v16, %v43_v17  ;;  %v52_v20 = vmul.f32 %v290_v16, %v34_v18  ;;  %v40_v25 = vpop.xlane.xlu2 %39 }
  0x78   :  { %v54_v32 = vmul.f32 %v290_v16, %v40_v25 }
  0x79   :  { %v294_v21 = vsub.f32 %v25_v0, %v55_v19  ;;  %v296_v22 = vsub.f32 %v22_v1, %v52_v20  ;;  %v225_v20 = vld [vmem:[%s373_s4] ss:$0 sm:$0xff] }
  0x7a   :  { %v311_v35 = vsub.f32 %v24_v4, %v54_v32 }
  0x7b   :  { %v65_v23 = vmul.f32 %v294_v21, %v294_v21  ;;  %v62_v24 = vmul.f32 %v296_v22, %v296_v22 }
  0x7c   :  { %v64_v40 = vmul.f32 %v311_v35, %v311_v35 }
  0x7d   :  { %v78_v26 = vsel %vm28_vm0, %v65_v23, 0.0  ;;  %v69_v27 = vsel %vm28_vm0, %v62_v24, 0.0 }
  0x7e   :  { %79 = vadd.xlane.f32.xlu2 %v78_v26  ;;  %70 = vadd.xlane.f32.xlu1 %v69_v27  ;;  %v37_v28 = vpop.xlane.xlu1 %36  ;;  %v31_v29 = vpop.xlane.xlu0 %30  ;;  %v75_v41 = vsel %vm28_vm0, %v64_v40, 0.0 }
  0x7f   :  { %v53_v30 = vmul.f32 %v290_v16, %v37_v28  ;;  %v51_v31 = vmul.f32 %v290_v16, %v31_v29 }
  0x81   :  { %v307_v33 = vsub.f32 %v23_v6, %v53_v30  ;;  %v309_v34 = vsub.f32 %v21_v7, %v51_v31 }
  0x83   :  { %v63_v36 = vmul.f32 %v307_v33, %v307_v33  ;;  %v61_v37 = vmul.f32 %v309_v34, %v309_v34 }
  0x85   :  { %v72_v38 = vsel %vm28_vm0, %v63_v36, 0.0  ;;  %v66_v39 = vsel %vm28_vm0, %v61_v37, 0.0 }
  0x86   :  { %73 = vadd.xlane.f32.xlu2 %v72_v38  ;;  %67 = vadd.xlane.f32.xlu0 %v66_v39 }
  0x8e   :  { %76 = vadd.xlane.f32.xlu0 %v75_v41 }
  0xf1   :  { %v80_v48 = vpop.xlane.xlu2 %79  ;;  %v71_v49 = vpop.xlane.xlu1 %70 }
  0xf2   :  { %v85_v50 = vmul.f32 %v80_v48, %v290_v16  ;;  %v82_v51 = vmul.f32 %v71_v49, %v290_v16 }
  0xf4   :  { %v90_v52 = vadd.f32 1e-05, %v85_v50  ;;  %v87_v53 = vadd.f32 1e-05, %v82_v51 }
  0xf6   :  { %229 = vrsqrt.f32 %v90_v52  ;;  %vm137_vm3 = vweird.f32 %v90_v52  ;;  %vm107_vm4 = vweird.f32 %v87_v53 }
  0xf7   :  { %231 = vrsqrt.f32 %v87_v53 }
  0xf9   :  { %v74_v54 = vpop.xlane.xlu2 %73  ;;  %v68_v55 = vpop.xlane.xlu0 %67 }
  0xfa   :  { %v83_v56 = vmul.f32 %v74_v54, %v290_v16  ;;  %v81_v57 = vmul.f32 %v68_v55, %v290_v16 }
  0xfc   :  { %v230_v58 = vpop.eup %229  ;;  %v88_v59 = vadd.f32 1e-05, %v83_v56  ;;  %v86_v60 = vadd.f32 1e-05, %v81_v57 }
  0xfd   :  { %v232_v61 = vpop.eup %231  ;;  %v132_v62 = vmul.f32 %v230_v58, %v90_v52  ;;  %vm138_vm2 = vweird.f32 %v230_v58 }
  0xfe   :  { %v102_v63 = vmul.f32 %v232_v61, %v87_v53  ;;  %233 = vrsqrt.f32 %v88_v59  ;;  %vm139_vm5 = vmor %vm137_vm3, %vm138_vm2  ;;  %vm108_vm6 = vweird.f32 %v232_v61  ;;  %vm117_vm8 = vweird.f32 %v88_v59 }
  0xff   :  { %v133_v0 = vmul.f32 %v230_v58, %v132_v62  ;;  %235 = vrsqrt.f32 %v86_v60  ;;  %vm109_vm7 = vmor %vm107_vm4, %vm108_vm6  ;;  %vm97_vm11 = vweird.f32 %v86_v60 }
 0x100   :  { %v103_v1 = vmul.f32 %v232_v61, %v102_v63 }
 0x101   :  { %v134_v2 = vmul.f32 0.5, %v133_v0  ;;  %v77_v3 = vpop.xlane.xlu0 %76 }
 0x102   :  { %v104_v4 = vmul.f32 0.5, %v103_v1  ;;  %v84_v5 = vmul.f32 %v77_v3, %v290_v16 }
 0x103   :  { %v135_v6 = vsub.f32 1.5, %v134_v2 }
 0x104   :  { %v234_v7 = vpop.eup %233  ;;  %v105_v8 = vsub.f32 1.5, %v104_v4  ;;  %v89_v9 = vadd.f32 1e-05, %v84_v5 }
 0x105   :  { %v236_v10 = vpop.eup %235  ;;  %v136_v11 = vmul.f32 %v230_v58, %v135_v6  ;;  %v112_v12 = vmul.f32 %v234_v7, %v88_v59  ;;  %vm118_vm10 = vweird.f32 %v234_v7 }
 0x106   :  { %v106_v13 = vmul.f32 %v232_v61, %v105_v8  ;;  %v92_v14 = vmul.f32 %v236_v10, %v86_v60  ;;  %237 = vrsqrt.f32 %v89_v9  ;;  %vm98_vm9 = vweird.f32 %v236_v10  ;;  %vm119_vm13 = vmor %vm117_vm8, %vm118_vm10 }
 0x107   :  { %v140_v16 = vsel %vm139_vm5, %v230_v58, %v136_v11  ;;  %v113_v17 = vmul.f32 %v234_v7, %v112_v12  ;;  %vm99_vm12 = vmor %vm97_vm11, %vm98_vm9  ;;  %vm127_vm15 = vweird.f32 %v89_v9 }
 0x108   :  { %v93_v18 = vmul.f32 %v236_v10, %v92_v14  ;;  %v145_v19 = vmul.f32 %v140_v16, %v294_v21  ;;  %v110_v24 = vsel %vm109_vm7, %v232_v61, %v106_v13 }
 0x109   :  { %v114_v23 = vmul.f32 0.5, %v113_v17  ;;  %v142_v31 = vmul.f32 %v110_v24, %v296_v22 }
 0x10a   :  { %v94_v25 = vmul.f32 0.5, %v93_v18  ;;  %v153_v26 = vmul.f32 %v224_v15, %v145_v19 }
 0x10b   :  { %v115_v27 = vsub.f32 1.5, %v114_v23  ;;  %v150_v43 = vmul.f32 %v224_v15, %v142_v31 }
 0x10c   :  { %v238_v28 = vpop.eup %237  ;;  %v95_v29 = vsub.f32 1.5, %v94_v25  ;;  %v161_v30 = vadd.f32 %v225_v20, %v153_v26 }
 0x10d   :  { %v116_v32 = vmul.f32 %v234_v7, %v115_v27  ;;  %v122_v21 = vmul.f32 %v238_v28, %v89_v9  ;;  %vm128_vm14 = vweird.f32 %v238_v28  ;;  %v158_v48 = vadd.f32 %v225_v20, %v150_v43 }
 0x10e   :  { %v96_v36 = vmul.f32 %v236_v10, %v95_v29  ;;  %v164_v37 = vpack.c.bf16 %v161_v30, %v161_v30  ;;  %vm129_vm1 = vmor %vm127_vm15, %vm128_vm14 }
 0x10f   :  { %v123_v38 = vmul.f32 %v238_v28, %v122_v21  ;;  %v120_v40 = vsel %vm119_vm13, %v234_v7, %v116_v32 }
 0x110   :  { %v100_v39 = vsel %vm99_vm12, %v236_v10, %v96_v36  ;;  %218 = vmatmul.msk.bf16.vlgmr.msra.gmra.mxu2 %vm28_vm0, %v164_v37  ;;  %v143_v45 = vmul.f32 %v120_v40, %v307_v33  ;;  %v226_v33 = vld [vmem:[%s374_s2] ss:$0 sm:$0xff] }
 0x111   :  { %v141_v41 = vmul.f32 %v100_v39, %v309_v34  ;;  %v124_v42 = vmul.f32 0.5, %v123_v38 }
 0x112   :  { %v151_v52 = vmul.f32 %v224_v15, %v143_v45 }
 0x113   :  { %v125_v44 = vsub.f32 1.5, %v124_v42  ;;  %v149_v22 = vmul.f32 %v224_v15, %v141_v41 }
 0x114   :  { %v159_v53 = vadd.f32 %v225_v20, %v151_v52 }
 0x115   :  { %v126_v46 = vmul.f32 %v238_v28, %v125_v44  ;;  %v157_v47 = vadd.f32 %v225_v20, %v149_v22 }
 0x117   :  { %v130_v49 = vsel %vm129_vm1, %v238_v28, %v126_v46  ;;  %v162_v50 = vpack.c.bf16 %v158_v48, %v157_v47 }
 0x118   :  { %v144_v51 = vmul.f32 %v130_v49, %v311_v35 }
 0x119   :  { %216 = vmatmul.msk.bf16.vlgmr.msra.gmra.mxu0 %vm28_vm0, %v162_v50 }
 0x11a   :  { %v152_v34 = vmul.f32 %v224_v15, %v144_v51 }
 0x11c   :  { %v160_v54 = vadd.f32 %v225_v20, %v152_v34 }
 0x11e   :  { %v163_v55 = vpack.c.bf16 %v160_v54, %v159_v53 }
 0x120   :  { %217 = vmatmul.msk.bf16.vlgmr.msra.gmra.mxu1 %vm28_vm0, %v163_v55 }
 0x193   :  { %v203_v56 = vpop.f32.mrf.mxu2 }
 0x194   :  { %v204_v57 = vadd.f32 %v226_v33, %v203_v56 }
 0x196   :  { %211 = vst [vmem:[%s376_s5 + $0x20] sm:$0xff] %v204_v57  ;;  %v193_v35 = vpop.f32.mrf.mxu0 }
 0x197   :  { %v194_v58 = vadd.f32 %v226_v33, %v193_v35 }
 0x199   :  { %207 = vst [vmem:[%s376_s5] sm:$0xff] %v194_v58 }
 0x19b   :  { %v205_v59 = vpop.f32.mrf.mxu2 }
 0x19d   :  { %v198_v60 = vpop.f32.mrf.mxu1 }
 0x19e   :  { %v195_v61 = vpop.f32.mrf.mxu0  ;;  %v199_v62 = vadd.f32 %v226_v33, %v198_v60 }
 0x19f   :  { %v196_v63 = vadd.f32 %v226_v33, %v195_v61 }
 0x1a0   :  { %209 = vst [vmem:[%s376_s5 + $0x10] sm:$0xff] %v199_v62 }
 0x1a1   :  { %208 = vst [vmem:[%s376_s5 + $0x8] sm:$0xff] %v196_v63 }
 0x1a5   :  { %v200_v0 = vpop.f32.mrf.mxu1 }
 0x1a6   :  { %v201_v1 = vadd.f32 %v226_v33, %v200_v0 }
 0x1a8   :  { %210 = vst [vmem:[%s376_s5 + $0x18] sm:$0xff] %v201_v1 }

// kernel: _lambda_.20
= control target key start
LH: loop header
LB: loop body
LE: loop exit
PB: predicated region body
PF: predicated region fallthrough
CT: control target
= control target key end

     0   :  { %s922_s22 = smov 64   ;;  %s923_s23 = smov 96   ;;  %vm520_vm0 = vcmask 261120   ;;  %vm526_vm1 = vcmask 523264   ;;  %vm532_vm2 = vcmask 785408   ;;  %s1615_s1 = inlined_call_operand.vmem [shape: f32[4,256,32], index: 1, kind: input, shape index: {}]   ;;  %s1616_s0 = inlined_call_operand.vmem [shape: f32[4,40,256], index: 0, kind: input, shape index: {}]   ;;  %s1617_s2 = inlined_call_operand.vmem [shape: f32[1,128], index: 2, kind: input, shape index: {}]   ;;  %s1618_s3 = inlined_call_operand.vmem [shape: f32[40,128], index: 3, kind: output, shape index: {}]  }
   0x1   :  { %v44_v0 = vld [vmem:[%s1615_s1 + $0x70] sm:$0xff]  ;;  %v45_v1 = vld [vmem:[%s1615_s1 + $0x78] sm:$0xff]  ;;  %v42_v11 = vld [vmem:[%s1615_s1 + $0x60] sm:$0xff] }
   0x2   :  { %v60_v2 = vld [vmem:[%s1615_s1 + $0xf0] sm:$0xff]  ;;  %v69_v3 = vpack.c.bf16 %v45_v1, %v44_v0  ;;  %v61_v4 = vld [vmem:[%s1615_s1 + $0xf8] sm:$0xff]  ;;  %v43_v13 = vld [vmem:[%s1615_s1 + $0x68] sm:$0xff] }
   0x3   :  { %v800_v5 = vld [vmem:[%s1615_s1 + $0x170] sm:$0xff]  ;;  %v801_v6 = vld [vmem:[%s1615_s1 + $0x178] sm:$0xff]  ;;  %v77_v7 = vpack.c.bf16 %v61_v4, %v60_v2  ;;  %v58_v14 = vld [vmem:[%s1615_s1 + $0xe0] sm:$0xff]  ;;  %v68_v16 = vpack.c.bf16 %v43_v13, %v42_v11 }
   0x4   :  { %v181_v8 = vpack.c.bf16 %v801_v6, %v800_v5  ;;  %v816_v9 = vld [vmem:[%s1615_s1 + $0x1f0] sm:$0xff]  ;;  %v817_v10 = vld [vmem:[%s1615_s1 + $0x1f8] sm:$0xff]  ;;  %78 = vmatpush.bf16.msra.mxu0 %v69_v3  ;;  %v59_v15 = vld [vmem:[%s1615_s1 + $0xe8] sm:$0xff] }
   0x5   :  { %v189_v12 = vpack.c.bf16 %v817_v10, %v816_v9  ;;  %101 = vmatpush.bf16.msra.mxu1 %v77_v7  ;;  %v76_v17 = vpack.c.bf16 %v59_v15, %v58_v14  ;;  %v798_v18 = vld [vmem:[%s1615_s1 + $0x160] sm:$0xff]  ;;  %v799_v19 = vld [vmem:[%s1615_s1 + $0x168] sm:$0xff]  ;;  %v40_v23 = vld [vmem:[%s1615_s1 + $0x50] sm:$0xff] }
   0x6   :  { %190 = vmatpush.bf16.msra.mxu2 %v181_v8  ;;  %v814_v20 = vld [vmem:[%s1615_s1 + $0x1e0] sm:$0xff]  ;;  %v180_v21 = vpack.c.bf16 %v799_v19, %v798_v18  ;;  %v815_v22 = vld [vmem:[%s1615_s1 + $0x1e8] sm:$0xff]  ;;  %v41_v24 = vld [vmem:[%s1615_s1 + $0x58] sm:$0xff] }
   0x7   :  { %213 = vmatpush.bf16.msra.mxu3 %v189_v12  ;;  %v188_v25 = vpack.c.bf16 %v815_v22, %v814_v20  ;;  %v56_v26 = vld [vmem:[%s1615_s1 + $0xd0] sm:$0xff]  ;;  %v57_v27 = vld [vmem:[%s1615_s1 + $0xd8] sm:$0xff]  ;;  %v67_v29 = vpack.c.bf16 %v41_v24, %v40_v23  ;;  %v38_v35 = vld [vmem:[%s1615_s1 + $0x40] sm:$0xff] }
   0x8   :  { %v796_v28 = vld [vmem:[%s1615_s1 + $0x150] sm:$0xff]  ;;  %79 = vmatpush.bf16.msra.mxu0 %v68_v16  ;;  %v797_v30 = vld [vmem:[%s1615_s1 + $0x158] sm:$0xff]  ;;  %v75_v33 = vpack.c.bf16 %v57_v27, %v56_v26  ;;  %v39_v36 = vld [vmem:[%s1615_s1 + $0x48] sm:$0xff] }
   0x9   :  { %v812_v31 = vld [vmem:[%s1615_s1 + $0x1d0] sm:$0xff]  ;;  %v813_v32 = vld [vmem:[%s1615_s1 + $0x1d8] sm:$0xff]  ;;  %102 = vmatpush.bf16.msra.mxu1 %v76_v17  ;;  %v179_v34 = vpack.c.bf16 %v797_v30, %v796_v28  ;;  %v54_v37 = vld [vmem:[%s1615_s1 + $0xc0] sm:$0xff]  ;;  %v66_v44 = vpack.c.bf16 %v39_v36, %v38_v35 }
   0xa   :  { %191 = vmatpush.bf16.msra.mxu2 %v180_v21  ;;  %v187_v38 = vpack.c.bf16 %v813_v32, %v812_v31  ;;  %v55_v39 = vld [vmem:[%s1615_s1 + $0xc8] sm:$0xff]  ;;  %v794_v40 = vld [vmem:[%s1615_s1 + $0x140] sm:$0xff]  ;;  %v36_v47 = vld [vmem:[%s1615_s1 + $0x30] sm:$0xff] }
   0xb   :  { %214 = vmatpush.bf16.msra.mxu3 %v188_v25  ;;  %v795_v41 = vld [vmem:[%s1615_s1 + $0x148] sm:$0xff]  ;;  %v810_v42 = vld [vmem:[%s1615_s1 + $0x1c0] sm:$0xff]  ;;  %v74_v45 = vpack.c.bf16 %v55_v39, %v54_v37  ;;  %v37_v48 = vld [vmem:[%s1615_s1 + $0x38] sm:$0xff] }
   0xc   :  { %v811_v43 = vld [vmem:[%s1615_s1 + $0x1c8] sm:$0xff]  ;;  %80 = vmatpush.bf16.msra.mxu0 %v67_v29  ;;  %v178_v46 = vpack.c.bf16 %v795_v41, %v794_v40  ;;  %v52_v49 = vld [vmem:[%s1615_s1 + $0xb0] sm:$0xff]  ;;  %v53_v51 = vld [vmem:[%s1615_s1 + $0xb8] sm:$0xff]  ;;  %v65_v56 = vpack.c.bf16 %v37_v48, %v36_v47 }
   0xd   :  { %103 = vmatpush.bf16.msra.mxu1 %v75_v33  ;;  %v186_v50 = vpack.c.bf16 %v811_v43, %v810_v42  ;;  %v792_v52 = vld [vmem:[%s1615_s1 + $0x130] sm:$0xff]  ;;  %v793_v53 = vld [vmem:[%s1615_s1 + $0x138] sm:$0xff]  ;;  %v73_v57 = vpack.c.bf16 %v53_v51, %v52_v49  ;;  %v34_v59 = vld [vmem:[%s1615_s1 + $0x20] sm:$0xff] }
   0xe   :  { %192 = vmatpush.bf16.msra.mxu2 %v179_v34  ;;  %v808_v54 = vld [vmem:[%s1615_s1 + $0x1b0] sm:$0xff]  ;;  %v809_v55 = vld [vmem:[%s1615_s1 + $0x1b8] sm:$0xff]  ;;  %v177_v58 = vpack.c.bf16 %v793_v53, %v792_v52  ;;  %v35_v60 = vld [vmem:[%s1615_s1 + $0x28] sm:$0xff] }
   0xf   :  { %215 = vmatpush.bf16.msra.mxu3 %v187_v38  ;;  %v50_v61 = vld [vmem:[%s1615_s1 + $0xa0] sm:$0xff]  ;;  %v185_v62 = vpack.c.bf16 %v809_v55, %v808_v54  ;;  %v51_v63 = vld [vmem:[%s1615_s1 + $0xa8] sm:$0xff]  ;;  %v64_v4 = vpack.c.bf16 %v35_v60, %v34_v59  ;;  %v32_v7 = vld [vmem:[%s1615_s1 + $0x10] sm:$0xff] }
  0x10   :  { %81 = vmatpush.bf16.msra.mxu0 %v66_v44  ;;  %v790_v0 = vld [vmem:[%s1615_s1 + $0x120] sm:$0xff]  ;;  %v791_v1 = vld [vmem:[%s1615_s1 + $0x128] sm:$0xff]  ;;  %v72_v5 = vpack.c.bf16 %v51_v63, %v50_v61  ;;  %v33_v8 = vld [vmem:[%s1615_s1 + $0x18] sm:$0xff] }
  0x11   :  { %104 = vmatpush.bf16.msra.mxu1 %v74_v45  ;;  %v806_v2 = vld [vmem:[%s1615_s1 + $0x1a0] sm:$0xff]  ;;  %v807_v3 = vld [vmem:[%s1615_s1 + $0x1a8] sm:$0xff]  ;;  %v176_v6 = vpack.c.bf16 %v791_v1, %v790_v0  ;;  %v48_v9 = vld [vmem:[%s1615_s1 + $0x90] sm:$0xff]  ;;  %v63_v17 = vpack.c.bf16 %v33_v8, %v32_v7 }
  0x12   :  { %193 = vmatpush.bf16.msra.mxu2 %v178_v46  ;;  %v184_v10 = vpack.c.bf16 %v807_v3, %v806_v2  ;;  %v49_v11 = vld [vmem:[%s1615_s1 + $0x98] sm:$0xff]  ;;  %v788_v12 = vld [vmem:[%s1615_s1 + $0x110] sm:$0xff]  ;;  %v30_v16 = vld [vmem:[%s1615_s1] sm:$0xff] }
  0x13   :  { %216 = vmatpush.bf16.msra.mxu3 %v186_v50  ;;  %v789_v13 = vld [vmem:[%s1615_s1 + $0x118] sm:$0xff]  ;;  %v804_v14 = vld [vmem:[%s1615_s1 + $0x190] sm:$0xff]  ;;  %v31_v18 = vld [vmem:[%s1615_s1 + $0x8] sm:$0xff]  ;;  %v71_v21 = vpack.c.bf16 %v49_v11, %v48_v9 }
  0x14   :  { %82 = vmatpush.bf16.msra.mxu0 %v65_v56  ;;  %v805_v15 = vld [vmem:[%s1615_s1 + $0x198] sm:$0xff]  ;;  %v46_v19 = vld [vmem:[%s1615_s1 + $0x80] sm:$0xff]  ;;  %v47_v20 = vld [vmem:[%s1615_s1 + $0x88] sm:$0xff]  ;;  %v175_v22 = vpack.c.bf16 %v789_v13, %v788_v12  ;;  %v62_v34 = vpack.c.bf16 %v31_v18, %v30_v16 }
  0x15   :  { %105 = vmatpush.bf16.msra.mxu1 %v73_v57  ;;  %v786_v23 = vld [vmem:[%s1615_s1 + $0x100] sm:$0xff]  ;;  %v787_v24 = vld [vmem:[%s1615_s1 + $0x108] sm:$0xff]  ;;  %v183_v26 = vpack.c.bf16 %v805_v15, %v804_v14  ;;  %v16_v29 = vld [vmem:[%s1616_s0 + $0x10] sm:$0xff]  ;;  %v70_v38 = vpack.c.bf16 %v47_v20, %v46_v19 }
  0x16   :  { %194 = vmatpush.bf16.msra.mxu2 %v177_v58  ;;  %v802_v25 = vld [vmem:[%s1615_s1 + $0x180] sm:$0xff]  ;;  %v803_v27 = vld [vmem:[%s1615_s1 + $0x188] sm:$0xff]  ;;  %v17_v31 = vld [vmem:[%s1616_s0 + $0x18] sm:$0xff]  ;;  %v174_v39 = vpack.c.bf16 %v787_v24, %v786_v23 }
  0x17   :  { %217 = vmatpush.bf16.msra.mxu3 %v185_v62  ;;  %v14_v28 = vld [vmem:[%s1616_s0] sm:$0xff]  ;;  %v15_v30 = vld [vmem:[%s1616_s0 + $0x8] sm:$0xff]  ;;  %v842_v32 = vld [vmem:[%s1615_s1 + $0x270] sm:$0xff]  ;;  %v182_v43 = vpack.c.bf16 %v803_v27, %v802_v25 }
  0x18   :  { %83 = vmatpush.bf16.msra.mxu0 %v64_v4  ;;  %v843_v33 = vld [vmem:[%s1615_s1 + $0x278] sm:$0xff]  ;;  %v776_v35 = vld [vmem:[%s1616_s0 + $0x50] sm:$0xff]  ;;  %v778_v40 = vld [vmem:[%s1616_s0 + $0x60] sm:$0xff]  ;;  %v24_v48 = vpack.c.bf16 %v16_v29, %v14_v28  ;;  %v25_v53 = vpack.c.bf16 %v17_v31, %v15_v30 }
  0x19   :  { %106 = vmatpush.bf16.msra.mxu1 %v72_v5  ;;  %v858_v36 = vld [vmem:[%s1615_s1 + $0x2f0] sm:$0xff]  ;;  %v859_v37 = vld [vmem:[%s1615_s1 + $0x2f8] sm:$0xff]  ;;  %v779_v42 = vld [vmem:[%s1616_s0 + $0x68] sm:$0xff]  ;;  %v293_v44 = vpack.c.bf16 %v843_v33, %v842_v32  ;;  %v135_v54 = vpack.c.bf16 %v778_v40, %v776_v35 }
  0x1a   :  { %195 = vmatpush.bf16.msra.mxu2 %v176_v6  ;;  %v777_v41 = vld [vmem:[%s1616_s0 + $0x58] sm:$0xff]  ;;  %v840_v45 = vld [vmem:[%s1615_s1 + $0x260] sm:$0xff]  ;;  %v884_v46 = vld [vmem:[%s1615_s1 + $0x370] sm:$0xff]  ;;  %v301_v49 = vpack.c.bf16 %v859_v37, %v858_v36 }
  0x1b   :  { %218 = vmatpush.bf16.msra.mxu3 %v184_v10  ;;  %v885_v47 = vld [vmem:[%s1615_s1 + $0x378] sm:$0xff]  ;;  %v841_v50 = vld [vmem:[%s1615_s1 + $0x268] sm:$0xff]  ;;  %v900_v51 = vld [vmem:[%s1615_s1 + $0x3f0] sm:$0xff]  ;;  %v136_v57 = vpack.c.bf16 %v779_v42, %v777_v41 }
  0x1c   :  { %84 = vmatpush.bf16.msra.mxu0 %v63_v17  ;;  %v901_v52 = vld [vmem:[%s1615_s1 + $0x3f8] sm:$0xff]  ;;  %v856_v55 = vld [vmem:[%s1615_s1 + $0x2e0] sm:$0xff]  ;;  %v857_v56 = vld [vmem:[%s1615_s1 + $0x2e8] sm:$0xff]  ;;  %v405_v58 = vpack.c.bf16 %v885_v47, %v884_v46  ;;  %v292_v59 = vpack.c.bf16 %v841_v50, %v840_v45 }
  0x1d   :  { %107 = vmatpush.bf16.msra.mxu1 %v71_v21  ;;  %v413_v60 = vpack.c.bf16 %v901_v52, %v900_v51  ;;  %v838_v61 = vld [vmem:[%s1615_s1 + $0x250] sm:$0xff]  ;;  %v882_v62 = vld [vmem:[%s1615_s1 + $0x360] sm:$0xff]  ;;  %v883_v63 = vld [vmem:[%s1615_s1 + $0x368] sm:$0xff]  ;;  %v300_v0 = vpack.c.bf16 %v857_v56, %v856_v55 }
  0x1e   :  { %196 = vmatpush.bf16.msra.mxu2 %v175_v22  ;;  %v839_v1 = vld [vmem:[%s1615_s1 + $0x258] sm:$0xff]  ;;  %v898_v2 = vld [vmem:[%s1615_s1 + $0x3e0] sm:$0xff]  ;;  %v899_v3 = vld [vmem:[%s1615_s1 + $0x3e8] sm:$0xff]  ;;  %v404_v6 = vpack.c.bf16 %v883_v63, %v882_v62 }
  0x1f   :  { %219 = vmatpush.bf16.msra.mxu3 %v183_v26  ;;  %v854_v4 = vld [vmem:[%s1615_s1 + $0x2d0] sm:$0xff]  ;;  %v855_v5 = vld [vmem:[%s1615_s1 + $0x2d8] sm:$0xff]  ;;  %v291_v7 = vpack.c.bf16 %v839_v1, %v838_v61  ;;  %v412_v8 = vpack.c.bf16 %v899_v3, %v898_v2  ;;  %v836_v9 = vld [vmem:[%s1615_s1 + $0x240] sm:$0xff] }
  0x20   :  { %85 = vmatpush.bf16.msra.mxu0 %v62_v34  ;;  %v880_v10 = vld [vmem:[%s1615_s1 + $0x350] sm:$0xff]  ;;  %v881_v11 = vld [vmem:[%s1615_s1 + $0x358] sm:$0xff]  ;;  %v299_v12 = vpack.c.bf16 %v855_v5, %v854_v4  ;;  %v837_v13 = vld [vmem:[%s1615_s1 + $0x248] sm:$0xff] }
  0x21   :  { %108 = vmatpush.bf16.msra.mxu1 %v70_v38  ;;  %v896_v14 = vld [vmem:[%s1615_s1 + $0x3d0] sm:$0xff]  ;;  %v897_v15 = vld [vmem:[%s1615_s1 + $0x3d8] sm:$0xff]  ;;  %v852_v16 = vld [vmem:[%s1615_s1 + $0x2c0] sm:$0xff]  ;;  %v403_v18 = vpack.c.bf16 %v881_v11, %v880_v10  ;;  %v290_v21 = vpack.c.bf16 %v837_v13, %v836_v9 }
  0x22   :  { %197 = vmatpush.bf16.msra.mxu2 %v174_v39  ;;  %v853_v17 = vld [vmem:[%s1615_s1 + $0x2c8] sm:$0xff]  ;;  %v18_v19 = vld [vmem:[%s1616_s0 + $0x20] sm:$0xff]  ;;  %v20_v20 = vld [vmem:[%s1616_s0 + $0x30] sm:$0xff]  ;;  %v411_v22 = vpack.c.bf16 %v897_v15, %v896_v14 }
  0x23   :  { %220 = vmatpush.bf16.msra.mxu3 %v182_v43  ;;  %86 = vmatmul.bf16.vlgmr.msra.gmra.mxu0 %v24_v48  ;;  %v834_v23 = vld [vmem:[%s1615_s1 + $0x230] sm:$0xff]  ;;  %v878_v24 = vld [vmem:[%s1615_s1 + $0x340] sm:$0xff]  ;;  %v879_v25 = vld [vmem:[%s1615_s1 + $0x348] sm:$0xff]  ;;  %v298_v28 = vpack.c.bf16 %v853_v17, %v852_v16 }
  0x24   :  { %302 = vmatpush.bf16.msrb.mxu0 %v293_v44  ;;  %109 = vmatmul.bf16.vlgmr.msra.gmra.mxu1 %v25_v53  ;;  %v19_v26 = vld [vmem:[%s1616_s0 + $0x28] sm:$0xff]  ;;  %v21_v27 = vld [vmem:[%s1616_s0 + $0x38] sm:$0xff]  ;;  %v894_v30 = vld [vmem:[%s1615_s1 + $0x3c0] sm:$0xff]  ;;  %v402_v38 = vpack.c.bf16 %v879_v25, %v878_v24  ;;  %v26_v44 = vpack.c.bf16 %v20_v20, %v18_v19 }
  0x25   :  { %325 = vmatpush.bf16.msrb.mxu1 %v301_v49  ;;  %198 = vmatmul.bf16.vlgmr.msra.gmra.mxu2 %v135_v54  ;;  %v835_v29 = vld [vmem:[%s1615_s1 + $0x238] sm:$0xff]  ;;  %v895_v31 = vld [vmem:[%s1615_s1 + $0x3c8] sm:$0xff]  ;;  %v780_v32 = vld [vmem:[%s1616_s0 + $0x70] sm:$0xff]  ;;  %v27_v49 = vpack.c.bf16 %v21_v27, %v19_v26 }
  0x26   :  { %221 = vmatmul.bf16.vlgmr.msra.gmra.mxu3 %v136_v57  ;;  %414 = vmatpush.bf16.msrb.mxu2 %v405_v58  ;;  %v850_v33 = vld [vmem:[%s1615_s1 + $0x2b0] sm:$0xff]  ;;  %v851_v34 = vld [vmem:[%s1615_s1 + $0x2b8] sm:$0xff]  ;;  %v782_v35 = vld [vmem:[%s1616_s0 + $0x80] sm:$0xff]  ;;  %v289_v39 = vpack.c.bf16 %v835_v29, %v834_v23  ;;  %v410_v40 = vpack.c.bf16 %v895_v31, %v894_v30 }
  0x27   :  { %437 = vmatpush.bf16.msrb.mxu3 %v413_v60  ;;  %v781_v36 = vld [vmem:[%s1616_s0 + $0x78] sm:$0xff]  ;;  %v783_v37 = vld [vmem:[%s1616_s0 + $0x88] sm:$0xff]  ;;  %v832_v41 = vld [vmem:[%s1615_s1 + $0x220] sm:$0xff]  ;;  %v297_v45 = vpack.c.bf16 %v851_v34, %v850_v33  ;;  %v137_v50 = vpack.c.bf16 %v782_v35, %v780_v32 }
  0x28   :  { %303 = vmatpush.bf16.msrb.mxu0 %v292_v59  ;;  %v876_v42 = vld [vmem:[%s1615_s1 + $0x330] sm:$0xff]  ;;  %v877_v43 = vld [vmem:[%s1615_s1 + $0x338] sm:$0xff]  ;;  %v833_v46 = vld [vmem:[%s1615_s1 + $0x228] sm:$0xff]  ;;  %v138_v53 = vpack.c.bf16 %v783_v37, %v781_v36 }
  0x29   :  { %326 = vmatpush.bf16.msrb.mxu1 %v300_v0  ;;  %v892_v47 = vld [vmem:[%s1615_s1 + $0x3b0] sm:$0xff]  ;;  %v893_v48 = vld [vmem:[%s1615_s1 + $0x3b8] sm:$0xff]  ;;  %v848_v51 = vld [vmem:[%s1615_s1 + $0x2a0] sm:$0xff]  ;;  %v401_v54 = vpack.c.bf16 %v877_v43, %v876_v42  ;;  %v288_v55 = vpack.c.bf16 %v833_v46, %v832_v41 }
  0x2a   :  { %415 = vmatpush.bf16.msrb.mxu2 %v404_v6  ;;  %v849_v52 = vld [vmem:[%s1615_s1 + $0x2a8] sm:$0xff]  ;;  %v409_v56 = vpack.c.bf16 %v893_v48, %v892_v47  ;;  %v830_v57 = vld [vmem:[%s1615_s1 + $0x210] sm:$0xff]  ;;  %v874_v58 = vld [vmem:[%s1615_s1 + $0x320] sm:$0xff] }
  0x2b   :  { %438 = vmatpush.bf16.msrb.mxu3 %v412_v8  ;;  %v875_v59 = vld [vmem:[%s1615_s1 + $0x328] sm:$0xff]  ;;  %v296_v60 = vpack.c.bf16 %v849_v52, %v848_v51  ;;  %v831_v61 = vld [vmem:[%s1615_s1 + $0x218] sm:$0xff]  ;;  %v890_v62 = vld [vmem:[%s1615_s1 + $0x3a0] sm:$0xff] }
  0x2c   :  { %304 = vmatpush.bf16.msrb.mxu0 %v291_v7  ;;  %v891_v63 = vld [vmem:[%s1615_s1 + $0x3a8] sm:$0xff]  ;;  %v846_v0 = vld [vmem:[%s1615_s1 + $0x290] sm:$0xff]  ;;  %v847_v1 = vld [vmem:[%s1615_s1 + $0x298] sm:$0xff]  ;;  %v400_v2 = vpack.c.bf16 %v875_v59, %v874_v58  ;;  %v287_v3 = vpack.c.bf16 %v831_v61, %v830_v57 }
  0x2d   :  { %327 = vmatpush.bf16.msrb.mxu1 %v299_v12  ;;  %v408_v4 = vpack.c.bf16 %v891_v63, %v890_v62  ;;  %v872_v5 = vld [vmem:[%s1615_s1 + $0x310] sm:$0xff]  ;;  %v873_v6 = vld [vmem:[%s1615_s1 + $0x318] sm:$0xff]  ;;  %v295_v8 = vpack.c.bf16 %v847_v1, %v846_v0  ;;  %v828_v10 = vld [vmem:[%s1615_s1 + $0x200] sm:$0xff] }
  0x2e   :  { %416 = vmatpush.bf16.msrb.mxu2 %v403_v18  ;;  %v888_v7 = vld [vmem:[%s1615_s1 + $0x390] sm:$0xff]  ;;  %v889_v9 = vld [vmem:[%s1615_s1 + $0x398] sm:$0xff]  ;;  %v829_v11 = vld [vmem:[%s1615_s1 + $0x208] sm:$0xff]  ;;  %v399_v14 = vpack.c.bf16 %v873_v6, %v872_v5 }
  0x2f   :  { %439 = vmatpush.bf16.msrb.mxu3 %v411_v22  ;;  %v844_v12 = vld [vmem:[%s1615_s1 + $0x280] sm:$0xff]  ;;  %v845_v13 = vld [vmem:[%s1615_s1 + $0x288] sm:$0xff]  ;;  %v407_v15 = vpack.c.bf16 %v889_v9, %v888_v7  ;;  %v286_v16 = vpack.c.bf16 %v829_v11, %v828_v10  ;;  %v784_v24 = vld [vmem:[%s1616_s0 + $0x90] sm:$0xff] }
  0x30   :  { %305 = vmatpush.bf16.msrb.mxu0 %v290_v21  ;;  %v870_v17 = vld [vmem:[%s1615_s1 + $0x300] sm:$0xff]  ;;  %v871_v18 = vld [vmem:[%s1615_s1 + $0x308] sm:$0xff]  ;;  %v294_v19 = vpack.c.bf16 %v845_v13, %v844_v12  ;;  %v785_v26 = vld [vmem:[%s1616_s0 + $0x98] sm:$0xff]  ;;  %v139_v30 = vpack.c.bf16 %v784_v24, %v784_v24 }
  0x31   :  { %328 = vmatpush.bf16.msrb.mxu1 %v298_v28  ;;  %v886_v20 = vld [vmem:[%s1615_s1 + $0x380] sm:$0xff]  ;;  %v887_v21 = vld [vmem:[%s1615_s1 + $0x388] sm:$0xff]  ;;  %v398_v25 = vpack.c.bf16 %v871_v18, %v870_v17  ;;  %v140_v31 = vpack.c.bf16 %v785_v26, %v785_v26  ;;  %v820_v33 = vld [vmem:[%s1616_s0 + $0xb0] sm:$0xff] }
  0x32   :  { %417 = vmatpush.bf16.msrb.mxu2 %v402_v38  ;;  %v22_v22 = vld [vmem:[%s1616_s0 + $0x40] sm:$0xff]  ;;  %v23_v23 = vld [vmem:[%s1616_s0 + $0x48] sm:$0xff]  ;;  %v406_v27 = vpack.c.bf16 %v887_v21, %v886_v20  ;;  %v821_v35 = vld [vmem:[%s1616_s0 + $0xb8] sm:$0xff] }
  0x33   :  { %440 = vmatpush.bf16.msrb.mxu3 %v410_v40  ;;  %91 = vmatmul.bf16.gmra.mxu0 %v26_v44  ;;  %v28_v28 = vpack.c.bf16 %v22_v22, %v22_v22  ;;  %v29_v29 = vpack.c.bf16 %v23_v23, %v23_v23  ;;  %v818_v32 = vld [vmem:[%s1616_s0 + $0xa0] sm:$0xff]  ;;  %v819_v34 = vld [vmem:[%s1616_s0 + $0xa8] sm:$0xff]  ;;  %v860_v36 = vld [vmem:[%s1616_s0 + $0xf0] sm:$0xff] }
  0x34   :  { %306 = vmatpush.bf16.msrb.mxu0 %v289_v39  ;;  %114 = vmatmul.bf16.gmra.mxu1 %v27_v49  ;;  %v862_v37 = vld [vmem:[%s1616_s0 + $0x100] sm:$0xff]  ;;  %v861_v38 = vld [vmem:[%s1616_s0 + $0xf8] sm:$0xff]  ;;  %v863_v39 = vld [vmem:[%s1616_s0 + $0x108] sm:$0xff]  ;;  %v247_v40 = vpack.c.bf16 %v820_v33, %v818_v32  ;;  %v248_v41 = vpack.c.bf16 %v821_v35, %v819_v34 }
  0x35   :  { %329 = vmatpush.bf16.msrb.mxu1 %v297_v45  ;;  %203 = vmatmul.bf16.gmra.mxu2 %v137_v50  ;;  %v359_v42 = vpack.c.bf16 %v862_v37, %v860_v36  ;;  %v360_v43 = vpack.c.bf16 %v863_v39, %v861_v38  ;;  %v822_v44 = vld [vmem:[%s1616_s0 + $0xc0] sm:$0xff]  ;;  %v824_v45 = vld [vmem:[%s1616_s0 + $0xd0] sm:$0xff]  ;;  %v823_v46 = vld [vmem:[%s1616_s0 + $0xc8] sm:$0xff] }
  0x36   :  { %226 = vmatmul.bf16.gmra.mxu3 %v138_v53  ;;  %418 = vmatpush.bf16.msrb.mxu2 %v401_v54  ;;  %v825_v47 = vld [vmem:[%s1616_s0 + $0xd8] sm:$0xff]  ;;  %v864_v48 = vld [vmem:[%s1616_s0 + $0x110] sm:$0xff]  ;;  %v866_v49 = vld [vmem:[%s1616_s0 + $0x120] sm:$0xff]  ;;  %v249_v52 = vpack.c.bf16 %v824_v45, %v822_v44 }
  0x37   :  { %441 = vmatpush.bf16.msrb.mxu3 %v409_v56  ;;  %v865_v50 = vld [vmem:[%s1616_s0 + $0x118] sm:$0xff]  ;;  %v867_v51 = vld [vmem:[%s1616_s0 + $0x128] sm:$0xff]  ;;  %v250_v53 = vpack.c.bf16 %v825_v47, %v823_v46  ;;  %v361_v54 = vpack.c.bf16 %v866_v49, %v864_v48  ;;  %v826_v56 = vld [vmem:[%s1616_s0 + $0xe0] sm:$0xff] }
  0x38   :  { %307 = vmatpush.bf16.msrb.mxu0 %v288_v55  ;;  %v362_v55 = vpack.c.bf16 %v867_v51, %v865_v50  ;;  %v827_v57 = vld [vmem:[%s1616_s0 + $0xe8] sm:$0xff]  ;;  %v868_v58 = vld [vmem:[%s1616_s0 + $0x130] sm:$0xff]  ;;  %v869_v59 = vld [vmem:[%s1616_s0 + $0x138] sm:$0xff]  ;;  %s921_s0 = smov 32  }
  0x39   :  { %330 = vmatpush.bf16.msrb.mxu1 %v296_v60  ;;  %v251_v60 = vpack.c.bf16 %v826_v56, %v826_v56  ;;  %v252_v61 = vpack.c.bf16 %v827_v57, %v827_v57  ;;  %v363_v62 = vpack.c.bf16 %v868_v58, %v868_v58  ;;  %v364_v63 = vpack.c.bf16 %v869_v59, %v869_v59 }
  0x3a   :  { %419 = vmatpush.bf16.msrb.mxu2 %v400_v2 }
  0x3b   :  { %442 = vmatpush.bf16.msrb.mxu3 %v408_v4 }
  0x3c   :  { %308 = vmatpush.bf16.msrb.mxu0 %v287_v3 }
  0x3d   :  { %331 = vmatpush.bf16.msrb.mxu1 %v295_v8 }
  0x3e   :  { %420 = vmatpush.bf16.msrb.mxu2 %v399_v14 }
  0x3f   :  { %443 = vmatpush.bf16.msrb.mxu3 %v407_v15 }
  0x40   :  { %309 = vmatpush.bf16.msrb.mxu0 %v286_v16 }
  0x41   :  { %332 = vmatpush.bf16.msrb.mxu1 %v294_v19 }
  0x42   :  { %421 = vmatpush.bf16.msrb.mxu2 %v398_v25 }
  0x43   :  { %444 = vmatpush.bf16.msrb.mxu3 %v406_v27  ;;  %96 = vmatmul.bf16.gmra.mxu0 %v28_v28 }
  0x44   :  { %119 = vmatmul.bf16.gmra.mxu1 %v29_v29 }
  0x45   :  { %208 = vmatmul.bf16.gmra.mxu2 %v139_v30 }
  0x46   :  { %231 = vmatmul.bf16.gmra.mxu3 %v140_v31 }
  0x53   :  { %310 = vmatmul.bf16.vlgmr.msrb.gmra.mxu0 %v247_v40 }
  0x54   :  { %333 = vmatmul.bf16.vlgmr.msrb.gmra.mxu1 %v248_v41 }
  0x55   :  { %422 = vmatmul.bf16.vlgmr.msrb.gmra.mxu2 %v359_v42 }
  0x56   :  { %445 = vmatmul.bf16.vlgmr.msrb.gmra.mxu3 %v360_v43 }
  0x63   :  { %315 = vmatmul.bf16.gmra.mxu0 %v249_v52 }
  0x64   :  { %338 = vmatmul.bf16.gmra.mxu1 %v250_v53 }
  0x65   :  { %427 = vmatmul.bf16.gmra.mxu2 %v361_v54 }
  0x66   :  { %450 = vmatmul.bf16.gmra.mxu3 %v362_v55 }
  0x73   :  { %320 = vmatmul.bf16.gmra.mxu0 %v251_v60 }
  0x74   :  { %343 = vmatmul.bf16.gmra.mxu1 %v252_v61 }
  0x75   :  { %432 = vmatmul.bf16.gmra.mxu2 %v363_v62 }
  0x76   :  { %455 = vmatmul.bf16.gmra.mxu3 %v364_v63 }
  0xa0   :  { %v87_v0 = vpop.f32.mrf.mxu0 }
  0xa1   :  { %v110_v1 = vpop.f32.mrf.mxu1 }
  0xa2   :  { %v1448_v2 = vadd.f32 %v110_v1, %v87_v0 }
  0xa8   :  { %v199_v3 = vpop.f32.mrf.mxu2  ;;  %v89_v5 = vpop.f32.mrf.mxu0 }
  0xa9   :  { %v222_v4 = vpop.f32.mrf.mxu3  ;;  %v112_v7 = vpop.f32.mrf.mxu1 }
  0xaa   :  { %v223_v6 = vadd.f32 %v222_v4, %v199_v3  ;;  %v1450_v8 = vadd.f32 %v112_v7, %v89_v5 }
  0xac   :  { %465 = vrot.lane.b32.xlu0 %v223_v6, %s921_s0 }
  0xb0   :  { %v201_v9 = vpop.f32.mrf.mxu2  ;;  %v92_v11 = vpop.f32.mrf.mxu0 }
  0xb1   :  { %v224_v10 = vpop.f32.mrf.mxu3  ;;  %v115_v13 = vpop.f32.mrf.mxu1 }
  0xb2   :  { %v225_v12 = vadd.f32 %v224_v10, %v201_v9  ;;  %v1452_v14 = vadd.f32 %v115_v13, %v92_v11 }
  0xb4   :  { %467 = vrot.lane.b32.xlu0 %v225_v12, %s921_s0  ;;  %v1475_v12 = vld [vmem:[%s1617_s2] ss:$0 sm:$0xff] }
  0xb8   :  { %v204_v15 = vpop.f32.mrf.mxu2  ;;  %v94_v17 = vpop.f32.mrf.mxu0 }
  0xb9   :  { %v227_v16 = vpop.f32.mrf.mxu3  ;;  %v117_v19 = vpop.f32.mrf.mxu1 }
  0xba   :  { %v228_v18 = vadd.f32 %v227_v16, %v204_v15  ;;  %v1454_v20 = vadd.f32 %v117_v19, %v94_v17 }
  0xbc   :  { %469 = vrot.lane.b32.xlu1 %v228_v18, %s921_s0 }
  0xc0   :  { %v206_v21 = vpop.f32.mrf.mxu2  ;;  %v97_v23 = vpop.f32.mrf.mxu0 }
  0xc1   :  { %v229_v22 = vpop.f32.mrf.mxu3  ;;  %v120_v25 = vpop.f32.mrf.mxu1 }
  0xc2   :  { %v230_v24 = vadd.f32 %v229_v22, %v206_v21  ;;  %v1456_v26 = vadd.f32 %v120_v25, %v97_v23 }
  0xc4   :  { %471 = vrot.lane.b32.xlu1 %v230_v24, %s921_s0 }
  0xc8   :  { %v209_v27 = vpop.f32.mrf.mxu2  ;;  %v99_v29 = vpop.f32.mrf.mxu0 }
  0xc9   :  { %v232_v28 = vpop.f32.mrf.mxu3  ;;  %v122_v31 = vpop.f32.mrf.mxu1 }
  0xca   :  { %v233_v30 = vadd.f32 %v232_v28, %v209_v27 }
  0xcc   :  { %473 = vrot.lane.b32.xlu2 %v233_v30, %s921_s0 }
  0xd0   :  { %v211_v32 = vpop.f32.mrf.mxu2  ;;  %v311_v34 = vpop.f32.mrf.mxu0 }
  0xd1   :  { %v234_v33 = vpop.f32.mrf.mxu3  ;;  %v334_v35 = vpop.f32.mrf.mxu1 }
  0xd2   :  { %v335_v36 = vadd.f32 %v334_v35, %v311_v34 }
  0xd4   :  { %485 = vrot.lane.b32.xlu2 %v335_v36, %s922_s22 }
  0xd8   :  { %v423_v37 = vpop.f32.mrf.mxu2  ;;  %v313_v39 = vpop.f32.mrf.mxu0 }
  0xd9   :  { %v446_v38 = vpop.f32.mrf.mxu3  ;;  %v336_v41 = vpop.f32.mrf.mxu1 }
  0xda   :  { %v447_v40 = vadd.f32 %v446_v38, %v423_v37  ;;  %v337_v42 = vadd.f32 %v336_v41, %v313_v39 }
  0xdc   :  { %505 = vrot.lane.b32.xlu1 %v447_v40, %s923_s23  ;;  %487 = vrot.lane.b32.xlu0 %v337_v42, %s922_s22 }
  0xe0   :  { %v425_v43 = vpop.f32.mrf.mxu2  ;;  %v316_v45 = vpop.f32.mrf.mxu0 }
  0xe1   :  { %v448_v44 = vpop.f32.mrf.mxu3  ;;  %v339_v47 = vpop.f32.mrf.mxu1 }
  0xe2   :  { %v449_v46 = vadd.f32 %v448_v44, %v425_v43  ;;  %v340_v48 = vadd.f32 %v339_v47, %v316_v45 }
  0xe4   :  { %507 = vrot.lane.b32.xlu2 %v449_v46, %s923_s23  ;;  %489 = vrot.lane.b32.xlu1 %v340_v48, %s922_s22 }
  0xe8   :  { %v428_v49 = vpop.f32.mrf.mxu2  ;;  %v318_v51 = vpop.f32.mrf.mxu0 }
  0xe9   :  { %v451_v50 = vpop.f32.mrf.mxu3  ;;  %v341_v52 = vpop.f32.mrf.mxu1 }
  0xea   :  { %v342_v53 = vadd.f32 %v341_v52, %v318_v51  ;;  %v452_v1 = vadd.f32 %v451_v50, %v428_v49 }
  0xec   :  { %491 = vrot.lane.b32.xlu2 %v342_v53, %s922_s22 }
  0xf0   :  { %v430_v54 = vpop.f32.mrf.mxu2  ;;  %v321_v56 = vpop.f32.mrf.mxu0 }
  0xf1   :  { %v453_v55 = vpop.f32.mrf.mxu3  ;;  %v344_v58 = vpop.f32.mrf.mxu1 }
  0xf2   :  { %v454_v57 = vadd.f32 %v453_v55, %v430_v54  ;;  %v345_v59 = vadd.f32 %v344_v58, %v321_v56 }
  0xf4   :  { %511 = vrot.lane.b32.xlu1 %v454_v57, %s923_s23  ;;  %493 = vrot.lane.b32.xlu0 %v345_v59, %s922_s22 }
  0xf8   :  { %v433_v60 = vpop.f32.mrf.mxu2  ;;  %v323_v61 = vpop.f32.mrf.mxu0 }
  0xf9   :  { %v456_v62 = vpop.f32.mrf.mxu3  ;;  %v346_v63 = vpop.f32.mrf.mxu1 }
  0xfa   :  { %v457_v0 = vadd.f32 %v456_v62, %v433_v60 }
  0xfc   :  { %513 = vrot.lane.b32.xlu2 %v457_v0, %s923_s23  ;;  %509 = vrot.lane.b32.xlu0 %v452_v1, %s923_s23 }
 0x100   :  { %v435_v3 = vpop.f32.mrf.mxu2 }
 0x101   :  { %v458_v4 = vpop.f32.mrf.mxu3 }
 0x11e   :  { %v466_v6 = vpop.permute.xlu0 %465 }
 0x11f   :  { %v521_v13 = vsel %vm520_vm0, %v1448_v2, %v466_v6 }
 0x126   :  { %v1470_v7 = vpop.permute.xlu2 %473  ;;  %v468_v10 = vpop.permute.xlu0 %467 }
 0x127   :  { %v522_v17 = vsel %vm520_vm0, %v1450_v8, %v468_v10  ;;  %v525_v6 = vsel %vm520_vm0, %v1456_v26, %v1470_v7 }
 0x12e   :  { %v1468_v5 = vpop.permute.xlu1 %469  ;;  %v486_v11 = vpop.permute.xlu2 %485 }
 0x12f   :  { %v527_v15 = vsel %vm526_vm1, %v521_v13, %v486_v11 }
 0x136   :  { %v472_v9 = vpop.permute.xlu1 %471 }
 0x137   :  { %v524_v58 = vsel %vm520_vm0, %v1454_v20, %v472_v9 }
 0x13e   :  { %v508_v21 = vpop.permute.xlu2 %507 }
 0x146   :  { %v492_v46 = vpop.permute.xlu2 %491 }
 0x147   :  { %v530_v60 = vsel %vm526_vm1, %v524_v58, %v492_v46 }
 0x14e   :  { %v506_v16 = vpop.permute.xlu1 %505  ;;  %v488_v19 = vpop.permute.xlu0 %487 }
 0x14f   :  { %v533_v18 = vsel %vm532_vm2, %v527_v15, %v506_v16  ;;  %v528_v23 = vsel %vm526_vm1, %v522_v17, %v488_v19 }
 0x150   :  { %v1484_v22 = vadd.f32 %v1475_v12, %v533_v18  ;;  %v534_v24 = vsel %vm532_vm2, %v528_v23, %v508_v21 }
 0x151   :  { %v1492_v2 = vadd.f32 %v1475_v12, %v534_v24 }
 0x152   :  { %v1489_v25 = vmul.f32 0.70710677, %v1484_v22 }
 0x153   :  { %v1497_v27 = vmul.f32 0.70710677, %v1492_v2 }
 0x154   :  { %v557_v8 = vmul.f32 %v1489_v25, %v1489_v25 }
 0x155   :  { %v597_v29 = vmul.f32 %v1497_v27, %v1497_v27 }
 0x156   :  { %v558_v28 = vmin.f32 %v557_v8, 16.0  ;;  %v490_v44 = vpop.permute.xlu1 %489  ;;  %v514_v20 = vpop.permute.xlu2 %513 }
 0x157   :  { %v598_v32 = vmin.f32 %v597_v29, 16.0 }
 0x158   :  { %v559_v30 = vmul.f32 2.1237322e-06, %v558_v28  ;;  %v570_v31 = vmul.f32 3.8918573e-05, %v558_v28 }
 0x159   :  { %v599_v35 = vmul.f32 2.1237322e-06, %v598_v32  ;;  %v610_v36 = vmul.f32 3.8918573e-05, %v598_v32 }
 0x15a   :  { %v560_v33 = vadd.f32 0.00028619796, %v559_v30  ;;  %v571_v34 = vadd.f32 0.001143296, %v570_v31 }
 0x15b   :  { %v600_v39 = vadd.f32 0.00028619796, %v599_v35  ;;  %v611_v40 = vadd.f32 0.001143296, %v610_v36 }
 0x15c   :  { %v561_v37 = vmul.f32 %v560_v33, %v558_v28  ;;  %v572_v38 = vmul.f32 %v571_v34, %v558_v28 }
 0x15d   :  { %v601_v43 = vmul.f32 %v600_v39, %v598_v32  ;;  %v612_v45 = vmul.f32 %v611_v40, %v598_v32 }
 0x15e   :  { %v562_v41 = vadd.f32 0.0036580483, %v561_v37  ;;  %v573_v42 = vadd.f32 0.014752088, %v572_v38 }
 0x15f   :  { %v602_v49 = vadd.f32 0.0036580483, %v601_v43  ;;  %v613_v50 = vadd.f32 0.014752088, %v612_v45 }
 0x160   :  { %v563_v47 = vmul.f32 %v562_v41, %v558_v28  ;;  %v574_v48 = vmul.f32 %v573_v42, %v558_v28 }
 0x161   :  { %v603_v53 = vmul.f32 %v602_v49, %v598_v32  ;;  %v614_v54 = vmul.f32 %v613_v50, %v598_v32 }
 0x162   :  { %v564_v51 = vadd.f32 0.05243302, %v563_v47  ;;  %v575_v52 = vadd.f32 0.112945676, %v574_v48 }
 0x163   :  { %v604_v57 = vadd.f32 0.05243302, %v603_v53  ;;  %v615_v59 = vadd.f32 0.112945676, %v614_v54 }
 0x164   :  { %v565_v55 = vmul.f32 %v564_v51, %v558_v28  ;;  %v576_v56 = vmul.f32 %v575_v52, %v558_v28 }
 0x165   :  { %v605_v63 = vmul.f32 %v604_v57, %v598_v32  ;;  %v616_v1 = vmul.f32 %v615_v59, %v598_v32 }
 0x166   :  { %v566_v61 = vadd.f32 0.18741608, %v565_v55  ;;  %v577_v62 = vadd.f32 0.4994258, %v576_v56  ;;  %v512_v0 = vpop.permute.xlu1 %511  ;;  %v494_v4 = vpop.permute.xlu0 %493 }
 0x167   :  { %v536_v3 = vsel %vm532_vm2, %v530_v60, %v512_v0  ;;  %v606_v11 = vadd.f32 0.18741608, %v605_v63  ;;  %v617_v9 = vadd.f32 0.4994258, %v616_v1  ;;  %v531_v15 = vsel %vm526_vm1, %v525_v6, %v494_v4 }
 0x168   :  { %v578_v10 = vmul.f32 %v577_v62, %v558_v28  ;;  %v1509_v13 = vadd.f32 %v1475_v12, %v536_v3  ;;  %v567_v16 = vmul.f32 %v566_v61, %v558_v28  ;;  %v537_v21 = vsel %vm532_vm2, %v531_v15, %v514_v20 }
 0x169   :  { %v618_v18 = vmul.f32 %v617_v9, %v598_v32  ;;  %v607_v23 = vmul.f32 %v606_v11, %v598_v32  ;;  %v1521_v8 = vadd.f32 %v1475_v12, %v537_v21  ;;  %v523_v28 = vsel %vm520_vm0, %v1452_v14, %v1468_v5 }
 0x16a   :  { %v579_v17 = vadd.f32 1.0, %v578_v10  ;;  %v1513_v19 = vmul.f32 0.70710677, %v1509_v13  ;;  %v568_v24 = vadd.f32 1.1283791, %v567_v16  ;;  %v529_v32 = vsel %vm526_vm1, %v523_v28, %v490_v44 }
 0x16b   :  { %v1516_v26 = vadd.f32 1.0, %v618_v18  ;;  %v608_v33 = vadd.f32 1.1283791, %v607_v23  ;;  %v1531_v35 = vmul.f32 0.70710677, %v1521_v8 }
 0x16c   :  { %911 = vrcp.f32 %v579_v17  ;;  %v677_v7 = vmul.f32 %v1513_v19, %v1513_v19  ;;  %v589_v29 = vand.u32 2147483647, %v579_v17  ;;  %v591_v31 = vand.u32 2147483648, %v579_v17 }
 0x16d   :  { %913 = vrcp.f32 %v1516_v26  ;;  %v569_v38 = vmul.f32 %v568_v24, %v1489_v25  ;;  %vm585_vm3 = vweird.f32 %v579_v17  ;;  %v717_v41 = vmul.f32 %v1531_v35, %v1531_v35 }
 0x16e   :  { %v510_v30 = vpop.permute.xlu0 %509  ;;  %v1528_v34 = vmin.f32 %v677_v7, 16.0  ;;  %vm1537_vm4 = vcmp.eq.f32.partialorder %v589_v29, 8.507059e+37  ;;  %v592_v43 = vor.u32 1.1754944e-38, %v591_v31  ;;  %v609_v44 = vmul.f32 %v608_v33, %v1497_v27 }
 0x16f   :  { %v535_v36 = vsel %vm532_vm2, %v529_v32, %v510_v30  ;;  %v629_v48 = vand.u32 2147483647, %v1516_v26  ;;  %v1548_v49 = vmin.f32 %v717_v41, 16.0  ;;  %v631_v57 = vand.u32 2147483648, %v1516_v26 }
 0x170   :  { %v679_v14 = vmul.f32 2.1237322e-06, %v1528_v34  ;;  %v690_v5 = vmul.f32 3.8918573e-05, %v1528_v34  ;;  %v1544_v42 = vadd.f32 %v1475_v12, %v535_v36  ;;  %vm625_vm8 = vweird.f32 %v1516_v26 }
 0x171   :  { %v719_v27 = vmul.f32 2.1237322e-06, %v1548_v49  ;;  %v730_v54 = vmul.f32 3.8918573e-05, %v1548_v49  ;;  %v632_v9 = vor.u32 1.1754944e-38, %v631_v57  ;;  %vm630_vm10 = vcmp.eq.f32.partialorder %v629_v48, 8.507059e+37 }
 0x172   :  { %v912_v37 = vpop.eup %911  ;;  %v680_v25 = vadd.f32 0.00028619796, %v679_v14  ;;  %v691_v45 = vadd.f32 0.001143296, %v690_v5  ;;  %v1551_v50 = vmul.f32 0.70710677, %v1544_v42 }
 0x173   :  { %v581_v39 = vmul.f32 %v912_v37, %v579_v17  ;;  %v914_v46 = vpop.eup %913  ;;  %vm586_vm5 = vweird.f32 %v912_v37  ;;  %v720_v61 = vadd.f32 0.00028619796, %v719_v27  ;;  %v731_v62 = vadd.f32 0.001143296, %v730_v54 }
 0x174   :  { %v621_v51 = vmul.f32 %v914_v46, %v1516_v26  ;;  %v681_v12 = vmul.f32 %v680_v25, %v1528_v34  ;;  %v692_v52 = vmul.f32 %v691_v45, %v1528_v34  ;;  %v637_v55 = vmul.f32 %v1551_v50, %v1551_v50  ;;  %vm587_vm6 = vmor %vm585_vm3, %vm586_vm5 }
 0x175   :  { %v582_v47 = vsub.f32 1.0, %v581_v39  ;;  %vm626_vm7 = vweird.f32 %v914_v46  ;;  %v721_v6 = vmul.f32 %v720_v61, %v1548_v49  ;;  %v732_v10 = vmul.f32 %v731_v62, %v1548_v49 }
 0x176   :  { %v622_v56 = vsub.f32 1.0, %v621_v51  ;;  %v682_v58 = vadd.f32 0.0036580483, %v681_v12  ;;  %v693_v59 = vadd.f32 0.014752088, %v692_v52  ;;  %v1561_v63 = vmin.f32 %v637_v55, 16.0  ;;  %vm627_vm9 = vmor %vm625_vm8, %vm626_vm7 }
 0x177   :  { %v583_v53 = vmul.f32 %v912_v37, %v582_v47  ;;  %v722_v17 = vadd.f32 0.0036580483, %v721_v6  ;;  %v733_v18 = vadd.f32 0.014752088, %v732_v10  ;;  %v547_v36 = vmul.f32 0.5, %v1484_v22 }
 0x178   :  { %v623_v0 = vmul.f32 %v914_v46, %v622_v56  ;;  %v683_v1 = vmul.f32 %v682_v58, %v1528_v34  ;;  %v694_v3 = vmul.f32 %v693_v59, %v1528_v34  ;;  %v639_v21 = vmul.f32 2.1237322e-06, %v1561_v63 }
 0x179   :  { %v584_v60 = vadd.f32 %v912_v37, %v583_v53  ;;  %v734_v29 = vmul.f32 %v733_v18, %v1548_v49  ;;  %v650_v30 = vmul.f32 3.8918573e-05, %v1561_v63  ;;  %v723_v32 = vmul.f32 %v722_v17, %v1548_v49 }
 0x17a   :  { %v624_v20 = vadd.f32 %v914_v46, %v623_v0  ;;  %v695_v15 = vadd.f32 0.112945676, %v694_v3  ;;  %v684_v7 = vadd.f32 0.05243302, %v683_v1  ;;  %v640_v14 = vadd.f32 0.00028619796, %v639_v21 }
 0x17b   :  { %v588_v4 = vsel %vm587_vm6, %v912_v37, %v584_v60  ;;  %v651_v25 = vadd.f32 0.001143296, %v650_v30  ;;  %v548_v45 = vmul.f32 0.5, %v1492_v2  ;;  %v724_v47 = vadd.f32 0.05243302, %v723_v32 }
 0x17c   :  { %v593_v11 = vsel %vm1537_vm4, %v592_v43, %v588_v4  ;;  %v628_v23 = vsel %vm627_vm9, %v914_v46, %v624_v20  ;;  %v696_v26 = vmul.f32 %v695_v15, %v1528_v34  ;;  %v685_v41 = vmul.f32 %v684_v7, %v1528_v34 }
 0x17d   :  { %v594_v16 = vmul.f32 %v593_v11, %v569_v38  ;;  %v633_v28 = vsel %vm630_vm10, %v632_v9, %v628_v23  ;;  %v735_v38 = vadd.f32 0.112945676, %v734_v29  ;;  %v641_v48 = vmul.f32 %v640_v14, %v1561_v63 }
 0x17e   :  { %v634_v31 = vmul.f32 %v633_v28, %v609_v44  ;;  %v697_v33 = vadd.f32 0.4994258, %v696_v26  ;;  %v652_v51 = vmul.f32 %v651_v25, %v1561_v63  ;;  %v686_v52 = vadd.f32 0.18741608, %v685_v41 }
 0x17f   :  { %v902_v24 = vclamps-f32 %v594_v16, 1.0  ;;  %v736_v43 = vmul.f32 %v735_v38, %v1548_v49  ;;  %v725_v2 = vmul.f32 %v724_v47, %v1548_v49  ;;  %v642_v55 = vadd.f32 0.0036580483, %v641_v48 }
 0x180   :  { %v903_v5 = vclamps-f32 %v634_v31, 1.0  ;;  %v698_v39 = vmul.f32 %v697_v33, %v1528_v34  ;;  %v653_v27 = vadd.f32 0.014752088, %v652_v51  ;;  %v687_v57 = vmul.f32 %v686_v52, %v1528_v34 }
 0x181   :  { %v757_v37 = vadd.f32 1.0, %v902_v24  ;;  %v737_v22 = vadd.f32 0.4994258, %v736_v43  ;;  %v726_v59 = vadd.f32 0.18741608, %v725_v2  ;;  %v643_v62 = vmul.f32 %v642_v55, %v1561_v63 }
 0x182   :  { %v758_v44 = vadd.f32 1.0, %v903_v5  ;;  %v699_v46 = vadd.f32 1.0, %v698_v39  ;;  %v654_v56 = vmul.f32 %v653_v27, %v1561_v63  ;;  %v688_v1 = vadd.f32 1.1283791, %v687_v57 }
 0x183   :  { %v762_v40 = vmul.f32 %v757_v37, %v547_v36  ;;  %v738_v53 = vmul.f32 %v737_v22, %v1548_v49  ;;  %v727_v10 = vmul.f32 %v726_v59, %v1548_v49  ;;  %v644_v34 = vadd.f32 0.05243302, %v643_v62 }
 0x184   :  { %v763_v12 = vmul.f32 %v758_v44, %v548_v45  ;;  %915 = vrcp.f32 %v699_v46  ;;  %v655_v60 = vadd.f32 0.112945676, %v654_v56  ;;  %v709_v4 = vand.u32 2147483647, %v699_v46 }
 0x185   :  { %767 = vst [vmem:[%s1618_s3] sm:$0xff] %v762_v40  ;;  %v739_v54 = vadd.f32 1.0, %v738_v53  ;;  %v711_v6 = vand.u32 2147483648, %v699_v46  ;;  %v689_v17 = vmul.f32 %v688_v1, %v1513_v19  ;;  %vm705_vm12 = vweird.f32 %v699_v46 }
 0x186   :  { %768 = vst [vmem:[%s1618_s3 + $0x8] sm:$0xff] %v763_v12  ;;  %v656_v0 = vmul.f32 %v655_v60, %v1561_v63  ;;  %vm710_vm13 = vcmp.eq.f32.partialorder %v709_v4, 8.507059e+37  ;;  %v728_v23 = vadd.f32 1.1283791, %v727_v10  ;;  %v645_v29 = vmul.f32 %v644_v34, %v1561_v63 }
 0x187   :  { %917 = vrcp.f32 %v739_v54  ;;  %v712_v21 = vor.u32 1.1754944e-38, %v711_v6  ;;  %v749_v49 = vand.u32 2147483647, %v739_v54  ;;  %v751_v28 = vand.u32 2147483648, %v739_v54 }
 0x188   :  { %v657_v11 = vadd.f32 0.4994258, %v656_v0  ;;  %vm745_vm0 = vweird.f32 %v739_v54  ;;  %v646_v37 = vadd.f32 0.18741608, %v645_v29  ;;  %v729_v38 = vmul.f32 %v728_v23, %v1531_v35 }
 0x189   :  { %v752_v36 = vor.u32 1.1754944e-38, %v751_v28  ;;  %vm750_vm2 = vcmp.eq.f32.partialorder %v749_v49, 8.507059e+37  ;;  %v550_v5 = vmul.f32 0.5, %v1509_v13  ;;  %v551_v35 = vmul.f32 0.5, %v1521_v8 }
 0x18a   :  { %v916_v58 = vpop.eup %915  ;;  %v658_v16 = vmul.f32 %v657_v11, %v1561_v63  ;;  %v647_v45 = vmul.f32 %v646_v37, %v1561_v63  ;;  %v549_v56 = vmul.f32 0.5, %v1544_v42 }
 0x18b   :  { %v701_v61 = vmul.f32 %v916_v58, %v699_v46  ;;  %vm706_vm11 = vweird.f32 %v916_v58 }
 0x18c   :  { %vm707_vm14 = vmor %vm705_vm12, %vm706_vm11  ;;  %v659_v26 = vadd.f32 1.0, %v658_v16  ;;  %v648_v51 = vadd.f32 1.1283791, %v647_v45 }
 0x18d   :  { %v702_v3 = vsub.f32 1.0, %v701_v61  ;;  %v918_v20 = vpop.eup %917 }
 0x18e   :  { %v741_v15 = vmul.f32 %v918_v20, %v739_v54  ;;  %vm746_vm15 = vweird.f32 %v918_v20  ;;  %919 = vrcp.f32 %v659_v26  ;;  %v671_v48 = vand.u32 2147483648, %v659_v26 }
 0x18f   :  { %v703_v9 = vmul.f32 %v916_v58, %v702_v3  ;;  %vm747_vm1 = vmor %vm745_vm0, %vm746_vm15  ;;  %v669_v12 = vand.u32 2147483647, %v659_v26  ;;  %vm665_vm4 = vweird.f32 %v659_v26  ;;  %v649_v2 = vmul.f32 %v648_v51, %v1551_v50 }
 0x190   :  { %v742_v7 = vsub.f32 1.0, %v741_v15  ;;  %v672_v63 = vor.u32 1.1754944e-38, %v671_v48 }
 0x191   :  { %v704_v18 = vadd.f32 %v916_v58, %v703_v9  ;;  %vm670_vm6 = vcmp.eq.f32.partialorder %v669_v12, 8.507059e+37 }
 0x192   :  { %v743_v31 = vmul.f32 %v918_v20, %v742_v7 }
 0x193   :  { %v708_v24 = vsel %vm707_vm14, %v916_v58, %v704_v18 }
 0x194   :  { %v713_v30 = vsel %vm710_vm13, %v712_v21, %v708_v24  ;;  %v744_v32 = vadd.f32 %v918_v20, %v743_v31  ;;  %v920_v41 = vpop.eup %919 }
 0x195   :  { %v714_v33 = vmul.f32 %v713_v30, %v689_v17  ;;  %v661_v44 = vmul.f32 %v920_v41, %v659_v26  ;;  %vm666_vm3 = vweird.f32 %v920_v41 }
 0x196   :  { %v748_v14 = vsel %vm747_vm1, %v918_v20, %v744_v32  ;;  %vm667_vm5 = vmor %vm665_vm4, %vm666_vm3 }
 0x197   :  { %v905_v19 = vclamps-f32 %v714_v33, 1.0  ;;  %v753_v40 = vsel %vm750_vm2, %v752_v36, %v748_v14  ;;  %v662_v47 = vsub.f32 1.0, %v661_v44 }
 0x198   :  { %v754_v43 = vmul.f32 %v753_v40, %v729_v38 }
 0x199   :  { %v760_v39 = vadd.f32 1.0, %v905_v19  ;;  %v663_v13 = vmul.f32 %v920_v41, %v662_v47 }
 0x19a   :  { %v906_v46 = vclamps-f32 %v754_v43, 1.0 }
 0x19b   :  { %v765_v25 = vmul.f32 %v760_v39, %v550_v5  ;;  %v664_v53 = vadd.f32 %v920_v41, %v663_v13 }
 0x19c   :  { %v761_v22 = vadd.f32 1.0, %v906_v46 }
 0x19d   :  { %770 = vst [vmem:[%s1618_s3 + $0x18] sm:$0xff] %v765_v25  ;;  %v668_v27 = vsel %vm667_vm5, %v920_v41, %v664_v53 }
 0x19e   :  { %v766_v52 = vmul.f32 %v761_v22, %v551_v35  ;;  %v673_v8 = vsel %vm670_vm6, %v672_v63, %v668_v27 }
 0x19f   :  { %v674_v54 = vmul.f32 %v673_v8, %v649_v2 }
 0x1a0   :  { %771 = vst [vmem:[%s1618_s3 + $0x20] sm:$0xff] %v766_v52 }
 0x1a1   :  { %v904_v55 = vclamps-f32 %v674_v54, 1.0 }
 0x1a3   :  { %v759_v57 = vadd.f32 1.0, %v904_v55 }
 0x1a5   :  { %v764_v58 = vmul.f32 %v759_v57, %v549_v56 }
 0x1a7   :  { %769 = vst [vmem:[%s1618_s3 + $0x10] sm:$0xff] %v764_v58 }

// kernel: _lambda_.21
= control target key start
LH: loop header
LB: loop body
LE: loop exit
PB: predicated region body
PF: predicated region fallthrough
CT: control target
= control target key end

     0   :  { %v344_v5 = vmov 128.0   ;;  %s631_s0 = inlined_call_operand.vmem [shape: f32[38,128], index: 0, kind: input, shape index: {}]   ;;  %s632_s3 = inlined_call_operand.vmem [shape: f32[1,128], index: 3, kind: input, shape index: {}]   ;;  %s633_s4 = inlined_call_operand.vmem [shape: f32[1,128], index: 4, kind: input, shape index: {}]   ;;  %s634_s1 = inlined_call_operand.vmem [shape: f32[128,384], index: 1, kind: input, shape index: {}]   ;;  %s635_s2 = inlined_call_operand.vmem [shape: f32[1,384], index: 2, kind: input, shape index: {}]   ;;  %s636_s5 = inlined_call_operand.vmem [shape: f32[38,384], index: 5, kind: output, shape index: {}]  }
   0x1   :  { %v22_v0 = vld [vmem:[%s631_s0 + $0x10] sm:$0xff]  ;;  %v20_v1 = vld [vmem:[%s631_s0] sm:$0xff]  ;;  %v23_v3 = vld [vmem:[%s631_s0 + $0x18] sm:$0xff]  ;;  %332 = vrcp.f32 %v344_v5 }
   0x2   :  { %31 = vadd.xlane.f32.xlu1 %v22_v0  ;;  %27 = vadd.xlane.f32.xlu0 %v20_v1  ;;  %v24_v2 = vld [vmem:[%s631_s0 + $0x20] sm:$0xff]  ;;  %v21_v4 = vld [vmem:[%s631_s0 + $0x8] sm:$0xff]  ;;  %v195_v32 = vld [vmem:[%s634_s1 + $0x150] sm:$0xff] }
   0x3   :  { %35 = vadd.xlane.f32.xlu2 %v24_v2  ;;  %v198_v33 = vld [vmem:[%s634_s1 + $0x168] sm:$0xff]  ;;  %v196_v34 = vld [vmem:[%s634_s1 + $0x158] sm:$0xff]  ;;  %v199_v36 = vld [vmem:[%s634_s1 + $0x170] sm:$0xff] }
   0x4   :  { %v222_v35 = vpack.c.bf16 %v198_v33, %v195_v32  ;;  %v197_v37 = vld [vmem:[%s634_s1 + $0x160] sm:$0xff]  ;;  %v200_v38 = vld [vmem:[%s634_s1 + $0x178] sm:$0xff]  ;;  %v223_v39 = vpack.c.bf16 %v199_v36, %v196_v34  ;;  %v190_v43 = vld [vmem:[%s634_s1 + $0x128] sm:$0xff] }
   0x5   :  { %v224_v40 = vpack.c.bf16 %v200_v38, %v197_v37  ;;  %v189_v41 = vld [vmem:[%s634_s1 + $0x120] sm:$0xff]  ;;  %v192_v42 = vld [vmem:[%s634_s1 + $0x138] sm:$0xff]  ;;  %v191_v46 = vld [vmem:[%s634_s1 + $0x130] sm:$0xff] }
   0x6   :  { %233 = vmatpush.bf16.msra.mxu0 %v222_v35  ;;  %321 = vmatpush.bf16.msra.mxu3 %v222_v35  ;;  %v219_v44 = vpack.c.bf16 %v192_v42, %v189_v41  ;;  %v193_v45 = vld [vmem:[%s634_s1 + $0x140] sm:$0xff]  ;;  %v194_v47 = vld [vmem:[%s634_s1 + $0x148] sm:$0xff]  ;;  %v183_v50 = vld [vmem:[%s634_s1 + $0xf0] sm:$0xff] }
   0x7   :  { %v333_v6 = vpop.eup %332  ;;  %256 = vmatpush.bf16.msra.mxu1 %v223_v39  ;;  %279 = vmatpush.bf16.msra.mxu2 %v224_v40  ;;  %v220_v48 = vpack.c.bf16 %v193_v45, %v190_v43  ;;  %v221_v49 = vpack.c.bf16 %v194_v47, %v191_v46  ;;  %v186_v51 = vld [vmem:[%s634_s1 + $0x108] sm:$0xff]  ;;  %v184_v52 = vld [vmem:[%s634_s1 + $0xf8] sm:$0xff]  ;;  %v187_v54 = vld [vmem:[%s634_s1 + $0x110] sm:$0xff] }
   0x8   :  { %v38_v7 = vmul.f32 128.0, %v333_v6  ;;  %vm42_vm0 = vweird.f32 %v333_v6  ;;  %v216_v53 = vpack.c.bf16 %v186_v51, %v183_v50  ;;  %v185_v55 = vld [vmem:[%s634_s1 + $0x100] sm:$0xff]  ;;  %v188_v56 = vld [vmem:[%s634_s1 + $0x118] sm:$0xff]  ;;  %v217_v57 = vpack.c.bf16 %v187_v54, %v184_v52  ;;  %v178_v61 = vld [vmem:[%s634_s1 + $0xc8] sm:$0xff] }
   0x9   :  { %v218_v58 = vpack.c.bf16 %v188_v56, %v185_v55  ;;  %v177_v59 = vld [vmem:[%s634_s1 + $0xc0] sm:$0xff]  ;;  %v180_v60 = vld [vmem:[%s634_s1 + $0xd8] sm:$0xff]  ;;  %v174_v5 = vld [vmem:[%s634_s1 + $0xa8] sm:$0xff] }
   0xa   :  { %33 = vadd.xlane.f32.xlu1 %v23_v3  ;;  %29 = vadd.xlane.f32.xlu0 %v21_v4  ;;  %v39_v8 = vsub.f32 1.0, %v38_v7  ;;  %v213_v62 = vpack.c.bf16 %v180_v60, %v177_v59  ;;  %v181_v63 = vld [vmem:[%s634_s1 + $0xe0] sm:$0xff]  ;;  %v163_v32 = vld [vmem:[%s634_s1 + $0x50] sm:$0xff]  ;;  %v164_v34 = vld [vmem:[%s634_s1 + $0x58] sm:$0xff] }
   0xb   :  { %234 = vmatpush.bf16.msra.mxu0 %v219_v44  ;;  %322 = vmatpush.bf16.msra.mxu3 %v219_v44  ;;  %v161_v33 = vld [vmem:[%s634_s1 + $0x40] sm:$0xff]  ;;  %v156_v42 = vld [vmem:[%s634_s1 + $0x18] sm:$0xff]  ;;  %v154_v43 = vld [vmem:[%s634_s1 + $0x8] sm:$0xff] }
   0xc   :  { %v40_v9 = vmul.f32 %v333_v6, %v39_v8  ;;  %257 = vmatpush.bf16.msra.mxu1 %v220_v48  ;;  %280 = vmatpush.bf16.msra.mxu2 %v221_v49  ;;  %v175_v8 = vld [vmem:[%s634_s1 + $0xb0] sm:$0xff]  ;;  %v206_v38 = vpack.c.bf16 %v164_v34, %v161_v33  ;;  %v153_v41 = vld [vmem:[%s634_s1] sm:$0xff]  ;;  %v158_v50 = vld [vmem:[%s634_s1 + $0x28] sm:$0xff] }
   0xd   :  { %v201_v46 = vpack.c.bf16 %v156_v42, %v153_v41  ;;  %v157_v47 = vld [vmem:[%s634_s1 + $0x20] sm:$0xff]  ;;  %v155_v48 = vld [vmem:[%s634_s1 + $0x10] sm:$0xff] }
   0xe   :  { %v41_v10 = vadd.f32 %v333_v6, %v40_v9  ;;  %v173_v9 = vld [vmem:[%s634_s1 + $0xa0] sm:$0xff]  ;;  %v202_v49 = vpack.c.bf16 %v157_v47, %v154_v43  ;;  %v203_v51 = vpack.c.bf16 %v158_v50, %v155_v48 }
   0xf   :  { %235 = vmatpush.bf16.msra.mxu0 %v216_v53  ;;  %323 = vmatpush.bf16.msra.mxu3 %v216_v53 }
  0x10   :  { %v390_v11 = vsel %vm42_vm0, %v333_v6, %v41_v10  ;;  %258 = vmatpush.bf16.msra.mxu1 %v217_v57  ;;  %281 = vmatpush.bf16.msra.mxu2 %v218_v58  ;;  %v172_v6 = vld [vmem:[%s634_s1 + $0x98] sm:$0xff] }
  0x11   :  { %v176_v10 = vld [vmem:[%s634_s1 + $0xb8] sm:$0xff] }
  0x13   :  { %236 = vmatpush.bf16.msra.mxu0 %v213_v62  ;;  %324 = vmatpush.bf16.msra.mxu3 %v213_v62 }
  0x75   :  { %v32_v12 = vpop.xlane.xlu1 %31  ;;  %v28_v13 = vpop.xlane.xlu0 %27 }
  0x76   :  { %v46_v14 = vmul.f32 %v390_v11, %v32_v12  ;;  %v44_v15 = vmul.f32 %v390_v11, %v28_v13  ;;  %v36_v20 = vpop.xlane.xlu2 %35  ;;  %v211_v12 = vpack.c.bf16 %v175_v8, %v172_v6  ;;  %v212_v13 = vpack.c.bf16 %v176_v10, %v173_v9 }
  0x77   :  { %v48_v27 = vmul.f32 %v390_v11, %v36_v20  ;;  %v169_v20 = vld [vmem:[%s634_s1 + $0x80] sm:$0xff] }
  0x78   :  { %v394_v16 = vsub.f32 %v22_v0, %v46_v14  ;;  %v396_v17 = vsub.f32 %v20_v1, %v44_v15  ;;  %v179_v0 = vld [vmem:[%s634_s1 + $0xd0] sm:$0xff]  ;;  %v182_v1 = vld [vmem:[%s634_s1 + $0xe8] sm:$0xff]  ;;  %v165_v14 = vld [vmem:[%s634_s1 + $0x60] sm:$0xff] }
  0x79   :  { %v413_v30 = vsub.f32 %v24_v2, %v48_v27  ;;  %v214_v2 = vpack.c.bf16 %v181_v63, %v178_v61  ;;  %v168_v15 = vld [vmem:[%s634_s1 + $0x78] sm:$0xff]  ;;  %v159_v27 = vld [vmem:[%s634_s1 + $0x30] sm:$0xff] }
  0x7a   :  { %v56_v18 = vmul.f32 %v394_v16, %v394_v16  ;;  %v54_v19 = vmul.f32 %v396_v17, %v396_v17 }
  0x7b   :  { %v58_v31 = vmul.f32 %v413_v30, %v413_v30  ;;  %259 = vmatpush.bf16.msra.mxu1 %v214_v2 }
  0x7c   :  { %63 = vadd.xlane.f32.xlu1 %v56_v18  ;;  %59 = vadd.xlane.f32.xlu2 %v54_v19  ;;  %v166_v18 = vld [vmem:[%s634_s1 + $0x68] sm:$0xff]  ;;  %v207_v19 = vpack.c.bf16 %v168_v15, %v165_v14 }
  0x7d   :  { %v34_v21 = vpop.xlane.xlu1 %33  ;;  %v30_v22 = vpop.xlane.xlu0 %29 }
  0x7e   :  { %v47_v23 = vmul.f32 %v390_v11, %v34_v21  ;;  %v45_v24 = vmul.f32 %v390_v11, %v30_v22  ;;  %v167_v21 = vld [vmem:[%s634_s1 + $0x70] sm:$0xff]  ;;  %v170_v22 = vld [vmem:[%s634_s1 + $0x88] sm:$0xff] }
  0x7f   :  { %260 = vmatpush.bf16.msra.mxu1 %v211_v12 }
  0x80   :  { %v404_v25 = vsub.f32 %v23_v3, %v47_v23  ;;  %v406_v26 = vsub.f32 %v21_v4, %v45_v24  ;;  %v215_v3 = vpack.c.bf16 %v182_v1, %v179_v0  ;;  %v171_v4 = vld [vmem:[%s634_s1 + $0x90] sm:$0xff]  ;;  %v208_v23 = vpack.c.bf16 %v169_v20, %v166_v18 }
  0x81   :  { %v210_v7 = vpack.c.bf16 %v174_v5, %v171_v4  ;;  %v209_v24 = vpack.c.bf16 %v170_v22, %v167_v21 }
  0x82   :  { %v57_v28 = vmul.f32 %v404_v25, %v404_v25  ;;  %v55_v29 = vmul.f32 %v406_v26, %v406_v26  ;;  %282 = vmatpush.bf16.msra.mxu2 %v215_v3 }
  0x83   :  { %237 = vmatpush.bf16.msra.mxu0 %v210_v7  ;;  %325 = vmatpush.bf16.msra.mxu3 %v210_v7 }
  0x84   :  { %65 = vadd.xlane.f32.xlu2 %v57_v28  ;;  %61 = vadd.xlane.f32.xlu0 %v55_v29  ;;  %v162_v28 = vld [vmem:[%s634_s1 + $0x48] sm:$0xff]  ;;  %v160_v29 = vld [vmem:[%s634_s1 + $0x38] sm:$0xff] }
  0x85   :  { %261 = vmatpush.bf16.msra.mxu1 %v208_v23  ;;  %v205_v37 = vpack.c.bf16 %v163_v32, %v160_v29 }
  0x86   :  { %283 = vmatpush.bf16.msra.mxu2 %v212_v13 }
  0x87   :  { %238 = vmatpush.bf16.msra.mxu0 %v207_v19  ;;  %326 = vmatpush.bf16.msra.mxu3 %v207_v19 }
  0x89   :  { %262 = vmatpush.bf16.msra.mxu1 %v205_v37 }
  0x8a   :  { %284 = vmatpush.bf16.msra.mxu2 %v209_v24 }
  0x8c   :  { %67 = vadd.xlane.f32.xlu0 %v58_v31  ;;  %v204_v31 = vpack.c.bf16 %v162_v28, %v159_v27  ;;  %v330_v28 = vld [vmem:[%s632_s3] ss:$0 sm:$0xff] }
  0x8d   :  { %263 = vmatpush.bf16.msra.mxu1 %v202_v49 }
  0x8e   :  { %239 = vmatpush.bf16.msra.mxu0 %v204_v31  ;;  %327 = vmatpush.bf16.msra.mxu3 %v204_v31 }
  0x8f   :  { %285 = vmatpush.bf16.msra.mxu2 %v206_v38 }
  0x92   :  { %240 = vmatpush.bf16.msra.mxu0 %v201_v46  ;;  %328 = vmatpush.bf16.msra.mxu3 %v201_v46 }
  0x93   :  { %286 = vmatpush.bf16.msra.mxu2 %v203_v51 }
  0xef   :  { %v64_v35 = vpop.xlane.xlu1 %63  ;;  %v60_v36 = vpop.xlane.xlu2 %59 }
  0xf0   :  { %v71_v39 = vmul.f32 %v64_v35, %v390_v11  ;;  %v69_v40 = vmul.f32 %v60_v36, %v390_v11 }
  0xf2   :  { %v76_v44 = vadd.f32 1e-05, %v71_v39  ;;  %v74_v45 = vadd.f32 1e-05, %v69_v40 }
  0xf4   :  { %334 = vrsqrt.f32 %v76_v44  ;;  %vm105_vm1 = vweird.f32 %v76_v44  ;;  %vm85_vm5 = vweird.f32 %v74_v45 }
  0xf5   :  { %336 = vrsqrt.f32 %v74_v45 }
  0xf7   :  { %v66_v52 = vpop.xlane.xlu2 %65  ;;  %v62_v53 = vpop.xlane.xlu0 %61 }
  0xf8   :  { %v72_v54 = vmul.f32 %v66_v52, %v390_v11  ;;  %v70_v55 = vmul.f32 %v62_v53, %v390_v11 }
  0xfa   :  { %v335_v56 = vpop.eup %334  ;;  %v77_v57 = vadd.f32 1e-05, %v72_v54  ;;  %v75_v58 = vadd.f32 1e-05, %v70_v55  ;;  %v225_v54 = vld [vmem:[%s635_s2] sm:$0x7] }
  0xfb   :  { %v337_v59 = vpop.eup %336  ;;  %v100_v60 = vmul.f32 %v335_v56, %v76_v44  ;;  %vm106_vm2 = vweird.f32 %v335_v56  ;;  %v227_v55 = vperm.slane %v225_v54, 0 }
  0xfc   :  { %v80_v61 = vmul.f32 %v337_v59, %v74_v45  ;;  %338 = vrsqrt.f32 %v77_v57  ;;  %vm566_vm3 = vmor %vm105_vm1, %vm106_vm2  ;;  %vm86_vm4 = vweird.f32 %v337_v59  ;;  %vm115_vm7 = vweird.f32 %v77_v57 }
  0xfd   :  { %v101_v62 = vmul.f32 %v335_v56, %v100_v60  ;;  %340 = vrsqrt.f32 %v75_v58  ;;  %vm87_vm6 = vmor %vm85_vm5, %vm86_vm4  ;;  %vm95_vm11 = vweird.f32 %v75_v58 }
  0xfe   :  { %v81_v63 = vmul.f32 %v337_v59, %v80_v61 }
  0xff   :  { %v102_v0 = vmul.f32 0.5, %v101_v62  ;;  %v68_v1 = vpop.xlane.xlu0 %67 }
 0x100   :  { %v82_v2 = vmul.f32 0.5, %v81_v63  ;;  %v73_v3 = vmul.f32 %v68_v1, %v390_v11 }
 0x101   :  { %v103_v4 = vsub.f32 1.5, %v102_v0 }
 0x102   :  { %v339_v5 = vpop.eup %338  ;;  %v83_v6 = vsub.f32 1.5, %v82_v2  ;;  %v78_v7 = vadd.f32 1e-05, %v73_v3 }
 0x103   :  { %v341_v8 = vpop.eup %340  ;;  %v104_v9 = vmul.f32 %v335_v56, %v103_v4  ;;  %v110_v10 = vmul.f32 %v339_v5, %v77_v57  ;;  %vm116_vm8 = vweird.f32 %v339_v5 }
 0x104   :  { %v84_v13 = vmul.f32 %v337_v59, %v83_v6  ;;  %v90_v14 = vmul.f32 %v341_v8, %v75_v58  ;;  %342 = vrsqrt.f32 %v78_v7  ;;  %vm117_vm9 = vmor %vm115_vm7, %vm116_vm8  ;;  %vm96_vm10 = vweird.f32 %v341_v8 }
 0x105   :  { %v111_v15 = vmul.f32 %v339_v5, %v110_v10  ;;  %v108_v18 = vsel %vm566_vm3, %v335_v56, %v104_v9  ;;  %vm97_vm12 = vmor %vm95_vm11, %vm96_vm10  ;;  %vm125_vm13 = vweird.f32 %v78_v7  ;;  %v228_v56 = vperm.slane %v225_v54, 1 }
 0x106   :  { %v91_v11 = vmul.f32 %v341_v8, %v90_v14  ;;  %v88_v20 = vsel %vm87_vm6, %v337_v59, %v84_v13  ;;  %v131_v24 = vmul.f32 %v108_v18, %v394_v16  ;;  %v331_v16 = vld [vmem:[%s633_s4] ss:$0 sm:$0xff] }
 0x107   :  { %v112_v19 = vmul.f32 0.5, %v111_v15  ;;  %v129_v29 = vmul.f32 %v88_v20, %v396_v17 }
 0x108   :  { %v92_v21 = vmul.f32 0.5, %v91_v11  ;;  %v139_v38 = vmul.f32 %v330_v28, %v131_v24 }
 0x109   :  { %v113_v22 = vsub.f32 1.5, %v112_v19  ;;  %v137_v17 = vmul.f32 %v330_v28, %v129_v29 }
 0x10a   :  { %v343_v23 = vpop.eup %342  ;;  %v93_v27 = vsub.f32 1.5, %v92_v21  ;;  %v147_v44 = vadd.f32 %v331_v16, %v139_v38 }
 0x10b   :  { %v114_v31 = vmul.f32 %v339_v5, %v113_v22  ;;  %v120_v32 = vmul.f32 %v343_v23, %v78_v7  ;;  %vm126_vm14 = vweird.f32 %v343_v23 }
 0x10c   :  { %v94_v33 = vmul.f32 %v341_v8, %v93_v27  ;;  %vm127_vm15 = vmor %vm125_vm13, %vm126_vm14 }
 0x10d   :  { %v118_v34 = vsel %vm117_vm9, %v339_v5, %v114_v31  ;;  %v121_v35 = vmul.f32 %v343_v23, %v120_v32 }
 0x10e   :  { %v132_v36 = vmul.f32 %v118_v34, %v404_v25  ;;  %v98_v37 = vsel %vm97_vm12, %v341_v8, %v94_v33  ;;  %v145_v25 = vadd.f32 %v331_v16, %v137_v17 }
 0x10f   :  { %v130_v39 = vmul.f32 %v98_v37, %v406_v26  ;;  %v122_v40 = vmul.f32 0.5, %v121_v35 }
 0x110   :  { %v140_v41 = vmul.f32 %v330_v28, %v132_v36 }
 0x111   :  { %v123_v42 = vsub.f32 1.5, %v122_v40  ;;  %v138_v43 = vmul.f32 %v330_v28, %v130_v39 }
 0x112   :  { %v148_v45 = vadd.f32 %v331_v16, %v140_v41 }
 0x113   :  { %v124_v46 = vmul.f32 %v343_v23, %v123_v42  ;;  %v146_v47 = vadd.f32 %v331_v16, %v138_v43 }
 0x114   :  { %v151_v48 = vpack.c.bf16 %v148_v45, %v147_v44 }
 0x115   :  { %v128_v49 = vsel %vm127_vm15, %v343_v23, %v124_v46  ;;  %v150_v50 = vpack.c.bf16 %v146_v47, %v145_v25 }
 0x116   :  { %246 = vmatmul.bf16.vlgmr.msra.gmra.mxu3 %v151_v48  ;;  %v133_v26 = vmul.f32 %v128_v49, %v413_v30  ;;  %v229_v30 = vperm.slane %v225_v54, 2 }
 0x117   :  { %241 = vmatmul.bf16.vlgmr.msra.gmra.mxu0 %v150_v50  ;;  %264 = vmatmul.bf16.vlgmr.msra.gmra.mxu1 %v150_v50 }
 0x118   :  { %287 = vmatmul.bf16.vlgmr.msra.gmra.mxu2 %v150_v50  ;;  %v141_v51 = vmul.f32 %v330_v28, %v133_v26 }
 0x11a   :  { %v149_v52 = vadd.f32 %v331_v16, %v141_v51 }
 0x11c   :  { %v152_v53 = vpack.c.bf16 %v149_v52, %v149_v52 }
 0x126   :  { %251 = vmatmul.bf16.gmra.mxu3 %v152_v53 }
 0x127   :  { %269 = vmatmul.bf16.gmra.mxu1 %v151_v48 }
 0x128   :  { %292 = vmatmul.bf16.gmra.mxu2 %v151_v48 }
 0x137   :  { %274 = vmatmul.bf16.gmra.mxu1 %v152_v53 }
 0x138   :  { %297 = vmatmul.bf16.gmra.mxu2 %v152_v53 }
 0x194   :  { %v242_v57 = vpop.f32.mrf.mxu0  ;;  %v265_v58 = vpop.f32.mrf.mxu1 }
 0x195   :  { %v243_v59 = vadd.f32 %v242_v57, %v227_v55  ;;  %v266_v60 = vadd.f32 %v265_v58, %v228_v56 }
 0x197   :  { %302 = vst [vmem:[%s636_s5] sm:$0xff] %v243_v59 }
 0x198   :  { %303 = vst [vmem:[%s636_s5 + $0x8] sm:$0xff] %v266_v60 }
 0x199   :  { %v247_v61 = vpop.f32.mrf.mxu3 }
 0x19a   :  { %v248_v62 = vadd.f32 %v247_v61, %v227_v55 }
 0x19b   :  { %v288_v63 = vpop.f32.mrf.mxu2 }
 0x19c   :  { %308 = vst [vmem:[%s636_s5 + $0x30] sm:$0xff] %v248_v62  ;;  %v289_v0 = vadd.f32 %v288_v63, %v229_v30  ;;  %v244_v1 = vpop.f32.mrf.mxu0  ;;  %v267_v2 = vpop.f32.mrf.mxu1 }
 0x19d   :  { %v245_v3 = vadd.f32 %v244_v1, %v227_v55  ;;  %v268_v4 = vadd.f32 %v267_v2, %v228_v56 }
 0x19e   :  { %304 = vst [vmem:[%s636_s5 + $0x10] sm:$0xff] %v289_v0 }
 0x19f   :  { %305 = vst [vmem:[%s636_s5 + $0x18] sm:$0xff] %v245_v3 }
 0x1a0   :  { %306 = vst [vmem:[%s636_s5 + $0x20] sm:$0xff] %v268_v4 }
 0x1a1   :  { %v249_v5 = vpop.f32.mrf.mxu3 }
 0x1a2   :  { %v250_v6 = vadd.f32 %v249_v5, %v227_v55 }
 0x1a3   :  { %v290_v7 = vpop.f32.mrf.mxu2 }
 0x1a4   :  { %311 = vst [vmem:[%s636_s5 + $0x48] sm:$0xff] %v250_v6  ;;  %v291_v8 = vadd.f32 %v290_v7, %v229_v30  ;;  %v270_v9 = vpop.f32.mrf.mxu1 }
 0x1a5   :  { %v271_v10 = vadd.f32 %v270_v9, %v228_v56 }
 0x1a6   :  { %307 = vst [vmem:[%s636_s5 + $0x28] sm:$0xff] %v291_v8 }
 0x1a7   :  { %309 = vst [vmem:[%s636_s5 + $0x38] sm:$0xff] %v271_v10 }
 0x1a9   :  { %v252_v12 = vpop.f32.mrf.mxu3 }
 0x1aa   :  { %v253_v13 = vadd.f32 %v252_v12, %v227_v55 }
 0x1ab   :  { %v293_v14 = vpop.f32.mrf.mxu2 }
 0x1ac   :  { %314 = vst [vmem:[%s636_s5 + $0x60] sm:$0xff] %v253_v13  ;;  %v294_v15 = vadd.f32 %v293_v14, %v229_v30  ;;  %v272_v11 = vpop.f32.mrf.mxu1 }
 0x1ad   :  { %v273_v18 = vadd.f32 %v272_v11, %v228_v56 }
 0x1ae   :  { %310 = vst [vmem:[%s636_s5 + $0x40] sm:$0xff] %v294_v15 }
 0x1af   :  { %312 = vst [vmem:[%s636_s5 + $0x50] sm:$0xff] %v273_v18 }
 0x1b1   :  { %v254_v19 = vpop.f32.mrf.mxu3 }
 0x1b3   :  { %v295_v20 = vpop.f32.mrf.mxu2 }
 0x1b4   :  { %v296_v21 = vadd.f32 %v295_v20, %v229_v30  ;;  %v275_v22 = vpop.f32.mrf.mxu1 }
 0x1b5   :  { %v276_v23 = vadd.f32 %v275_v22, %v228_v56 }
 0x1b6   :  { %313 = vst [vmem:[%s636_s5 + $0x58] sm:$0xff] %v296_v21 }
 0x1b7   :  { %315 = vst [vmem:[%s636_s5 + $0x68] sm:$0xff] %v276_v23 }
 0x1bb   :  { %v298_v24 = vpop.f32.mrf.mxu2 }
 0x1bc   :  { %v299_v27 = vadd.f32 %v298_v24, %v229_v30  ;;  %v277_v28 = vpop.f32.mrf.mxu1 }
 0x1be   :  { %316 = vst [vmem:[%s636_s5 + $0x70] sm:$0xff] %v299_v27 }
 0x1c3   :  { %v300_v29 = vpop.f32.mrf.mxu2 }

// kernel: _lambda_.23
= control target key start
LH: loop header
LB: loop body
LE: loop exit
PB: predicated region body
PF: predicated region fallthrough
CT: control target
= control target key end

     0   :  { %s233_s1 = inlined_call_operand.vmem [shape: f32[128,128], index: 1, kind: input, shape index: {}]   ;;  %s234_s2 = inlined_call_operand.vmem [shape: f32[1,128], index: 2, kind: input, shape index: {}]   ;;  %s235_s0 = inlined_call_operand.vmem [shape: f32[38,128], index: 0, kind: input, shape index: {}]   ;;  %s236_s3 = inlined_call_operand.vmem [shape: f32[38,128], index: 3, kind: input, shape index: {}]   ;;  %s237_s4 = inlined_call_operand.vmem [shape: f32[38,128], index: 4, kind: output, shape index: {}]  }
   0x1   :  { %v39_v0 = vld [vmem:[%s233_s1 + $0x70] sm:$0xff]  ;;  %v40_v1 = vld [vmem:[%s233_s1 + $0x78] sm:$0xff]  ;;  %v37_v2 = vld [vmem:[%s233_s1 + $0x60] sm:$0xff] }
   0x2   :  { %v48_v3 = vpack.c.bf16 %v40_v1, %v39_v0  ;;  %v38_v4 = vld [vmem:[%s233_s1 + $0x68] sm:$0xff]  ;;  %v35_v6 = vld [vmem:[%s233_s1 + $0x50] sm:$0xff]  ;;  %v36_v7 = vld [vmem:[%s233_s1 + $0x58] sm:$0xff] }
   0x3   :  { %v47_v5 = vpack.c.bf16 %v38_v4, %v37_v2  ;;  %v46_v8 = vpack.c.bf16 %v36_v7, %v35_v6  ;;  %v33_v9 = vld [vmem:[%s233_s1 + $0x40] sm:$0xff]  ;;  %v34_v10 = vld [vmem:[%s233_s1 + $0x48] sm:$0xff]  ;;  %v31_v12 = vld [vmem:[%s233_s1 + $0x30] sm:$0xff] }
   0x4   :  { %53 = vmatpush.bf16.msra.mxu0 %v48_v3  ;;  %95 = vmatpush.bf16.msra.mxu1 %v48_v3  ;;  %v45_v11 = vpack.c.bf16 %v34_v10, %v33_v9  ;;  %v32_v13 = vld [vmem:[%s233_s1 + $0x38] sm:$0xff]  ;;  %v29_v15 = vld [vmem:[%s233_s1 + $0x20] sm:$0xff]  ;;  %v30_v16 = vld [vmem:[%s233_s1 + $0x28] sm:$0xff] }
   0x5   :  { %96 = vmatpush.bf16.msra.mxu2 %v48_v3  ;;  %v44_v14 = vpack.c.bf16 %v32_v13, %v31_v12  ;;  %v43_v17 = vpack.c.bf16 %v30_v16, %v29_v15  ;;  %v27_v18 = vld [vmem:[%s233_s1 + $0x10] sm:$0xff]  ;;  %v28_v19 = vld [vmem:[%s233_s1 + $0x18] sm:$0xff]  ;;  %v25_v21 = vld [vmem:[%s233_s1] sm:$0xff] }
   0x6   :  { %v42_v20 = vpack.c.bf16 %v28_v19, %v27_v18  ;;  %v26_v22 = vld [vmem:[%s233_s1 + $0x8] sm:$0xff]  ;;  %v17_v23 = vld [vmem:[%s235_s0] sm:$0xff]  ;;  %v19_v26 = vld [vmem:[%s235_s0 + $0x10] sm:$0xff] }
   0x7   :  { %v41_v24 = vpack.c.bf16 %v26_v22, %v25_v21  ;;  %v18_v25 = vld [vmem:[%s235_s0 + $0x8] sm:$0xff]  ;;  %v20_v27 = vld [vmem:[%s235_s0 + $0x18] sm:$0xff]  ;;  %v21_v28 = vld [vmem:[%s235_s0 + $0x20] sm:$0xff] }
   0x8   :  { %54 = vmatpush.bf16.msra.mxu0 %v47_v5  ;;  %97 = vmatpush.bf16.msra.mxu1 %v47_v5  ;;  %v22_v29 = vpack.c.bf16 %v18_v25, %v17_v23  ;;  %v23_v30 = vpack.c.bf16 %v20_v27, %v19_v26  ;;  %v24_v31 = vpack.c.bf16 %v21_v28, %v21_v28  ;;  %v111_v32 = vld [vmem:[%s234_s2] ss:$0 sm:$0xff]  ;;  %v78_v36 = vld [vmem:[%s236_s3 + $0x10] sm:$0xff]  ;;  %v77_v45 = vld [vmem:[%s236_s3 + $0x8] sm:$0xff] }
   0x9   :  { %98 = vmatpush.bf16.msra.mxu2 %v47_v5  ;;  %v76_v34 = vld [vmem:[%s236_s3] sm:$0xff]  ;;  %v79_v47 = vld [vmem:[%s236_s3 + $0x18] sm:$0xff] }
   0xa   :  { %v80_v42 = vld [vmem:[%s236_s3 + $0x20] sm:$0xff] }
   0xc   :  { %55 = vmatpush.bf16.msra.mxu0 %v46_v8  ;;  %99 = vmatpush.bf16.msra.mxu1 %v46_v8 }
   0xd   :  { %100 = vmatpush.bf16.msra.mxu2 %v46_v8 }
  0x10   :  { %56 = vmatpush.bf16.msra.mxu0 %v45_v11  ;;  %101 = vmatpush.bf16.msra.mxu1 %v45_v11 }
  0x11   :  { %102 = vmatpush.bf16.msra.mxu2 %v45_v11 }
  0x14   :  { %57 = vmatpush.bf16.msra.mxu0 %v44_v14  ;;  %103 = vmatpush.bf16.msra.mxu1 %v44_v14 }
  0x15   :  { %104 = vmatpush.bf16.msra.mxu2 %v44_v14 }
  0x18   :  { %58 = vmatpush.bf16.msra.mxu0 %v43_v17  ;;  %105 = vmatpush.bf16.msra.mxu1 %v43_v17 }
  0x19   :  { %106 = vmatpush.bf16.msra.mxu2 %v43_v17 }
  0x1c   :  { %59 = vmatpush.bf16.msra.mxu0 %v42_v20  ;;  %107 = vmatpush.bf16.msra.mxu1 %v42_v20 }
  0x1d   :  { %108 = vmatpush.bf16.msra.mxu2 %v42_v20 }
  0x20   :  { %60 = vmatpush.bf16.msra.mxu0 %v41_v24  ;;  %109 = vmatpush.bf16.msra.mxu1 %v41_v24 }
  0x21   :  { %110 = vmatpush.bf16.msra.mxu2 %v41_v24 }
  0x23   :  { %61 = vmatmul.bf16.vlgmr.msra.gmra.mxu0 %v22_v29  ;;  %66 = vmatmul.bf16.vlgmr.msra.gmra.mxu1 %v23_v30 }
  0x24   :  { %71 = vmatmul.bf16.vlgmr.msra.gmra.mxu2 %v24_v31 }
  0xa0   :  { %v62_v33 = vpop.f32.mrf.mxu0  ;;  %v67_v35 = vpop.f32.mrf.mxu1 }
  0xa1   :  { %v63_v37 = vadd.f32 %v111_v32, %v62_v33  ;;  %v68_v38 = vadd.f32 %v111_v32, %v67_v35 }
  0xa3   :  { %v81_v39 = vadd.f32 %v76_v34, %v63_v37  ;;  %v83_v40 = vadd.f32 %v78_v36, %v68_v38 }
  0xa5   :  { %86 = vst [vmem:[%s237_s4] sm:$0xff] %v81_v39 }
  0xa6   :  { %88 = vst [vmem:[%s237_s4 + $0x10] sm:$0xff] %v83_v40 }
  0xa7   :  { %v72_v41 = vpop.f32.mrf.mxu2 }
  0xa8   :  { %v73_v43 = vadd.f32 %v111_v32, %v72_v41  ;;  %v64_v44 = vpop.f32.mrf.mxu0  ;;  %v69_v46 = vpop.f32.mrf.mxu1 }
  0xa9   :  { %v65_v48 = vadd.f32 %v111_v32, %v64_v44  ;;  %v70_v49 = vadd.f32 %v111_v32, %v69_v46 }
  0xaa   :  { %v85_v50 = vadd.f32 %v80_v42, %v73_v43 }
  0xab   :  { %v82_v51 = vadd.f32 %v77_v45, %v65_v48  ;;  %v84_v52 = vadd.f32 %v79_v47, %v70_v49 }
  0xac   :  { %90 = vst [vmem:[%s237_s4 + $0x20] sm:$0xff] %v85_v50 }
  0xad   :  { %87 = vst [vmem:[%s237_s4 + $0x8] sm:$0xff] %v82_v51 }
  0xae   :  { %89 = vst [vmem:[%s237_s4 + $0x18] sm:$0xff] %v84_v52 }
  0xaf   :  { %v74_v53 = vpop.f32.mrf.mxu2 }

// kernel: _lambda_.22
= control target key start
LH: loop header
LB: loop body
LE: loop exit
PB: predicated region body
PF: predicated region fallthrough
CT: control target
= control target key end

     0   :  { %s899_s12 = smov 0   ;;  %s1091_s0 = inlined_call_operand.vmem [shape: f32[2,19,128], index: 0, kind: input, shape index: {}]   ;;  %s1092_s1 = inlined_call_operand.vmem [shape: f32[2,19,128], index: 1, kind: input, shape index: {}]   ;;  %s1093_s2 = inlined_call_operand.vmem [shape: f32[2,19,128], index: 2, kind: input, shape index: {}]   ;;  %s1094_s3 = inlined_call_operand.vmem [shape: f32[2,19,128], index: 3, kind: output, shape index: {}]  }
   0x1 LB: > { %s779_s13 = sadd.s32 4294967295, %s873_s12   ;;  %p783_p0 = scmp.ge.s32.totalorder %s873_s12, 1  ;;  %s873_s12 = sphi %s899_s12, %s13_s12  }
   0x2   : > { %p157_p1 = scmp.lt.s32.totalorder %s873_s12, 3 }
   0x4   : > { %p158_p2 = pnand %p783_p0, %p157_p1 }
   0x5   : > { %p191_p3 = scmp.lt.s32.totalorder (!%p158_p2), %s779_s13, 1  ;;  %s875_s21 = smov (!%p158_p2), 96  }
   0x6   : > { %161 = sbr.rel (%p158_p2) target bundleno = 1176 (0x498), region = 32  ;;  %s876_s22 = smov (!%p158_p2), 64  }
   0x7   : > { %s878_s26 = smov (!%p158_p2), 32  }
   0xb   : > { %s1096_s13 = smov (!%p191_p3, %s779_s13), 1  ;;  %vm230_vm0 = vcmask 261120   ;;  %vm261_vm1 = vcmask 154624   ;;  %vm268_vm2 = vcmask 149504   ;;  %vm304_vm3 = vcmask 1040384  }
   0xc   : > { %s907_s14 = smul.u32 24, %s1096_s13  ;;  %vm305_vm4 = vcmask 1041408   ;;  %v877_v37 = vmov 65535   ;;  %vm689_vm5 = vcmask 523264   ;;  %vm693_vm6 = vcmask 785408  }
   0xd   : > { %v306_v38 = vsel %vm304_vm3, 4294967295, %v877_v37 }
   0xe   : > { %s200_s17 = scalar_lea.vmem %s1092_s1, %s907_s14  ;;  %s195_s20 = scalar_lea.vmem %s1091_s0, %s907_s14  ;;  %v956_v41 = vsel %vm305_vm4, %v306_v38, 0 }
   0xf   : > { %v220_v0 = vld [vmem:[%s200_s17 + $0x10] sm:$0x7]  ;;  %v218_v2 = vld [vmem:[%s200_s17] sm:$0xff]  ;;  %v219_v3 = vld [vmem:[%s200_s17 + $0x8] sm:$0xff]  ;;  %s205_s25 = scalar_lea.vmem %s1093_s2, %s907_s14  ;;  %s210_s29 = scalar_lea.vmem %s1094_s3, %s907_s14 }
  0x10   : > { %v913_v1 = vpack.c.bf16 %v220_v0, %v220_v0  ;;  %v917_v5 = vpack.c.bf16 %v219_v3, %v218_v2  ;;  %v212_v6 = vld [vmem:[%s195_s20] sm:$0xff]  ;;  %v213_v7 = vld [vmem:[%s195_s20 + $0x8] sm:$0xff]  ;;  %v214_v12 = vld [vmem:[%s195_s20 + $0x10] sm:$0x7] }
  0x11   : > { %v215_v9 = vmul.f32 0.17677669, %v212_v6  ;;  %v216_v10 = vmul.f32 0.17677669, %v213_v7  ;;  %v217_v13 = vmul.f32 0.17677669, %v214_v12 }
  0x12   : > { %v241_v4 = vsel %vm230_vm0, %v913_v1, 0  ;;  %v238_v8 = vsel %vm230_vm0, %v917_v5, 0  ;;  %337 = vrot.lane.b32.xlu2 %v917_v5, %s875_s21  ;;  %v223_v35 = vld [vmem:[%s205_s25 + $0x10] sm:$0x7]  ;;  %v221_v42 = vld [vmem:[%s205_s25] sm:$0xff]  ;;  %v222_v43 = vld [vmem:[%s205_s25 + $0x8] sm:$0xff] }
  0x13   : > { %249 = vmatpush.bf16.xpose.msra.mxu0 %v241_v4  ;;  %v925_v11 = vpack.c.bf16 %v216_v10, %v215_v9  ;;  %v929_v14 = vpack.c.bf16 %v217_v13, %v217_v13  ;;  %v954_v36 = vpack.c.bf16 %v223_v35, %v223_v35  ;;  %v961_v46 = vpack.c.bf16 %v222_v43, %v221_v42 }
  0x15   : > { %v309_v45 = vand.u32 %v956_v41, %v954_v36 }
  0x17   : > { %317 = vmatpush.bf16.msra.mxu1 %v309_v45 }
  0x1b   : > { %250 = vmatpush.bf16.xpose.msra.mxu0 %v238_v8  ;;  %318 = vmatpush.bf16.msra.mxu1 %v961_v46 }
  0x22   : > { %788 = vmatmul.msk.bf16.vlgmr.msra.gmra.mxu0 %vm230_vm0, %v925_v11 }
  0x32   : > { %789 = vmatmul.msk.bf16.gmra.mxu0 %vm230_vm0, %v929_v14 }
  0x6c   : > { %v338_v52 = vpop.permute.xlu2 %337 }
  0x6d   : > { %v348_v53 = vsel %vm230_vm0, %v338_v52, 0 }
  0x9f   : > { %v252_v15 = vpop.f32.mrf.mxu0 }
  0xa0   : > { %v262_v16 = vsel %vm261_vm1, %v252_v15, -inf }
  0xa1   : > { %263 = vmax.xlane.f32.xlu0 %v262_v16 }
  0xa7   : > { %v254_v17 = vpop.f32.mrf.mxu0 }
  0xa8   : > { %v265_v18 = vsel %vm261_vm1, %v254_v17, -inf }
  0xa9   : > { %266 = vmax.xlane.f32.xlu0 %v265_v18 }
  0xaf   : > { %v257_v19 = vpop.f32.mrf.mxu0 }
  0xb0   : > { %v269_v20 = vsel %vm268_vm2, %v257_v19, -inf }
  0xb1   : > { %270 = vmax.xlane.f32.xlu1 %v269_v20 }
  0xb7   : > { %v259_v21 = vpop.f32.mrf.mxu0 }
  0xbd   : > { %331 = vrot.lane.b32.xlu0 %v925_v11, %s875_s21 }
  0xc5   : > { %446 = vrot.lane.b32.xlu0 %v913_v1, %s876_s22 }
  0xca   : > { %339 = vrot.lane.b32.xlu1 %v913_v1, %s875_s21 }
  0xcd   : > { %333 = vrot.lane.b32.xlu0 %v929_v14, %s875_s21 }
  0xd5   : > { %444 = vrot.lane.b32.xlu0 %v917_v5, %s876_s22 }
 0x114   : > { %v264_v22 = vpop.xlane.xlu0 %263 }
 0x115   : > { %v272_v23 = vsub.f32 %v252_v15, %v264_v22 }
 0x117   : > { %v275_v24 = vmul.f32 1.442695, %v272_v23 }
 0x119   : > { %819 = vpow2.f32 %v275_v24 }
 0x11c   : > { %v267_v25 = vpop.xlane.xlu0 %266 }
 0x11d   : > { %v273_v26 = vsub.f32 %v254_v17, %v267_v25 }
 0x11f   : > { %v820_v27 = vpop.eup %819  ;;  %v277_v28 = vmul.f32 1.442695, %v273_v26 }
 0x120   : > { %v281_v29 = vsel %vm261_vm1, %v820_v27, 0.0 }
 0x121   : > { %821 = vpow2.f32 %v277_v28  ;;  %282 = vadd.xlane.f32.xlu2 %v281_v29 }
 0x124   : > { %v271_v30 = vpop.xlane.xlu1 %270 }
 0x125   : > { %v274_v31 = vsub.f32 %v257_v19, %v271_v30 }
 0x127   : > { %v822_v32 = vpop.eup %821  ;;  %v279_v33 = vmul.f32 1.442695, %v274_v31 }
 0x128   : > { %v284_v34 = vsel %vm261_vm1, %v822_v32, 0.0 }
 0x129   : > { %823 = vpow2.f32 %v279_v33  ;;  %285 = vadd.xlane.f32.xlu0 %v284_v34 }
 0x12f   : > { %v824_v39 = vpop.eup %823  ;;  %v332_v40 = vpop.permute.xlu0 %331 }
 0x130   : > { %v287_v44 = vsel %vm268_vm2, %v824_v39, 0.0 }
 0x131   : > { %288 = vadd.xlane.f32.xlu1 %v287_v44 }
 0x137   : > { %v447_v47 = vpop.permute.xlu0 %446 }
 0x138   : > { %v458_v50 = vsel %vm230_vm0, %v447_v47, 0 }
 0x139   : > { %551 = vrot.lane.b32.xlu2 %v913_v1, %s878_s26  ;;  %466 = vmatpush.bf16.xpose.msrb.mxu1 %v458_v50 }
 0x13c   : > { %v340_v48 = vpop.permute.xlu1 %339 }
 0x13d   : > { %v351_v49 = vsel %vm230_vm0, %v340_v48, 0  ;;  %549 = vrot.lane.b32.xlu0 %v917_v5, %s878_s26 }
 0x13e   : > { %359 = vmatpush.bf16.xpose.msra.mxu2 %v351_v49 }
 0x13f   : > { %v334_v51 = vpop.permute.xlu0 %333 }
 0x141   : > { %440 = vrot.lane.b32.xlu2 %v925_v11, %s876_s22 }
 0x145   : > { %442 = vrot.lane.b32.xlu0 %v929_v14, %s876_s22 }
 0x146   : > { %360 = vmatpush.bf16.xpose.msra.mxu2 %v348_v53 }
 0x147   : > { %v445_v54 = vpop.permute.xlu0 %444 }
 0x148   : > { %v455_v55 = vsel %vm230_vm0, %v445_v54, 0 }
 0x149   : > { %547 = vrot.lane.b32.xlu2 %v929_v14, %s878_s26  ;;  %467 = vmatpush.bf16.xpose.msrb.mxu1 %v455_v55 }
 0x14a   : > { %545 = vrot.lane.b32.xlu1 %v925_v11, %s878_s26 }
 0x14d   : > { %792 = vmatmul.msk.bf16.vlgmr.msra.gmra.mxu2 %vm230_vm0, %v332_v40 }
 0x15d   : > { %793 = vmatmul.msk.bf16.gmra.mxu2 %vm230_vm0, %v334_v51 }
 0x194   : > { %v283_v56 = vpop.xlane.xlu2 %282 }
 0x195   : > { %825 = vrcp.f32 %v283_v56 }
 0x19b   : > { %v826_v60 = vpop.eup %825 }
 0x19c   : > { %v286_v57 = vpop.xlane.xlu0 %285  ;;  %v552_v58 = vpop.permute.xlu2 %551  ;;  %v293_v62 = vmul.f32 %v826_v60, %v820_v27 }
 0x19d   : > { %827 = vrcp.f32 %v286_v57  ;;  %v563_v59 = vsel %vm230_vm0, %v552_v58, 0 }
 0x19e   : > { %571 = vmatpush.bf16.xpose.msrb.mxu0 %v563_v59 }
 0x1a3   : > { %v828_v61 = vpop.eup %827 }
 0x1a4   : > { %v294_v63 = vmul.f32 %v828_v61, %v822_v32  ;;  %v289_v0 = vpop.xlane.xlu1 %288  ;;  %v441_v8 = vpop.permute.xlu2 %440 }
 0x1a5   : > { %829 = vrcp.f32 %v289_v0 }
 0x1a6   : > { %v296_v1 = vpack.c.bf16 %v294_v63, %v293_v62 }
 0x1a8   : > { %790 = vmatmul.msk.bf16.vlgmr.msra.gmra.mxu1 %vm261_vm1, %v296_v1 }
 0x1ab   : > { %v830_v2 = vpop.eup %829 }
 0x1ac   : > { %v295_v5 = vmul.f32 %v830_v2, %v824_v39  ;;  %v548_v9 = vpop.permute.xlu2 %547 }
 0x1ae   : > { %v297_v6 = vpack.c.bf16 %v295_v5, %v295_v5 }
 0x1af   : > { %v550_v3 = vpop.permute.xlu0 %549 }
 0x1b0   : > { %v560_v4 = vsel %vm230_vm0, %v550_v3, 0 }
 0x1b1   : > { %572 = vmatpush.bf16.xpose.msrb.mxu0 %v560_v4 }
 0x1b7   : > { %v443_v17 = vpop.permute.xlu0 %442 }
 0x1b8   : > { %791 = vmatmul.msk.bf16.gmra.mxu1 %vm261_vm1, %v297_v6 }
 0x1bc   : > { %v546_v7 = vpop.permute.xlu1 %545 }
 0x1bd   : > { %800 = vmatmul.msk.bf16.vlgmr.msrb.gmra.mxu0 %vm230_vm0, %v546_v7 }
 0x1c8   : > { %796 = vmatmul.msk.bf16.vlgmr.msrb.gmra.mxu1 %vm230_vm0, %v441_v8 }
 0x1cd   : > { %801 = vmatmul.msk.bf16.gmra.mxu0 %vm230_vm0, %v548_v9 }
 0x1d0   : > { %v362_v10 = vpop.f32.mrf.mxu2 }
 0x1d1   : > { %v371_v11 = vsel %vm261_vm1, %v362_v10, -inf }
 0x1d2   : > { %372 = vmax.xlane.f32.xlu0 %v371_v11 }
 0x1d8   : > { %v364_v12 = vpop.f32.mrf.mxu2  ;;  %797 = vmatmul.msk.bf16.gmra.mxu1 %vm230_vm0, %v443_v17 }
 0x1d9   : > { %v374_v13 = vsel %vm261_vm1, %v364_v12, -inf }
 0x1da   : > { %375 = vmax.xlane.f32.xlu2 %v374_v13 }
 0x1e0   : > { %v367_v14 = vpop.f32.mrf.mxu2 }
 0x1e1   : > { %v377_v15 = vsel %vm268_vm2, %v367_v14, -inf }
 0x1e2   : > { %378 = vmax.xlane.f32.xlu1 %v377_v15 }
 0x1e8   : > { %v369_v16 = vpop.f32.mrf.mxu2 }
 0x225   : > { %v993_v18 = vpop.f32.mrf.mxu1 }
 0x22d   : > { %v995_v19 = vpop.f32.mrf.mxu1 }
 0x235   : > { %v997_v20 = vpop.f32.mrf.mxu1 }
 0x23a   : > { %v574_v21 = vpop.f32.mrf.mxu0 }
 0x23b   : > { %v583_v22 = vsel %vm261_vm1, %v574_v21, -inf }
 0x23c   : > { %584 = vmax.xlane.f32.xlu0 %v583_v22 }
 0x23d   : > { %v327_v23 = vpop.f32.mrf.mxu1 }
 0x242   : > { %v576_v24 = vpop.f32.mrf.mxu0 }
 0x243   : > { %v586_v25 = vsel %vm261_vm1, %v576_v24, -inf }
 0x244   : > { %587 = vmax.xlane.f32.xlu2 %v586_v25 }
 0x245   : > { %v373_v26 = vpop.xlane.xlu0 %372  ;;  %v1001_v30 = vpop.f32.mrf.mxu1 }
 0x246   : > { %v380_v27 = vsub.f32 %v362_v10, %v373_v26  ;;  %v478_v48 = vsel %vm261_vm1, %v1001_v30, -inf }
 0x248   : > { %v383_v28 = vmul.f32 1.442695, %v380_v27 }
 0x24a   : > { %831 = vpow2.f32 %v383_v28  ;;  %v579_v29 = vpop.f32.mrf.mxu0 }
 0x24b   : > { %v589_v31 = vsel %vm268_vm2, %v579_v29, -inf }
 0x24c   : > { %590 = vmax.xlane.f32.xlu1 %v589_v31 }
 0x24d   : > { %v376_v32 = vpop.xlane.xlu2 %375  ;;  %v471_v39 = vpop.f32.mrf.mxu1 }
 0x24e   : > { %v381_v33 = vsub.f32 %v364_v12, %v376_v32  ;;  %v481_v42 = vsel %vm261_vm1, %v471_v39, -inf }
 0x250   : > { %v1004_v34 = vpop.eup %831  ;;  %v385_v35 = vmul.f32 1.442695, %v381_v33 }
 0x251   : > { %v389_v37 = vsel %vm261_vm1, %v1004_v34, 0.0 }
 0x252   : > { %833 = vpow2.f32 %v385_v35  ;;  %390 = vadd.xlane.f32.xlu2 %v389_v37  ;;  %v581_v38 = vpop.f32.mrf.mxu0 }
 0x255   : > { %v379_v40 = vpop.xlane.xlu1 %378  ;;  %v1022_v51 = vpop.f32.mrf.mxu1 }
 0x256   : > { %v382_v44 = vsub.f32 %v367_v14, %v379_v40  ;;  %v484_v53 = vsel %vm268_vm2, %v1022_v51, -inf }
 0x258   : > { %v834_v43 = vpop.eup %833  ;;  %v387_v47 = vmul.f32 1.442695, %v382_v44 }
 0x259   : > { %v392_v45 = vsel %vm261_vm1, %v834_v43, 0.0 }
 0x25a   : > { %393 = vadd.xlane.f32.xlu0 %v392_v45  ;;  %482 = vmax.xlane.f32.xlu2 %v481_v42  ;;  %835 = vpow2.f32 %v387_v47 }
 0x25d   : > { %v476_v52 = vpop.f32.mrf.mxu1 }
 0x260   : > { %v1014_v49 = vpop.eup %835 }
 0x261   : > { %v395_v50 = vsel %vm268_vm2, %v1014_v49, 0.0 }
 0x262   : > { %479 = vmax.xlane.f32.xlu0 %v478_v48 }
 0x265   : > { %410 = vrot.lane.b32.xlu1 %v954_v36, %s875_s21 }
 0x26a   : > { %396 = vadd.xlane.f32.xlu0 %v395_v50 }
 0x272   : > { %408 = vrot.lane.b32.xlu2 %v961_v46, %s875_s21 }
 0x27e   : > { %515 = vrot.lane.b32.xlu0 %v954_v36, %s876_s22 }
 0x286   : > { %620 = vrot.lane.b32.xlu0 %v954_v36, %s878_s26 }
 0x2af   : > { %v585_v54 = vpop.xlane.xlu0 %584 }
 0x2b0   : > { %v592_v55 = vsub.f32 %v574_v21, %v585_v54  ;;  %485 = vmax.xlane.f32.xlu0 %v484_v53 }
 0x2b2   : > { %v595_v56 = vmul.f32 1.442695, %v592_v55 }
 0x2b4   : > { %837 = vpow2.f32 %v595_v56 }
 0x2b7   : > { %v588_v57 = vpop.xlane.xlu2 %587 }
 0x2b8   : > { %v593_v58 = vsub.f32 %v576_v24, %v588_v57 }
 0x2ba   : > { %v1028_v59 = vpop.eup %837  ;;  %v597_v60 = vmul.f32 1.442695, %v593_v58 }
 0x2bb   : > { %v601_v61 = vsel %vm261_vm1, %v1028_v59, 0.0 }
 0x2bc   : > { %839 = vpow2.f32 %v597_v60  ;;  %602 = vadd.xlane.f32.xlu1 %v601_v61 }
 0x2bf   : > { %v591_v36 = vpop.xlane.xlu1 %590 }
 0x2c0   : > { %v594_v62 = vsub.f32 %v579_v29, %v591_v36 }
 0x2c2   : > { %v1032_v63 = vpop.eup %839  ;;  %v599_v0 = vmul.f32 1.442695, %v594_v62 }
 0x2c3   : > { %v604_v1 = vsel %vm261_vm1, %v1032_v63, 0.0 }
 0x2c4   : > { %841 = vpow2.f32 %v599_v0  ;;  %605 = vadd.xlane.f32.xlu2 %v604_v1 }
 0x2c5   : > { %v391_v2 = vpop.xlane.xlu2 %390 }
 0x2ca   : > { %v1036_v3 = vpop.eup %841 }
 0x2cb   : > { %v607_v4 = vsel %vm268_vm2, %v1036_v3, 0.0 }
 0x2cc   : > { %608 = vadd.xlane.f32.xlu2 %v607_v4 }
 0x2cd   : > { %v394_v5 = vpop.xlane.xlu0 %393  ;;  %v483_v6 = vpop.xlane.xlu2 %482 }
 0x2ce   : > { %843 = vrcp.f32 %v394_v5  ;;  %v488_v11 = vsub.f32 %v471_v39, %v483_v6 }
 0x2cf   : > { %845 = vrcp.f32 %v391_v2 }
 0x2d0   : > { %v492_v17 = vmul.f32 1.442695, %v488_v11 }
 0x2d4   : > { %v844_v10 = vpop.eup %843 }
 0x2d5   : > { %v480_v7 = vpop.xlane.xlu0 %479  ;;  %618 = vrot.lane.b32.xlu1 %v961_v46, %s878_s26  ;;  %v846_v14 = vpop.eup %845  ;;  %v402_v16 = vmul.f32 %v844_v10, %v834_v43 }
 0x2d6   : > { %v487_v8 = vsub.f32 %v1001_v30, %v480_v7  ;;  %v409_v15 = vpop.permute.xlu2 %408  ;;  %v401_v21 = vmul.f32 %v846_v14, %v1004_v34 }
 0x2d7   : > { %v411_v9 = vpop.permute.xlu1 %410 }
 0x2d8   : > { %v490_v12 = vmul.f32 1.442695, %v487_v8  ;;  %v420_v13 = vand.u32 %v411_v9, %v956_v41  ;;  %v404_v23 = vpack.c.bf16 %v402_v16, %v401_v21 }
 0x2da   : > { %847 = vpow2.f32 %v490_v12  ;;  %428 = vmatpush.bf16.msra.mxu3 %v420_v13 }
 0x2db   : > { %849 = vpow2.f32 %v492_v17 }
 0x2dd   : > { %v397_v22 = vpop.xlane.xlu0 %396 }
 0x2de   : > { %429 = vmatpush.bf16.msra.mxu3 %v409_v15  ;;  %851 = vrcp.f32 %v397_v22 }
 0x2e0   : > { %v848_v24 = vpop.eup %847 }
 0x2e1   : > { %794 = vmatmul.msk.bf16.vlgmr.msra.gmra.mxu3 %vm261_vm1, %v404_v23  ;;  %v496_v25 = vsel %vm261_vm1, %v848_v24, 0.0  ;;  %v850_v26 = vpop.eup %849 }
 0x2e2   : > { %497 = vadd.xlane.f32.xlu0 %v496_v25  ;;  %v499_v28 = vsel %vm261_vm1, %v850_v26, 0.0 }
 0x2e4   : > { %v852_v27 = vpop.eup %851 }
 0x2e5   : > { %v403_v29 = vmul.f32 %v852_v27, %v1014_v49 }
 0x2e7   : > { %v405_v30 = vpack.c.bf16 %v403_v29, %v403_v29 }
 0x2ea   : > { %500 = vadd.xlane.f32.xlu0 %v499_v28 }
 0x2f0   : > { %v516_v31 = vpop.permute.xlu0 %515 }
 0x2f1   : > { %v525_v32 = vand.u32 %v516_v31, %v956_v41  ;;  %795 = vmatmul.msk.bf16.gmra.mxu3 %vm261_vm1, %v405_v30 }
 0x2f3   : > { %533 = vmatpush.bf16.msrb.mxu3 %v525_v32 }
 0x2f8   : > { %v621_v33 = vpop.permute.xlu0 %620 }
 0x2f9   : > { %v630_v34 = vand.u32 %v621_v33, %v956_v41 }
 0x2fb   : > { %638 = vmatpush.bf16.msrb.mxu2 %v630_v34 }
 0x2fe   : > { %513 = vrot.lane.b32.xlu0 %v961_v46, %s876_s22 }
 0x323   : > { %v486_v35 = vpop.xlane.xlu0 %485 }
 0x324   : > { %v489_v37 = vsub.f32 %v1022_v51, %v486_v35 }
 0x326   : > { %v494_v38 = vmul.f32 1.442695, %v489_v37 }
 0x328   : > { %853 = vpow2.f32 %v494_v38 }
 0x32e   : > { %v854_v39 = vpop.eup %853 }
 0x32f   : > { %v502_v40 = vsel %vm268_vm2, %v854_v39, 0.0  ;;  %v603_v43 = vpop.xlane.xlu1 %602 }
 0x330   : > { %503 = vadd.xlane.f32.xlu0 %v502_v40 }
 0x337   : > { %v606_v42 = vpop.xlane.xlu2 %605 }
 0x338   : > { %855 = vrcp.f32 %v606_v42 }
 0x339   : > { %857 = vrcp.f32 %v603_v43 }
 0x33e   : > { %v856_v44 = vpop.eup %855 }
 0x33f   : > { %v858_v45 = vpop.eup %857  ;;  %v614_v41 = vmul.f32 %v856_v44, %v1032_v63  ;;  %v609_v48 = vpop.xlane.xlu2 %608 }
 0x340   : > { %v613_v47 = vmul.f32 %v858_v45, %v1028_v59  ;;  %859 = vrcp.f32 %v609_v48 }
 0x342   : > { %v616_v49 = vpack.c.bf16 %v614_v41, %v613_v47 }
 0x346   : > { %v860_v50 = vpop.eup %859 }
 0x347   : > { %v619_v46 = vpop.permute.xlu1 %618  ;;  %v615_v51 = vmul.f32 %v860_v50, %v1036_v3 }
 0x348   : > { %639 = vmatpush.bf16.msrb.mxu2 %v619_v46 }
 0x349   : > { %v617_v53 = vpack.c.bf16 %v615_v51, %v615_v51 }
 0x34b   : > { %802 = vmatmul.msk.bf16.vlgmr.msrb.gmra.mxu2 %vm261_vm1, %v616_v49 }
 0x355   : > { %v498_v52 = vpop.xlane.xlu0 %497 }
 0x35b   : > { %803 = vmatmul.msk.bf16.gmra.mxu2 %vm261_vm1, %v617_v53 }
 0x35d   : > { %v501_v54 = vpop.xlane.xlu0 %500 }
 0x35e   : > { %861 = vrcp.f32 %v501_v54 }
 0x35f   : > { %863 = vrcp.f32 %v498_v52 }
 0x364   : > { %v431_v55 = vpop.f32.mrf.mxu3  ;;  %v862_v56 = vpop.eup %861 }
 0x365   : > { %653 = vrot.lane.b32.xlu2 %v431_v55, %s878_s26  ;;  %v864_v58 = vpop.eup %863  ;;  %v509_v59 = vmul.f32 %v862_v56, %v850_v26 }
 0x366   : > { %v508_v60 = vmul.f32 %v864_v58, %v848_v24 }
 0x368   : > { %v511_v36 = vpack.c.bf16 %v509_v59, %v508_v60 }
 0x36c   : > { %v433_v57 = vpop.f32.mrf.mxu3 }
 0x36d   : > { %655 = vrot.lane.b32.xlu1 %v433_v57, %s878_s26 }
 0x370   : > { %v514_v61 = vpop.permute.xlu0 %513 }
 0x371   : > { %534 = vmatpush.bf16.msrb.mxu3 %v514_v61 }
 0x374   : > { %v436_v62 = vpop.f32.mrf.mxu3  ;;  %798 = vmatmul.msk.bf16.vlgmr.msrb.gmra.mxu3 %vm261_vm1, %v511_v36 }
 0x375   : > { %657 = vrot.lane.b32.xlu1 %v436_v62, %s878_s26 }
 0x37c   : > { %v438_v63 = vpop.f32.mrf.mxu3 }
 0x3a3   : > { %v504_v0 = vpop.xlane.xlu0 %503 }
 0x3a4   : > { %865 = vrcp.f32 %v504_v0 }
 0x3aa   : > { %v866_v1 = vpop.eup %865 }
 0x3ab   : > { %v510_v2 = vmul.f32 %v866_v1, %v854_v39 }
 0x3ad   : > { %v512_v3 = vpack.c.bf16 %v510_v2, %v510_v2 }
 0x3af   : > { %799 = vmatmul.msk.bf16.gmra.mxu3 %vm261_vm1, %v512_v3 }
 0x3bf   : > { %v654_v12 = vpop.permute.xlu2 %653 }
 0x3c0   : > { %v686_v13 = vsel %vm230_vm0, %v993_v18, %v654_v12 }
 0x3ce   : > { %v641_v4 = vpop.f32.mrf.mxu2 }
 0x3cf   : > { %677 = vrot.lane.b32.xlu0 %v641_v4, %s875_s21 }
 0x3d6   : > { %v643_v5 = vpop.f32.mrf.mxu2 }
 0x3de   : > { %v646_v6 = vpop.f32.mrf.mxu2 }
 0x3df   : > { %v656_v21 = vpop.permute.xlu1 %655 }
 0x3e0   : > { %v687_v24 = vsel %vm230_vm0, %v995_v19, %v656_v21 }
 0x3e6   : > { %v648_v7 = vpop.f32.mrf.mxu2 }
 0x3e7   : > { %v658_v22 = vpop.permute.xlu1 %657 }
 0x3e8   : > { %v688_v28 = vsel %vm230_vm0, %v997_v20, %v658_v22 }
 0x3f7   : > { %v536_v8 = vpop.f32.mrf.mxu3 }
 0x3f8   : > { %665 = vrot.lane.b32.xlu2 %v536_v8, %s876_s22 }
 0x3ff   : > { %v538_v9 = vpop.f32.mrf.mxu3 }
 0x400   : > { %667 = vrot.lane.b32.xlu1 %v538_v9, %s876_s22 }
 0x408   : > { %679 = vrot.lane.b32.xlu1 %v643_v5, %s875_s21 }
 0x432   : > { %v541_v10 = vpop.f32.mrf.mxu3 }
 0x433   : > { %669 = vrot.lane.b32.xlu2 %v541_v10, %s876_s22 }
 0x43a   : > { %v543_v11 = vpop.f32.mrf.mxu3 }
 0x43b   : > { %681 = vrot.lane.b32.xlu2 %v646_v6, %s875_s21 }
 0x441   : > { %v678_v15 = vpop.permute.xlu0 %677 }
 0x452   : > { %v666_v14 = vpop.permute.xlu2 %665 }
 0x453   : > { %v690_v16 = vsel %vm689_vm5, %v686_v13, %v666_v14 }
 0x454   : > { %v694_v17 = vsel %vm693_vm6, %v690_v16, %v678_v15 }
 0x455   : > { %697 = vst [vmem:[%s210_s29] sm:$0xff] %v694_v17 }
 0x472   : > { %v668_v23 = vpop.permute.xlu1 %667 }
 0x473   : > { %v691_v25 = vsel %vm689_vm5, %v687_v24, %v668_v23 }
 0x47a   : > { %v680_v18 = vpop.permute.xlu1 %679 }
 0x47b   : > { %v695_v26 = vsel %vm693_vm6, %v691_v25, %v680_v18 }
 0x47c   : > { %698 = vst [vmem:[%s210_s29 + $0x8] sm:$0xff] %v695_v26 }
 0x48d   : > { %v670_v27 = vpop.permute.xlu2 %669 }
 0x48e   : > { %v692_v29 = vsel %vm689_vm5, %v688_v28, %v670_v27 }
 0x495   : > { %v682_v30 = vpop.permute.xlu2 %681 }
 0x496   : > { %v696_v31 = vsel %vm693_vm6, %v692_v29, %v682_v30 }
 0x497   : > { %699 = vst [vmem:[%s210_s29 + $0x10] sm:$0x7] %v696_v31 }
 0x498 PF: > { %s13_s12 = sadd.s32 1, %s873_s12  }
 0x499   : > { %p10_p4 = scmp.ge.s32.totalorder %s13_s12, 4  }
 0x49b   :  { %12 = sbr.rel (!%p10_p4) target bundleno = 1 (0x1), region = 68 }

// kernel: _lambda_.24
= control target key start
LH: loop header
LB: loop body
LE: loop exit
PB: predicated region body
PF: predicated region fallthrough
CT: control target
= control target key end

     0   :  { %v768_v5 = vmov 128.0   ;;  %s1334_s0 = inlined_call_operand.vmem [shape: f32[38,128], index: 0, kind: input, shape index: {}]   ;;  %s1335_s3 = inlined_call_operand.vmem [shape: f32[1,128], index: 3, kind: input, shape index: {}]   ;;  %s1336_s4 = inlined_call_operand.vmem [shape: f32[1,128], index: 4, kind: input, shape index: {}]   ;;  %s1337_s1 = inlined_call_operand.vmem [shape: f32[128,256], index: 1, kind: input, shape index: {}]   ;;  %s1338_s2 = inlined_call_operand.vmem [shape: f32[1,256], index: 2, kind: input, shape index: {}]   ;;  %s1339_s5 = inlined_call_operand.vmem [shape: f32[38,256], index: 5, kind: output, shape index: {}]  }
   0x1   :  { %v22_v0 = vld [vmem:[%s1334_s0 + $0x10] sm:$0xff]  ;;  %v20_v1 = vld [vmem:[%s1334_s0] sm:$0xff]  ;;  %v23_v3 = vld [vmem:[%s1334_s0 + $0x18] sm:$0xff]  ;;  %736 = vrcp.f32 %v768_v5 }
   0x2   :  { %31 = vadd.xlane.f32.xlu0 %v22_v0  ;;  %27 = vadd.xlane.f32.xlu1 %v20_v1  ;;  %v24_v2 = vld [vmem:[%s1334_s0 + $0x20] sm:$0xff]  ;;  %v21_v4 = vld [vmem:[%s1334_s0 + $0x8] sm:$0xff]  ;;  %v183_v33 = vld [vmem:[%s1337_s1 + $0xf0] sm:$0xff] }
   0x3   :  { %35 = vadd.xlane.f32.xlu2 %v24_v2  ;;  %v181_v32 = vld [vmem:[%s1337_s1 + $0xe0] sm:$0xff]  ;;  %v182_v34 = vld [vmem:[%s1337_s1 + $0xe8] sm:$0xff]  ;;  %v184_v36 = vld [vmem:[%s1337_s1 + $0xf8] sm:$0xff] }
   0x4   :  { %v199_v35 = vpack.c.bf16 %v183_v33, %v181_v32  ;;  %v200_v37 = vpack.c.bf16 %v184_v36, %v182_v34  ;;  %v177_v38 = vld [vmem:[%s1337_s1 + $0xc0] sm:$0xff]  ;;  %v179_v39 = vld [vmem:[%s1337_s1 + $0xd0] sm:$0xff]  ;;  %v178_v40 = vld [vmem:[%s1337_s1 + $0xc8] sm:$0xff] }
   0x5   :  { %v197_v41 = vpack.c.bf16 %v179_v39, %v177_v38  ;;  %v180_v42 = vld [vmem:[%s1337_s1 + $0xd8] sm:$0xff]  ;;  %v173_v44 = vld [vmem:[%s1337_s1 + $0xa0] sm:$0xff]  ;;  %v175_v45 = vld [vmem:[%s1337_s1 + $0xb0] sm:$0xff] }
   0x6   :  { %207 = vmatpush.bf16.msra.mxu0 %v199_v35  ;;  %717 = vmatpush.bf16.msra.mxu2 %v199_v35  ;;  %v198_v43 = vpack.c.bf16 %v180_v42, %v178_v40  ;;  %v174_v46 = vld [vmem:[%s1337_s1 + $0xa8] sm:$0xff]  ;;  %v195_v47 = vpack.c.bf16 %v175_v45, %v173_v44  ;;  %v176_v48 = vld [vmem:[%s1337_s1 + $0xb8] sm:$0xff]  ;;  %v169_v50 = vld [vmem:[%s1337_s1 + $0x80] sm:$0xff] }
   0x7   :  { %v737_v6 = vpop.eup %736  ;;  %230 = vmatpush.bf16.msra.mxu1 %v200_v37  ;;  %725 = vmatpush.bf16.msra.mxu3 %v200_v37  ;;  %v196_v49 = vpack.c.bf16 %v176_v48, %v174_v46  ;;  %v171_v51 = vld [vmem:[%s1337_s1 + $0x90] sm:$0xff]  ;;  %v170_v52 = vld [vmem:[%s1337_s1 + $0x88] sm:$0xff]  ;;  %v172_v54 = vld [vmem:[%s1337_s1 + $0x98] sm:$0xff] }
   0x8   :  { %v38_v7 = vmul.f32 128.0, %v737_v6  ;;  %vm42_vm0 = vweird.f32 %v737_v6  ;;  %v193_v53 = vpack.c.bf16 %v171_v51, %v169_v50  ;;  %v194_v55 = vpack.c.bf16 %v172_v54, %v170_v52  ;;  %v165_v56 = vld [vmem:[%s1337_s1 + $0x60] sm:$0xff]  ;;  %v167_v57 = vld [vmem:[%s1337_s1 + $0x70] sm:$0xff]  ;;  %v166_v58 = vld [vmem:[%s1337_s1 + $0x68] sm:$0xff] }
   0x9   :  { %v191_v59 = vpack.c.bf16 %v167_v57, %v165_v56  ;;  %v168_v60 = vld [vmem:[%s1337_s1 + $0x78] sm:$0xff]  ;;  %v161_v62 = vld [vmem:[%s1337_s1 + $0x40] sm:$0xff]  ;;  %v163_v63 = vld [vmem:[%s1337_s1 + $0x50] sm:$0xff] }
   0xa   :  { %33 = vadd.xlane.f32.xlu0 %v23_v3  ;;  %29 = vadd.xlane.f32.xlu1 %v21_v4  ;;  %v39_v8 = vsub.f32 1.0, %v38_v7  ;;  %v192_v61 = vpack.c.bf16 %v168_v60, %v166_v58  ;;  %v159_v5 = vld [vmem:[%s1337_s1 + $0x30] sm:$0xff] }
   0xb   :  { %208 = vmatpush.bf16.msra.mxu0 %v197_v41  ;;  %718 = vmatpush.bf16.msra.mxu2 %v197_v41 }
   0xc   :  { %v40_v9 = vmul.f32 %v737_v6, %v39_v8  ;;  %231 = vmatpush.bf16.msra.mxu1 %v198_v43  ;;  %726 = vmatpush.bf16.msra.mxu3 %v198_v43  ;;  %v160_v8 = vld [vmem:[%s1337_s1 + $0x38] sm:$0xff] }
   0xe   :  { %v41_v10 = vadd.f32 %v737_v6, %v40_v9 }
   0xf   :  { %209 = vmatpush.bf16.msra.mxu0 %v195_v47  ;;  %719 = vmatpush.bf16.msra.mxu2 %v195_v47 }
  0x10   :  { %v814_v11 = vsel %vm42_vm0, %v737_v6, %v41_v10  ;;  %232 = vmatpush.bf16.msra.mxu1 %v196_v49  ;;  %727 = vmatpush.bf16.msra.mxu3 %v196_v49  ;;  %v158_v6 = vld [vmem:[%s1337_s1 + $0x28] sm:$0xff] }
  0x13   :  { %210 = vmatpush.bf16.msra.mxu0 %v193_v53  ;;  %720 = vmatpush.bf16.msra.mxu2 %v193_v53 }
  0x14   :  { %233 = vmatpush.bf16.msra.mxu1 %v194_v55  ;;  %728 = vmatpush.bf16.msra.mxu3 %v194_v55 }
  0x17   :  { %211 = vmatpush.bf16.msra.mxu0 %v191_v59  ;;  %721 = vmatpush.bf16.msra.mxu2 %v191_v59 }
  0x18   :  { %234 = vmatpush.bf16.msra.mxu1 %v192_v61  ;;  %729 = vmatpush.bf16.msra.mxu3 %v192_v61 }
  0x75   :  { %v32_v12 = vpop.xlane.xlu0 %31  ;;  %v28_v13 = vpop.xlane.xlu1 %27 }
  0x76   :  { %v46_v14 = vmul.f32 %v814_v11, %v32_v12  ;;  %v44_v15 = vmul.f32 %v814_v11, %v28_v13  ;;  %v36_v20 = vpop.xlane.xlu2 %35  ;;  %v188_v12 = vpack.c.bf16 %v160_v8, %v158_v6 }
  0x77   :  { %v48_v27 = vmul.f32 %v814_v11, %v36_v20 }
  0x78   :  { %v818_v16 = vsub.f32 %v22_v0, %v46_v14  ;;  %v820_v17 = vsub.f32 %v20_v1, %v44_v15  ;;  %v162_v0 = vld [vmem:[%s1337_s1 + $0x48] sm:$0xff]  ;;  %v189_v1 = vpack.c.bf16 %v163_v63, %v161_v62  ;;  %v153_v15 = vld [vmem:[%s1337_s1] sm:$0xff] }
  0x79   :  { %v837_v30 = vsub.f32 %v24_v2, %v48_v27  ;;  %v164_v2 = vld [vmem:[%s1337_s1 + $0x58] sm:$0xff]  ;;  %v734_v62 = vld [vmem:[%s1335_s3] ss:$0 sm:$0xff] }
  0x7a   :  { %v56_v18 = vmul.f32 %v818_v16, %v818_v16  ;;  %v54_v19 = vmul.f32 %v820_v17, %v820_v17  ;;  %212 = vmatpush.bf16.msra.mxu0 %v189_v1  ;;  %722 = vmatpush.bf16.msra.mxu2 %v189_v1 }
  0x7b   :  { %v58_v31 = vmul.f32 %v837_v30, %v837_v30 }
  0x7c   :  { %63 = vadd.xlane.f32.xlu2 %v56_v18  ;;  %59 = vadd.xlane.f32.xlu1 %v54_v19  ;;  %v155_v18 = vld [vmem:[%s1337_s1 + $0x10] sm:$0xff]  ;;  %v154_v19 = vld [vmem:[%s1337_s1 + $0x8] sm:$0xff] }
  0x7d   :  { %v34_v21 = vpop.xlane.xlu0 %33  ;;  %v30_v22 = vpop.xlane.xlu1 %29 }
  0x7e   :  { %v47_v23 = vmul.f32 %v814_v11, %v34_v21  ;;  %v45_v24 = vmul.f32 %v814_v11, %v30_v22  ;;  %v185_v22 = vpack.c.bf16 %v155_v18, %v153_v15 }
  0x80   :  { %v828_v25 = vsub.f32 %v23_v3, %v47_v23  ;;  %v830_v26 = vsub.f32 %v21_v4, %v45_v24  ;;  %v190_v3 = vpack.c.bf16 %v164_v2, %v162_v0  ;;  %v157_v4 = vld [vmem:[%s1337_s1 + $0x20] sm:$0xff]  ;;  %v156_v23 = vld [vmem:[%s1337_s1 + $0x18] sm:$0xff] }
  0x81   :  { %v187_v7 = vpack.c.bf16 %v159_v5, %v157_v4  ;;  %v186_v24 = vpack.c.bf16 %v156_v23, %v154_v19 }
  0x82   :  { %v57_v28 = vmul.f32 %v828_v25, %v828_v25  ;;  %v55_v29 = vmul.f32 %v830_v26, %v830_v26  ;;  %235 = vmatpush.bf16.msra.mxu1 %v190_v3  ;;  %730 = vmatpush.bf16.msra.mxu3 %v190_v3 }
  0x83   :  { %213 = vmatpush.bf16.msra.mxu0 %v187_v7  ;;  %723 = vmatpush.bf16.msra.mxu2 %v187_v7  ;;  %v735_v7 = vld [vmem:[%s1336_s4] ss:$0 sm:$0xff] }
  0x84   :  { %65 = vadd.xlane.f32.xlu0 %v57_v28  ;;  %61 = vadd.xlane.f32.xlu2 %v55_v29 }
  0x86   :  { %236 = vmatpush.bf16.msra.mxu1 %v188_v12  ;;  %731 = vmatpush.bf16.msra.mxu3 %v188_v12 }
  0x87   :  { %214 = vmatpush.bf16.msra.mxu0 %v185_v22  ;;  %724 = vmatpush.bf16.msra.mxu2 %v185_v22 }
  0x8a   :  { %237 = vmatpush.bf16.msra.mxu1 %v186_v24  ;;  %732 = vmatpush.bf16.msra.mxu3 %v186_v24 }
  0x8c   :  { %67 = vadd.xlane.f32.xlu0 %v58_v31 }
  0xef   :  { %v64_v9 = vpop.xlane.xlu2 %63  ;;  %v60_v10 = vpop.xlane.xlu1 %59 }
  0xf0   :  { %v71_v13 = vmul.f32 %v64_v9, %v814_v11  ;;  %v69_v14 = vmul.f32 %v60_v10, %v814_v11 }
  0xf2   :  { %v76_v20 = vadd.f32 1e-05, %v71_v13  ;;  %v74_v21 = vadd.f32 1e-05, %v69_v14 }
  0xf4   :  { %738 = vrsqrt.f32 %v76_v20  ;;  %vm85_vm1 = vweird.f32 %v74_v21  ;;  %vm105_vm4 = vweird.f32 %v76_v20 }
  0xf5   :  { %740 = vrsqrt.f32 %v74_v21 }
  0xf7   :  { %v66_v27 = vpop.xlane.xlu0 %65  ;;  %v62_v28 = vpop.xlane.xlu2 %61 }
  0xf8   :  { %v72_v29 = vmul.f32 %v66_v27, %v814_v11  ;;  %v70_v31 = vmul.f32 %v62_v28, %v814_v11 }
  0xfa   :  { %v739_v32 = vpop.eup %738  ;;  %v77_v33 = vadd.f32 1e-05, %v72_v29  ;;  %v75_v34 = vadd.f32 1e-05, %v70_v31  ;;  %v201_v29 = vld [vmem:[%s1338_s2] sm:$0x3] }
  0xfb   :  { %v741_v35 = vpop.eup %740  ;;  %v100_v36 = vmul.f32 %v739_v32, %v76_v20  ;;  %vm106_vm3 = vweird.f32 %v739_v32  ;;  %v962_v31 = vperm.slane %v201_v29, 0 }
  0xfc   :  { %v80_v37 = vmul.f32 %v741_v35, %v74_v21  ;;  %742 = vrsqrt.f32 %v77_v33  ;;  %vm86_vm2 = vweird.f32 %v741_v35  ;;  %vm107_vm6 = vmor %vm105_vm4, %vm106_vm3  ;;  %vm95_vm7 = vweird.f32 %v75_v34 }
  0xfd   :  { %v101_v38 = vmul.f32 %v739_v32, %v100_v36  ;;  %744 = vrsqrt.f32 %v75_v34  ;;  %vm942_vm5 = vmor %vm85_vm1, %vm86_vm2  ;;  %vm115_vm10 = vweird.f32 %v77_v33 }
  0xfe   :  { %v81_v39 = vmul.f32 %v741_v35, %v80_v37 }
  0xff   :  { %v102_v40 = vmul.f32 0.5, %v101_v38  ;;  %v68_v41 = vpop.xlane.xlu0 %67 }
 0x100   :  { %v82_v42 = vmul.f32 0.5, %v81_v39  ;;  %v73_v43 = vmul.f32 %v68_v41, %v814_v11 }
 0x101   :  { %v103_v44 = vsub.f32 1.5, %v102_v40 }
 0x102   :  { %v743_v45 = vpop.eup %742  ;;  %v83_v46 = vsub.f32 1.5, %v82_v42  ;;  %v78_v47 = vadd.f32 1e-05, %v73_v43 }
 0x103   :  { %v745_v48 = vpop.eup %744  ;;  %v104_v49 = vmul.f32 %v739_v32, %v103_v44  ;;  %v110_v50 = vmul.f32 %v743_v45, %v77_v33  ;;  %vm116_vm9 = vweird.f32 %v743_v45 }
 0x104   :  { %v84_v51 = vmul.f32 %v741_v35, %v83_v46  ;;  %v90_v52 = vmul.f32 %v745_v48, %v75_v34  ;;  %746 = vrsqrt.f32 %v78_v47  ;;  %vm96_vm8 = vweird.f32 %v745_v48  ;;  %vm117_vm12 = vmor %vm115_vm10, %vm116_vm9 }
 0x105   :  { %v111_v54 = vmul.f32 %v743_v45, %v110_v50  ;;  %v108_v56 = vsel %vm107_vm6, %v739_v32, %v104_v49  ;;  %vm97_vm11 = vmor %vm95_vm7, %vm96_vm8  ;;  %vm125_vm13 = vweird.f32 %v78_v47  ;;  %v964_v32 = vperm.slane %v201_v29, 1 }
 0x106   :  { %v91_v11 = vmul.f32 %v745_v48, %v90_v52  ;;  %v88_v58 = vsel %vm942_vm5, %v741_v35, %v84_v51  ;;  %v131_v63 = vmul.f32 %v108_v56, %v818_v16 }
 0x107   :  { %v112_v55 = vmul.f32 0.5, %v111_v54  ;;  %v129_v2 = vmul.f32 %v88_v58, %v820_v17 }
 0x108   :  { %v92_v57 = vmul.f32 0.5, %v91_v11  ;;  %v139_v9 = vmul.f32 %v734_v62, %v131_v63 }
 0x109   :  { %v113_v59 = vsub.f32 1.5, %v112_v55  ;;  %v137_v12 = vmul.f32 %v734_v62, %v129_v2 }
 0x10a   :  { %v747_v60 = vpop.eup %746  ;;  %v93_v61 = vsub.f32 1.5, %v92_v57  ;;  %v147_v15 = vadd.f32 %v735_v7, %v139_v9 }
 0x10b   :  { %v114_v0 = vmul.f32 %v743_v45, %v113_v59  ;;  %v120_v1 = vmul.f32 %v747_v60, %v78_v47  ;;  %vm126_vm14 = vweird.f32 %v747_v60  ;;  %v145_v20 = vadd.f32 %v735_v7, %v137_v12 }
 0x10c   :  { %v94_v3 = vmul.f32 %v745_v48, %v93_v61  ;;  %vm127_vm15 = vmor %vm125_vm13, %vm126_vm14 }
 0x10d   :  { %v121_v4 = vmul.f32 %v747_v60, %v120_v1  ;;  %v118_v5 = vsel %vm117_vm12, %v743_v45, %v114_v0 }
 0x10e   :  { %v98_v6 = vsel %vm97_vm11, %v745_v48, %v94_v3  ;;  %v132_v8 = vmul.f32 %v118_v5, %v828_v25 }
 0x10f   :  { %v122_v10 = vmul.f32 0.5, %v121_v4  ;;  %v130_v16 = vmul.f32 %v98_v6, %v830_v26 }
 0x110   :  { %v140_v13 = vmul.f32 %v734_v62, %v132_v8 }
 0x111   :  { %v123_v14 = vsub.f32 1.5, %v122_v10  ;;  %v138_v17 = vmul.f32 %v734_v62, %v130_v16 }
 0x112   :  { %v148_v18 = vadd.f32 %v735_v7, %v140_v13 }
 0x113   :  { %v124_v19 = vmul.f32 %v747_v60, %v123_v14  ;;  %v146_v21 = vadd.f32 %v735_v7, %v138_v17 }
 0x114   :  { %v151_v22 = vpack.c.bf16 %v148_v18, %v147_v15 }
 0x115   :  { %v150_v23 = vpack.c.bf16 %v146_v21, %v145_v20  ;;  %v128_v24 = vsel %vm127_vm15, %v747_v60, %v124_v19 }
 0x116   :  { %220 = vmatmul.bf16.vlgmr.msra.gmra.mxu2 %v151_v22  ;;  %243 = vmatmul.bf16.vlgmr.msra.gmra.mxu3 %v151_v22  ;;  %v133_v25 = vmul.f32 %v128_v24, %v837_v30 }
 0x117   :  { %215 = vmatmul.bf16.vlgmr.msra.gmra.mxu0 %v150_v23  ;;  %238 = vmatmul.bf16.vlgmr.msra.gmra.mxu1 %v150_v23 }
 0x118   :  { %v141_v26 = vmul.f32 %v734_v62, %v133_v25 }
 0x11a   :  { %v149_v27 = vadd.f32 %v735_v7, %v141_v26 }
 0x11c   :  { %v152_v28 = vpack.c.bf16 %v149_v27, %v149_v27 }
 0x126   :  { %225 = vmatmul.bf16.gmra.mxu2 %v152_v28  ;;  %248 = vmatmul.bf16.gmra.mxu3 %v152_v28 }
 0x194   :  { %v216_v33 = vpop.f32.mrf.mxu0  ;;  %v239_v34 = vpop.f32.mrf.mxu1 }
 0x195   :  { %v967_v35 = vadd.f32 %v216_v33, %v962_v31  ;;  %v970_v30 = vadd.f32 %v239_v34, %v964_v32 }
 0x197   :  { %v973_v36 = vmul.f32 0.70710677, %v967_v35  ;;  %v976_v37 = vmul.f32 0.70710677, %v970_v30 }
 0x199   :  { %v273_v38 = vmul.f32 %v973_v36, %v973_v36  ;;  %v313_v39 = vmul.f32 %v976_v37, %v976_v37  ;;  %v221_v40 = vpop.f32.mrf.mxu2  ;;  %v244_v41 = vpop.f32.mrf.mxu3 }
 0x19a   :  { %v983_v42 = vadd.f32 %v221_v40, %v962_v31  ;;  %v986_v43 = vadd.f32 %v244_v41, %v964_v32 }
 0x19b   :  { %v988_v44 = vmin.f32 %v273_v38, 16.0  ;;  %v990_v45 = vmin.f32 %v313_v39, 16.0 }
 0x19c   :  { %v993_v46 = vmul.f32 0.70710677, %v983_v42  ;;  %v996_v47 = vmul.f32 0.70710677, %v986_v43  ;;  %v218_v12 = vpop.f32.mrf.mxu0 }
 0x19d   :  { %v275_v48 = vmul.f32 2.1237322e-06, %v988_v44  ;;  %v286_v49 = vmul.f32 3.8918573e-05, %v988_v44  ;;  %v315_v50 = vmul.f32 2.1237322e-06, %v990_v45  ;;  %v1026_v25 = vadd.f32 %v218_v12, %v962_v31 }
 0x19e   :  { %v326_v51 = vmul.f32 3.8918573e-05, %v990_v45  ;;  %v433_v52 = vmul.f32 %v993_v46, %v993_v46  ;;  %v473_v53 = vmul.f32 %v996_v47, %v996_v47 }
 0x19f   :  { %v276_v54 = vadd.f32 0.00028619796, %v275_v48  ;;  %v287_v11 = vadd.f32 0.001143296, %v286_v49  ;;  %v316_v55 = vadd.f32 0.00028619796, %v315_v50 }
 0x1a0   :  { %v327_v56 = vadd.f32 0.001143296, %v326_v51  ;;  %v1006_v57 = vmin.f32 %v433_v52, 16.0  ;;  %v1008_v58 = vmin.f32 %v473_v53, 16.0 }
 0x1a1   :  { %v277_v59 = vmul.f32 %v276_v54, %v988_v44  ;;  %v288_v60 = vmul.f32 %v287_v11, %v988_v44  ;;  %v317_v61 = vmul.f32 %v316_v55, %v990_v45 }
 0x1a2   :  { %v328_v62 = vmul.f32 %v327_v56, %v990_v45  ;;  %v435_v63 = vmul.f32 2.1237322e-06, %v1006_v57  ;;  %v446_v0 = vmul.f32 3.8918573e-05, %v1006_v57  ;;  %v475_v1 = vmul.f32 2.1237322e-06, %v1008_v58 }
 0x1a3   :  { %v278_v2 = vadd.f32 0.0036580483, %v277_v59  ;;  %v289_v3 = vadd.f32 0.014752088, %v288_v60  ;;  %v318_v4 = vadd.f32 0.0036580483, %v317_v61 }
 0x1a4   :  { %v329_v5 = vadd.f32 0.014752088, %v328_v62  ;;  %v436_v6 = vadd.f32 0.00028619796, %v435_v63  ;;  %v447_v7 = vadd.f32 0.001143296, %v446_v0 }
 0x1a5   :  { %v279_v8 = vmul.f32 %v278_v2, %v988_v44  ;;  %v290_v9 = vmul.f32 %v289_v3, %v988_v44  ;;  %v319_v10 = vmul.f32 %v318_v4, %v990_v45  ;;  %v476_v16 = vadd.f32 0.00028619796, %v475_v1 }
 0x1a6   :  { %v330_v13 = vmul.f32 %v329_v5, %v990_v45  ;;  %v437_v14 = vmul.f32 %v436_v6, %v1006_v57  ;;  %v448_v17 = vmul.f32 %v447_v7, %v1006_v57  ;;  %v486_v15 = vmul.f32 3.8918573e-05, %v1008_v58  ;;  %v241_v5 = vpop.f32.mrf.mxu1  ;;  %v223_v6 = vpop.f32.mrf.mxu2 }
 0x1a7   :  { %v280_v18 = vadd.f32 0.05243302, %v279_v8  ;;  %v291_v19 = vadd.f32 0.112945676, %v290_v9  ;;  %v320_v20 = vadd.f32 0.05243302, %v319_v10  ;;  %v477_v21 = vmul.f32 %v476_v16, %v1008_v58 }
 0x1a8   :  { %v331_v22 = vadd.f32 0.112945676, %v330_v13  ;;  %v438_v23 = vadd.f32 0.0036580483, %v437_v14  ;;  %v449_v24 = vadd.f32 0.014752088, %v448_v17  ;;  %v1069_v13 = vadd.f32 %v223_v6, %v962_v31 }
 0x1a9   :  { %v281_v26 = vmul.f32 %v280_v18, %v988_v44  ;;  %v292_v27 = vmul.f32 %v291_v19, %v988_v44  ;;  %v321_v28 = vmul.f32 %v320_v20, %v990_v45  ;;  %v478_v29 = vadd.f32 0.0036580483, %v477_v21 }
 0x1aa   :  { %v332_v33 = vmul.f32 %v331_v22, %v990_v45  ;;  %v439_v34 = vmul.f32 %v438_v23, %v1006_v57  ;;  %v450_v38 = vmul.f32 %v449_v24, %v1006_v57  ;;  %v487_v39 = vadd.f32 0.001143296, %v486_v15  ;;  %v1076_v15 = vpop.f32.mrf.mxu3 }
 0x1ab   :  { %v282_v40 = vadd.f32 0.18741608, %v281_v26  ;;  %v293_v41 = vadd.f32 0.4994258, %v292_v27  ;;  %v322_v48 = vadd.f32 0.18741608, %v321_v28  ;;  %v479_v49 = vmul.f32 %v478_v29, %v1008_v58 }
 0x1ac   :  { %v333_v50 = vadd.f32 0.4994258, %v332_v33  ;;  %v440_v51 = vadd.f32 0.05243302, %v439_v34  ;;  %v451_v52 = vadd.f32 0.112945676, %v450_v38  ;;  %v488_v53 = vmul.f32 %v487_v39, %v1008_v58 }
 0x1ad   :  { %v283_v54 = vmul.f32 %v282_v40, %v988_v44  ;;  %v294_v11 = vmul.f32 %v293_v41, %v988_v44  ;;  %v480_v55 = vadd.f32 0.05243302, %v479_v49  ;;  %v1039_v56 = vmul.f32 0.70710677, %v1026_v25 }
 0x1ae   :  { %v334_v59 = vmul.f32 %v333_v50, %v990_v45  ;;  %v441_v60 = vmul.f32 %v440_v51, %v1006_v57  ;;  %v452_v61 = vmul.f32 %v451_v52, %v1006_v57  ;;  %v489_v62 = vadd.f32 0.014752088, %v488_v53 }
 0x1af   :  { %v284_v63 = vadd.f32 1.1283791, %v283_v54  ;;  %v1044_v0 = vadd.f32 1.0, %v294_v11  ;;  %v323_v1 = vmul.f32 %v322_v48, %v990_v45  ;;  %v1051_v7 = vmul.f32 0.5, %v967_v35 }
 0x1b0   :  { %v1047_v2 = vadd.f32 1.0, %v334_v59  ;;  %v442_v3 = vadd.f32 0.18741608, %v441_v60  ;;  %v453_v44 = vadd.f32 0.4994258, %v452_v61  ;;  %v490_v4 = vmul.f32 %v489_v62, %v1008_v58 }
 0x1b1   :  { %748 = vrcp.f32 %v1044_v0  ;;  %v353_v8 = vmul.f32 %v1039_v56, %v1039_v56  ;;  %v1057_v9 = vmul.f32 0.5, %v970_v30  ;;  %v1061_v45 = vmul.f32 0.5, %v983_v42 }
 0x1b2   :  { %750 = vrcp.f32 %v1047_v2  ;;  %v481_v10 = vmul.f32 %v480_v55, %v1008_v58  ;;  %v324_v16 = vadd.f32 1.1283791, %v323_v1  ;;  %v443_v12 = vmul.f32 %v442_v3, %v1006_v57 }
 0x1b3   :  { %v1066_v35 = vadd.f32 %v241_v5, %v964_v32  ;;  %v1072_v14 = vmul.f32 %v284_v63, %v973_v36  ;;  %v305_v30 = vand.u32 2147483647, %v1044_v0  ;;  %v454_v17 = vmul.f32 %v453_v44, %v1006_v57  ;;  %v1120_v5 = vpop.f32.mrf.mxu3 }
 0x1b4   :  { %v491_v42 = vadd.f32 0.112945676, %v490_v4  ;;  %v307_v18 = vand.u32 2147483648, %v1044_v0  ;;  %v345_v19 = vand.u32 2147483647, %v1047_v2  ;;  %v347_v20 = vand.u32 2147483648, %v1047_v2  ;;  %v1118_v4 = vpop.f32.mrf.mxu2 }
 0x1b5   :  { %v1081_v21 = vmin.f32 %v353_v8, 16.0  ;;  %vm301_vm0 = vweird.f32 %v1044_v0  ;;  %v444_v22 = vadd.f32 1.1283791, %v443_v12  ;;  %v1084_v36 = vadd.f32 1.0, %v454_v17 }
 0x1b6   :  { %v482_v23 = vadd.f32 0.18741608, %v481_v10  ;;  %v492_v24 = vmul.f32 %v491_v42, %v1008_v58  ;;  %v325_v26 = vmul.f32 %v324_v16, %v976_v37  ;;  %vm341_vm1 = vweird.f32 %v1047_v2 }
 0x1b7   :  { %v749_v57 = vpop.eup %748  ;;  %v355_v27 = vmul.f32 2.1237322e-06, %v1081_v21  ;;  %v1091_v28 = vmul.f32 0.70710677, %v1066_v35  ;;  %vm1094_vm2 = vcmp.eq.f32.partialorder %v305_v30, 8.507059e+37  ;;  %752 = vrcp.f32 %v1084_v36 }
 0x1b8   :  { %v751_v29 = vpop.eup %750  ;;  %v297_v33 = vmul.f32 %v749_v57, %v1044_v0  ;;  %v366_v38 = vmul.f32 3.8918573e-05, %v1081_v21  ;;  %v308_v39 = vor.u32 1.1754944e-38, %v307_v18  ;;  %vm1101_vm3 = vcmp.eq.f32.partialorder %v345_v19, 8.507059e+37 }
 0x1b9   :  { %v337_v37 = vmul.f32 %v751_v29, %v1047_v2  ;;  %v348_v41 = vor.u32 1.1754944e-38, %v347_v20  ;;  %v1106_v49 = vmul.f32 %v444_v22, %v993_v46  ;;  %v483_v50 = vmul.f32 %v482_v23, %v1008_v58 }
 0x1ba   :  { %v298_v48 = vsub.f32 1.0, %v297_v33  ;;  %v493_v51 = vadd.f32 0.4994258, %v492_v24  ;;  %v465_v53 = vand.u32 2147483647, %v1084_v36  ;;  %v393_v11 = vmul.f32 %v1091_v28, %v1091_v28 }
 0x1bb   :  { %v338_v52 = vsub.f32 1.0, %v337_v37  ;;  %v356_v54 = vadd.f32 0.00028619796, %v355_v27  ;;  %vm302_vm4 = vweird.f32 %v749_v57  ;;  %v367_v60 = vadd.f32 0.001143296, %v366_v38 }
 0x1bc   :  { %v299_v55 = vmul.f32 %v749_v57, %v298_v48  ;;  %v494_v59 = vmul.f32 %v493_v51, %v1008_v58  ;;  %vm342_vm5 = vweird.f32 %v751_v29  ;;  %v467_v46 = vand.u32 2147483648, %v1084_v36  ;;  %vm303_vm7 = vmor %vm301_vm0, %vm302_vm4  ;;  %v228_v51 = vpop.f32.mrf.mxu2 }
 0x1bd   :  { %v339_v61 = vmul.f32 %v751_v29, %v338_v52  ;;  %v357_v62 = vmul.f32 %v356_v54, %v1081_v21  ;;  %v753_v63 = vpop.eup %752  ;;  %vm461_vm6 = vweird.f32 %v1084_v36  ;;  %v484_v3 = vadd.f32 1.1283791, %v483_v50  ;;  %vm343_vm9 = vmor %vm341_vm1, %vm342_vm5  ;;  %v251_v52 = vpop.f32.mrf.mxu3 }
 0x1be   :  { %v300_v1 = vadd.f32 %v749_v57, %v299_v55  ;;  %v1116_v44 = vadd.f32 1.0, %v494_v59  ;;  %v457_v6 = vmul.f32 %v753_v63, %v1084_v36  ;;  %vm1125_vm8 = vcmp.eq.f32.partialorder %v465_v53, 8.507059e+37 }
 0x1bf   :  { %v340_v58 = vadd.f32 %v751_v29, %v339_v61  ;;  %v368_v10 = vmul.f32 %v367_v60, %v1081_v21  ;;  %v1130_v16 = vmin.f32 %v393_v11, 16.0  ;;  %v358_v0 = vadd.f32 0.0036580483, %v357_v62 }
 0x1c0   :  { %v304_v12 = vsel %vm303_vm7, %v749_v57, %v300_v1  ;;  %754 = vrcp.f32 %v1116_v44  ;;  %v1137_v30 = vmul.f32 0.70710677, %v1069_v13  ;;  %v458_v18 = vsub.f32 1.0, %v457_v6 }
 0x1c1   :  { %v309_v17 = vsel %vm1094_vm2, %v308_v39, %v304_v12  ;;  %v344_v42 = vsel %vm343_vm9, %v751_v29, %v340_v58  ;;  %v468_v19 = vor.u32 1.1754944e-38, %v467_v46  ;;  %vm462_vm10 = vweird.f32 %v753_v63 }
 0x1c2   :  { %v310_v20 = vmul.f32 %v309_v17, %v1072_v14  ;;  %v349_v22 = vsel %vm1101_vm3, %v348_v41, %v344_v42  ;;  %v1145_v2 = vmul.f32 %v484_v3, %v996_v47  ;;  %v459_v24 = vmul.f32 %v753_v63, %v458_v18  ;;  %vm463_vm12 = vmor %vm461_vm6, %vm462_vm10 }
 0x1c3   :  { %v350_v23 = vmul.f32 %v349_v22, %v325_v26  ;;  %v505_v57 = vand.u32 2147483647, %v1116_v44  ;;  %v369_v27 = vadd.f32 0.014752088, %v368_v10  ;;  %v359_v34 = vmul.f32 %v358_v0, %v1081_v21 }
 0x1c4   :  { %v707_v33 = vclamps-f32 %v310_v20, 1.0  ;;  %v395_v29 = vmul.f32 2.1237322e-06, %v1130_v16  ;;  %v513_v14 = vmul.f32 %v1137_v30, %v1137_v30  ;;  %v460_v39 = vadd.f32 %v753_v63, %v459_v24 }
 0x1c5   :  { %v708_v38 = vclamps-f32 %v350_v23, 1.0  ;;  %vm501_vm11 = vweird.f32 %v1116_v44  ;;  %v507_v47 = vand.u32 2147483648, %v1116_v44  ;;  %v370_v26 = vmul.f32 %v369_v27, %v1081_v21 }
 0x1c6   :  { %v755_v37 = vpop.eup %754  ;;  %v673_v40 = vadd.f32 1.0, %v707_v33  ;;  %v396_v41 = vadd.f32 0.00028619796, %v395_v29  ;;  %v406_v48 = vmul.f32 3.8918573e-05, %v1130_v16  ;;  %v1159_v50 = vmin.f32 %v513_v14, 16.0 }
 0x1c7   :  { %v674_v53 = vadd.f32 1.0, %v708_v38  ;;  %v464_v54 = vsel %vm463_vm12, %v753_v63, %v460_v39  ;;  %v497_v11 = vmul.f32 %v755_v37, %v1116_v44  ;;  %vm1162_vm13 = vcmp.eq.f32.partialorder %v505_v57, 8.507059e+37 }
 0x1c8   :  { %v683_v59 = vmul.f32 %v673_v40, %v1051_v7  ;;  %v469_v36 = vsel %vm1125_vm8, %v468_v19, %v464_v54  ;;  %v360_v60 = vadd.f32 0.05243302, %v359_v34  ;;  %v371_v61 = vadd.f32 0.112945676, %v370_v26 }
 0x1c9   :  { %v684_v46 = vmul.f32 %v674_v53, %v1057_v9  ;;  %v470_v62 = vmul.f32 %v469_v36, %v1106_v49  ;;  %v498_v1 = vsub.f32 1.0, %v497_v11  ;;  %v397_v63 = vmul.f32 %v396_v41, %v1130_v16 }
 0x1ca   :  { %693 = vst [vmem:[%s1339_s5] sm:$0xff] %v683_v59  ;;  %vm502_vm14 = vweird.f32 %v755_v37  ;;  %v372_v3 = vmul.f32 %v371_v61, %v1081_v21  ;;  %v407_v7 = vadd.f32 0.001143296, %v406_v48  ;;  %v515_v58 = vmul.f32 2.1237322e-06, %v1159_v50 }
 0x1cb   :  { %694 = vst [vmem:[%s1339_s5 + $0x8] sm:$0xff] %v684_v46  ;;  %v711_v9 = vclamps-f32 %v470_v62, 1.0  ;;  %v499_v6 = vmul.f32 %v755_v37, %v498_v1  ;;  %v398_v49 = vadd.f32 0.0036580483, %v397_v63  ;;  %v526_v8 = vmul.f32 3.8918573e-05, %v1159_v50  ;;  %vm503_vm15 = vmor %vm501_vm11, %vm502_vm14 }
 0x1cc   :  { %v361_v10 = vmul.f32 %v360_v60, %v1081_v21  ;;  %v373_v12 = vadd.f32 0.4994258, %v372_v3  ;;  %v408_v0 = vmul.f32 %v407_v7, %v1130_v16  ;;  %v516_v17 = vadd.f32 0.00028619796, %v515_v58 }
 0x1cd   :  { %v677_v42 = vadd.f32 1.0, %v711_v9  ;;  %v500_v18 = vadd.f32 %v755_v37, %v499_v6  ;;  %v399_v19 = vmul.f32 %v398_v49, %v1130_v16  ;;  %v527_v20 = vadd.f32 0.001143296, %v526_v8 }
 0x1ce   :  { %v508_v22 = vor.u32 1.1754944e-38, %v507_v47  ;;  %v374_v23 = vmul.f32 %v373_v12, %v1081_v21  ;;  %v409_v24 = vadd.f32 0.014752088, %v408_v0  ;;  %v517_v57 = vmul.f32 %v516_v17, %v1159_v50 }
 0x1cf   :  { %v687_v27 = vmul.f32 %v677_v42, %v1061_v45  ;;  %v504_v33 = vsel %vm503_vm15, %v755_v37, %v500_v18  ;;  %v400_v34 = vadd.f32 0.05243302, %v399_v19  ;;  %v528_v29 = vmul.f32 %v527_v20, %v1159_v50 }
 0x1d0   :  { %v509_v14 = vsel %vm1162_vm13, %v508_v22, %v504_v33  ;;  %v375_v38 = vadd.f32 1.0, %v374_v23  ;;  %v410_v39 = vmul.f32 %v409_v24, %v1130_v16  ;;  %v518_v44 = vadd.f32 0.0036580483, %v517_v57 }
 0x1d1   :  { %697 = vst [vmem:[%s1339_s5 + $0x20] sm:$0xff] %v687_v27  ;;  %v510_v47 = vmul.f32 %v509_v14, %v1145_v2  ;;  %v362_v26 = vadd.f32 0.18741608, %v361_v10  ;;  %v529_v40 = vadd.f32 0.014752088, %v528_v29  ;;  %v401_v45 = vmul.f32 %v400_v34, %v1130_v16 }
 0x1d2   :  { %756 = vrcp.f32 %v375_v38  ;;  %v1201_v37 = vadd.f32 %v1076_v15, %v964_v32  ;;  %v411_v48 = vadd.f32 0.112945676, %v410_v39  ;;  %v519_v51 = vmul.f32 %v518_v44, %v1159_v50 }
 0x1d3   :  { %v712_v41 = vclamps-f32 %v510_v47, 1.0  ;;  %v258_v52 = vmul.f32 0.5, %v986_v43  ;;  %v530_v53 = vmul.f32 %v529_v40, %v1159_v50  ;;  %v363_v2 = vmul.f32 %v362_v26, %v1081_v21 }
 0x1d4   :  { %v412_v11 = vmul.f32 %v411_v48, %v1130_v16  ;;  %v520_v55 = vadd.f32 0.05243302, %v519_v51  ;;  %v402_v59 = vadd.f32 0.18741608, %v401_v45  ;;  %v1209_v60 = vmul.f32 0.70710677, %v1201_v37 }
 0x1d5   :  { %v678_v54 = vadd.f32 1.0, %v712_v41  ;;  %v531_v36 = vadd.f32 0.112945676, %v530_v53  ;;  %v1213_v15 = vadd.f32 %v1118_v4, %v962_v31  ;;  %v364_v3 = vadd.f32 1.1283791, %v363_v2 }
 0x1d6   :  { %v413_v46 = vadd.f32 0.4994258, %v412_v11  ;;  %v521_v62 = vmul.f32 %v520_v55, %v1159_v50  ;;  %v553_v21 = vmul.f32 %v1209_v60, %v1209_v60  ;;  %v385_v4 = vand.u32 2147483647, %v375_v38 }
 0x1d7   :  { %v688_v61 = vmul.f32 %v678_v54, %v258_v52  ;;  %v532_v1 = vmul.f32 %v531_v36, %v1159_v50  ;;  %v1220_v63 = vmul.f32 0.70710677, %v1213_v15  ;;  %v387_v58 = vand.u32 2147483648, %v375_v38 }
 0x1d8   :  { %v757_v43 = vpop.eup %756  ;;  %v414_v7 = vmul.f32 %v413_v46, %v1130_v16  ;;  %v403_v9 = vmul.f32 %v402_v59, %v1130_v16  ;;  %v1227_v49 = vmin.f32 %v553_v21, 16.0  ;;  %v1235_v0 = vadd.f32 %v1120_v5, %v964_v32 }
 0x1d9   :  { %698 = vst [vmem:[%s1339_s5 + $0x28] sm:$0xff] %v688_v61  ;;  %v377_v31 = vmul.f32 %v757_v43, %v375_v38  ;;  %v533_v6 = vadd.f32 0.4994258, %v532_v1  ;;  %v593_v12 = vmul.f32 %v1220_v63, %v1220_v63  ;;  %v522_v17 = vadd.f32 0.18741608, %v521_v62 }
 0x1da   :  { %v1229_v10 = vadd.f32 1.0, %v414_v7  ;;  %v555_v18 = vmul.f32 2.1237322e-06, %v1227_v49  ;;  %v566_v16 = vmul.f32 3.8918573e-05, %v1227_v49  ;;  %v365_v19 = vmul.f32 %v364_v3, %v1039_v56 }
 0x1db   :  { %v378_v8 = vsub.f32 1.0, %v377_v31  ;;  %v534_v42 = vmul.f32 %v533_v6, %v1159_v50  ;;  %vm382_vm0 = vweird.f32 %v757_v43  ;;  %vm381_vm1 = vweird.f32 %v375_v38 }
 0x1dc   :  { %758 = vrcp.f32 %v1229_v10  ;;  %vm1242_vm2 = vcmp.eq.f32.partialorder %v385_v4, 8.507059e+37  ;;  %v556_v5 = vadd.f32 0.00028619796, %v555_v18  ;;  %v404_v24 = vadd.f32 1.1283791, %v403_v9  ;;  %vm383_vm3 = vmor %vm381_vm1, %vm382_vm0 }
 0x1dd   :  { %v379_v20 = vmul.f32 %v757_v43, %v378_v8  ;;  %v1246_v32 = vadd.f32 1.0, %v534_v42  ;;  %v567_v57 = vadd.f32 0.001143296, %v566_v16  ;;  %v1248_v27 = vmin.f32 %v593_v12, 16.0 }
 0x1de   :  { %v388_v33 = vor.u32 1.1754944e-38, %v387_v58  ;;  %v523_v56 = vmul.f32 %v522_v17, %v1159_v50  ;;  %v1253_v34 = vmul.f32 0.70710677, %v1235_v0  ;;  %v425_v14 = vand.u32 2147483647, %v1229_v10 }
 0x1df   :  { %v380_v23 = vadd.f32 %v757_v43, %v379_v20  ;;  %760 = vrcp.f32 %v1246_v32  ;;  %v427_v38 = vand.u32 2147483648, %v1229_v10  ;;  %v557_v39 = vmul.f32 %v556_v5, %v1227_v49 }
 0x1e0   :  { %v568_v47 = vmul.f32 %v567_v57, %v1227_v49  ;;  %v595_v26 = vmul.f32 2.1237322e-06, %v1248_v27  ;;  %v606_v50 = vmul.f32 3.8918573e-05, %v1248_v27  ;;  %v255_v45 = vmul.f32 0.5, %v1026_v25 }
 0x1e1   :  { %v384_v29 = vsel %vm383_vm3, %v757_v43, %v380_v23  ;;  %v405_v48 = vmul.f32 %v404_v24, %v1091_v28  ;;  %v558_v51 = vadd.f32 0.0036580483, %v557_v39  ;;  %vm421_vm4 = vweird.f32 %v1229_v10 }
 0x1e2   :  { %v389_v44 = vsel %vm1242_vm2, %v388_v33, %v384_v29  ;;  %v759_v40 = vpop.eup %758  ;;  %v569_v53 = vadd.f32 0.014752088, %v568_v47  ;;  %v596_v54 = vadd.f32 0.00028619796, %v595_v26  ;;  %v524_v11 = vadd.f32 1.1283791, %v523_v56 }
 0x1e3   :  { %v390_v41 = vmul.f32 %v389_v44, %v365_v19  ;;  %v417_v52 = vmul.f32 %v759_v40, %v1229_v10  ;;  %v607_v55 = vadd.f32 0.001143296, %v606_v50  ;;  %v633_v59 = vmul.f32 %v1253_v34, %v1253_v34 }
 0x1e4   :  { %vm1269_vm5 = vcmp.eq.f32.partialorder %v425_v14, 8.507059e+37  ;;  %v428_v28 = vor.u32 1.1754944e-38, %v427_v38  ;;  %v570_v46 = vmul.f32 %v569_v53, %v1227_v49  ;;  %v559_v1 = vmul.f32 %v558_v51, %v1227_v49 }
 0x1e5   :  { %v709_v2 = vclamps-f32 %v390_v41, 1.0  ;;  %v761_v36 = vpop.eup %760  ;;  %v418_v61 = vsub.f32 1.0, %v417_v52  ;;  %v597_v21 = vmul.f32 %v596_v54, %v1248_v27  ;;  %vm422_vm6 = vweird.f32 %v759_v40 }
 0x1e6   :  { %v537_v62 = vmul.f32 %v761_v36, %v1246_v32  ;;  %v571_v31 = vadd.f32 0.112945676, %v570_v46  ;;  %v608_v4 = vmul.f32 %v607_v55, %v1248_v27  ;;  %v545_v9 = vand.u32 2147483647, %v1246_v32  ;;  %vm423_vm7 = vmor %vm421_vm4, %vm422_vm6 }
 0x1e7   :  { %v675_v43 = vadd.f32 1.0, %v709_v2  ;;  %v419_v3 = vmul.f32 %v759_v40, %v418_v61  ;;  %v1279_v6 = vmin.f32 %v633_v59, 16.0  ;;  %v547_v12 = vand.u32 2147483648, %v1246_v32 }
 0x1e8   :  { %v538_v58 = vsub.f32 1.0, %v537_v62  ;;  %v572_v17 = vmul.f32 %v571_v31, %v1227_v49  ;;  %v609_v42 = vadd.f32 0.014752088, %v608_v4  ;;  %vm542_vm8 = vweird.f32 %v761_v36 }
 0x1e9   :  { %v685_v7 = vmul.f32 %v675_v43, %v255_v45  ;;  %v420_v8 = vadd.f32 %v759_v40, %v419_v3  ;;  %v560_v16 = vadd.f32 0.05243302, %v559_v1  ;;  %v598_v19 = vadd.f32 0.0036580483, %v597_v21 }
 0x1ea   :  { %v539_v18 = vmul.f32 %v761_v36, %v538_v58  ;;  %v525_v22 = vmul.f32 %v524_v11, %v1137_v30  ;;  %v573_v5 = vadd.f32 0.4994258, %v572_v17  ;;  %v610_v23 = vmul.f32 %v609_v42, %v1248_v27 }
 0x1eb   :  { %695 = vst [vmem:[%s1339_s5 + $0x10] sm:$0xff] %v685_v7  ;;  %v424_v20 = vsel %vm423_vm7, %v759_v40, %v420_v8  ;;  %vm541_vm9 = vweird.f32 %v1246_v32  ;;  %v635_v33 = vmul.f32 2.1237322e-06, %v1279_v6  ;;  %v548_v56 = vor.u32 1.1754944e-38, %v547_v12 }
 0x1ec   :  { %v429_v24 = vsel %vm1269_vm5, %v428_v28, %v424_v20  ;;  %v540_v57 = vadd.f32 %v761_v36, %v539_v18  ;;  %vm543_vm10 = vmor %vm541_vm9, %vm542_vm8  ;;  %v574_v29 = vmul.f32 %v573_v5, %v1227_v49  ;;  %v611_v14 = vadd.f32 0.112945676, %v610_v23 }
 0x1ed   :  { %v430_v10 = vmul.f32 %v429_v24, %v405_v48  ;;  %vm546_vm11 = vcmp.eq.f32.partialorder %v545_v9, 8.507059e+37  ;;  %v561_v30 = vmul.f32 %v560_v16, %v1227_v49  ;;  %v599_v39 = vmul.f32 %v598_v19, %v1248_v27 }
 0x1ee   :  { %v544_v38 = vsel %vm543_vm10, %v761_v36, %v540_v57  ;;  %v575_v26 = vadd.f32 1.0, %v574_v29  ;;  %v646_v50 = vmul.f32 3.8918573e-05, %v1279_v6  ;;  %v612_v40 = vmul.f32 %v611_v14, %v1248_v27 }
 0x1ef   :  { %v710_v44 = vclamps-f32 %v430_v10, 1.0  ;;  %v549_v47 = vsel %vm546_vm11, %v548_v56, %v544_v38  ;;  %v636_v45 = vadd.f32 0.00028619796, %v635_v33  ;;  %v256_v41 = vmul.f32 0.5, %v1066_v35 }
 0x1f0   :  { %v550_v32 = vmul.f32 %v549_v47, %v525_v22  ;;  %762 = vrcp.f32 %v575_v26  ;;  %v600_v52 = vadd.f32 0.05243302, %v599_v39  ;;  %v613_v53 = vadd.f32 0.4994258, %v612_v40 }
 0x1f1   :  { %v676_v48 = vadd.f32 1.0, %v710_v44  ;;  %v562_v2 = vadd.f32 0.18741608, %v561_v30  ;;  %v647_v11 = vadd.f32 0.001143296, %v646_v50  ;;  %v259_v55 = vmul.f32 0.5, %v1069_v13 }
 0x1f2   :  { %v713_v51 = vclamps-f32 %v550_v32, 1.0  ;;  %v614_v36 = vmul.f32 %v613_v53, %v1248_v27  ;;  %v637_v61 = vmul.f32 %v636_v45, %v1279_v6  ;;  %v601_v28 = vmul.f32 %v600_v52, %v1248_v27 }
 0x1f3   :  { %v686_v54 = vmul.f32 %v676_v48, %v256_v41  ;;  %v648_v35 = vmul.f32 %v647_v11, %v1279_v6  ;;  %v563_v62 = vmul.f32 %v562_v2, %v1227_v49  ;;  %v587_v58 = vand.u32 2147483648, %v575_v26 }
 0x1f4   :  { %v679_v59 = vadd.f32 1.0, %v713_v51  ;;  %v615_v46 = vadd.f32 1.0, %v614_v36  ;;  %v638_v21 = vadd.f32 0.0036580483, %v637_v61  ;;  %v602_v4 = vadd.f32 0.18741608, %v601_v28 }
 0x1f5   :  { %696 = vst [vmem:[%s1339_s5 + $0x18] sm:$0xff] %v686_v54  ;;  %v649_v1 = vadd.f32 0.014752088, %v648_v35  ;;  %v564_v7 = vadd.f32 1.1283791, %v563_v62  ;;  %vm581_vm13 = vweird.f32 %v575_v26  ;;  %v588_v19 = vor.u32 1.1754944e-38, %v587_v58 }
 0x1f6   :  { %v689_v25 = vmul.f32 %v679_v59, %v259_v55  ;;  %v763_v43 = vpop.eup %762  ;;  %764 = vrcp.f32 %v615_v46  ;;  %v585_v12 = vand.u32 2147483647, %v575_v26  ;;  %v639_v49 = vmul.f32 %v638_v21, %v1279_v6 }
 0x1f7   :  { %v577_v13 = vmul.f32 %v763_v43, %v575_v26  ;;  %v650_v3 = vmul.f32 %v649_v1, %v1279_v6  ;;  %vm582_vm12 = vweird.f32 %v763_v43  ;;  %v603_v16 = vmul.f32 %v602_v4, %v1248_v27 }
 0x1f8   :  { %699 = vst [vmem:[%s1339_s5 + $0x30] sm:$0xff] %v689_v25  ;;  %vm583_vm14 = vmor %vm581_vm13, %vm582_vm12  ;;  %v565_v5 = vmul.f32 %v564_v7, %v1209_v60  ;;  %vm586_vm15 = vcmp.eq.f32.partialorder %v585_v12, 8.507059e+37  ;;  %v640_v24 = vadd.f32 0.05243302, %v639_v49  ;;  %v627_v14 = vand.u32 2147483648, %v615_v46 }
 0x1f9   :  { %v578_v31 = vsub.f32 1.0, %v577_v13  ;;  %v651_v9 = vadd.f32 0.112945676, %v650_v3  ;;  %v604_v29 = vadd.f32 1.1283791, %v603_v16  ;;  %vm621_vm1 = vweird.f32 %v615_v46 }
 0x1fa   :  { %v625_v30 = vand.u32 2147483647, %v615_v46  ;;  %v641_v44 = vmul.f32 %v640_v24, %v1279_v6  ;;  %v260_v60 = vmul.f32 0.5, %v1201_v37  ;;  %v628_v50 = vor.u32 1.1754944e-38, %v627_v14 }
 0x1fb   :  { %v579_v8 = vmul.f32 %v763_v43, %v578_v31  ;;  %v652_v17 = vmul.f32 %v651_v9, %v1279_v6  ;;  %v605_v32 = vmul.f32 %v604_v29, %v1220_v63  ;;  %v261_v2 = vmul.f32 0.5, %v1213_v15 }
 0x1fc   :  { %v765_v42 = vpop.eup %764  ;;  %vm626_vm3 = vcmp.eq.f32.partialorder %v625_v30, 8.507059e+37  ;;  %v642_v48 = vadd.f32 0.18741608, %v641_v44  ;;  %v262_v1 = vmul.f32 0.5, %v1235_v0 }
 0x1fd   :  { %v580_v18 = vadd.f32 %v763_v43, %v579_v8  ;;  %v617_v20 = vmul.f32 %v765_v42, %v615_v46  ;;  %v653_v22 = vadd.f32 0.4994258, %v652_v17  ;;  %vm622_vm0 = vweird.f32 %v765_v42 }
 0x1fe   :  { %vm623_vm2 = vmor %vm621_vm1, %vm622_vm0  ;;  %v643_v54 = vmul.f32 %v642_v48, %v1279_v6 }
 0x1ff   :  { %v584_v23 = vsel %vm583_vm14, %v763_v43, %v580_v18  ;;  %v618_v33 = vsub.f32 1.0, %v617_v20  ;;  %v654_v10 = vmul.f32 %v653_v22, %v1279_v6 }
 0x200   :  { %v589_v57 = vsel %vm586_vm15, %v588_v19, %v584_v23  ;;  %v644_v36 = vadd.f32 1.1283791, %v643_v54 }
 0x201   :  { %v590_v56 = vmul.f32 %v589_v57, %v565_v5  ;;  %v619_v38 = vmul.f32 %v765_v42, %v618_v33  ;;  %v655_v27 = vadd.f32 1.0, %v654_v10 }
 0x202   :  { %v645_v6 = vmul.f32 %v644_v36, %v1253_v34 }
 0x203   :  { %v714_v39 = vclamps-f32 %v590_v56, 1.0  ;;  %v620_v47 = vadd.f32 %v765_v42, %v619_v38  ;;  %766 = vrcp.f32 %v655_v27  ;;  %v667_v59 = vand.u32 2147483648, %v655_v27 }
 0x204   :  { %v665_v35 = vand.u32 2147483647, %v655_v27  ;;  %vm661_vm5 = vweird.f32 %v655_v27 }
 0x205   :  { %v680_v26 = vadd.f32 1.0, %v714_v39  ;;  %v624_v40 = vsel %vm623_vm2, %v765_v42, %v620_v47  ;;  %v668_v28 = vor.u32 1.1754944e-38, %v667_v59 }
 0x206   :  { %v629_v41 = vsel %vm626_vm3, %v628_v50, %v624_v40  ;;  %vm666_vm7 = vcmp.eq.f32.partialorder %v665_v35, 8.507059e+37 }
 0x207   :  { %v690_v45 = vmul.f32 %v680_v26, %v260_v60  ;;  %v630_v51 = vmul.f32 %v629_v41, %v605_v32 }
 0x209   :  { %700 = vst [vmem:[%s1339_s5 + $0x38] sm:$0xff] %v690_v45  ;;  %v767_v52 = vpop.eup %766  ;;  %v715_v53 = vclamps-f32 %v630_v51, 1.0 }
 0x20a   :  { %v657_v37 = vmul.f32 %v767_v52, %v655_v27  ;;  %vm662_vm4 = vweird.f32 %v767_v52 }
 0x20b   :  { %v681_v11 = vadd.f32 1.0, %v715_v53  ;;  %vm663_vm6 = vmor %vm661_vm5, %vm662_vm4 }
 0x20c   :  { %v658_v55 = vsub.f32 1.0, %v657_v37 }
 0x20d   :  { %v691_v63 = vmul.f32 %v681_v11, %v261_v2 }
 0x20e   :  { %v659_v61 = vmul.f32 %v767_v52, %v658_v55 }
 0x20f   :  { %701 = vst [vmem:[%s1339_s5 + $0x40] sm:$0xff] %v691_v63 }
 0x210   :  { %v660_v25 = vadd.f32 %v767_v52, %v659_v61 }
 0x212   :  { %v664_v46 = vsel %vm663_vm6, %v767_v52, %v660_v25 }
 0x213   :  { %v669_v15 = vsel %vm666_vm7, %v668_v28, %v664_v46 }
 0x214   :  { %v670_v43 = vmul.f32 %v669_v15, %v645_v6 }
 0x216   :  { %v716_v62 = vclamps-f32 %v670_v43, 1.0 }
 0x218   :  { %v682_v13 = vadd.f32 1.0, %v716_v62 }
 0x21a   :  { %v692_v21 = vmul.f32 %v682_v13, %v262_v1 }
 0x21c   :  { %702 = vst [vmem:[%s1339_s5 + $0x48] sm:$0xff] %v692_v21 }

// kernel: _lambda_.25
= control target key start
LH: loop header
LB: loop body
LE: loop exit
PB: predicated region body
PF: predicated region fallthrough
CT: control target
= control target key end

     0   :  { %s351_s1 = inlined_call_operand.vmem [shape: f32[256,128], index: 1, kind: input, shape index: {}]   ;;  %s352_s2 = inlined_call_operand.vmem [shape: f32[1,128], index: 2, kind: input, shape index: {}]   ;;  %s353_s0 = inlined_call_operand.vmem [shape: f32[38,256], index: 0, kind: input, shape index: {}]   ;;  %s354_s3 = inlined_call_operand.vmem [shape: f32[38,128], index: 3, kind: input, shape index: {}]   ;;  %s355_s4 = inlined_call_operand.vmem [shape: f32[38,128], index: 4, kind: output, shape index: {}]  }
   0x1   :  { %v47_v0 = vld [vmem:[%s351_s1 + $0x70] sm:$0xff]  ;;  %v48_v1 = vld [vmem:[%s351_s1 + $0x78] sm:$0xff]  ;;  %v45_v5 = vld [vmem:[%s351_s1 + $0x60] sm:$0xff] }
   0x2   :  { %v63_v2 = vld [vmem:[%s351_s1 + $0xf0] sm:$0xff]  ;;  %v72_v3 = vpack.c.bf16 %v48_v1, %v47_v0  ;;  %v64_v4 = vld [vmem:[%s351_s1 + $0xf8] sm:$0xff]  ;;  %v46_v6 = vld [vmem:[%s351_s1 + $0x68] sm:$0xff] }
   0x3   :  { %v80_v7 = vpack.c.bf16 %v64_v4, %v63_v2  ;;  %v61_v8 = vld [vmem:[%s351_s1 + $0xe0] sm:$0xff]  ;;  %v62_v9 = vld [vmem:[%s351_s1 + $0xe8] sm:$0xff]  ;;  %v71_v10 = vpack.c.bf16 %v46_v6, %v45_v5  ;;  %v43_v12 = vld [vmem:[%s351_s1 + $0x50] sm:$0xff] }
   0x4   :  { %150 = vmatpush.bf16.msra.mxu2 %v72_v3  ;;  %85 = vmatpush.bf16.msra.mxu0 %v72_v3  ;;  %v79_v11 = vpack.c.bf16 %v62_v9, %v61_v8  ;;  %v44_v13 = vld [vmem:[%s351_s1 + $0x58] sm:$0xff]  ;;  %v59_v14 = vld [vmem:[%s351_s1 + $0xd0] sm:$0xff]  ;;  %v41_v18 = vld [vmem:[%s351_s1 + $0x40] sm:$0xff] }
   0x5   :  { %158 = vmatpush.bf16.msra.mxu3 %v80_v7  ;;  %108 = vmatpush.bf16.msra.mxu1 %v80_v7  ;;  %v60_v15 = vld [vmem:[%s351_s1 + $0xd8] sm:$0xff]  ;;  %v70_v16 = vpack.c.bf16 %v44_v13, %v43_v12  ;;  %v42_v19 = vld [vmem:[%s351_s1 + $0x48] sm:$0xff]  ;;  %v57_v20 = vld [vmem:[%s351_s1 + $0xc0] sm:$0xff] }
   0x6   :  { %v78_v17 = vpack.c.bf16 %v60_v15, %v59_v14  ;;  %v58_v21 = vld [vmem:[%s351_s1 + $0xc8] sm:$0xff]  ;;  %v69_v22 = vpack.c.bf16 %v42_v19, %v41_v18  ;;  %v39_v24 = vld [vmem:[%s351_s1 + $0x30] sm:$0xff]  ;;  %v40_v25 = vld [vmem:[%s351_s1 + $0x38] sm:$0xff] }
   0x7   :  { %v77_v23 = vpack.c.bf16 %v58_v21, %v57_v20  ;;  %v55_v26 = vld [vmem:[%s351_s1 + $0xb0] sm:$0xff]  ;;  %v56_v27 = vld [vmem:[%s351_s1 + $0xb8] sm:$0xff]  ;;  %v68_v28 = vpack.c.bf16 %v40_v25, %v39_v24  ;;  %v37_v30 = vld [vmem:[%s351_s1 + $0x20] sm:$0xff] }
   0x8   :  { %151 = vmatpush.bf16.msra.mxu2 %v71_v10  ;;  %86 = vmatpush.bf16.msra.mxu0 %v71_v10  ;;  %v76_v29 = vpack.c.bf16 %v56_v27, %v55_v26  ;;  %v38_v31 = vld [vmem:[%s351_s1 + $0x28] sm:$0xff]  ;;  %v53_v32 = vld [vmem:[%s351_s1 + $0xa0] sm:$0xff]  ;;  %v35_v36 = vld [vmem:[%s351_s1 + $0x10] sm:$0xff] }
   0x9   :  { %159 = vmatpush.bf16.msra.mxu3 %v79_v11  ;;  %109 = vmatpush.bf16.msra.mxu1 %v79_v11  ;;  %v54_v33 = vld [vmem:[%s351_s1 + $0xa8] sm:$0xff]  ;;  %v67_v34 = vpack.c.bf16 %v38_v31, %v37_v30  ;;  %v36_v37 = vld [vmem:[%s351_s1 + $0x18] sm:$0xff]  ;;  %v51_v38 = vld [vmem:[%s351_s1 + $0x90] sm:$0xff] }
   0xa   :  { %v75_v35 = vpack.c.bf16 %v54_v33, %v53_v32  ;;  %v52_v39 = vld [vmem:[%s351_s1 + $0x98] sm:$0xff]  ;;  %v66_v40 = vpack.c.bf16 %v36_v37, %v35_v36  ;;  %v33_v42 = vld [vmem:[%s351_s1] sm:$0xff]  ;;  %v34_v43 = vld [vmem:[%s351_s1 + $0x8] sm:$0xff] }
   0xb   :  { %v74_v41 = vpack.c.bf16 %v52_v39, %v51_v38  ;;  %v49_v44 = vld [vmem:[%s351_s1 + $0x80] sm:$0xff]  ;;  %v50_v45 = vld [vmem:[%s351_s1 + $0x88] sm:$0xff]  ;;  %v23_v47 = vld [vmem:[%s353_s0 + $0x30] sm:$0xff]  ;;  %v65_v48 = vpack.c.bf16 %v34_v43, %v33_v42 }
   0xc   :  { %152 = vmatpush.bf16.msra.mxu2 %v70_v16  ;;  %87 = vmatpush.bf16.msra.mxu0 %v70_v16  ;;  %v21_v46 = vld [vmem:[%s353_s0 + $0x20] sm:$0xff]  ;;  %v22_v49 = vld [vmem:[%s353_s0 + $0x28] sm:$0xff]  ;;  %v19_v51 = vld [vmem:[%s353_s0 + $0x10] sm:$0xff]  ;;  %v73_v52 = vpack.c.bf16 %v50_v45, %v49_v44 }
   0xd   :  { %160 = vmatpush.bf16.msra.mxu3 %v78_v17  ;;  %110 = vmatpush.bf16.msra.mxu1 %v78_v17  ;;  %v17_v50 = vld [vmem:[%s353_s0] sm:$0xff]  ;;  %v24_v53 = vld [vmem:[%s353_s0 + $0x38] sm:$0xff]  ;;  %v18_v54 = vld [vmem:[%s353_s0 + $0x8] sm:$0xff]  ;;  %v29_v56 = vpack.c.bf16 %v23_v47, %v21_v46 }
   0xe   :  { %v20_v55 = vld [vmem:[%s353_s0 + $0x18] sm:$0xff]  ;;  %v27_v57 = vpack.c.bf16 %v19_v51, %v17_v50  ;;  %v30_v58 = vpack.c.bf16 %v24_v53, %v22_v49  ;;  %v25_v60 = vld [vmem:[%s353_s0 + $0x40] sm:$0xff]  ;;  %v26_v61 = vld [vmem:[%s353_s0 + $0x48] sm:$0xff] }
   0xf   :  { %v28_v59 = vpack.c.bf16 %v20_v55, %v18_v54  ;;  %v31_v62 = vpack.c.bf16 %v25_v60, %v25_v60  ;;  %v32_v63 = vpack.c.bf16 %v26_v61, %v26_v61  ;;  %v166_v0 = vld [vmem:[%s352_s2] ss:$0 sm:$0xff]  ;;  %v133_v10 = vld [vmem:[%s354_s3 + $0x10] sm:$0xff]  ;;  %v132_v15 = vld [vmem:[%s354_s3 + $0x8] sm:$0xff] }
  0x10   :  { %153 = vmatpush.bf16.msra.mxu2 %v69_v22  ;;  %88 = vmatpush.bf16.msra.mxu0 %v69_v22  ;;  %v131_v4 = vld [vmem:[%s354_s3] sm:$0xff]  ;;  %v134_v22 = vld [vmem:[%s354_s3 + $0x18] sm:$0xff] }
  0x11   :  { %161 = vmatpush.bf16.msra.mxu3 %v77_v23  ;;  %111 = vmatpush.bf16.msra.mxu1 %v77_v23 }
  0x14   :  { %154 = vmatpush.bf16.msra.mxu2 %v68_v28  ;;  %89 = vmatpush.bf16.msra.mxu0 %v68_v28  ;;  %v135_v28 = vld [vmem:[%s354_s3 + $0x20] sm:$0xff] }
  0x15   :  { %162 = vmatpush.bf16.msra.mxu3 %v76_v29  ;;  %112 = vmatpush.bf16.msra.mxu1 %v76_v29 }
  0x18   :  { %155 = vmatpush.bf16.msra.mxu2 %v67_v34  ;;  %90 = vmatpush.bf16.msra.mxu0 %v67_v34 }
  0x19   :  { %163 = vmatpush.bf16.msra.mxu3 %v75_v35  ;;  %113 = vmatpush.bf16.msra.mxu1 %v75_v35 }
  0x1c   :  { %156 = vmatpush.bf16.msra.mxu2 %v66_v40  ;;  %91 = vmatpush.bf16.msra.mxu0 %v66_v40 }
  0x1d   :  { %164 = vmatpush.bf16.msra.mxu3 %v74_v41  ;;  %114 = vmatpush.bf16.msra.mxu1 %v74_v41 }
  0x20   :  { %157 = vmatpush.bf16.msra.mxu2 %v65_v48  ;;  %92 = vmatpush.bf16.msra.mxu0 %v65_v48 }
  0x21   :  { %165 = vmatpush.bf16.msra.mxu3 %v73_v52  ;;  %115 = vmatpush.bf16.msra.mxu1 %v73_v52 }
  0x23   :  { %98 = vmatmul.bf16.vlgmr.msra.gmra.mxu2 %v29_v56  ;;  %93 = vmatmul.bf16.vlgmr.msra.gmra.mxu0 %v27_v57 }
  0x24   :  { %121 = vmatmul.bf16.vlgmr.msra.gmra.mxu3 %v30_v58  ;;  %116 = vmatmul.bf16.vlgmr.msra.gmra.mxu1 %v28_v59 }
  0x33   :  { %103 = vmatmul.bf16.gmra.mxu2 %v31_v62 }
  0x34   :  { %126 = vmatmul.bf16.gmra.mxu3 %v32_v63 }
  0xa0   :  { %v94_v1 = vpop.f32.mrf.mxu0 }
  0xa1   :  { %v95_v2 = vadd.f32 %v166_v0, %v94_v1  ;;  %v117_v3 = vpop.f32.mrf.mxu1 }
  0xa3   :  { %v118_v5 = vadd.f32 %v117_v3, %v95_v2 }
  0xa5   :  { %v136_v6 = vadd.f32 %v131_v4, %v118_v5 }
  0xa6   :  { %v99_v7 = vpop.f32.mrf.mxu2 }
  0xa7   :  { %v100_v8 = vadd.f32 %v166_v0, %v99_v7  ;;  %v122_v9 = vpop.f32.mrf.mxu3  ;;  %141 = vst [vmem:[%s355_s4] sm:$0xff] %v136_v6 }
  0xa8   :  { %v96_v11 = vpop.f32.mrf.mxu0 }
  0xa9   :  { %v123_v12 = vadd.f32 %v122_v9, %v100_v8  ;;  %v97_v13 = vadd.f32 %v166_v0, %v96_v11  ;;  %v119_v14 = vpop.f32.mrf.mxu1 }
  0xab   :  { %v138_v16 = vadd.f32 %v133_v10, %v123_v12  ;;  %v120_v17 = vadd.f32 %v119_v14, %v97_v13 }
  0xad   :  { %143 = vst [vmem:[%s355_s4 + $0x10] sm:$0xff] %v138_v16  ;;  %v137_v18 = vadd.f32 %v132_v15, %v120_v17 }
  0xae   :  { %v101_v19 = vpop.f32.mrf.mxu2 }
  0xaf   :  { %v102_v20 = vadd.f32 %v166_v0, %v101_v19  ;;  %v124_v21 = vpop.f32.mrf.mxu3  ;;  %142 = vst [vmem:[%s355_s4 + $0x8] sm:$0xff] %v137_v18 }
  0xb1   :  { %v125_v23 = vadd.f32 %v124_v21, %v102_v20 }
  0xb3   :  { %v139_v24 = vadd.f32 %v134_v22, %v125_v23 }
  0xb5   :  { %144 = vst [vmem:[%s355_s4 + $0x18] sm:$0xff] %v139_v24 }
  0xb6   :  { %v104_v25 = vpop.f32.mrf.mxu2 }
  0xb7   :  { %v105_v26 = vadd.f32 %v166_v0, %v104_v25  ;;  %v127_v27 = vpop.f32.mrf.mxu3 }
  0xb9   :  { %v128_v29 = vadd.f32 %v127_v27, %v105_v26 }
  0xbb   :  { %v140_v30 = vadd.f32 %v135_v28, %v128_v29 }
  0xbd   :  { %145 = vst [vmem:[%s355_s4 + $0x20] sm:$0xff] %v140_v30 }
  0xbe   :  { %v106_v31 = vpop.f32.mrf.mxu2 }
  0xbf   :  { %v129_v32 = vpop.f32.mrf.mxu3 }

// kernel: _lambda_.31
= control target key start
LH: loop header
LB: loop body
LE: loop exit
PB: predicated region body
PF: predicated region fallthrough
CT: control target
= control target key end

     0   :  { %v168_v5 = vmov 128.0   ;;  %s250_s0 = inlined_call_operand.vmem [shape: f32[38,128], index: 0, kind: input, shape index: {}]   ;;  %s251_s1 = inlined_call_operand.vmem [shape: f32[1,128], index: 1, kind: input, shape index: {}]   ;;  %s252_s2 = inlined_call_operand.vmem [shape: f32[1,128], index: 2, kind: input, shape index: {}]   ;;  %s253_s3 = inlined_call_operand.vmem [shape: f32[38,128], index: 3, kind: output, shape index: {}]  }
   0x1   :  { %v16_v0 = vld [vmem:[%s250_s0 + $0x10] sm:$0xff]  ;;  %v14_v1 = vld [vmem:[%s250_s0] sm:$0xff]  ;;  %v17_v3 = vld [vmem:[%s250_s0 + $0x18] sm:$0xff]  ;;  %156 = vrcp.f32 %v168_v5 }
   0x2   :  { %25 = vadd.xlane.f32.xlu1 %v16_v0  ;;  %21 = vadd.xlane.f32.xlu0 %v14_v1  ;;  %v18_v2 = vld [vmem:[%s250_s0 + $0x20] sm:$0xff]  ;;  %v15_v4 = vld [vmem:[%s250_s0 + $0x8] sm:$0xff] }
   0x3   :  { %29 = vadd.xlane.f32.xlu2 %v18_v2  ;;  %v154_v61 = vld [vmem:[%s251_s1] ss:$0 sm:$0xff] }
   0x7   :  { %v157_v6 = vpop.eup %156 }
   0x8   :  { %v32_v7 = vmul.f32 128.0, %v157_v6  ;;  %vm36_vm0 = vweird.f32 %v157_v6 }
   0xa   :  { %27 = vadd.xlane.f32.xlu1 %v17_v3  ;;  %23 = vadd.xlane.f32.xlu0 %v15_v4  ;;  %v33_v8 = vsub.f32 1.0, %v32_v7 }
   0xc   :  { %v34_v9 = vmul.f32 %v157_v6, %v33_v8 }
   0xe   :  { %v35_v10 = vadd.f32 %v157_v6, %v34_v9 }
  0x10   :  { %v37_v11 = vsel %vm36_vm0, %v157_v6, %v35_v10 }
  0x75   :  { %v26_v12 = vpop.xlane.xlu1 %25  ;;  %v22_v13 = vpop.xlane.xlu0 %21 }
  0x76   :  { %v40_v14 = vmul.f32 %v37_v11, %v26_v12  ;;  %v38_v15 = vmul.f32 %v37_v11, %v22_v13  ;;  %v30_v20 = vpop.xlane.xlu2 %29 }
  0x77   :  { %v42_v27 = vmul.f32 %v37_v11, %v30_v20 }
  0x78   :  { %v204_v16 = vsub.f32 %v16_v0, %v40_v14  ;;  %v206_v17 = vsub.f32 %v14_v1, %v38_v15 }
  0x79   :  { %v220_v30 = vsub.f32 %v18_v2, %v42_v27  ;;  %v155_v2 = vld [vmem:[%s252_s2] ss:$0 sm:$0xff] }
  0x7a   :  { %v50_v18 = vmul.f32 %v204_v16, %v204_v16  ;;  %v48_v19 = vmul.f32 %v206_v17, %v206_v17 }
  0x7b   :  { %v52_v31 = vmul.f32 %v220_v30, %v220_v30 }
  0x7c   :  { %57 = vadd.xlane.f32.xlu1 %v50_v18  ;;  %53 = vadd.xlane.f32.xlu2 %v48_v19 }
  0x7d   :  { %v28_v21 = vpop.xlane.xlu1 %27  ;;  %v24_v22 = vpop.xlane.xlu0 %23 }
  0x7e   :  { %v41_v23 = vmul.f32 %v37_v11, %v28_v21  ;;  %v39_v24 = vmul.f32 %v37_v11, %v24_v22 }
  0x80   :  { %v212_v25 = vsub.f32 %v17_v3, %v41_v23  ;;  %v214_v26 = vsub.f32 %v15_v4, %v39_v24 }
  0x82   :  { %v51_v28 = vmul.f32 %v212_v25, %v212_v25  ;;  %v49_v29 = vmul.f32 %v214_v26, %v214_v26 }
  0x84   :  { %59 = vadd.xlane.f32.xlu2 %v51_v28  ;;  %55 = vadd.xlane.f32.xlu0 %v49_v29 }
  0x8c   :  { %61 = vadd.xlane.f32.xlu0 %v52_v31 }
  0xef   :  { %v58_v32 = vpop.xlane.xlu1 %57  ;;  %v54_v33 = vpop.xlane.xlu2 %53 }
  0xf0   :  { %v65_v34 = vmul.f32 %v58_v32, %v37_v11  ;;  %v63_v35 = vmul.f32 %v54_v33, %v37_v11 }
  0xf2   :  { %v70_v36 = vadd.f32 1e-05, %v65_v34  ;;  %v68_v37 = vadd.f32 1e-05, %v63_v35 }
  0xf4   :  { %158 = vrsqrt.f32 %v70_v36  ;;  %vm99_vm1 = vweird.f32 %v70_v36  ;;  %vm79_vm5 = vweird.f32 %v68_v37 }
  0xf5   :  { %160 = vrsqrt.f32 %v68_v37 }
  0xf7   :  { %v60_v38 = vpop.xlane.xlu2 %59  ;;  %v56_v39 = vpop.xlane.xlu0 %55 }
  0xf8   :  { %v66_v40 = vmul.f32 %v60_v38, %v37_v11  ;;  %v64_v41 = vmul.f32 %v56_v39, %v37_v11 }
  0xfa   :  { %v159_v42 = vpop.eup %158  ;;  %v71_v43 = vadd.f32 1e-05, %v66_v40  ;;  %v69_v44 = vadd.f32 1e-05, %v64_v41 }
  0xfb   :  { %v161_v45 = vpop.eup %160  ;;  %v94_v46 = vmul.f32 %v159_v42, %v70_v36  ;;  %vm100_vm2 = vweird.f32 %v159_v42 }
  0xfc   :  { %v74_v47 = vmul.f32 %v161_v45, %v68_v37  ;;  %162 = vrsqrt.f32 %v71_v43  ;;  %vm80_vm3 = vweird.f32 %v161_v45  ;;  %vm101_vm4 = vmor %vm99_vm1, %vm100_vm2  ;;  %vm109_vm7 = vweird.f32 %v71_v43 }
  0xfd   :  { %v95_v48 = vmul.f32 %v159_v42, %v94_v46  ;;  %164 = vrsqrt.f32 %v69_v44  ;;  %vm81_vm6 = vmor %vm79_vm5, %vm80_vm3  ;;  %vm89_vm11 = vweird.f32 %v69_v44 }
  0xfe   :  { %v75_v49 = vmul.f32 %v161_v45, %v74_v47 }
  0xff   :  { %v96_v50 = vmul.f32 0.5, %v95_v48  ;;  %v62_v51 = vpop.xlane.xlu0 %61 }
 0x100   :  { %v76_v52 = vmul.f32 0.5, %v75_v49  ;;  %v67_v53 = vmul.f32 %v62_v51, %v37_v11 }
 0x101   :  { %v97_v54 = vsub.f32 1.5, %v96_v50 }
 0x102   :  { %v163_v55 = vpop.eup %162  ;;  %v77_v56 = vsub.f32 1.5, %v76_v52  ;;  %v72_v57 = vadd.f32 1e-05, %v67_v53 }
 0x103   :  { %v165_v58 = vpop.eup %164  ;;  %v98_v59 = vmul.f32 %v159_v42, %v97_v54  ;;  %v104_v60 = vmul.f32 %v163_v55, %v71_v43  ;;  %vm110_vm8 = vweird.f32 %v163_v55 }
 0x104   :  { %v78_v62 = vmul.f32 %v161_v45, %v77_v56  ;;  %v84_v63 = vmul.f32 %v165_v58, %v69_v44  ;;  %166 = vrsqrt.f32 %v72_v57  ;;  %vm90_vm9 = vweird.f32 %v165_v58  ;;  %vm111_vm10 = vmor %vm109_vm7, %vm110_vm8 }
 0x105   :  { %v102_v0 = vsel %vm101_vm4, %v159_v42, %v98_v59  ;;  %v105_v1 = vmul.f32 %v163_v55, %v104_v60  ;;  %vm91_vm12 = vmor %vm89_vm11, %vm90_vm9  ;;  %vm119_vm14 = vweird.f32 %v72_v57 }
 0x106   :  { %v125_v3 = vmul.f32 %v102_v0, %v204_v16  ;;  %v82_v4 = vsel %vm81_vm6, %v161_v45, %v78_v62  ;;  %v85_v5 = vmul.f32 %v165_v58, %v84_v63 }
 0x107   :  { %v123_v6 = vmul.f32 %v82_v4, %v206_v17  ;;  %v106_v7 = vmul.f32 0.5, %v105_v1 }
 0x108   :  { %v133_v8 = vmul.f32 %v154_v61, %v125_v3  ;;  %v86_v9 = vmul.f32 0.5, %v85_v5 }
 0x109   :  { %v131_v10 = vmul.f32 %v154_v61, %v123_v6  ;;  %v107_v11 = vsub.f32 1.5, %v106_v7 }
 0x10a   :  { %v167_v12 = vpop.eup %166  ;;  %v141_v13 = vadd.f32 %v155_v2, %v133_v8  ;;  %v87_v14 = vsub.f32 1.5, %v86_v9 }
 0x10b   :  { %v139_v15 = vadd.f32 %v155_v2, %v131_v10  ;;  %v108_v18 = vmul.f32 %v163_v55, %v107_v11  ;;  %v114_v19 = vmul.f32 %v167_v12, %v72_v57  ;;  %vm120_vm13 = vweird.f32 %v167_v12 }
 0x10c   :  { %146 = vst [vmem:[%s253_s3 + $0x10] sm:$0xff] %v141_v13  ;;  %v88_v16 = vmul.f32 %v165_v58, %v87_v14  ;;  %vm121_vm15 = vmor %vm119_vm14, %vm120_vm13 }
 0x10d   :  { %144 = vst [vmem:[%s253_s3] sm:$0xff] %v139_v15  ;;  %v112_v17 = vsel %vm111_vm10, %v163_v55, %v108_v18  ;;  %v115_v20 = vmul.f32 %v167_v12, %v114_v19 }
 0x10e   :  { %v126_v21 = vmul.f32 %v112_v17, %v212_v25  ;;  %v92_v22 = vsel %vm91_vm12, %v165_v58, %v88_v16 }
 0x10f   :  { %v124_v23 = vmul.f32 %v92_v22, %v214_v26  ;;  %v116_v24 = vmul.f32 0.5, %v115_v20 }
 0x110   :  { %v134_v27 = vmul.f32 %v154_v61, %v126_v21 }
 0x111   :  { %v132_v28 = vmul.f32 %v154_v61, %v124_v23  ;;  %v117_v29 = vsub.f32 1.5, %v116_v24 }
 0x112   :  { %v142_v31 = vadd.f32 %v155_v2, %v134_v27 }
 0x113   :  { %v140_v32 = vadd.f32 %v155_v2, %v132_v28  ;;  %v118_v33 = vmul.f32 %v167_v12, %v117_v29 }
 0x114   :  { %147 = vst [vmem:[%s253_s3 + $0x18] sm:$0xff] %v142_v31 }
 0x115   :  { %145 = vst [vmem:[%s253_s3 + $0x8] sm:$0xff] %v140_v32  ;;  %v122_v25 = vsel %vm121_vm15, %v167_v12, %v118_v33 }
 0x116   :  { %v127_v26 = vmul.f32 %v122_v25, %v220_v30 }
 0x118   :  { %v135_v34 = vmul.f32 %v154_v61, %v127_v26 }
 0x11a   :  { %v143_v35 = vadd.f32 %v155_v2, %v135_v34 }
 0x11c   :  { %148 = vst [vmem:[%s253_s3 + $0x20] sm:$0xff] %v143_v35 }

</bundles_post_ra>
